<compile_context>
chip_gen: v7x
topology: tpu7x:2x2x1
jax: 0.10.0
libtpu: 0.0.40
codegen_flags: <defaults>
</compile_context>

<pallas_src>
import math
from functools import partial

import jax
import jax.numpy as jnp
from jax.experimental import pallas as pl
from jax.experimental.pallas import tpu as pltpu


# ---------------------------------------------------------------------------
# tiling helpers
# ---------------------------------------------------------------------------
def _pick_row_tile(h, w, c2, vmem_budget_bytes=4 << 20):
    """Largest divisor `th` of H whose conv working set fits the VMEM budget."""
    best = 1
    for th in range(1, min(h, 128) + 1):
        if h % th:
            continue
        tile_bytes = th * w * 9 * c2 * 4          # assembled im2col tile (f32)
        tile_bytes += (th + 2) * (w + 2) * c2 * 4  # input slab
        if tile_bytes <= vmem_budget_bytes:
            best = th
    return best


def _pick_flat_tile(m):
    """Row tile for the flat elementwise (affine) kernel. Returns (tile, padded_m)."""
    for t in (1024, 512, 256, 128, 64, 32, 16, 8):
        if m % t == 0:
            return t, m
    t = 256
    return t, ((m + t - 1) // t) * t


# ---------------------------------------------------------------------------
# Pallas kernels
# ---------------------------------------------------------------------------
def _cconv_bn_kernel(x_ref, w_ref, b_ref, y_ref, st_ref, a_ref, *, th, w, c2, cout):
    # x_ref : (th+2, w+2, c2)  packed-complex input slab (real channels | imag channels)
    # w_ref : (9*c2, 2*cout)   complex conv weights, tap-major rows
    # b_ref : (1, 2*cout)      packed bias row  [br - bi | br + bi]
    # y_ref : (th*w, 2*cout)   raw complex conv output for this tile
    # st_ref: (8, cout)        per-image BN statistics accumulator (resident over tiles)
    # a_ref : (th*w, 9*c2)     VMEM scratch: in-kernel im2col of this tile
    x = x_ref[...]
    for di in range(3):
        for dj in range(3):
            t = di * 3 + dj
            tap = x[di:di + th, dj:dj + w, :].reshape(th * w, c2)
            a_ref[:, t * c2:(t + 1) * c2] = tap

    y = jnp.dot(a_ref[...], w_ref[...], preferred_element_type=jnp.float32) + b_ref[...]
    y_ref[...] = y

    yr = y[:, :cout]
    yi = y[:, cout:]
    part = jnp.concatenate(
        [jnp.sum(yr, axis=0, keepdims=True),
         jnp.sum(yi, axis=0, keepdims=True),
         jnp.sum(yr * yr, axis=0, keepdims=True),
         jnp.sum(yi * yi, axis=0, keepdims=True),
         jnp.sum(yr * yi, axis=0, keepdims=True),
         jnp.zeros((3, cout), jnp.float32)],
        axis=0,
    )  # (8, cout)

    @pl.when(pl.program_id(1) == 0)
    def _():
        st_ref[...] = jnp.zeros_like(st_ref)

    st_ref[...] += part


def _affine_kernel(y_ref, c_ref, o_ref, *, cout, relu):
    # y_ref/o_ref: (TR, 2*cout) packed complex; c_ref: (8, cout) whitening+affine coefs.
    y = y_ref[...]
    yr = y[:, :cout]
    yi = y[:, cout:]
    arr = c_ref[0:1, :]
    ari = c_ref[1:2, :]
    air = c_ref[2:3, :]
    aii = c_ref[3:4, :]
    b_r = c_ref[4:5, :]
    b_i = c_ref[5:6, :]
    outr = arr * yr + ari * yi + b_r
    outi = air * yr + aii * yi + b_i
    if relu:
        outr = jnp.maximum(outr, 0.0)
        outi = jnp.maximum(outi, 0.0)
    o_ref[...] = jnp.concatenate([outr, outi], axis=-1)


# ---------------------------------------------------------------------------
# complex layers
# ---------------------------------------------------------------------------
def complex_conv3x3(x, wr, wi, br, bi):
    """ComplexConv2d(k=3, padding='same') on packed-complex NHWC input, fused BN stats.

    x : (N, H, W, 2*Cin);  wr, wi: (Cout, Cin, 3, 3);  br, bi: (Cout,)
    returns raw conv output (N, H, W, 2*Cout), stats (8, Cout), element count.
    """
    n, h, w, c2 = x.shape
    cout = wr.shape[0]

    th = _pick_row_tile(h, w, c2)
    nt = h // th

    xpad = jnp.pad(x, ((0, 0), (1, 1), (1, 1), (0, 0)))
    if nt == 1:
        tiles = xpad[:, None]                                   # (N, 1, H+2, W+2, 2C)
    else:
        tiles = jnp.stack([xpad[:, i * th:i * th + th + 2] for i in range(nt)], axis=1)

    # Weight matrix rows ordered (tap, [real Cin | imag Cin]); cols = [out real | out imag].
    wrt = jnp.transpose(wr, (2, 3, 1, 0))                        # (3, 3, Cin, Cout)
    wit = jnp.transpose(wi, (2, 3, 1, 0))
    top = jnp.concatenate([wrt, wit], axis=-1)                   # real-input rows
    bot = jnp.concatenate([-wit, wrt], axis=-1)                  # imag-input rows
    wmat = jnp.concatenate([top, bot], axis=2).reshape(9 * c2, 2 * cout)
    brow = jnp.concatenate([br - bi, br + bi]).reshape(1, 2 * cout)

    kernel = partial(_cconv_bn_kernel, th=th, w=w, c2=c2, cout=cout)
    y, stats = pl.pallas_call(
        kernel,
        out_shape=(jax.ShapeDtypeStruct((n, nt, th * w, 2 * cout), jnp.float32),
                   jax.ShapeDtypeStruct((n, 8, cout), jnp.float32)),
        grid=(n, nt),
        in_specs=[
            pl.BlockSpec((None, None, th + 2, w + 2, c2), lambda b, i: (b, i, 0, 0, 0)),
            pl.BlockSpec((9 * c2, 2 * cout), lambda b, i: (0, 0)),
            pl.BlockSpec((1, 2 * cout), lambda b, i: (0, 0)),
        ],
        out_specs=(
            pl.BlockSpec((None, None, th * w, 2 * cout), lambda b, i: (b, i, 0, 0)),
            pl.BlockSpec((None, 8, cout), lambda b, i: (b, 0, 0)),
        ),
        scratch_shapes=[pltpu.VMEM((th * w, 9 * c2), jnp.float32)],
        compiler_params=pltpu.CompilerParams(
            dimension_semantics=("parallel", "arbitrary")),
    )(tiles, wmat, brow)

    y = y.reshape(n, h, w, 2 * cout)
    stats = jnp.sum(stats, axis=0)                               # (8, Cout)
    return y, stats, float(n * h * w)


def complex_bn_relu(y, stats, count, weight, bias, *, relu, eps=1e-5):
    """ComplexBatchNorm2d (training-mode batch statistics) + optional ComplexReLU."""
    n, h, w, c2 = y.shape
    c = c2 // 2

    mr = stats[0] / count
    mi = stats[1] / count
    # TODO(synk): E[x^2] - mean^2 can lose precision for very large activations.
    crr = stats[2] / count - mr * mr + eps
    cii = stats[3] / count - mi * mi + eps
    cri = stats[4] / count - mr * mi
    det = crr * cii - cri * cri
    s = jnp.sqrt(det)
    t = jnp.sqrt(crr + cii + 2.0 * s)
    ist = 1.0 / (s * t)
    rrr = (cii + s) * ist
    rii = (crr + s) * ist
    rri = -cri * ist

    w0, w1, w2 = weight[:, 0], weight[:, 1], weight[:, 2]
    b0, b1 = bias[:, 0], bias[:, 1]
    arr = w0 * rrr + w2 * rri
    ari = w0 * rri + w2 * rii
    air = w2 * rrr + w1 * rri
    aii = w2 * rri + w1 * rii
    br_eff = b0 - arr * mr - ari * mi
    bi_eff = b1 - air * mr - aii * mi
    zero = jnp.zeros_like(arr)
    coef = jnp.stack([arr, ari, air, aii, br_eff, bi_eff, zero, zero], axis=0)  # (8, C)

    m = n * h * w
    tr, mp = _pick_flat_tile(m)
    y2 = y.reshape(m, c2)
    if mp != m:
        y2 = jnp.pad(y2, ((0, mp - m), (0, 0)))

    out = pl.pallas_call(
        partial(_affine_kernel, cout=c, relu=relu),
        out_shape=jax.ShapeDtypeStruct((mp, c2), jnp.float32),
        grid=(mp // tr,),
        in_specs=[
            pl.BlockSpec((tr, c2), lambda g: (g, 0)),
            pl.BlockSpec((8, c), lambda g: (0, 0)),
        ],
        out_specs=pl.BlockSpec((tr, c2), lambda g: (g, 0)),
        compiler_params=pltpu.CompilerParams(dimension_semantics=("parallel",)),
    )(y2, coef)

    if mp != m:
        out = out[:m]
    return out.reshape(n, h, w, c2)


# ---------------------------------------------------------------------------
# ComplexConvBlock forward
# ---------------------------------------------------------------------------
def complex_conv_block_forward(params, x, with_act=True, drop_prob=0.0):
    """Forward on packed-complex NHWC input (N, H, W, 2*Cin) -> (N, H, W, 2*Cout)."""
    # TODO(synk): stochastic ComplexDropout2d for drop_prob > 0 not implemented (identity at p=0).
    assert drop_prob == 0.0
    y, st, cnt = complex_conv3x3(x, *params["conv1"])
    x = complex_bn_relu(y, st, cnt, *params["bn1"], relu=True)
    y, st, cnt = complex_conv3x3(x, *params["conv2"])
    x = complex_bn_relu(y, st, cnt, *params["bn2"], relu=with_act)
    return x


# ---------------------------------------------------------------------------
# parameter init (deterministic, PyTorch-shaped)
# ---------------------------------------------------------------------------
def _init_cconv(key, cin, cout, ksize):
    ks = jax.random.split(key, 4)
    s = 1.0 / math.sqrt(cin * ksize * ksize)
    wr = jax.random.uniform(ks[0], (cout, cin, ksize, ksize), jnp.float32, -s, s)
    wi = jax.random.uniform(ks[1], (cout, cin, ksize, ksize), jnp.float32, -s, s)
    br = jax.random.uniform(ks[2], (cout,), jnp.float32, -s, s)
    bi = jax.random.uniform(ks[3], (cout,), jnp.float32, -s, s)
    return (wr, wi, br, bi)


def _init_cbn(c):
    # complexPyTorch default: weight[:, :2] = sqrt(2), weight[:, 2] = 0, bias = 0
    weight = jnp.concatenate(
        [jnp.full((c, 2), 1.4142135623730951, jnp.float32),
         jnp.zeros((c, 1), jnp.float32)], axis=1)
    bias = jnp.zeros((c, 2), jnp.float32)
    return (weight, bias)


def init_complex_conv_block(key, in_channels, out_channels):
    k1, k2 = jax.random.split(key)
    return {
        "conv1": _init_cconv(k1, in_channels, out_channels, 3),
        "bn1": _init_cbn(out_channels),
        "conv2": _init_cconv(k2, out_channels, out_channels, 3),
        "bn2": _init_cbn(out_channels),
    }


# ---------------------------------------------------------------------------
# pure-JAX reference (correctness check)
# ---------------------------------------------------------------------------
def _reference_forward(params, xr, xi, with_act=True, eps=1e-5):
    dn = ("NCHW", "OIHW", "NCHW")

    def conv(x, w):
        return jax.lax.conv_general_dilated(
            x, w, (1, 1), "SAME", dimension_numbers=dn,
            precision=jax.lax.Precision.HIGHEST)

    def cconv(xr, xi, wr, wi, br, bi):
        rr = conv(xr, wr) + br[None, :, None, None]
        ii = conv(xi, wi) + bi[None, :, None, None]
        ri = conv(xi, wr) + br[None, :, None, None]
        ir = conv(xr, wi) + bi[None, :, None, None]
        return rr - ii, ri + ir

    def bc(v):
        return v[None, :, None, None]

    def cbn(xr, xi, weight, bias, relu):
        mr = xr.mean(axis=(0, 2, 3))
        mi = xi.mean(axis=(0, 2, 3))
        xrc = xr - bc(mr)
        xic = xi - bc(mi)
        crr = (xrc * xrc).mean(axis=(0, 2, 3)) + eps
        cii = (xic * xic).mean(axis=(0, 2, 3)) + eps
        cri = (xrc * xic).mean(axis=(0, 2, 3))
        det = crr * cii - cri * cri
        s = jnp.sqrt(det)
        t = jnp.sqrt(crr + cii + 2.0 * s)
        ist = 1.0 / (s * t)
        rrr = (cii + s) * ist
        rii = (crr + s) * ist
        rri = -cri * ist
        xhr = bc(rrr) * xrc + bc(rri) * xic
        xhi = bc(rri) * xrc + bc(rii) * xic
        w0, w1, w2 = weight[:, 0], weight[:, 1], weight[:, 2]
        b0, b1 = bias[:, 0], bias[:, 1]
        yr = bc(w0) * xhr + bc(w2) * xhi + bc(b0)
        yi = bc(w2) * xhr + bc(w1) * xhi + bc(b1)
        if relu:
            yr = jnp.maximum(yr, 0.0)
            yi = jnp.maximum(yi, 0.0)
        return yr, yi

    xr, xi = cconv(xr, xi, *params["conv1"])
    xr, xi = cbn(xr, xi, *params["bn1"], relu=True)
    xr, xi = cconv(xr, xi, *params["conv2"])
    xr, xi = cbn(xr, xi, *params["bn2"], relu=with_act)
    return xr, xi


# ---------------------------------------------------------------------------
# main
# ---------------------------------------------------------------------------
if __name__ == "__main__":
    key = jax.random.PRNGKey(0)
    kx, kp = jax.random.split(key)

    B, CIN, COUT, H, W = 2, 4, 8, 16, 16

    kr, ki = jax.random.split(kx)
    x_real_nchw = jax.random.normal(kr, (B, CIN, H, W), jnp.float32)
    x_imag_nchw = jax.random.normal(ki, (B, CIN, H, W), jnp.float32)

    params = init_complex_conv_block(kp, CIN, COUT)

    # PyTorch complex NCHW -> packed-complex NHWC ([real channels | imag channels])
    xr_in = jnp.transpose(x_real_nchw, (0, 2, 3, 1))
    xi_in = jnp.transpose(x_imag_nchw, (0, 2, 3, 1))
    x = jnp.concatenate([xr_in, xi_in], axis=-1)

    fwd = jax.jit(partial(complex_conv_block_forward, with_act=True))
    y = jax.block_until_ready(fwd(params, x))

    # back to PyTorch-style complex NCHW output
    yr = jnp.transpose(y[..., :COUT], (0, 3, 1, 2))
    yi = jnp.transpose(y[..., COUT:], (0, 3, 1, 2))
    out = jax.block_until_ready((yr + 1j * yi).astype(jnp.complex64))

    assert out.shape == (B, COUT, H, W)
    assert bool(jnp.all(jnp.isfinite(yr))) and bool(jnp.all(jnp.isfinite(yi)))

    # correctness vs. pure-JAX reference (relative L2 error)
    ref_r, ref_i = _reference_forward(params, x_real_nchw, x_imag_nchw, with_act=True)
    num = jnp.sqrt(jnp.sum((yr - ref_r) ** 2 + (yi - ref_i) ** 2))
    den = jnp.sqrt(jnp.sum(ref_r ** 2 + ref_i ** 2)) + 1e-12
    assert float(num / den) < 1e-2

    print("KERNEL_OK")
</pallas_src>

<mosaic_0001>
module attributes {stable_mosaic.version = 11 : i64} {
  func.func @_cconv_bn_kernel(%arg0: i32, %arg1: i32, %arg2: memref<1x1x18x18x8xf32, #tpu.memory_space<vmem>>, %arg3: memref<72x16xf32, #tpu.memory_space<vmem>>, %arg4: memref<1x16xf32, #tpu.memory_space<vmem>>, %arg5: memref<1x1x256x16xf32, #tpu.memory_space<vmem>>, %arg6: memref<1x8x8xf32, #tpu.memory_space<vmem>>, %arg7: memref<256x72xf32, #tpu.memory_space<vmem>>) attributes {dimension_semantics = [#tpu.dimension_semantics<parallel>, #tpu.dimension_semantics<arbitrary>], iteration_bounds = array<i64: 2, 1>, scalar_prefetch = 0 : i64, scratch_operands = 1 : i64, tpu.core_type = #tpu.core_type<tc>, window_params = [{transform_indices = @transform_0, window_bounds = array<i64: 1, 1, 18, 18, 8>}, {pipeline_mode = #tpu.pipeline_mode<synchronous>, transform_indices = @transform_1, window_bounds = array<i64: 72, 16>}, {pipeline_mode = #tpu.pipeline_mode<synchronous>, transform_indices = @transform_2, window_bounds = array<i64: 1, 16>}, {transform_indices = @transform_3, window_bounds = array<i64: 1, 1, 256, 16>}, {transform_indices = @transform_4, window_bounds = array<i64: 1, 8, 8>}]} {
    %c0 = arith.constant 0 : index
    %c0_0 = arith.constant 0 : index
    %c0_1 = arith.constant 0 : index
    %c0_2 = arith.constant 0 : index
    %c0_3 = arith.constant 0 : index
    %0 = vector.load %arg2[%c0, %c0_0, %c0_1, %c0_2, %c0_3] : memref<1x1x18x18x8xf32, #tpu.memory_space<vmem>>, vector<1x1x18x18x8xf32>
    %1 = vector.shape_cast %0 : vector<1x1x18x18x8xf32> to vector<18x18x8xf32>
    %2 = vector.extract_strided_slice %1 {offsets = [0, 0, 0], sizes = [16, 16, 8], strides = [1, 1, 1]} : vector<18x18x8xf32> to vector<16x16x8xf32>
    %3 = vector.shape_cast %2 : vector<16x16x8xf32> to vector<256x8xf32>
    %c0_4 = arith.constant 0 : index
    %c0_5 = arith.constant 0 : index
    %4 = vector.load %arg7[%c0_4, %c0_5] : memref<256x72xf32, #tpu.memory_space<vmem>>, vector<256x8xf32>
    tpu.vector_store %arg7[%c0_4, %c0_5], %3 {strides = array<i32>} : memref<256x72xf32, #tpu.memory_space<vmem>>, vector<256x8xf32>,
    %5 = vector.extract_strided_slice %1 {offsets = [0, 1, 0], sizes = [16, 16, 8], strides = [1, 1, 1]} : vector<18x18x8xf32> to vector<16x16x8xf32>
    %6 = vector.shape_cast %5 : vector<16x16x8xf32> to vector<256x8xf32>
    %c0_6 = arith.constant 0 : index
    %c8 = arith.constant 8 : index
    %7 = vector.load %arg7[%c0_6, %c8] : memref<256x72xf32, #tpu.memory_space<vmem>>, vector<256x8xf32>
    tpu.vector_store %arg7[%c0_6, %c8], %6 {strides = array<i32>} : memref<256x72xf32, #tpu.memory_space<vmem>>, vector<256x8xf32>,
    %8 = vector.extract_strided_slice %1 {offsets = [0, 2, 0], sizes = [16, 16, 8], strides = [1, 1, 1]} : vector<18x18x8xf32> to vector<16x16x8xf32>
    %9 = vector.shape_cast %8 : vector<16x16x8xf32> to vector<256x8xf32>
    %c0_7 = arith.constant 0 : index
    %c16 = arith.constant 16 : index
    %10 = vector.load %arg7[%c0_7, %c16] : memref<256x72xf32, #tpu.memory_space<vmem>>, vector<256x8xf32>
    tpu.vector_store %arg7[%c0_7, %c16], %9 {strides = array<i32>} : memref<256x72xf32, #tpu.memory_space<vmem>>, vector<256x8xf32>,
    %11 = vector.extract_strided_slice %1 {offsets = [1, 0, 0], sizes = [16, 16, 8], strides = [1, 1, 1]} : vector<18x18x8xf32> to vector<16x16x8xf32>
    %12 = vector.shape_cast %11 : vector<16x16x8xf32> to vector<256x8xf32>
    %c0_8 = arith.constant 0 : index
    %c24 = arith.constant 24 : index
    %13 = vector.load %arg7[%c0_8, %c24] : memref<256x72xf32, #tpu.memory_space<vmem>>, vector<256x8xf32>
    tpu.vector_store %arg7[%c0_8, %c24], %12 {strides = array<i32>} : memref<256x72xf32, #tpu.memory_space<vmem>>, vector<256x8xf32>,
    %14 = vector.extract_strided_slice %1 {offsets = [1, 1, 0], sizes = [16, 16, 8], strides = [1, 1, 1]} : vector<18x18x8xf32> to vector<16x16x8xf32>
    %15 = vector.shape_cast %14 : vector<16x16x8xf32> to vector<256x8xf32>
    %c0_9 = arith.constant 0 : index
    %c32 = arith.constant 32 : index
    %16 = vector.load %arg7[%c0_9, %c32] : memref<256x72xf32, #tpu.memory_space<vmem>>, vector<256x8xf32>
    tpu.vector_store %arg7[%c0_9, %c32], %15 {strides = array<i32>} : memref<256x72xf32, #tpu.memory_space<vmem>>, vector<256x8xf32>,
    %17 = vector.extract_strided_slice %1 {offsets = [1, 2, 0], sizes = [16, 16, 8], strides = [1, 1, 1]} : vector<18x18x8xf32> to vector<16x16x8xf32>
    %18 = vector.shape_cast %17 : vector<16x16x8xf32> to vector<256x8xf32>
    %c0_10 = arith.constant 0 : index
    %c40 = arith.constant 40 : index
    %19 = vector.load %arg7[%c0_10, %c40] : memref<256x72xf32, #tpu.memory_space<vmem>>, vector<256x8xf32>
    tpu.vector_store %arg7[%c0_10, %c40], %18 {strides = array<i32>} : memref<256x72xf32, #tpu.memory_space<vmem>>, vector<256x8xf32>,
    %20 = vector.extract_strided_slice %1 {offsets = [2, 0, 0], sizes = [16, 16, 8], strides = [1, 1, 1]} : vector<18x18x8xf32> to vector<16x16x8xf32>
    %21 = vector.shape_cast %20 : vector<16x16x8xf32> to vector<256x8xf32>
    %c0_11 = arith.constant 0 : index
    %c48 = arith.constant 48 : index
    %22 = vector.load %arg7[%c0_11, %c48] : memref<256x72xf32, #tpu.memory_space<vmem>>, vector<256x8xf32>
    tpu.vector_store %arg7[%c0_11, %c48], %21 {strides = array<i32>} : memref<256x72xf32, #tpu.memory_space<vmem>>, vector<256x8xf32>,
    %23 = vector.extract_strided_slice %1 {offsets = [2, 1, 0], sizes = [16, 16, 8], strides = [1, 1, 1]} : vector<18x18x8xf32> to vector<16x16x8xf32>
    %24 = vector.shape_cast %23 : vector<16x16x8xf32> to vector<256x8xf32>
    %c0_12 = arith.constant 0 : index
    %c56 = arith.constant 56 : index
    %25 = vector.load %arg7[%c0_12, %c56] : memref<256x72xf32, #tpu.memory_space<vmem>>, vector<256x8xf32>
    tpu.vector_store %arg7[%c0_12, %c56], %24 {strides = array<i32>} : memref<256x72xf32, #tpu.memory_space<vmem>>, vector<256x8xf32>,
    %26 = vector.extract_strided_slice %1 {offsets = [2, 2, 0], sizes = [16, 16, 8], strides = [1, 1, 1]} : vector<18x18x8xf32> to vector<16x16x8xf32>
    %27 = vector.shape_cast %26 : vector<16x16x8xf32> to vector<256x8xf32>
    %c0_13 = arith.constant 0 : index
    %c64 = arith.constant 64 : index
    %28 = vector.load %arg7[%c0_13, %c64] : memref<256x72xf32, #tpu.memory_space<vmem>>, vector<256x8xf32>
    tpu.vector_store %arg7[%c0_13, %c64], %27 {strides = array<i32>} : memref<256x72xf32, #tpu.memory_space<vmem>>, vector<256x8xf32>,
    %c0_14 = arith.constant 0 : index
    %c0_15 = arith.constant 0 : index
    %29 = vector.load %arg7[%c0_14, %c0_15] : memref<256x72xf32, #tpu.memory_space<vmem>>, vector<256x72xf32>
    %c0_16 = arith.constant 0 : index
    %c0_17 = arith.constant 0 : index
    %30 = vector.load %arg3[%c0_16, %c0_17] : memref<72x16xf32, #tpu.memory_space<vmem>>, vector<72x16xf32>
    %cst = arith.constant dense<0.000000e+00> : vector<256x16xf32>
    %31 = tpu.matmul %29, %30, %cst {dimension_numbers = #tpu.dot_dimension_numbers<[1], [0], [0], [1], [0, 0, 1, 1], [], []>} : vector<256x72xf32>, vector<72x16xf32>, vector<256x16xf32> -> vector<256x16xf32>
    %c0_18 = arith.constant 0 : index
    %c0_19 = arith.constant 0 : index
    %32 = vector.load %arg4[%c0_18, %c0_19] : memref<1x16xf32, #tpu.memory_space<vmem>>, vector<1x16xf32>
    %33 = vector.broadcast %32 : vector<1x16xf32> to vector<256x16xf32>
    %34 = arith.addf %31, %33 : vector<256x16xf32>
    %c0_20 = arith.constant 0 : index
    %c0_21 = arith.constant 0 : index
    %c0_22 = arith.constant 0 : index
    %c0_23 = arith.constant 0 : index
    %35 = vector.load %arg5[%c0_20, %c0_21, %c0_22, %c0_23] : memref<1x1x256x16xf32, #tpu.memory_space<vmem>>, vector<1x1x256x16xf32>
    %36 = vector.shape_cast %35 : vector<1x1x256x16xf32> to vector<256x16xf32>
    %37 = vector.shape_cast %34 : vector<256x16xf32> to vector<1x1x256x16xf32>
    tpu.vector_store %arg5[%c0_20, %c0_21, %c0_22, %c0_23], %37 {strides = array<i32>} : memref<1x1x256x16xf32, #tpu.memory_space<vmem>>, vector<1x1x256x16xf32>,
    %38 = vector.extract_strided_slice %34 {offsets = [0, 0], sizes = [256, 8], strides = [1, 1]} : vector<256x16xf32> to vector<256x8xf32>
    %39 = vector.extract_strided_slice %34 {offsets = [0, 8], sizes = [256, 8], strides = [1, 1]} : vector<256x16xf32> to vector<256x8xf32>
    %cst_24 = arith.constant dense<0.000000e+00> : vector<8xf32>
    %40 = vector.multi_reduction <add>, %38, %cst_24 [0] : vector<256x8xf32> to vector<8xf32>
    %41 = vector.shape_cast %40 : vector<8xf32> to vector<1x8xf32>
    %cst_25 = arith.constant dense<0.000000e+00> : vector<8xf32>
    %42 = vector.multi_reduction <add>, %39, %cst_25 [0] : vector<256x8xf32> to vector<8xf32>
    %43 = vector.shape_cast %42 : vector<8xf32> to vector<1x8xf32>
    %44 = arith.mulf %38, %38 : vector<256x8xf32>
    %cst_26 = arith.constant dense<0.000000e+00> : vector<8xf32>
    %45 = vector.multi_reduction <add>, %44, %cst_26 [0] : vector<256x8xf32> to vector<8xf32>
    %46 = vector.shape_cast %45 : vector<8xf32> to vector<1x8xf32>
    %47 = arith.mulf %39, %39 : vector<256x8xf32>
    %cst_27 = arith.constant dense<0.000000e+00> : vector<8xf32>
    %48 = vector.multi_reduction <add>, %47, %cst_27 [0] : vector<256x8xf32> to vector<8xf32>
    %49 = vector.shape_cast %48 : vector<8xf32> to vector<1x8xf32>
    %50 = arith.mulf %38, %39 : vector<256x8xf32>
    %cst_28 = arith.constant dense<0.000000e+00> : vector<8xf32>
    %51 = vector.multi_reduction <add>, %50, %cst_28 [0] : vector<256x8xf32> to vector<8xf32>
    %52 = vector.shape_cast %51 : vector<8xf32> to vector<1x8xf32>
    %cst_29 = arith.constant 0.000000e+00 : f32
    %53 = vector.broadcast %cst_29 : f32 to vector<3x8xf32>
    %54 = tpu.concatenate %41, %43, %46, %49, %52, %53 in 0 : vector<1x8xf32>, vector<1x8xf32>, vector<1x8xf32>, vector<1x8xf32>, vector<1x8xf32>, vector<3x8xf32> -> vector<8x8xf32>
    %c0_i32 = arith.constant 0 : i32
    %55 = arith.cmpi eq, %arg1, %c0_i32 : i32
    %56 = arith.extui %55 : i1 to i32
    %c0_i32_30 = arith.constant 0 : i32
    %57 = arith.cmpi ne, %56, %c0_i32_30 : i32
    scf.if %57 {
      %cst_37 = arith.constant 0.000000e+00 : f32
      %64 = vector.broadcast %cst_37 : f32 to vector<8x8xf32>
      %c0_38 = arith.constant 0 : index
      %c0_39 = arith.constant 0 : index
      %c0_40 = arith.constant 0 : index
      %65 = vector.load %arg6[%c0_38, %c0_39, %c0_40] : memref<1x8x8xf32, #tpu.memory_space<vmem>>, vector<1x8x8xf32>
      %66 = vector.shape_cast %65 : vector<1x8x8xf32> to vector<8x8xf32>
      %67 = vector.shape_cast %64 : vector<8x8xf32> to vector<1x8x8xf32>
      tpu.vector_store %arg6[%c0_38, %c0_39, %c0_40], %67 {strides = array<i32>} : memref<1x8x8xf32, #tpu.memory_space<vmem>>, vector<1x8x8xf32>,
    } else {
    }
    %c0_31 = arith.constant 0 : index
    %c0_32 = arith.constant 0 : index
    %c0_33 = arith.constant 0 : index
    %58 = vector.load %arg6[%c0_31, %c0_32, %c0_33] : memref<1x8x8xf32, #tpu.memory_space<vmem>>, vector<1x8x8xf32>
    %59 = vector.shape_cast %58 : vector<1x8x8xf32> to vector<8x8xf32>
    %60 = arith.addf %59, %54 : vector<8x8xf32>
    %c0_34 = arith.constant 0 : index
    %c0_35 = arith.constant 0 : index
    %c0_36 = arith.constant 0 : index
    %61 = vector.load %arg6[%c0_34, %c0_35, %c0_36] : memref<1x8x8xf32, #tpu.memory_space<vmem>>, vector<1x8x8xf32>
    %62 = vector.shape_cast %61 : vector<1x8x8xf32> to vector<8x8xf32>
    %63 = vector.shape_cast %60 : vector<8x8xf32> to vector<1x8x8xf32>
    tpu.vector_store %arg6[%c0_34, %c0_35, %c0_36], %63 {strides = array<i32>} : memref<1x8x8xf32, #tpu.memory_space<vmem>>, vector<1x8x8xf32>,
    return
  }
  func.func @transform_0(%arg0: i32, %arg1: i32) -> (i32, i32, i32, i32, i32) {
    %c0_i32 = arith.constant 0 : i32
    %c0_i32_0 = arith.constant 0 : i32
    %c0_i32_1 = arith.constant 0 : i32
    %c0_i32_2 = arith.constant 0 : i32
    return %arg0, %arg1, %c0_i32, %c0_i32_0, %c0_i32_1 : i32, i32, i32, i32, i32
  }
  func.func @transform_1(%arg0: i32, %arg1: i32) -> (i32, i32) {
    %c0_i32 = arith.constant 0 : i32
    %c0_i32_0 = arith.constant 0 : i32
    %c0_i32_1 = arith.constant 0 : i32
    return %c0_i32, %c0_i32_0 : i32, i32
  }
  func.func @transform_2(%arg0: i32, %arg1: i32) -> (i32, i32) {
    %c0_i32 = arith.constant 0 : i32
    %c0_i32_0 = arith.constant 0 : i32
    %c0_i32_1 = arith.constant 0 : i32
    return %c0_i32, %c0_i32_0 : i32, i32
  }
  func.func @transform_3(%arg0: i32, %arg1: i32) -> (i32, i32, i32, i32) {
    %c0_i32 = arith.constant 0 : i32
    %c0_i32_0 = arith.constant 0 : i32
    %c0_i32_1 = arith.constant 0 : i32
    return %arg0, %arg1, %c0_i32, %c0_i32_0 : i32, i32, i32, i32
  }
  func.func @transform_4(%arg0: i32, %arg1: i32) -> (i32, i32, i32) {
    %c0_i32 = arith.constant 0 : i32
    %c0_i32_0 = arith.constant 0 : i32
    %c0_i32_1 = arith.constant 0 : i32
    return %arg0, %c0_i32, %c0_i32_0 : i32, i32, i32
  }
}

module attributes {stable_mosaic.version = 11 : i64} {
  func.func @_affine_kernel(%arg0: i32, %arg1: memref<512x16xf32, #tpu.memory_space<vmem>>, %arg2: memref<8x8xf32, #tpu.memory_space<vmem>>, %arg3: memref<512x16xf32, #tpu.memory_space<vmem>>) attributes {dimension_semantics = [#tpu.dimension_semantics<parallel>], iteration_bounds = array<i64: 1>, scalar_prefetch = 0 : i64, scratch_operands = 0 : i64, tpu.core_type = #tpu.core_type<tc>, window_params = [{transform_indices = @transform_0, window_bounds = array<i64: 512, 16>}, {pipeline_mode = #tpu.pipeline_mode<synchronous>, transform_indices = @transform_1, window_bounds = array<i64: 8, 8>}, {transform_indices = @transform_2, window_bounds = array<i64: 512, 16>}]} {
    %c0 = arith.constant 0 : index
    %c0_0 = arith.constant 0 : index
    %0 = vector.load %arg1[%c0, %c0_0] : memref<512x16xf32, #tpu.memory_space<vmem>>, vector<512x16xf32>
    %1 = vector.extract_strided_slice %0 {offsets = [0, 0], sizes = [512, 8], strides = [1, 1]} : vector<512x16xf32> to vector<512x8xf32>
    %2 = vector.extract_strided_slice %0 {offsets = [0, 8], sizes = [512, 8], strides = [1, 1]} : vector<512x16xf32> to vector<512x8xf32>
    %c0_1 = arith.constant 0 : index
    %c0_2 = arith.constant 0 : index
    %3 = vector.load %arg2[%c0_1, %c0_2] : memref<8x8xf32, #tpu.memory_space<vmem>>, vector<1x8xf32>
    %c1 = arith.constant 1 : index
    %c0_3 = arith.constant 0 : index
    %4 = vector.load %arg2[%c1, %c0_3] : memref<8x8xf32, #tpu.memory_space<vmem>>, vector<1x8xf32>
    %c2 = arith.constant 2 : index
    %c0_4 = arith.constant 0 : index
    %5 = vector.load %arg2[%c2, %c0_4] : memref<8x8xf32, #tpu.memory_space<vmem>>, vector<1x8xf32>
    %c3 = arith.constant 3 : index
    %c0_5 = arith.constant 0 : index
    %6 = vector.load %arg2[%c3, %c0_5] : memref<8x8xf32, #tpu.memory_space<vmem>>, vector<1x8xf32>
    %c4 = arith.constant 4 : index
    %c0_6 = arith.constant 0 : index
    %7 = vector.load %arg2[%c4, %c0_6] : memref<8x8xf32, #tpu.memory_space<vmem>>, vector<1x8xf32>
    %c5 = arith.constant 5 : index
    %c0_7 = arith.constant 0 : index
    %8 = vector.load %arg2[%c5, %c0_7] : memref<8x8xf32, #tpu.memory_space<vmem>>, vector<1x8xf32>
    %9 = vector.broadcast %3 : vector<1x8xf32> to vector<512x8xf32>
    %10 = arith.mulf %9, %1 : vector<512x8xf32>
    %11 = vector.broadcast %4 : vector<1x8xf32> to vector<512x8xf32>
    %12 = arith.mulf %11, %2 : vector<512x8xf32>
    %13 = arith.addf %10, %12 : vector<512x8xf32>
    %14 = vector.broadcast %7 : vector<1x8xf32> to vector<512x8xf32>
    %15 = arith.addf %13, %14 : vector<512x8xf32>
    %16 = vector.broadcast %5 : vector<1x8xf32> to vector<512x8xf32>
    %17 = arith.mulf %16, %1 : vector<512x8xf32>
    %18 = vector.broadcast %6 : vector<1x8xf32> to vector<512x8xf32>
    %19 = arith.mulf %18, %2 : vector<512x8xf32>
    %20 = arith.addf %17, %19 : vector<512x8xf32>
    %21 = vector.broadcast %8 : vector<1x8xf32> to vector<512x8xf32>
    %22 = arith.addf %20, %21 : vector<512x8xf32>
    %cst = arith.constant 0.000000e+00 : f32
    %23 = vector.broadcast %cst : f32 to vector<512x8xf32>
    %24 = arith.maximumf %15, %23 : vector<512x8xf32>
    %cst_8 = arith.constant 0.000000e+00 : f32
    %25 = vector.broadcast %cst_8 : f32 to vector<512x8xf32>
    %26 = arith.maximumf %22, %25 : vector<512x8xf32>
    %27 = tpu.concatenate %24, %26 in 1 : vector<512x8xf32>, vector<512x8xf32> -> vector<512x16xf32>
    %c0_9 = arith.constant 0 : index
    %c0_10 = arith.constant 0 : index
    %28 = vector.load %arg3[%c0_9, %c0_10] : memref<512x16xf32, #tpu.memory_space<vmem>>, vector<512x16xf32>
    tpu.vector_store %arg3[%c0_9, %c0_10], %27 {strides = array<i32>} : memref<512x16xf32, #tpu.memory_space<vmem>>, vector<512x16xf32>,
    return
  }
  func.func @transform_0(%arg0: i32) -> (i32, i32) {
    %c0_i32 = arith.constant 0 : i32
    %c0_i32_0 = arith.constant 0 : i32
    return %arg0, %c0_i32 : i32, i32
  }
  func.func @transform_1(%arg0: i32) -> (i32, i32) {
    %c0_i32 = arith.constant 0 : i32
    %c0_i32_0 = arith.constant 0 : i32
    %c0_i32_1 = arith.constant 0 : i32
    return %c0_i32, %c0_i32_0 : i32, i32
  }
  func.func @transform_2(%arg0: i32) -> (i32, i32) {
    %c0_i32 = arith.constant 0 : i32
    %c0_i32_0 = arith.constant 0 : i32
    return %arg0, %c0_i32 : i32, i32
  }
}

module attributes {stable_mosaic.version = 11 : i64} {
  func.func @_cconv_bn_kernel(%arg0: i32, %arg1: i32, %arg2: memref<1x1x18x18x16xf32, #tpu.memory_space<vmem>>, %arg3: memref<144x16xf32, #tpu.memory_space<vmem>>, %arg4: memref<1x16xf32, #tpu.memory_space<vmem>>, %arg5: memref<1x1x256x16xf32, #tpu.memory_space<vmem>>, %arg6: memref<1x8x8xf32, #tpu.memory_space<vmem>>, %arg7: memref<256x144xf32, #tpu.memory_space<vmem>>) attributes {dimension_semantics = [#tpu.dimension_semantics<parallel>, #tpu.dimension_semantics<arbitrary>], iteration_bounds = array<i64: 2, 1>, scalar_prefetch = 0 : i64, scratch_operands = 1 : i64, tpu.core_type = #tpu.core_type<tc>, window_params = [{transform_indices = @transform_0, window_bounds = array<i64: 1, 1, 18, 18, 16>}, {pipeline_mode = #tpu.pipeline_mode<synchronous>, transform_indices = @transform_1, window_bounds = array<i64: 144, 16>}, {pipeline_mode = #tpu.pipeline_mode<synchronous>, transform_indices = @transform_2, window_bounds = array<i64: 1, 16>}, {transform_indices = @transform_3, window_bounds = array<i64: 1, 1, 256, 16>}, {transform_indices = @transform_4, window_bounds = array<i64: 1, 8, 8>}]} {
    %c0 = arith.constant 0 : index
    %c0_0 = arith.constant 0 : index
    %c0_1 = arith.constant 0 : index
    %c0_2 = arith.constant 0 : index
    %c0_3 = arith.constant 0 : index
    %0 = vector.load %arg2[%c0, %c0_0, %c0_1, %c0_2, %c0_3] : memref<1x1x18x18x16xf32, #tpu.memory_space<vmem>>, vector<1x1x18x18x16xf32>
    %1 = vector.shape_cast %0 : vector<1x1x18x18x16xf32> to vector<18x18x16xf32>
    %2 = vector.extract_strided_slice %1 {offsets = [0, 0, 0], sizes = [16, 16, 16], strides = [1, 1, 1]} : vector<18x18x16xf32> to vector<16x16x16xf32>
    %3 = vector.shape_cast %2 : vector<16x16x16xf32> to vector<256x16xf32>
    %c0_4 = arith.constant 0 : index
    %c0_5 = arith.constant 0 : index
    %4 = vector.load %arg7[%c0_4, %c0_5] : memref<256x144xf32, #tpu.memory_space<vmem>>, vector<256x16xf32>
    tpu.vector_store %arg7[%c0_4, %c0_5], %3 {strides = array<i32>} : memref<256x144xf32, #tpu.memory_space<vmem>>, vector<256x16xf32>,
    %5 = vector.extract_strided_slice %1 {offsets = [0, 1, 0], sizes = [16, 16, 16], strides = [1, 1, 1]} : vector<18x18x16xf32> to vector<16x16x16xf32>
    %6 = vector.shape_cast %5 : vector<16x16x16xf32> to vector<256x16xf32>
    %c0_6 = arith.constant 0 : index
    %c16 = arith.constant 16 : index
    %7 = vector.load %arg7[%c0_6, %c16] : memref<256x144xf32, #tpu.memory_space<vmem>>, vector<256x16xf32>
    tpu.vector_store %arg7[%c0_6, %c16], %6 {strides = array<i32>} : memref<256x144xf32, #tpu.memory_space<vmem>>, vector<256x16xf32>,
    %8 = vector.extract_strided_slice %1 {offsets = [0, 2, 0], sizes = [16, 16, 16], strides = [1, 1, 1]} : vector<18x18x16xf32> to vector<16x16x16xf32>
    %9 = vector.shape_cast %8 : vector<16x16x16xf32> to vector<256x16xf32>
    %c0_7 = arith.constant 0 : index
    %c32 = arith.constant 32 : index
    %10 = vector.load %arg7[%c0_7, %c32] : memref<256x144xf32, #tpu.memory_space<vmem>>, vector<256x16xf32>
    tpu.vector_store %arg7[%c0_7, %c32], %9 {strides = array<i32>} : memref<256x144xf32, #tpu.memory_space<vmem>>, vector<256x16xf32>,
    %11 = vector.extract_strided_slice %1 {offsets = [1, 0, 0], sizes = [16, 16, 16], strides = [1, 1, 1]} : vector<18x18x16xf32> to vector<16x16x16xf32>
    %12 = vector.shape_cast %11 : vector<16x16x16xf32> to vector<256x16xf32>
    %c0_8 = arith.constant 0 : index
    %c48 = arith.constant 48 : index
    %13 = vector.load %arg7[%c0_8, %c48] : memref<256x144xf32, #tpu.memory_space<vmem>>, vector<256x16xf32>
    tpu.vector_store %arg7[%c0_8, %c48], %12 {strides = array<i32>} : memref<256x144xf32, #tpu.memory_space<vmem>>, vector<256x16xf32>,
    %14 = vector.extract_strided_slice %1 {offsets = [1, 1, 0], sizes = [16, 16, 16], strides = [1, 1, 1]} : vector<18x18x16xf32> to vector<16x16x16xf32>
    %15 = vector.shape_cast %14 : vector<16x16x16xf32> to vector<256x16xf32>
    %c0_9 = arith.constant 0 : index
    %c64 = arith.constant 64 : index
    %16 = vector.load %arg7[%c0_9, %c64] : memref<256x144xf32, #tpu.memory_space<vmem>>, vector<256x16xf32>
    tpu.vector_store %arg7[%c0_9, %c64], %15 {strides = array<i32>} : memref<256x144xf32, #tpu.memory_space<vmem>>, vector<256x16xf32>,
    %17 = vector.extract_strided_slice %1 {offsets = [1, 2, 0], sizes = [16, 16, 16], strides = [1, 1, 1]} : vector<18x18x16xf32> to vector<16x16x16xf32>
    %18 = vector.shape_cast %17 : vector<16x16x16xf32> to vector<256x16xf32>
    %c0_10 = arith.constant 0 : index
    %c80 = arith.constant 80 : index
    %19 = vector.load %arg7[%c0_10, %c80] : memref<256x144xf32, #tpu.memory_space<vmem>>, vector<256x16xf32>
    tpu.vector_store %arg7[%c0_10, %c80], %18 {strides = array<i32>} : memref<256x144xf32, #tpu.memory_space<vmem>>, vector<256x16xf32>,
    %20 = vector.extract_strided_slice %1 {offsets = [2, 0, 0], sizes = [16, 16, 16], strides = [1, 1, 1]} : vector<18x18x16xf32> to vector<16x16x16xf32>
    %21 = vector.shape_cast %20 : vector<16x16x16xf32> to vector<256x16xf32>
    %c0_11 = arith.constant 0 : index
    %c96 = arith.constant 96 : index
    %22 = vector.load %arg7[%c0_11, %c96] : memref<256x144xf32, #tpu.memory_space<vmem>>, vector<256x16xf32>
    tpu.vector_store %arg7[%c0_11, %c96], %21 {strides = array<i32>} : memref<256x144xf32, #tpu.memory_space<vmem>>, vector<256x16xf32>,
    %23 = vector.extract_strided_slice %1 {offsets = [2, 1, 0], sizes = [16, 16, 16], strides = [1, 1, 1]} : vector<18x18x16xf32> to vector<16x16x16xf32>
    %24 = vector.shape_cast %23 : vector<16x16x16xf32> to vector<256x16xf32>
    %c0_12 = arith.constant 0 : index
    %c112 = arith.constant 112 : index
    %25 = vector.load %arg7[%c0_12, %c112] : memref<256x144xf32, #tpu.memory_space<vmem>>, vector<256x16xf32>
    tpu.vector_store %arg7[%c0_12, %c112], %24 {strides = array<i32>} : memref<256x144xf32, #tpu.memory_space<vmem>>, vector<256x16xf32>,
    %26 = vector.extract_strided_slice %1 {offsets = [2, 2, 0], sizes = [16, 16, 16], strides = [1, 1, 1]} : vector<18x18x16xf32> to vector<16x16x16xf32>
    %27 = vector.shape_cast %26 : vector<16x16x16xf32> to vector<256x16xf32>
    %c0_13 = arith.constant 0 : index
    %c128 = arith.constant 128 : index
    %28 = vector.load %arg7[%c0_13, %c128] : memref<256x144xf32, #tpu.memory_space<vmem>>, vector<256x16xf32>
    tpu.vector_store %arg7[%c0_13, %c128], %27 {strides = array<i32>} : memref<256x144xf32, #tpu.memory_space<vmem>>, vector<256x16xf32>,
    %c0_14 = arith.constant 0 : index
    %c0_15 = arith.constant 0 : index
    %29 = vector.load %arg7[%c0_14, %c0_15] : memref<256x144xf32, #tpu.memory_space<vmem>>, vector<256x144xf32>
    %c0_16 = arith.constant 0 : index
    %c0_17 = arith.constant 0 : index
    %30 = vector.load %arg3[%c0_16, %c0_17] : memref<144x16xf32, #tpu.memory_space<vmem>>, vector<144x16xf32>
    %cst = arith.constant dense<0.000000e+00> : vector<256x16xf32>
    %31 = tpu.matmul %29, %30, %cst {dimension_numbers = #tpu.dot_dimension_numbers<[1], [0], [0], [1], [0, 0, 1, 1], [], []>} : vector<256x144xf32>, vector<144x16xf32>, vector<256x16xf32> -> vector<256x16xf32>
    %c0_18 = arith.constant 0 : index
    %c0_19 = arith.constant 0 : index
    %32 = vector.load %arg4[%c0_18, %c0_19] : memref<1x16xf32, #tpu.memory_space<vmem>>, vector<1x16xf32>
    %33 = vector.broadcast %32 : vector<1x16xf32> to vector<256x16xf32>
    %34 = arith.addf %31, %33 : vector<256x16xf32>
    %c0_20 = arith.constant 0 : index
    %c0_21 = arith.constant 0 : index
    %c0_22 = arith.constant 0 : index
    %c0_23 = arith.constant 0 : index
    %35 = vector.load %arg5[%c0_20, %c0_21, %c0_22, %c0_23] : memref<1x1x256x16xf32, #tpu.memory_space<vmem>>, vector<1x1x256x16xf32>
    %36 = vector.shape_cast %35 : vector<1x1x256x16xf32> to vector<256x16xf32>
    %37 = vector.shape_cast %34 : vector<256x16xf32> to vector<1x1x256x16xf32>
    tpu.vector_store %arg5[%c0_20, %c0_21, %c0_22, %c0_23], %37 {strides = array<i32>} : memref<1x1x256x16xf32, #tpu.memory_space<vmem>>, vector<1x1x256x16xf32>,
    %38 = vector.extract_strided_slice %34 {offsets = [0, 0], sizes = [256, 8], strides = [1, 1]} : vector<256x16xf32> to vector<256x8xf32>
    %39 = vector.extract_strided_slice %34 {offsets = [0, 8], sizes = [256, 8], strides = [1, 1]} : vector<256x16xf32> to vector<256x8xf32>
    %cst_24 = arith.constant dense<0.000000e+00> : vector<8xf32>
    %40 = vector.multi_reduction <add>, %38, %cst_24 [0] : vector<256x8xf32> to vector<8xf32>
    %41 = vector.shape_cast %40 : vector<8xf32> to vector<1x8xf32>
    %cst_25 = arith.constant dense<0.000000e+00> : vector<8xf32>
    %42 = vector.multi_reduction <add>, %39, %cst_25 [0] : vector<256x8xf32> to vector<8xf32>
    %43 = vector.shape_cast %42 : vector<8xf32> to vector<1x8xf32>
    %44 = arith.mulf %38, %38 : vector<256x8xf32>
    %cst_26 = arith.constant dense<0.000000e+00> : vector<8xf32>
    %45 = vector.multi_reduction <add>, %44, %cst_26 [0] : vector<256x8xf32> to vector<8xf32>
    %46 = vector.shape_cast %45 : vector<8xf32> to vector<1x8xf32>
    %47 = arith.mulf %39, %39 : vector<256x8xf32>
    %cst_27 = arith.constant dense<0.000000e+00> : vector<8xf32>
    %48 = vector.multi_reduction <add>, %47, %cst_27 [0] : vector<256x8xf32> to vector<8xf32>
    %49 = vector.shape_cast %48 : vector<8xf32> to vector<1x8xf32>
    %50 = arith.mulf %38, %39 : vector<256x8xf32>
    %cst_28 = arith.constant dense<0.000000e+00> : vector<8xf32>
    %51 = vector.multi_reduction <add>, %50, %cst_28 [0] : vector<256x8xf32> to vector<8xf32>
    %52 = vector.shape_cast %51 : vector<8xf32> to vector<1x8xf32>
    %cst_29 = arith.constant 0.000000e+00 : f32
    %53 = vector.broadcast %cst_29 : f32 to vector<3x8xf32>
    %54 = tpu.concatenate %41, %43, %46, %49, %52, %53 in 0 : vector<1x8xf32>, vector<1x8xf32>, vector<1x8xf32>, vector<1x8xf32>, vector<1x8xf32>, vector<3x8xf32> -> vector<8x8xf32>
    %c0_i32 = arith.constant 0 : i32
    %55 = arith.cmpi eq, %arg1, %c0_i32 : i32
    %56 = arith.extui %55 : i1 to i32
    %c0_i32_30 = arith.constant 0 : i32
    %57 = arith.cmpi ne, %56, %c0_i32_30 : i32
    scf.if %57 {
      %cst_37 = arith.constant 0.000000e+00 : f32
      %64 = vector.broadcast %cst_37 : f32 to vector<8x8xf32>
      %c0_38 = arith.constant 0 : index
      %c0_39 = arith.constant 0 : index
      %c0_40 = arith.constant 0 : index
      %65 = vector.load %arg6[%c0_38, %c0_39, %c0_40] : memref<1x8x8xf32, #tpu.memory_space<vmem>>, vector<1x8x8xf32>
      %66 = vector.shape_cast %65 : vector<1x8x8xf32> to vector<8x8xf32>
      %67 = vector.shape_cast %64 : vector<8x8xf32> to vector<1x8x8xf32>
      tpu.vector_store %arg6[%c0_38, %c0_39, %c0_40], %67 {strides = array<i32>} : memref<1x8x8xf32, #tpu.memory_space<vmem>>, vector<1x8x8xf32>,
    } else {
    }
    %c0_31 = arith.constant 0 : index
    %c0_32 = arith.constant 0 : index
    %c0_33 = arith.constant 0 : index
    %58 = vector.load %arg6[%c0_31, %c0_32, %c0_33] : memref<1x8x8xf32, #tpu.memory_space<vmem>>, vector<1x8x8xf32>
    %59 = vector.shape_cast %58 : vector<1x8x8xf32> to vector<8x8xf32>
    %60 = arith.addf %59, %54 : vector<8x8xf32>
    %c0_34 = arith.constant 0 : index
    %c0_35 = arith.constant 0 : index
    %c0_36 = arith.constant 0 : index
    %61 = vector.load %arg6[%c0_34, %c0_35, %c0_36] : memref<1x8x8xf32, #tpu.memory_space<vmem>>, vector<1x8x8xf32>
    %62 = vector.shape_cast %61 : vector<1x8x8xf32> to vector<8x8xf32>
    %63 = vector.shape_cast %60 : vector<8x8xf32> to vector<1x8x8xf32>
    tpu.vector_store %arg6[%c0_34, %c0_35, %c0_36], %63 {strides = array<i32>} : memref<1x8x8xf32, #tpu.memory_space<vmem>>, vector<1x8x8xf32>,
    return
  }
  func.func @transform_0(%arg0: i32, %arg1: i32) -> (i32, i32, i32, i32, i32) {
    %c0_i32 = arith.constant 0 : i32
    %c0_i32_0 = arith.constant 0 : i32
    %c0_i32_1 = arith.constant 0 : i32
    %c0_i32_2 = arith.constant 0 : i32
    return %arg0, %arg1, %c0_i32, %c0_i32_0, %c0_i32_1 : i32, i32, i32, i32, i32
  }
  func.func @transform_1(%arg0: i32, %arg1: i32) -> (i32, i32) {
    %c0_i32 = arith.constant 0 : i32
    %c0_i32_0 = arith.constant 0 : i32
    %c0_i32_1 = arith.constant 0 : i32
    return %c0_i32, %c0_i32_0 : i32, i32
  }
  func.func @transform_2(%arg0: i32, %arg1: i32) -> (i32, i32) {
    %c0_i32 = arith.constant 0 : i32
    %c0_i32_0 = arith.constant 0 : i32
    %c0_i32_1 = arith.constant 0 : i32
    return %c0_i32, %c0_i32_0 : i32, i32
  }
  func.func @transform_3(%arg0: i32, %arg1: i32) -> (i32, i32, i32, i32) {
    %c0_i32 = arith.constant 0 : i32
    %c0_i32_0 = arith.constant 0 : i32
    %c0_i32_1 = arith.constant 0 : i32
    return %arg0, %arg1, %c0_i32, %c0_i32_0 : i32, i32, i32, i32
  }
  func.func @transform_4(%arg0: i32, %arg1: i32) -> (i32, i32, i32) {
    %c0_i32 = arith.constant 0 : i32
    %c0_i32_0 = arith.constant 0 : i32
    %c0_i32_1 = arith.constant 0 : i32
    return %arg0, %c0_i32, %c0_i32_0 : i32, i32, i32
  }
}

module attributes {stable_mosaic.version = 11 : i64} {
  func.func @_affine_kernel(%arg0: i32, %arg1: memref<512x16xf32, #tpu.memory_space<vmem>>, %arg2: memref<8x8xf32, #tpu.memory_space<vmem>>, %arg3: memref<512x16xf32, #tpu.memory_space<vmem>>) attributes {dimension_semantics = [#tpu.dimension_semantics<parallel>], iteration_bounds = array<i64: 1>, scalar_prefetch = 0 : i64, scratch_operands = 0 : i64, tpu.core_type = #tpu.core_type<tc>, window_params = [{transform_indices = @transform_0, window_bounds = array<i64: 512, 16>}, {pipeline_mode = #tpu.pipeline_mode<synchronous>, transform_indices = @transform_1, window_bounds = array<i64: 8, 8>}, {transform_indices = @transform_2, window_bounds = array<i64: 512, 16>}]} {
    %c0 = arith.constant 0 : index
    %c0_0 = arith.constant 0 : index
    %0 = vector.load %arg1[%c0, %c0_0] : memref<512x16xf32, #tpu.memory_space<vmem>>, vector<512x16xf32>
    %1 = vector.extract_strided_slice %0 {offsets = [0, 0], sizes = [512, 8], strides = [1, 1]} : vector<512x16xf32> to vector<512x8xf32>
    %2 = vector.extract_strided_slice %0 {offsets = [0, 8], sizes = [512, 8], strides = [1, 1]} : vector<512x16xf32> to vector<512x8xf32>
    %c0_1 = arith.constant 0 : index
    %c0_2 = arith.constant 0 : index
    %3 = vector.load %arg2[%c0_1, %c0_2] : memref<8x8xf32, #tpu.memory_space<vmem>>, vector<1x8xf32>
    %c1 = arith.constant 1 : index
    %c0_3 = arith.constant 0 : index
    %4 = vector.load %arg2[%c1, %c0_3] : memref<8x8xf32, #tpu.memory_space<vmem>>, vector<1x8xf32>
    %c2 = arith.constant 2 : index
    %c0_4 = arith.constant 0 : index
    %5 = vector.load %arg2[%c2, %c0_4] : memref<8x8xf32, #tpu.memory_space<vmem>>, vector<1x8xf32>
    %c3 = arith.constant 3 : index
    %c0_5 = arith.constant 0 : index
    %6 = vector.load %arg2[%c3, %c0_5] : memref<8x8xf32, #tpu.memory_space<vmem>>, vector<1x8xf32>
    %c4 = arith.constant 4 : index
    %c0_6 = arith.constant 0 : index
    %7 = vector.load %arg2[%c4, %c0_6] : memref<8x8xf32, #tpu.memory_space<vmem>>, vector<1x8xf32>
    %c5 = arith.constant 5 : index
    %c0_7 = arith.constant 0 : index
    %8 = vector.load %arg2[%c5, %c0_7] : memref<8x8xf32, #tpu.memory_space<vmem>>, vector<1x8xf32>
    %9 = vector.broadcast %3 : vector<1x8xf32> to vector<512x8xf32>
    %10 = arith.mulf %9, %1 : vector<512x8xf32>
    %11 = vector.broadcast %4 : vector<1x8xf32> to vector<512x8xf32>
    %12 = arith.mulf %11, %2 : vector<512x8xf32>
    %13 = arith.addf %10, %12 : vector<512x8xf32>
    %14 = vector.broadcast %7 : vector<1x8xf32> to vector<512x8xf32>
    %15 = arith.addf %13, %14 : vector<512x8xf32>
    %16 = vector.broadcast %5 : vector<1x8xf32> to vector<512x8xf32>
    %17 = arith.mulf %16, %1 : vector<512x8xf32>
    %18 = vector.broadcast %6 : vector<1x8xf32> to vector<512x8xf32>
    %19 = arith.mulf %18, %2 : vector<512x8xf32>
    %20 = arith.addf %17, %19 : vector<512x8xf32>
    %21 = vector.broadcast %8 : vector<1x8xf32> to vector<512x8xf32>
    %22 = arith.addf %20, %21 : vector<512x8xf32>
    %cst = arith.constant 0.000000e+00 : f32
    %23 = vector.broadcast %cst : f32 to vector<512x8xf32>
    %24 = arith.maximumf %15, %23 : vector<512x8xf32>
    %cst_8 = arith.constant 0.000000e+00 : f32
    %25 = vector.broadcast %cst_8 : f32 to vector<512x8xf32>
    %26 = arith.maximumf %22, %25 : vector<512x8xf32>
    %27 = tpu.concatenate %24, %26 in 1 : vector<512x8xf32>, vector<512x8xf32> -> vector<512x16xf32>
    %c0_9 = arith.constant 0 : index
    %c0_10 = arith.constant 0 : index
    %28 = vector.load %arg3[%c0_9, %c0_10] : memref<512x16xf32, #tpu.memory_space<vmem>>, vector<512x16xf32>
    tpu.vector_store %arg3[%c0_9, %c0_10], %27 {strides = array<i32>} : memref<512x16xf32, #tpu.memory_space<vmem>>, vector<512x16xf32>,
    return
  }
  func.func @transform_0(%arg0: i32) -> (i32, i32) {
    %c0_i32 = arith.constant 0 : i32
    %c0_i32_0 = arith.constant 0 : i32
    return %arg0, %c0_i32 : i32, i32
  }
  func.func @transform_1(%arg0: i32) -> (i32, i32) {
    %c0_i32 = arith.constant 0 : i32
    %c0_i32_0 = arith.constant 0 : i32
    %c0_i32_1 = arith.constant 0 : i32
    return %c0_i32, %c0_i32_0 : i32, i32
  }
  func.func @transform_2(%arg0: i32) -> (i32, i32) {
    %c0_i32 = arith.constant 0 : i32
    %c0_i32_0 = arith.constant 0 : i32
    return %arg0, %c0_i32 : i32, i32
  }
}

</mosaic_0001>

<bundles_post_ra>
// kernel: complex_conv_block_forward.5
= control target key start
LH: loop header
LB: loop body
LE: loop exit
PB: predicated region body
PF: predicated region fallthrough
CT: control target
= control target key end

     0   :  { %s1403_s13 = smov 120   ;;  %vm1257_vm0 = vcmask 64512   ;;  %vm1322_vm1 = vcmask 130048   ;;  %s3251_s0 = inlined_call_operand.vmem [shape: f32[512,16], index: 0, kind: input, shape index: {}]   ;;  %s3252_s1 = inlined_call_operand.vmem [shape: f32[8,8], index: 1, kind: input, shape index: {}]   ;;  %s3253_s2 = inlined_call_operand.vmem [shape: f32[512,16], index: 2, kind: output, shape index: {}]  }
   0x1   :  { %v1423_v0 = vld [vmem:[%s3251_s0 + $0x10] sm:$0xff]  ;;  %v1428_v1 = vld [vmem:[%s3252_s1] ss:$0 sm:$0xff]  ;;  %v1444_v4 = vld [vmem:[%s3251_s0 + $0x18] sm:$0xff] }
   0x2   :  { %221 = vrot.lane.b32.xlu1 %v1423_v0, %s1403_s13  ;;  %v1434_v2 = vmul.f32 %v1428_v1, %v1423_v0  ;;  %v1439_v3 = vld [vmem:[%s3251_s0] sm:$0xff]  ;;  %v1454_v6 = vmul.f32 %v1428_v1, %v1444_v4  ;;  %v1459_v7 = vld [vmem:[%s3251_s0 + $0x8] sm:$0xff]  ;;  %v1482_v12 = vld [vmem:[%s3251_s0 + $0x38] sm:$0xff] }
   0x3   :  { %217 = vrot.lane.b32.xlu0 %v1439_v3, %s1403_s13  ;;  %v1450_v5 = vmul.f32 %v1428_v1, %v1439_v3  ;;  %v1464_v8 = vld [vmem:[%s3251_s0 + $0x28] sm:$0xff]  ;;  %v1468_v9 = vmul.f32 %v1428_v1, %v1459_v7  ;;  %v1477_v11 = vld [vmem:[%s3251_s0 + $0x20] sm:$0xff]  ;;  %v1490_v14 = vmul.f32 %v1428_v1, %v1482_v12  ;;  %v1495_v15 = vld [vmem:[%s3251_s0 + $0x30] sm:$0xff] }
   0x4   :  { %3300 = vst [vmem:[#allocation2_spill] sm:$0xff] %v1434_v2  ;;  %3302 = vst [vmem:[#allocation4_spill] sm:$0xff] %v1454_v6  ;;  %v1472_v10 = vmul.f32 %v1428_v1, %v1464_v8  ;;  %v1486_v13 = vmul.f32 %v1428_v1, %v1477_v11  ;;  %v1500_v16 = vld [vmem:[%s3251_s0 + $0x48] sm:$0xff]  ;;  %v1506_v17 = vmul.f32 %v1428_v1, %v1495_v15  ;;  %v1515_v19 = vld [vmem:[%s3251_s0 + $0x40] sm:$0xff] }
   0x5   :  { %3301 = vst [vmem:[#allocation3_spill] sm:$0xff] %v1450_v5  ;;  %3303 = vst [vmem:[#allocation5_spill] sm:$0xff] %v1468_v9  ;;  %v1510_v18 = vmul.f32 %v1428_v1, %v1500_v16  ;;  %v1520_v20 = vld [vmem:[%s3251_s0 + $0x58] sm:$0xff]  ;;  %v1526_v21 = vmul.f32 %v1428_v1, %v1515_v19  ;;  %v1535_v23 = vld [vmem:[%s3251_s0 + $0x50] sm:$0xff] }
   0x6   :  { %3304 = vst [vmem:[#allocation6_spill] sm:$0xff] %v1472_v10  ;;  %3305 = vst [vmem:[#allocation7_spill] sm:$0xff] %v1486_v13  ;;  %223 = vrot.lane.b32.xlu1 %v1444_v4, %s1403_s13  ;;  %v1530_v22 = vmul.f32 %v1428_v1, %v1520_v20  ;;  %v1540_v24 = vld [vmem:[%s3251_s0 + $0x68] sm:$0xff]  ;;  %v1544_v25 = vmul.f32 %v1428_v1, %v1535_v23  ;;  %v1553_v27 = vld [vmem:[%s3251_s0 + $0x60] sm:$0xff] }
   0x7   :  { %3306 = vst [vmem:[#allocation8_spill] sm:$0xff] %v1490_v14  ;;  %3307 = vst [vmem:[#allocation9_spill] sm:$0xff] %v1506_v17  ;;  %219 = vrot.lane.b32.xlu0 %v1459_v7, %s1403_s13  ;;  %v1548_v26 = vmul.f32 %v1428_v1, %v1540_v24  ;;  %v1558_v28 = vld [vmem:[%s3251_s0 + $0x78] sm:$0xff]  ;;  %v1562_v29 = vmul.f32 %v1428_v1, %v1553_v27  ;;  %v1571_v31 = vld [vmem:[%s3251_s0 + $0x70] sm:$0xff] }
   0x8   :  { %3308 = vst [vmem:[#allocation10_spill] sm:$0xff] %v1510_v18  ;;  %3309 = vst [vmem:[#allocation11_spill] sm:$0xff] %v1526_v21  ;;  %v1566_v30 = vmul.f32 %v1428_v1, %v1558_v28  ;;  %v1576_v32 = vld [vmem:[%s3251_s0 + $0x88] sm:$0xff]  ;;  %v1582_v33 = vmul.f32 %v1428_v1, %v1571_v31  ;;  %v1591_v35 = vld [vmem:[%s3251_s0 + $0x80] sm:$0xff] }
   0x9   :  { %3310 = vst [vmem:[#allocation12_spill] sm:$0xff] %v1530_v22  ;;  %3311 = vst [vmem:[#allocation13_spill] sm:$0xff] %v1544_v25  ;;  %v1586_v34 = vmul.f32 %v1428_v1, %v1576_v32  ;;  %v1596_v36 = vld [vmem:[%s3251_s0 + $0x98] sm:$0xff]  ;;  %v1602_v37 = vmul.f32 %v1428_v1, %v1591_v35  ;;  %v1611_v39 = vld [vmem:[%s3251_s0 + $0x90] sm:$0xff] }
   0xa   :  { %3312 = vst [vmem:[#allocation14_spill] sm:$0xff] %v1548_v26  ;;  %3313 = vst [vmem:[#allocation15_spill] sm:$0xff] %v1562_v29  ;;  %227 = vrot.lane.b32.xlu1 %v1464_v8, %s1403_s13  ;;  %v1606_v38 = vmul.f32 %v1428_v1, %v1596_v36  ;;  %v1616_v40 = vld [vmem:[%s3251_s0 + $0xa8] sm:$0xff]  ;;  %v1620_v41 = vmul.f32 %v1428_v1, %v1611_v39  ;;  %v1629_v43 = vld [vmem:[%s3251_s0 + $0xa0] sm:$0xff] }
   0xb   :  { %3314 = vst [vmem:[#allocation16_spill] sm:$0xff] %v1566_v30  ;;  %3315 = vst [vmem:[#allocation17_spill] sm:$0xff] %v1582_v33  ;;  %225 = vrot.lane.b32.xlu0 %v1477_v11, %s1403_s13  ;;  %v1624_v42 = vmul.f32 %v1428_v1, %v1616_v40  ;;  %v1634_v44 = vld [vmem:[%s3251_s0 + $0xb8] sm:$0xff]  ;;  %v1638_v45 = vmul.f32 %v1428_v1, %v1629_v43  ;;  %v1647_v47 = vld [vmem:[%s3251_s0 + $0xb0] sm:$0xff] }
   0xc   :  { %3316 = vst [vmem:[#allocation18_spill] sm:$0xff] %v1586_v34  ;;  %3317 = vst [vmem:[#allocation19_spill] sm:$0xff] %v1602_v37  ;;  %v1642_v46 = vmul.f32 %v1428_v1, %v1634_v44  ;;  %v1652_v48 = vld [vmem:[%s3251_s0 + $0xc8] sm:$0xff]  ;;  %v1658_v49 = vmul.f32 %v1428_v1, %v1647_v47  ;;  %v1667_v51 = vld [vmem:[%s3251_s0 + $0xc0] sm:$0xff] }
   0xd   :  { %3318 = vst [vmem:[#allocation20_spill] sm:$0xff] %v1606_v38  ;;  %3319 = vst [vmem:[#allocation21_spill] sm:$0xff] %v1620_v41  ;;  %v1662_v50 = vmul.f32 %v1428_v1, %v1652_v48  ;;  %v1672_v52 = vld [vmem:[%s3251_s0 + $0xd8] sm:$0xff]  ;;  %v1678_v53 = vmul.f32 %v1428_v1, %v1667_v51  ;;  %v1687_v55 = vld [vmem:[%s3251_s0 + $0xd0] sm:$0xff] }
   0xe   :  { %3320 = vst [vmem:[#allocation22_spill] sm:$0xff] %v1624_v42  ;;  %3321 = vst [vmem:[#allocation23_spill] sm:$0xff] %v1638_v45  ;;  %231 = vrot.lane.b32.xlu1 %v1482_v12, %s1403_s13  ;;  %v1682_v54 = vmul.f32 %v1428_v1, %v1672_v52  ;;  %v1692_v56 = vld [vmem:[%s3251_s0 + $0xe8] sm:$0xff]  ;;  %v1696_v57 = vmul.f32 %v1428_v1, %v1687_v55  ;;  %v1705_v59 = vld [vmem:[%s3251_s0 + $0xe0] sm:$0xff] }
   0xf   :  { %3322 = vst [vmem:[#allocation24_spill] sm:$0xff] %v1642_v46  ;;  %3323 = vst [vmem:[#allocation25_spill] sm:$0xff] %v1658_v49  ;;  %229 = vrot.lane.b32.xlu0 %v1495_v15, %s1403_s13  ;;  %v1700_v58 = vmul.f32 %v1428_v1, %v1692_v56  ;;  %v1710_v60 = vld [vmem:[%s3251_s0 + $0xf8] sm:$0xff]  ;;  %v1715_v61 = vld [vmem:[%s3252_s1 + $0x2] ss:$0 sm:$0xff]  ;;  %v1719_v62 = vmul.f32 %v1428_v1, %v1705_v59 }
  0x10   :  { %3324 = vst [vmem:[#allocation26_spill] sm:$0xff] %v1662_v50  ;;  %3325 = vst [vmem:[#allocation27_spill] sm:$0xff] %v1678_v53  ;;  %v1723_v63 = vmul.f32 %v1428_v1, %v1710_v60  ;;  %v43_v50 = vld [vmem:[%s3251_s0 + $0x100] sm:$0xff]  ;;  %v46_v49 = vld [vmem:[%s3251_s0 + $0x118] sm:$0xff] }
  0x11   :  { %3326 = vst [vmem:[#allocation28_spill] sm:$0xff] %v1682_v54  ;;  %3327 = vst [vmem:[#allocation29_spill] sm:$0xff] %v1696_v57  ;;  %v44_v57 = vld [vmem:[%s3251_s0 + $0x108] sm:$0xff]  ;;  %v1754_v46 = vmul.f32 %v1428_v1, %v43_v50  ;;  %v1757_v45 = vmul.f32 %v1715_v61, %v43_v50  ;;  %v1760_v42 = vmul.f32 %v1428_v1, %v46_v49  ;;  %v45_v38 = vld [vmem:[%s3251_s0 + $0x110] sm:$0xff] }
  0x12   :  { %3328 = vst [vmem:[#allocation30_spill] sm:$0xff] %v1700_v58  ;;  %3329 = vst [vmem:[#allocation31_spill] sm:$0xff] %v1719_v62  ;;  %v1728_v58 = vld [vmem:[%s3251_s0 + $0xf0] sm:$0xff]  ;;  %235 = vrot.lane.b32.xlu1 %v1500_v16, %s1403_s13  ;;  %v1740_v62 = vmul.f32 %v1428_v1, %v44_v57  ;;  %v1743_v53 = vmul.f32 %v1715_v61, %v44_v57  ;;  %v1763_v41 = vmul.f32 %v1715_v61, %v46_v49  ;;  %v48_v37 = vld [vmem:[%s3251_s0 + $0x128] sm:$0xff] }
  0x13   :  { %v1737_v54 = vmul.f32 %v1428_v1, %v1728_v58  ;;  %233 = vrot.lane.b32.xlu0 %v1515_v19, %s1403_s13  ;;  %v1772_v34 = vmul.f32 %v1428_v1, %v45_v38  ;;  %v1775_v33 = vmul.f32 %v1715_v61, %v45_v38  ;;  %v1778_v30 = vmul.f32 %v1428_v1, %v48_v37  ;;  %v47_v26 = vld [vmem:[%s3251_s0 + $0x120] sm:$0xff]  ;;  %v50_v25 = vld [vmem:[%s3251_s0 + $0x138] sm:$0xff]  ;;  %v49_v14 = vld [vmem:[%s3251_s0 + $0x130] sm:$0xff] }
  0x14   :  { %v1781_v29 = vmul.f32 %v1715_v61, %v48_v37  ;;  %v1790_v22 = vmul.f32 %v1428_v1, %v47_v26  ;;  %v1793_v21 = vmul.f32 %v1715_v61, %v47_v26  ;;  %v1796_v18 = vmul.f32 %v1428_v1, %v50_v25  ;;  %v52_v13 = vld [vmem:[%s3251_s0 + $0x148] sm:$0xff]  ;;  %v51_v5 = vld [vmem:[%s3251_s0 + $0x140] sm:$0xff] }
  0x15   :  { %v1799_v17 = vmul.f32 %v1715_v61, %v50_v25  ;;  %v1810_v10 = vmul.f32 %v1428_v1, %v49_v14  ;;  %v1813_v9 = vmul.f32 %v1715_v61, %v49_v14  ;;  %v1816_v6 = vmul.f32 %v1428_v1, %v52_v13 }
  0x16   :  { %3330 = vst [vmem:[#allocation32_spill] sm:$0xff] %v1781_v29  ;;  %3331 = vst [vmem:[#allocation33_spill] sm:$0xff] %v1790_v22  ;;  %239 = vrot.lane.b32.xlu1 %v1520_v20, %s1403_s13  ;;  %v1819_v2 = vmul.f32 %v1715_v61, %v52_v13 }
  0x17   :  { %3332 = vst [vmem:[#allocation34_spill] sm:$0xff] %v1793_v21  ;;  %3333 = vst [vmem:[#allocation35_spill] sm:$0xff] %v1796_v18  ;;  %237 = vrot.lane.b32.xlu0 %v1535_v23, %s1403_s13  ;;  %v53_v18 = vld [vmem:[%s3251_s0 + $0x150] sm:$0xff] }
  0x18   :  { %3334 = vst [vmem:[#allocation36_spill] sm:$0xff] %v1799_v17  ;;  %3335 = vst [vmem:[#allocation37_spill] sm:$0xff] %v1810_v10  ;;  %v54_v17 = vld [vmem:[%s3251_s0 + $0x158] sm:$0xff]  ;;  %v1830_v10 = vmul.f32 %v1428_v1, %v51_v5  ;;  %v1845_v21 = vmul.f32 %v1428_v1, %v53_v18  ;;  %v1848_v22 = vmul.f32 %v1715_v61, %v53_v18 }
  0x19   :  { %3336 = vst [vmem:[#allocation38_spill] sm:$0xff] %v1813_v9  ;;  %3337 = vst [vmem:[#allocation39_spill] sm:$0xff] %v1816_v6  ;;  %v1833_v9 = vmul.f32 %v1715_v61, %v51_v5  ;;  %v1836_v6 = vmul.f32 %v1428_v1, %v54_v17 }
  0x1a   :  { %3338 = vst [vmem:[#allocation40_spill] sm:$0xff] %v1819_v2  ;;  %3339 = vst [vmem:[#allocation41_spill] sm:$0xff] %v1830_v10  ;;  %v1839_v2 = vmul.f32 %v1715_v61, %v54_v17  ;;  %243 = vrot.lane.b32.xlu1 %v1540_v24, %s1403_s13 }
  0x1b   :  { %3340 = vst [vmem:[#allocation42_spill] sm:$0xff] %v1833_v9  ;;  %3341 = vst [vmem:[#allocation43_spill] sm:$0xff] %v1836_v6  ;;  %241 = vrot.lane.b32.xlu0 %v1553_v27, %s1403_s13  ;;  %v2015_v6 = vld [vmem:[%s3251_s0 + $0x1d0] sm:$0xff]  ;;  %v612_v9 = vmul.f32 %v1715_v61, %v1444_v4 }
  0x1c   :  { %3342 = vst [vmem:[#allocation44_spill] sm:$0xff] %v1839_v2  ;;  %3343 = vst [vmem:[#allocation45_spill] sm:$0xff] %v1845_v21  ;;  %v1994_v21 = vld [vmem:[%s3251_s0 + $0x1c0] sm:$0xff] }
  0x1d   :  { %3344 = vst [vmem:[#allocation46_spill] sm:$0xff] %v1848_v22  ;;  %v1989_v22 = vld [vmem:[%s3251_s0 + $0x1c8] sm:$0xff]  ;;  %3354 = vst [vmem:[#allocation56_spill] sm:$0xff] %v1994_v21 }
  0x1e   :  { %247 = vrot.lane.b32.xlu1 %v1558_v28, %s1403_s13  ;;  %3353 = vst [vmem:[#allocation55_spill] sm:$0xff] %v1989_v22  ;;  %3357 = vst [vmem:[#allocation59_spill] sm:$0xff] %v2015_v6 }
  0x1f   :  { %245 = vrot.lane.b32.xlu0 %v1571_v31, %s1403_s13 }
  0x22   :  { %251 = vrot.lane.b32.xlu1 %v1576_v32, %s1403_s13 }
  0x23   :  { %249 = vrot.lane.b32.xlu0 %v1591_v35, %s1403_s13 }
  0x26   :  { %255 = vrot.lane.b32.xlu1 %v1596_v36, %s1403_s13 }
  0x27   :  { %253 = vrot.lane.b32.xlu0 %v1611_v39, %s1403_s13 }
  0x2a   :  { %259 = vrot.lane.b32.xlu1 %v1616_v40, %s1403_s13 }
  0x2b   :  { %257 = vrot.lane.b32.xlu0 %v1629_v43, %s1403_s13 }
  0x2e   :  { %263 = vrot.lane.b32.xlu1 %v1634_v44, %s1403_s13 }
  0x2f   :  { %261 = vrot.lane.b32.xlu0 %v1647_v47, %s1403_s13 }
  0x32   :  { %267 = vrot.lane.b32.xlu1 %v1652_v48, %s1403_s13 }
  0x33   :  { %265 = vrot.lane.b32.xlu0 %v1667_v51, %s1403_s13 }
  0x36   :  { %271 = vrot.lane.b32.xlu1 %v1672_v52, %s1403_s13 }
  0x37   :  { %269 = vrot.lane.b32.xlu0 %v1687_v55, %s1403_s13 }
  0x3a   :  { %275 = vrot.lane.b32.xlu1 %v1692_v56, %s1403_s13 }
  0x3b   :  { %273 = vrot.lane.b32.xlu0 %v1705_v59, %s1403_s13 }
  0x3e   :  { %279 = vrot.lane.b32.xlu1 %v1710_v60, %s1403_s13 }
  0x3f   :  { %277 = vrot.lane.b32.xlu0 %v1728_v58, %s1403_s13 }
  0x42   :  { %283 = vrot.lane.b32.xlu1 %v44_v57, %s1403_s13  ;;  %v1980_v57 = vld [vmem:[%s3251_s0 + $0x1b0] sm:$0xff] }
  0x43   :  { %281 = vrot.lane.b32.xlu0 %v43_v50, %s1403_s13  ;;  %v1975_v50 = vld [vmem:[%s3251_s0 + $0x1b8] sm:$0xff]  ;;  %3352 = vst [vmem:[#allocation54_spill] sm:$0xff] %v1980_v57 }
  0x44   :  { %3351 = vst [vmem:[#allocation53_spill] sm:$0xff] %v1975_v50 }
  0x46   :  { %287 = vrot.lane.b32.xlu1 %v46_v49, %s1403_s13  ;;  %v1966_v49 = vld [vmem:[%s3251_s0 + $0x1a0] sm:$0xff] }
  0x47   :  { %285 = vrot.lane.b32.xlu0 %v45_v38, %s1403_s13  ;;  %v1905_v38 = vld [vmem:[%s3251_s0 + $0x168] sm:$0xff]  ;;  %3350 = vst [vmem:[#allocation52_spill] sm:$0xff] %v1966_v49 }
  0x4a   :  { %291 = vrot.lane.b32.xlu1 %v48_v37, %s1403_s13  ;;  %v1961_v37 = vld [vmem:[%s3251_s0 + $0x1a8] sm:$0xff] }
  0x4b   :  { %289 = vrot.lane.b32.xlu0 %v47_v26, %s1403_s13  ;;  %v1910_v26 = vld [vmem:[%s3251_s0 + $0x160] sm:$0xff]  ;;  %3349 = vst [vmem:[#allocation51_spill] sm:$0xff] %v1961_v37 }
  0x4e   :  { %295 = vrot.lane.b32.xlu1 %v50_v25, %s1403_s13  ;;  %v1952_v25 = vld [vmem:[%s3251_s0 + $0x190] sm:$0xff] }
  0x4f   :  { %293 = vrot.lane.b32.xlu0 %v49_v14, %s1403_s13  ;;  %v1933_v14 = vld [vmem:[%s3251_s0 + $0x188] sm:$0xff]  ;;  %3348 = vst [vmem:[#allocation50_spill] sm:$0xff] %v1952_v25 }
  0x50   :  { %3345 = vst [vmem:[#allocation47_spill] sm:$0xff] %v1933_v14 }
  0x52   :  { %299 = vrot.lane.b32.xlu1 %v52_v13, %s1403_s13  ;;  %v1924_v13 = vld [vmem:[%s3251_s0 + $0x170] sm:$0xff] }
  0x53   :  { %297 = vrot.lane.b32.xlu0 %v51_v5, %s1403_s13  ;;  %v1919_v5 = vld [vmem:[%s3251_s0 + $0x178] sm:$0xff] }
  0x56   :  { %303 = vrot.lane.b32.xlu1 %v54_v17, %s1403_s13  ;;  %v1938_v17 = vld [vmem:[%s3251_s0 + $0x180] sm:$0xff] }
  0x57   :  { %301 = vrot.lane.b32.xlu0 %v53_v18, %s1403_s13  ;;  %3346 = vst [vmem:[#allocation48_spill] sm:$0xff] %v1938_v17  ;;  %v1947_v18 = vld [vmem:[%s3251_s0 + $0x198] sm:$0xff] }
  0x58   :  { %3347 = vst [vmem:[#allocation49_spill] sm:$0xff] %v1947_v18 }
  0x5a   :  { %307 = vrot.lane.b32.xlu1 %v1905_v38, %s1403_s13 }
  0x5b   :  { %305 = vrot.lane.b32.xlu0 %v1910_v26, %s1403_s13 }
  0x5e   :  { %311 = vrot.lane.b32.xlu1 %v1919_v5, %s1403_s13 }
  0x5f   :  { %309 = vrot.lane.b32.xlu0 %v1924_v13, %s1403_s13 }
  0x62   :  { %315 = vrot.lane.b32.xlu1 %v1933_v14, %s1403_s13 }
  0x63   :  { %313 = vrot.lane.b32.xlu0 %v1938_v17, %s1403_s13  ;;  %v2058_v17 = vld [vmem:[%s3252_s1 + $0x5] ss:$0 sm:$0xff] }
  0x66   :  { %319 = vrot.lane.b32.xlu1 %v1947_v18, %s1403_s13 }
  0x67   :  { %317 = vrot.lane.b32.xlu0 %v1952_v25, %s1403_s13 }
  0x6a   :  { %323 = vrot.lane.b32.xlu1 %v1961_v37, %s1403_s13  ;;  %v2030_v37 = vld [vmem:[%s3251_s0 + $0x1e8] sm:$0xff] }
  0x6b   :  { %321 = vrot.lane.b32.xlu0 %v1966_v49, %s1403_s13  ;;  %3359 = vst [vmem:[#allocation61_spill] sm:$0xff] %v2030_v37 }
  0x6e   :  { %327 = vrot.lane.b32.xlu1 %v1975_v50, %s1403_s13  ;;  %v2008_v50 = vld [vmem:[%s3251_s0 + $0x1d8] sm:$0xff] }
  0x6f   :  { %325 = vrot.lane.b32.xlu0 %v1980_v57, %s1403_s13  ;;  %v2003_v57 = vld [vmem:[%s3252_s1 + $0x3] ss:$0 sm:$0xff]  ;;  %3355 = vst [vmem:[#allocation57_spill] sm:$0xff] %v2008_v50 }
  0x72   :  { %331 = vrot.lane.b32.xlu1 %v1989_v22, %s1403_s13 }
  0x73   :  { %329 = vrot.lane.b32.xlu0 %v1994_v21, %s1403_s13  ;;  %v609_v21 = vmul.f32 %v1715_v61, %v1439_v3  ;;  %v610_v3 = vmul.f32 %v1715_v61, %v1459_v7 }
  0x74   :  { %v2010_v2 = vpop.permute.xlu1 %221 }
  0x75   :  { %3356 = vst [vmem:[#allocation58_spill] sm:$0xff] %v2010_v2  ;;  %v2019_v22 = vpop.permute.xlu0 %217 }
  0x76   :  { %3358 = vst [vmem:[#allocation60_spill] sm:$0xff] %v2019_v22  ;;  %v677_v49 = vmul.f32 %v2003_v57, %v2019_v22  ;;  %335 = vrot.lane.b32.xlu1 %v2008_v50, %s1403_s13  ;;  %v2041_v22 = vld [vmem:[%s3251_s0 + $0x1e0] sm:$0xff]  ;;  %v679_v50 = vmul.f32 %v2003_v57, %v2010_v2  ;;  %v2074_v2 = vld [vmem:[%s3251_s0 + $0x1f0] sm:$0xff] }
  0x77   :  { %333 = vrot.lane.b32.xlu0 %v2015_v6, %s1403_s13  ;;  %3361 = vst [vmem:[#allocation63_spill] sm:$0xff] %v2041_v22  ;;  %v611_v6 = vmul.f32 %v1715_v61, %v1423_v0  ;;  %v2065_v0 = vld [vmem:[%s3251_s0 + $0x1f8] sm:$0xff]  ;;  %3365 = vst [vmem:[#allocation67_spill] sm:$0xff] %v2074_v2  ;;  %s1404_s0 = smov 8  }
  0x78   :  { %v2036_v10 = vpop.permute.xlu1 %223  ;;  %v741_v25 = vadd.f32 %v677_v49, %v609_v21  ;;  %3363 = vst [vmem:[#allocation65_spill] sm:$0xff] %v2065_v0  ;;  %v614_v21 = vmul.f32 %v1715_v61, %v1464_v8 }
  0x79   :  { %3360 = vst [vmem:[#allocation62_spill] sm:$0xff] %v2036_v10  ;;  %v680_v4 = vmul.f32 %v2003_v57, %v2036_v10  ;;  %v2049_v18 = vpop.permute.xlu0 %219 }
  0x7a   :  { %3362 = vst [vmem:[#allocation64_spill] sm:$0xff] %v2049_v18  ;;  %v678_v7 = vmul.f32 %v2003_v57, %v2049_v18  ;;  %339 = vrot.lane.b32.xlu1 %v2030_v37, %s1403_s13  ;;  %v743_v37 = vadd.f32 %v679_v50, %v611_v6  ;;  %v809_v8 = vadd.f32 %v2058_v17, %v741_v25 }
  0x7b   :  { %337 = vrot.lane.b32.xlu0 %v2041_v22, %s1403_s13  ;;  %v744_v49 = vadd.f32 %v680_v4, %v612_v9  ;;  %v613_v22 = vmul.f32 %v1715_v61, %v1477_v11  ;;  %v616_v4 = vmul.f32 %v1715_v61, %v1482_v12  ;;  %v615_v6 = vmul.f32 %v1715_v61, %v1495_v15 }
  0x7c   :  { %v742_v18 = vadd.f32 %v678_v7, %v610_v3  ;;  %v2069_v10 = vpop.permute.xlu1 %227  ;;  %v811_v12 = vadd.f32 %v2058_v17, %v743_v37  ;;  %v618_v15 = vmul.f32 %v1715_v61, %v1500_v16 }
  0x7d   :  { %3364 = vst [vmem:[#allocation66_spill] sm:$0xff] %v2069_v10  ;;  %v682_v14 = vmul.f32 %v2003_v57, %v2069_v10  ;;  %v2080_v29 = vpop.permute.xlu0 %225  ;;  %v812_v7 = vadd.f32 %v2058_v17, %v744_v49 }
  0x7e   :  { %3366 = vst [vmem:[#allocation68_spill] sm:$0xff] %v2080_v29  ;;  %v681_v9 = vmul.f32 %v2003_v57, %v2080_v29  ;;  %343 = vrot.lane.b32.xlu1 %v2065_v0, %s1403_s13  ;;  %v810_v3 = vadd.f32 %v2058_v17, %v742_v18  ;;  %v937_v0 = vmax.f32 %v809_v8, 0.0 }
  0x7f   :  { %341 = vrot.lane.b32.xlu0 %v2074_v2, %s1403_s13  ;;  %v746_v11 = vadd.f32 %v682_v14, %v614_v21  ;;  %v940_v49 = vmax.f32 %v812_v7, 0.0 }
  0x80   :  { %v2094_v50 = vpop.permute.xlu1 %231  ;;  %v938_v25 = vmax.f32 %v810_v3, 0.0  ;;  %v745_v29 = vadd.f32 %v681_v9, %v613_v22  ;;  %v617_v22 = vmul.f32 %v1715_v61, %v1515_v19 }
  0x81   :  { %v684_v10 = vmul.f32 %v2003_v57, %v2094_v50  ;;  %v2099_v18 = vpop.permute.xlu0 %229  ;;  %v814_v37 = vadd.f32 %v2058_v17, %v746_v11 }
  0x82   :  { %v683_v2 = vmul.f32 %v2003_v57, %v2099_v18  ;;  %1067 = vrot.lane.b32.xlu1 %v938_v25, %s1404_s0  ;;  %v939_v25 = vmax.f32 %v811_v12, 0.0  ;;  %v813_v16 = vadd.f32 %v2058_v17, %v745_v29 }
  0x83   :  { %1065 = vrot.lane.b32.xlu0 %v937_v0, %s1404_s0  ;;  %v748_v14 = vadd.f32 %v684_v10, %v616_v4  ;;  %v620_v10 = vmul.f32 %v1715_v61, %v1520_v20 }
  0x84   :  { %v2110_v21 = vpop.permute.xlu1 %235  ;;  %v747_v8 = vadd.f32 %v683_v2, %v615_v6  ;;  %v619_v2 = vmul.f32 %v1715_v61, %v1535_v23  ;;  %v942_v6 = vmax.f32 %v814_v37, 0.0  ;;  %v622_v23 = vmul.f32 %v1715_v61, %v1540_v24 }
  0x85   :  { %v686_v9 = vmul.f32 %v2003_v57, %v2110_v21  ;;  %v2115_v3 = vpop.permute.xlu0 %233  ;;  %v816_v11 = vadd.f32 %v2058_v17, %v748_v14 }
  0x86   :  { %v685_v0 = vmul.f32 %v2003_v57, %v2115_v3  ;;  %1071 = vrot.lane.b32.xlu1 %v940_v49, %s1404_s0  ;;  %v941_v49 = vmax.f32 %v813_v16, 0.0  ;;  %v815_v20 = vadd.f32 %v2058_v17, %v747_v8 }
  0x87   :  { %1069 = vrot.lane.b32.xlu0 %v939_v25, %s1404_s0  ;;  %v750_v19 = vadd.f32 %v686_v9, %v618_v15  ;;  %v621_v15 = vmul.f32 %v1715_v61, %v1553_v27  ;;  %v944_v37 = vmax.f32 %v816_v11, 0.0  ;;  %v624_v27 = vmul.f32 %v1715_v61, %v1558_v28 }
  0x88   :  { %v2126_v4 = vpop.permute.xlu1 %239  ;;  %v749_v29 = vadd.f32 %v685_v0, %v617_v22 }
  0x89   :  { %v688_v7 = vmul.f32 %v2003_v57, %v2126_v4  ;;  %v2131_v12 = vpop.permute.xlu0 %237  ;;  %v818_v9 = vadd.f32 %v2058_v17, %v750_v19 }
  0x8a   :  { %v687_v25 = vmul.f32 %v2003_v57, %v2131_v12  ;;  %1075 = vrot.lane.b32.xlu1 %v942_v6, %s1404_s0  ;;  %v943_v6 = vmax.f32 %v815_v20, 0.0  ;;  %v817_v24 = vadd.f32 %v2058_v17, %v749_v29 }
  0x8b   :  { %1073 = vrot.lane.b32.xlu0 %v941_v49, %s1404_s0  ;;  %v752_v22 = vadd.f32 %v688_v7, %v620_v10  ;;  %v623_v10 = vmul.f32 %v1715_v61, %v1571_v31  ;;  %v946_v11 = vmax.f32 %v818_v9, 0.0  ;;  %v626_v31 = vmul.f32 %v1715_v61, %v1576_v32 }
  0x8c   :  { %v2142_v14 = vpop.permute.xlu1 %243  ;;  %v751_v8 = vadd.f32 %v687_v25, %v619_v2 }
  0x8d   :  { %v690_v16 = vmul.f32 %v2003_v57, %v2142_v14  ;;  %v2147_v0 = vpop.permute.xlu0 %241  ;;  %v820_v7 = vadd.f32 %v2058_v17, %v752_v22 }
  0x8e   :  { %v689_v49 = vmul.f32 %v2003_v57, %v2147_v0  ;;  %1079 = vrot.lane.b32.xlu1 %v944_v37, %s1404_s0  ;;  %v945_v37 = vmax.f32 %v817_v24, 0.0  ;;  %v819_v28 = vadd.f32 %v2058_v17, %v751_v8 }
  0x8f   :  { %1077 = vrot.lane.b32.xlu0 %v943_v6, %s1404_s0  ;;  %v754_v2 = vadd.f32 %v690_v16, %v622_v23  ;;  %v625_v23 = vmul.f32 %v1715_v61, %v1591_v35  ;;  %v948_v9 = vmax.f32 %v820_v7, 0.0  ;;  %v628_v35 = vmul.f32 %v1715_v61, %v1596_v36 }
  0x90   :  { %v2158_v19 = vpop.permute.xlu1 %247  ;;  %v753_v29 = vadd.f32 %v689_v49, %v621_v15 }
  0x91   :  { %v692_v20 = vmul.f32 %v2003_v57, %v2158_v19  ;;  %v2163_v25 = vpop.permute.xlu0 %245  ;;  %v822_v16 = vadd.f32 %v2058_v17, %v754_v2 }
  0x92   :  { %v691_v6 = vmul.f32 %v2003_v57, %v2163_v25  ;;  %1083 = vrot.lane.b32.xlu1 %v946_v11, %s1404_s0  ;;  %v947_v11 = vmax.f32 %v819_v28, 0.0  ;;  %v821_v32 = vadd.f32 %v2058_v17, %v753_v29 }
  0x93   :  { %1081 = vrot.lane.b32.xlu0 %v945_v37, %s1404_s0  ;;  %v756_v15 = vadd.f32 %v692_v20, %v624_v27  ;;  %v627_v27 = vmul.f32 %v1715_v61, %v1611_v39  ;;  %v950_v7 = vmax.f32 %v822_v16, 0.0  ;;  %v630_v39 = vmul.f32 %v1715_v61, %v1616_v40 }
  0x94   :  { %v2174_v22 = vpop.permute.xlu1 %251  ;;  %v755_v8 = vadd.f32 %v691_v6, %v623_v10 }
  0x95   :  { %v694_v24 = vmul.f32 %v2003_v57, %v2174_v22  ;;  %v2179_v49 = vpop.permute.xlu0 %249  ;;  %v824_v20 = vadd.f32 %v2058_v17, %v756_v15 }
  0x96   :  { %v693_v37 = vmul.f32 %v2003_v57, %v2179_v49  ;;  %1087 = vrot.lane.b32.xlu1 %v948_v9, %s1404_s0  ;;  %v949_v9 = vmax.f32 %v821_v32, 0.0  ;;  %v823_v36 = vadd.f32 %v2058_v17, %v755_v8 }
  0x97   :  { %1085 = vrot.lane.b32.xlu0 %v947_v11, %s1404_s0  ;;  %v758_v10 = vadd.f32 %v694_v24, %v626_v31  ;;  %v629_v31 = vmul.f32 %v1715_v61, %v1629_v43  ;;  %v952_v16 = vmax.f32 %v824_v20, 0.0  ;;  %v632_v43 = vmul.f32 %v1715_v61, %v1634_v44 }
  0x98   :  { %v2190_v2 = vpop.permute.xlu1 %255  ;;  %v757_v29 = vadd.f32 %v693_v37, %v625_v23 }
  0x99   :  { %v696_v28 = vmul.f32 %v2003_v57, %v2190_v2  ;;  %v2195_v6 = vpop.permute.xlu0 %253  ;;  %v826_v24 = vadd.f32 %v2058_v17, %v758_v10 }
  0x9a   :  { %v695_v11 = vmul.f32 %v2003_v57, %v2195_v6  ;;  %1091 = vrot.lane.b32.xlu1 %v950_v7, %s1404_s0  ;;  %v951_v7 = vmax.f32 %v823_v36, 0.0  ;;  %v825_v40 = vadd.f32 %v2058_v17, %v757_v29 }
  0x9b   :  { %1089 = vrot.lane.b32.xlu0 %v949_v9, %s1404_s0  ;;  %v760_v23 = vadd.f32 %v696_v28, %v628_v35  ;;  %v631_v35 = vmul.f32 %v1715_v61, %v1647_v47  ;;  %v954_v20 = vmax.f32 %v826_v24, 0.0  ;;  %v634_v47 = vmul.f32 %v1715_v61, %v1652_v48 }
  0x9c   :  { %v2206_v15 = vpop.permute.xlu1 %259  ;;  %v759_v8 = vadd.f32 %v695_v11, %v627_v27 }
  0x9d   :  { %v698_v32 = vmul.f32 %v2003_v57, %v2206_v15  ;;  %v2211_v37 = vpop.permute.xlu0 %257  ;;  %v828_v28 = vadd.f32 %v2058_v17, %v760_v23 }
  0x9e   :  { %v697_v9 = vmul.f32 %v2003_v57, %v2211_v37  ;;  %1095 = vrot.lane.b32.xlu1 %v952_v16, %s1404_s0  ;;  %v953_v16 = vmax.f32 %v825_v40, 0.0  ;;  %v827_v44 = vadd.f32 %v2058_v17, %v759_v8 }
  0x9f   :  { %1093 = vrot.lane.b32.xlu0 %v951_v7, %s1404_s0  ;;  %v762_v27 = vadd.f32 %v698_v32, %v630_v39  ;;  %v633_v39 = vmul.f32 %v1715_v61, %v1667_v51  ;;  %v956_v24 = vmax.f32 %v828_v28, 0.0  ;;  %v636_v51 = vmul.f32 %v1715_v61, %v1672_v52 }
  0xa0   :  { %v2222_v10 = vpop.permute.xlu1 %263  ;;  %v761_v29 = vadd.f32 %v697_v9, %v629_v31 }
  0xa1   :  { %3367 = vst [vmem:[#allocation69_spill] sm:$0xff] %v2222_v10  ;;  %v700_v36 = vmul.f32 %v2003_v57, %v2222_v10  ;;  %v2227_v11 = vpop.permute.xlu0 %261  ;;  %v830_v32 = vadd.f32 %v2058_v17, %v762_v27 }
  0xa2   :  { %3368 = vst [vmem:[#allocation70_spill] sm:$0xff] %v2227_v11  ;;  %v699_v7 = vmul.f32 %v2003_v57, %v2227_v11  ;;  %1099 = vrot.lane.b32.xlu1 %v954_v20, %s1404_s0  ;;  %v955_v20 = vmax.f32 %v827_v44, 0.0  ;;  %v829_v48 = vadd.f32 %v2058_v17, %v761_v29 }
  0xa3   :  { %1097 = vrot.lane.b32.xlu0 %v953_v16, %s1404_s0  ;;  %v764_v31 = vadd.f32 %v700_v36, %v632_v43  ;;  %v635_v43 = vmul.f32 %v1715_v61, %v1687_v55  ;;  %v958_v28 = vmax.f32 %v830_v32, 0.0 }
  0xa4   :  { %v2238_v23 = vpop.permute.xlu1 %267  ;;  %v763_v8 = vadd.f32 %v699_v7, %v631_v35 }
  0xa5   :  { %3369 = vst [vmem:[#allocation71_spill] sm:$0xff] %v2238_v23  ;;  %v702_v40 = vmul.f32 %v2003_v57, %v2238_v23  ;;  %v2243_v9 = vpop.permute.xlu0 %265  ;;  %v832_v36 = vadd.f32 %v2058_v17, %v764_v31  ;;  %v3409_v23 = vld [vmem:[#allocation46_spill] sm:$0xff] }
  0xa6   :  { %3370 = vst [vmem:[#allocation72_spill] sm:$0xff] %v2243_v9  ;;  %v701_v16 = vmul.f32 %v2003_v57, %v2243_v9  ;;  %1103 = vrot.lane.b32.xlu1 %v956_v24, %s1404_s0  ;;  %v957_v24 = vmax.f32 %v829_v48, 0.0  ;;  %v831_v52 = vadd.f32 %v2058_v17, %v763_v8  ;;  %v637_v8 = vmul.f32 %v1715_v61, %v1705_v59 }
  0xa7   :  { %1101 = vrot.lane.b32.xlu0 %v955_v20, %s1404_s0  ;;  %v766_v35 = vadd.f32 %v702_v40, %v634_v47  ;;  %v638_v47 = vmul.f32 %v1715_v61, %v1692_v56  ;;  %v960_v32 = vmax.f32 %v832_v36, 0.0  ;;  %v2290_v36 = vld [vmem:[%s3252_s1 + $0x1] ss:$0 sm:$0xff] }
  0xa8   :  { %v2254_v27 = vpop.permute.xlu1 %271  ;;  %v765_v29 = vadd.f32 %v701_v16, %v633_v39 }
  0xa9   :  { %3371 = vst [vmem:[#allocation73_spill] sm:$0xff] %v2254_v27  ;;  %v704_v44 = vmul.f32 %v2003_v57, %v2254_v27  ;;  %v2259_v7 = vpop.permute.xlu0 %269  ;;  %v834_v40 = vadd.f32 %v2058_v17, %v766_v35  ;;  %v639_v35 = vmul.f32 %v1715_v61, %v1728_v58 }
  0xaa   :  { %3372 = vst [vmem:[#allocation74_spill] sm:$0xff] %v2259_v7  ;;  %v703_v20 = vmul.f32 %v2003_v57, %v2259_v7  ;;  %1107 = vrot.lane.b32.xlu1 %v958_v28, %s1404_s0  ;;  %v833_v28 = vadd.f32 %v2058_v17, %v765_v29 }
  0xab   :  { %v768_v55 = vadd.f32 %v704_v44, %v636_v51  ;;  %1105 = vrot.lane.b32.xlu0 %v957_v24, %s1404_s0  ;;  %v959_v51 = vmax.f32 %v831_v52, 0.0  ;;  %v962_v24 = vmax.f32 %v834_v40, 0.0 }
  0xac   :  { %v767_v39 = vadd.f32 %v703_v20, %v635_v43  ;;  %v2268_v31 = vpop.permute.xlu1 %275  ;;  %v640_v43 = vmul.f32 %v1715_v61, %v1710_v60 }
  0xad   :  { %3373 = vst [vmem:[#allocation75_spill] sm:$0xff] %v2268_v31  ;;  %v706_v48 = vmul.f32 %v2003_v57, %v2268_v31  ;;  %v2275_v16 = vpop.permute.xlu0 %273  ;;  %v836_v59 = vadd.f32 %v2058_v17, %v768_v55  ;;  %v961_v55 = vmax.f32 %v833_v28, 0.0 }
  0xae   :  { %3374 = vst [vmem:[#allocation76_spill] sm:$0xff] %v2275_v16  ;;  %v705_v56 = vmul.f32 %v2003_v57, %v2275_v16  ;;  %1111 = vrot.lane.b32.xlu1 %v960_v32, %s1404_s0  ;;  %v835_v52 = vadd.f32 %v2058_v17, %v767_v39 }
  0xaf   :  { %1109 = vrot.lane.b32.xlu0 %v959_v51, %s1404_s0  ;;  %v770_v29 = vadd.f32 %v706_v48, %v638_v47  ;;  %v964_v47 = vmax.f32 %v836_v59, 0.0 }
  0xb0   :  { %v280_v44 = vpop.permute.xlu1 %279  ;;  %v769_v20 = vadd.f32 %v705_v56, %v637_v8  ;;  %v963_v48 = vmax.f32 %v835_v52, 0.0 }
  0xb1   :  { %v440_v60 = vmul.f32 %v2290_v36, %v280_v44  ;;  %v708_v32 = vmul.f32 %v2003_v57, %v280_v44  ;;  %v278_v51 = vpop.permute.xlu0 %277  ;;  %v838_v28 = vadd.f32 %v2058_v17, %v770_v29 }
  0xb2   :  { %v439_v16 = vmul.f32 %v2290_v36, %v278_v51  ;;  %v707_v58 = vmul.f32 %v2003_v57, %v278_v51  ;;  %1115 = vrot.lane.b32.xlu1 %v962_v24, %s1404_s0 }
  0xb3   :  { %v2299_v31 = vadd.f32 %v440_v60, %v1723_v63  ;;  %1113 = vrot.lane.b32.xlu0 %v961_v55, %s1404_s0  ;;  %v772_v39 = vadd.f32 %v708_v32, %v640_v43  ;;  %v837_v63 = vadd.f32 %v2058_v17, %v769_v20  ;;  %v966_v52 = vmax.f32 %v838_v28, 0.0 }
  0xb4   :  { %v2303_v40 = vadd.f32 %v439_v16, %v1737_v54  ;;  %v284_v8 = vpop.permute.xlu1 %283  ;;  %v771_v56 = vadd.f32 %v707_v58, %v639_v35 }
  0xb5   :  { %3375 = vst [vmem:[#allocation77_spill] sm:$0xff] %v2299_v31  ;;  %v442_v44 = vmul.f32 %v2290_v36, %v284_v8  ;;  %v710_v51 = vmul.f32 %v2003_v57, %v284_v8  ;;  %v282_v24 = vpop.permute.xlu0 %281  ;;  %v840_v20 = vadd.f32 %v2058_v17, %v772_v39  ;;  %v2334_v39 = vmul.f32 %v1715_v61, %v1905_v38  ;;  %v3401_v31 = vld [vmem:[#allocation42_spill] sm:$0xff] }
  0xb6   :  { %3376 = vst [vmem:[#allocation78_spill] sm:$0xff] %v2303_v40  ;;  %v441_v60 = vmul.f32 %v2290_v36, %v282_v24  ;;  %v709_v59 = vmul.f32 %v2003_v57, %v282_v24  ;;  %1119 = vrot.lane.b32.xlu1 %v964_v47, %s1404_s0  ;;  %v839_v47 = vadd.f32 %v2058_v17, %v771_v56 }
  0xb7   :  { %v2313_v54 = vadd.f32 %v442_v44, %v1740_v62  ;;  %v774_v16 = vadd.f32 %v710_v51, %v1743_v53  ;;  %1117 = vrot.lane.b32.xlu0 %v963_v48, %s1404_s0  ;;  %v965_v62 = vmax.f32 %v837_v63, 0.0  ;;  %v2327_v53 = vmul.f32 %v1428_v1, %v1905_v38 }
  0xb8   :  { %v2318_v43 = vadd.f32 %v441_v60, %v1754_v46  ;;  %v773_v35 = vadd.f32 %v709_v59, %v1757_v45  ;;  %v288_v29 = vpop.permute.xlu1 %287  ;;  %v2338_v8 = vmul.f32 %v1428_v1, %v1910_v26  ;;  %v968_v24 = vmax.f32 %v840_v20, 0.0 }
  0xb9   :  { %3377 = vst [vmem:[#allocation79_spill] sm:$0xff] %v2313_v54  ;;  %v444_v32 = vmul.f32 %v2290_v36, %v288_v29  ;;  %v712_v55 = vmul.f32 %v2003_v57, %v288_v29  ;;  %v286_v58 = vpop.permute.xlu0 %285  ;;  %v842_v28 = vadd.f32 %v2058_v17, %v774_v16  ;;  %v967_v29 = vmax.f32 %v839_v47, 0.0 }
  0xba   :  { %3378 = vst [vmem:[#allocation80_spill] sm:$0xff] %v2318_v43  ;;  %v443_v46 = vmul.f32 %v2290_v36, %v286_v58  ;;  %v711_v45 = vmul.f32 %v2003_v57, %v286_v58  ;;  %1123 = vrot.lane.b32.xlu1 %v966_v52, %s1404_s0  ;;  %v841_v38 = vadd.f32 %v2058_v17, %v773_v35 }
  0xbb   :  { %v2341_v48 = vadd.f32 %v444_v32, %v1760_v42  ;;  %1121 = vrot.lane.b32.xlu0 %v965_v62, %s1404_s0  ;;  %v776_v56 = vadd.f32 %v712_v55, %v1763_v41  ;;  %v2355_v16 = vmul.f32 %v1715_v61, %v1910_v26  ;;  %v2370_v52 = vmul.f32 %v1428_v1, %v1924_v13  ;;  %v3382_v55 = vld [vmem:[#allocation32_spill] sm:$0xff]  ;;  %v3383_v62 = vld [vmem:[#allocation33_spill] sm:$0xff] }
  0xbc   :  { %v2347_v44 = vadd.f32 %v443_v46, %v1772_v34  ;;  %v292_v51 = vpop.permute.xlu1 %291  ;;  %v775_v63 = vadd.f32 %v711_v45, %v1775_v33  ;;  %v2359_v34 = vmul.f32 %v1428_v1, %v1919_v5  ;;  %v2366_v33 = vmul.f32 %v1715_v61, %v1919_v5 }
  0xbd   :  { %3379 = vst [vmem:[#allocation81_spill] sm:$0xff] %v2341_v48  ;;  %v446_v60 = vmul.f32 %v2290_v36, %v292_v51  ;;  %v714_v42 = vmul.f32 %v2003_v57, %v292_v51  ;;  %v290_v59 = vpop.permute.xlu0 %289  ;;  %v970_v20 = vmax.f32 %v842_v28, 0.0  ;;  %v844_v32 = vadd.f32 %v2058_v17, %v776_v56  ;;  %v3385_v51 = vld [vmem:[#allocation34_spill] sm:$0xff]  ;;  %v3386_v56 = vld [vmem:[#allocation47_spill] sm:$0xff] }
  0xbe   :  { %3380 = vst [vmem:[#allocation82_spill] sm:$0xff] %v2347_v44  ;;  %v445_v41 = vmul.f32 %v2290_v36, %v290_v59  ;;  %v713_v35 = vmul.f32 %v2003_v57, %v290_v59  ;;  %1127 = vrot.lane.b32.xlu1 %v968_v24, %s1404_s0  ;;  %v969_v5 = vmax.f32 %v841_v38, 0.0  ;;  %v843_v45 = vadd.f32 %v2058_v17, %v775_v63 }
  0xbf   :  { %v2373_v26 = vadd.f32 %v446_v60, %v1778_v30  ;;  %1125 = vrot.lane.b32.xlu0 %v967_v29, %s1404_s0  ;;  %v778_v58 = vadd.f32 %v714_v42, %v3382_v55  ;;  %v2387_v28 = vmul.f32 %v1715_v61, %v1924_v13  ;;  %v2391_v42 = vmul.f32 %v1428_v1, %v3386_v56  ;;  %v3388_v13 = vld [vmem:[#allocation35_spill] sm:$0xff] }
  0xc0   :  { %v2379_v47 = vadd.f32 %v445_v41, %v3383_v62  ;;  %v296_v46 = vpop.permute.xlu1 %295  ;;  %v777_v24 = vadd.f32 %v713_v35, %v3385_v51  ;;  %v2398_v63 = vmul.f32 %v1715_v61, %v3386_v56  ;;  %v3387_v41 = vld [vmem:[#allocation48_spill] sm:$0xff]  ;;  %v972_v51 = vmax.f32 %v844_v32, 0.0  ;;  %v3394_v32 = vld [vmem:[#allocation49_spill] sm:$0xff] }
  0xc1   :  { %3381 = vst [vmem:[#allocation83_spill] sm:$0xff] %v2373_v26  ;;  %v448_v59 = vmul.f32 %v2290_v36, %v296_v46  ;;  %v716_v30 = vmul.f32 %v2003_v57, %v296_v46  ;;  %v294_v60 = vpop.permute.xlu0 %293  ;;  %v2402_v35 = vmul.f32 %v1428_v1, %v3387_v41  ;;  %v3390_v62 = vld [vmem:[#allocation36_spill] sm:$0xff]  ;;  %v3393_v26 = vld [vmem:[#allocation38_spill] sm:$0xff]  ;;  %v971_v48 = vmax.f32 %v843_v45, 0.0 }
  0xc2   :  { %3384 = vst [vmem:[#allocation32_spill] sm:$0xff] %v2379_v47  ;;  %v447_v29 = vmul.f32 %v2290_v36, %v294_v60  ;;  %v715_v38 = vmul.f32 %v2003_v57, %v294_v60  ;;  %1131 = vrot.lane.b32.xlu1 %v970_v20, %s1404_s0  ;;  %v846_v60 = vadd.f32 %v2058_v17, %v778_v58  ;;  %v3391_v47 = vld [vmem:[#allocation37_spill] sm:$0xff] }
  0xc3   :  { %v2405_v55 = vadd.f32 %v448_v59, %v3388_v13  ;;  %v780_v46 = vadd.f32 %v716_v30, %v3390_v62  ;;  %1129 = vrot.lane.b32.xlu0 %v969_v5, %s1404_s0  ;;  %v845_v43 = vadd.f32 %v2058_v17, %v777_v24  ;;  %v2419_v5 = vmul.f32 %v1715_v61, %v3387_v41 }
  0xc4   :  { %v2411_v20 = vadd.f32 %v447_v29, %v3391_v47  ;;  %v779_v56 = vadd.f32 %v715_v38, %v3393_v26  ;;  %v300_v44 = vpop.permute.xlu1 %299  ;;  %v2423_v58 = vmul.f32 %v1428_v1, %v3394_v32  ;;  %v2430_v45 = vmul.f32 %v1715_v61, %v3394_v32  ;;  %v3396_v29 = vld [vmem:[#allocation39_spill] sm:$0xff] }
  0xc5   :  { %3389 = vst [vmem:[#allocation33_spill] sm:$0xff] %v2405_v55  ;;  %v450_v54 = vmul.f32 %v2290_v36, %v300_v44  ;;  %v718_v59 = vmul.f32 %v2003_v57, %v300_v44  ;;  %v298_v13 = vpop.permute.xlu0 %297  ;;  %v3395_v44 = vld [vmem:[#allocation50_spill] sm:$0xff]  ;;  %v848_v30 = vadd.f32 %v2058_v17, %v780_v46  ;;  %v974_v41 = vmax.f32 %v846_v60, 0.0  ;;  %v3402_v60 = vld [vmem:[#allocation51_spill] sm:$0xff] }
  0xc6   :  { %3392 = vst [vmem:[#allocation34_spill] sm:$0xff] %v2411_v20  ;;  %v449_v47 = vmul.f32 %v2290_v36, %v298_v13  ;;  %v717_v26 = vmul.f32 %v2003_v57, %v298_v13  ;;  %1135 = vrot.lane.b32.xlu1 %v972_v51, %s1404_s0  ;;  %v2434_v24 = vmul.f32 %v1428_v1, %v3395_v44  ;;  %v3398_v13 = vld [vmem:[#allocation40_spill] sm:$0xff]  ;;  %v3399_v20 = vld [vmem:[#allocation41_spill] sm:$0xff]  ;;  %v973_v40 = vmax.f32 %v845_v43, 0.0 }
  0xc7   :  { %v2438_v38 = vadd.f32 %v450_v54, %v3396_v29  ;;  %1133 = vrot.lane.b32.xlu0 %v971_v48, %s1404_s0  ;;  %v847_v62 = vadd.f32 %v2058_v17, %v779_v56  ;;  %v782_v51 = vadd.f32 %v718_v59, %v3398_v13  ;;  %v2451_v48 = vmul.f32 %v1715_v61, %v3395_v44  ;;  %v3403_v43 = vld [vmem:[#allocation52_spill] sm:$0xff]  ;;  %v3404_v44 = vld [vmem:[#allocation43_spill] sm:$0xff] }
  0xc8   :  { %v2444_v55 = vadd.f32 %v449_v47, %v3399_v20  ;;  %v304_v32 = vpop.permute.xlu1 %303  ;;  %v781_v7 = vadd.f32 %v717_v26, %v3401_v31  ;;  %v2455_v56 = vmul.f32 %v1428_v1, %v3402_v60  ;;  %v2462_v31 = vmul.f32 %v1715_v61, %v3402_v60 }
  0xc9   :  { %3397 = vst [vmem:[#allocation47_spill] sm:$0xff] %v2438_v38  ;;  %v452_v27 = vmul.f32 %v2290_v36, %v304_v32  ;;  %v720_v46 = vmul.f32 %v2003_v57, %v304_v32  ;;  %v302_v54 = vpop.permute.xlu0 %301  ;;  %v2466_v47 = vmul.f32 %v1428_v1, %v3403_v43  ;;  %v976_v26 = vmax.f32 %v848_v30, 0.0 }
  0xca   :  { %3400 = vst [vmem:[#allocation48_spill] sm:$0xff] %v2444_v55  ;;  %v451_v20 = vmul.f32 %v2290_v36, %v302_v54  ;;  %v719_v59 = vmul.f32 %v2003_v57, %v302_v54  ;;  %1139 = vrot.lane.b32.xlu1 %v974_v41, %s1404_s0  ;;  %v975_v13 = vmax.f32 %v847_v62, 0.0  ;;  %v850_v32 = vadd.f32 %v2058_v17, %v782_v51  ;;  %v3406_v54 = vld [vmem:[#allocation44_spill] sm:$0xff]  ;;  %v3407_v41 = vld [vmem:[#allocation45_spill] sm:$0xff]  ;;  %v2488_v62 = vld [vmem:[%s3252_s1] ss:$0 sm:$0xff] }
  0xcb   :  { %v2469_v29 = vadd.f32 %v452_v27, %v3404_v44  ;;  %1137 = vrot.lane.b32.xlu0 %v973_v40, %s1404_s0  ;;  %v784_v55 = vadd.f32 %v720_v46, %v3406_v54  ;;  %v849_v9 = vadd.f32 %v2058_v17, %v781_v7  ;;  %v2483_v40 = vmul.f32 %v1715_v61, %v3403_v43  ;;  %v3410_v51 = vld [vmem:[#allocation53_spill] sm:$0xff] }
  0xcc   :  { %v2475_v38 = vadd.f32 %v451_v20, %v3407_v41  ;;  %v308_v60 = vpop.permute.xlu1 %307  ;;  %v783_v1 = vadd.f32 %v719_v59, %v3409_v23  ;;  %v2492_v46 = vmul.f32 %v2488_v62, %v3410_v51  ;;  %v2499_v20 = vmul.f32 %v1715_v61, %v3410_v51  ;;  %v3411_v59 = vld [vmem:[#allocation54_spill] sm:$0xff] }
  0xcd   :  { %3405 = vst [vmem:[#allocation35_spill] sm:$0xff] %v2469_v29  ;;  %v454_v30 = vmul.f32 %v2290_v36, %v308_v60  ;;  %v722_v27 = vmul.f32 %v2003_v57, %v308_v60  ;;  %v306_v44 = vpop.permute.xlu0 %305  ;;  %v2503_v43 = vmul.f32 %v2488_v62, %v3411_v59  ;;  %v978_v60 = vmax.f32 %v850_v32, 0.0 }
  0xce   :  { %3408 = vst [vmem:[#allocation36_spill] sm:$0xff] %v2475_v38  ;;  %v453_v23 = vmul.f32 %v2290_v36, %v306_v44  ;;  %v721_v7 = vmul.f32 %v2003_v57, %v306_v44  ;;  %1143 = vrot.lane.b32.xlu1 %v976_v26, %s1404_s0  ;;  %v852_v44 = vadd.f32 %v2058_v17, %v784_v55  ;;  %v977_v29 = vmax.f32 %v849_v9, 0.0 }
  0xcf   :  { %v2506_v54 = vadd.f32 %v454_v30, %v2327_v53  ;;  %v786_v41 = vadd.f32 %v722_v27, %v2334_v39  ;;  %1141 = vrot.lane.b32.xlu0 %v975_v13, %s1404_s0  ;;  %v851_v11 = vadd.f32 %v2058_v17, %v783_v1  ;;  %v2520_v39 = vmul.f32 %v1715_v61, %v3411_v59  ;;  %v3414_v13 = vld [vmem:[#allocation55_spill] sm:$0xff] }
  0xd0   :  { %v2512_v26 = vadd.f32 %v453_v23, %v2338_v8  ;;  %v785_v51 = vadd.f32 %v721_v7, %v2355_v16  ;;  %v312_v38 = vpop.permute.xlu1 %311  ;;  %v2524_v55 = vmul.f32 %v2488_v62, %v3414_v13  ;;  %v2531_v9 = vmul.f32 %v1715_v61, %v3414_v13 }
  0xd1   :  { %3412 = vst [vmem:[#allocation37_spill] sm:$0xff] %v2506_v54  ;;  %v456_v10 = vmul.f32 %v2290_v36, %v312_v38  ;;  %v724_v53 = vmul.f32 %v2003_v57, %v312_v38  ;;  %v310_v30 = vpop.permute.xlu0 %309  ;;  %v3415_v38 = vld [vmem:[#allocation56_spill] sm:$0xff]  ;;  %v854_v1 = vadd.f32 %v2058_v17, %v786_v41  ;;  %v980_v23 = vmax.f32 %v852_v44, 0.0 }
  0xd2   :  { %3413 = vst [vmem:[#allocation38_spill] sm:$0xff] %v2512_v26  ;;  %v455_v8 = vmul.f32 %v2290_v36, %v310_v30  ;;  %v723_v16 = vmul.f32 %v2003_v57, %v310_v30  ;;  %1147 = vrot.lane.b32.xlu1 %v978_v60, %s1404_s0  ;;  %v2535_v32 = vmul.f32 %v2488_v62, %v3415_v38  ;;  %v979_v13 = vmax.f32 %v851_v11, 0.0 }
  0xd3   :  { %v2539_v27 = vadd.f32 %v456_v10, %v2359_v34  ;;  %1145 = vrot.lane.b32.xlu0 %v977_v29, %s1404_s0  ;;  %v853_v7 = vadd.f32 %v2058_v17, %v785_v51  ;;  %v788_v59 = vadd.f32 %v724_v53, %v2366_v33  ;;  %v2552_v34 = vmul.f32 %v1715_v61, %v3415_v38  ;;  %v3418_v29 = vld [vmem:[#allocation57_spill] sm:$0xff] }
  0xd4   :  { %v2545_v60 = vadd.f32 %v455_v8, %v2370_v52  ;;  %v316_v30 = vpop.permute.xlu1 %315  ;;  %v787_v26 = vadd.f32 %v723_v16, %v2387_v28  ;;  %v2556_v44 = vmul.f32 %v2488_v62, %v3418_v29  ;;  %v2563_v11 = vmul.f32 %v1715_v61, %v3418_v29  ;;  %v3419_v28 = vld [vmem:[#allocation59_spill] sm:$0xff] }
  0xd5   :  { %3416 = vst [vmem:[#allocation49_spill] sm:$0xff] %v2539_v27  ;;  %v458_v54 = vmul.f32 %v2290_v36, %v316_v30  ;;  %v726_v41 = vmul.f32 %v2003_v57, %v316_v30  ;;  %v314_v10 = vpop.permute.xlu0 %313  ;;  %v2567_v51 = vmul.f32 %v2488_v62, %v3419_v28  ;;  %v982_v53 = vmax.f32 %v854_v1, 0.0 }
  0xd6   :  { %3417 = vst [vmem:[#allocation50_spill] sm:$0xff] %v2545_v60  ;;  %v457_v33 = vmul.f32 %v2290_v36, %v314_v10  ;;  %v725_v52 = vmul.f32 %v2003_v57, %v314_v10  ;;  %1151 = vrot.lane.b32.xlu1 %v980_v23, %s1404_s0  ;;  %v981_v16 = vmax.f32 %v853_v7, 0.0  ;;  %v856_v38 = vadd.f32 %v2058_v17, %v788_v59  ;;  %v1400_v7 = vld [vmem:[%s3252_s1 + $0x2] ss:$0 sm:$0xff] }
  0xd7   :  { %v2570_v8 = vadd.f32 %v458_v54, %v2391_v42  ;;  %1149 = vrot.lane.b32.xlu0 %v979_v13, %s1404_s0  ;;  %v790_v30 = vadd.f32 %v726_v41, %v2398_v63  ;;  %v855_v10 = vadd.f32 %v2058_v17, %v787_v26  ;;  %v2586_v59 = vmul.f32 %v1400_v7, %v3419_v28  ;;  %v3422_v63 = vld [vmem:[#allocation61_spill] sm:$0xff]  ;;  %v3423_v41 = vld [vmem:[#allocation63_spill] sm:$0xff] }
  0xd8   :  { %v2576_v23 = vadd.f32 %v457_v33, %v2402_v35  ;;  %v320_v61 = vpop.permute.xlu1 %319  ;;  %v789_v29 = vadd.f32 %v725_v52, %v2419_v5  ;;  %v2590_v35 = vmul.f32 %v2488_v62, %v3422_v63  ;;  %v2596_v13 = vmul.f32 %v1400_v7, %v3422_v63 }
  0xd9   :  { %3420 = vst [vmem:[#allocation39_spill] sm:$0xff] %v2570_v8  ;;  %v460_v1 = vmul.f32 %v2290_v36, %v320_v61  ;;  %v728_v42 = vmul.f32 %v2003_v57, %v320_v61  ;;  %v318_v54 = vpop.permute.xlu0 %317  ;;  %v2600_v33 = vmul.f32 %v2488_v62, %v3423_v41  ;;  %v984_v61 = vmax.f32 %v856_v38, 0.0 }
  0xda   :  { %3421 = vst [vmem:[#allocation40_spill] sm:$0xff] %v2576_v23  ;;  %v459_v26 = vmul.f32 %v2290_v36, %v318_v54  ;;  %v727_v5 = vmul.f32 %v2003_v57, %v318_v54  ;;  %1155 = vrot.lane.b32.xlu1 %v982_v53, %s1404_s0  ;;  %v858_v23 = vadd.f32 %v2058_v17, %v790_v30  ;;  %v983_v8 = vmax.f32 %v855_v10, 0.0  ;;  %v3426_v30 = vld [vmem:[#allocation60_spill] sm:$0xff] }
  0xdb   :  { %v2603_v52 = vadd.f32 %v460_v1, %v2423_v58  ;;  %v792_v28 = vadd.f32 %v728_v42, %v2430_v45  ;;  %1153 = vrot.lane.b32.xlu0 %v981_v16, %s1404_s0  ;;  %v857_v60 = vadd.f32 %v2058_v17, %v789_v29  ;;  %v2616_v45 = vmul.f32 %v1400_v7, %v3423_v41  ;;  %v3425_v16 = vld [vmem:[#allocation65_spill] sm:$0xff] }
  0xdc   :  { %v2609_v54 = vadd.f32 %v459_v26, %v2434_v24  ;;  %v791_v53 = vadd.f32 %v727_v5, %v2451_v48  ;;  %v324_v63 = vpop.permute.xlu1 %323  ;;  %v2620_v38 = vmul.f32 %v2488_v62, %v3425_v16  ;;  %v409_v10 = vmul.f32 %v2290_v36, %v3426_v30 }
  0xdd   :  { %v462_v27 = vmul.f32 %v2290_v36, %v324_v63  ;;  %v730_v58 = vmul.f32 %v2003_v57, %v324_v63  ;;  %v322_v1 = vpop.permute.xlu0 %321  ;;  %v2628_v29 = vmul.f32 %v1400_v7, %v3425_v16  ;;  %v860_v42 = vadd.f32 %v2058_v17, %v792_v28 }
  0xde   :  { %3424 = vst [vmem:[#allocation41_spill] sm:$0xff] %v2609_v54  ;;  %v461_v24 = vmul.f32 %v2290_v36, %v322_v1  ;;  %v729_v48 = vmul.f32 %v2003_v57, %v322_v1  ;;  %1159 = vrot.lane.b32.xlu1 %v984_v61, %s1404_s0  ;;  %v986_v5 = vmax.f32 %v858_v23, 0.0  ;;  %v859_v41 = vadd.f32 %v2058_v17, %v791_v53  ;;  %v3428_v23 = vld [vmem:[#allocation67_spill] sm:$0xff] }
  0xdf   :  { %v2632_v26 = vadd.f32 %v462_v27, %v2455_v56  ;;  %1157 = vrot.lane.b32.xlu0 %v983_v8, %s1404_s0  ;;  %v794_v63 = vadd.f32 %v730_v58, %v2462_v31  ;;  %v985_v30 = vmax.f32 %v857_v60, 0.0  ;;  %v3427_v27 = vld [vmem:[#allocation58_spill] sm:$0xff]  ;;  %v2647_v53 = vmul.f32 %v2488_v62, %v3428_v23  ;;  %v3429_v60 = vld [vmem:[#allocation3_spill] sm:$0xff] }
  0xe0   :  { %v2638_v61 = vadd.f32 %v461_v24, %v2466_v47  ;;  %v328_v1 = vpop.permute.xlu1 %327  ;;  %v793_v16 = vadd.f32 %v729_v48, %v2483_v40  ;;  %v411_v8 = vmul.f32 %v2290_v36, %v3427_v27  ;;  %v473_v40 = vadd.f32 %v409_v10, %v3429_v60  ;;  %v2663_v62 = vld [vmem:[%s3252_s1 + $0x4] ss:$0 sm:$0xff] }
  0xe1   :  { %v464_v54 = vmul.f32 %v2290_v36, %v328_v1  ;;  %v732_v28 = vmul.f32 %v2003_v57, %v328_v1  ;;  %v326_v56 = vpop.permute.xlu0 %325  ;;  %v2654_v58 = vmul.f32 %v1400_v7, %v3428_v23  ;;  %v988_v24 = vmax.f32 %v860_v42, 0.0  ;;  %v3430_v23 = vld [vmem:[#allocation2_spill] sm:$0xff] }
  0xe2   :  { %v463_v31 = vmul.f32 %v2290_v36, %v326_v56  ;;  %v731_v47 = vmul.f32 %v2003_v57, %v326_v56  ;;  %1163 = vrot.lane.b32.xlu1 %v986_v5, %s1404_s0  ;;  %v987_v1 = vmax.f32 %v859_v41, 0.0  ;;  %v862_v56 = vadd.f32 %v2058_v17, %v794_v63  ;;  %v3431_v41 = vld [vmem:[#allocation62_spill] sm:$0xff] }
  0xe3   :  { %v2657_v48 = vadd.f32 %v464_v54, %v2492_v46  ;;  %1161 = vrot.lane.b32.xlu0 %v985_v30, %s1404_s0  ;;  %v796_v5 = vadd.f32 %v732_v28, %v2499_v20  ;;  %v861_v42 = vadd.f32 %v2058_v17, %v793_v16  ;;  %v475_v60 = vadd.f32 %v411_v8, %v3430_v23  ;;  %v3432_v28 = vld [vmem:[#allocation64_spill] sm:$0xff] }
  0xe4   :  { %v2668_v10 = vadd.f32 %v463_v31, %v2503_v43  ;;  %v332_v7 = vpop.permute.xlu1 %331  ;;  %v795_v46 = vadd.f32 %v731_v47, %v2520_v39  ;;  %v412_v63 = vmul.f32 %v2290_v36, %v3431_v41  ;;  %v410_v16 = vmul.f32 %v2290_v36, %v3432_v28 }
  0xe5   :  { %v466_v54 = vmul.f32 %v2290_v36, %v332_v7  ;;  %v734_v30 = vmul.f32 %v2003_v57, %v332_v7  ;;  %v330_v27 = vpop.permute.xlu0 %329  ;;  %v2688_v8 = vadd.f32 %v2663_v62, %v473_v40  ;;  %v990_v47 = vmax.f32 %v862_v56, 0.0 }
  0xe6   :  { %v465_v20 = vmul.f32 %v2290_v36, %v330_v27  ;;  %v733_v43 = vmul.f32 %v2003_v57, %v330_v27  ;;  %1167 = vrot.lane.b32.xlu1 %v988_v24, %s1404_s0  ;;  %v864_v7 = vadd.f32 %v2058_v17, %v796_v5  ;;  %v989_v41 = vmax.f32 %v861_v42, 0.0 }
  0xe7   :  { %v2683_v39 = vadd.f32 %v466_v54, %v2524_v55  ;;  %v798_v31 = vadd.f32 %v734_v30, %v2531_v9  ;;  %1165 = vrot.lane.b32.xlu0 %v987_v1, %s1404_s0  ;;  %v863_v55 = vadd.f32 %v2058_v17, %v795_v46  ;;  %v3433_v30 = vld [vmem:[#allocation4_spill] sm:$0xff] }
  0xe8   :  { %v2692_v27 = vadd.f32 %v465_v20, %v2535_v32  ;;  %v797_v24 = vadd.f32 %v733_v43, %v2552_v34  ;;  %v336_v23 = vpop.permute.xlu1 %335  ;;  %v476_v40 = vadd.f32 %v412_v63, %v3433_v30  ;;  %v2703_v32 = vadd.f32 %v2663_v62, %v475_v60  ;;  %v3434_v34 = vld [vmem:[#allocation5_spill] sm:$0xff] }
  0xe9   :  { %v468_v54 = vmul.f32 %v2290_v36, %v336_v23  ;;  %v736_v9 = vmul.f32 %v2003_v57, %v336_v23  ;;  %v334_v1 = vpop.permute.xlu0 %333  ;;  %v474_v42 = vadd.f32 %v410_v16, %v3434_v34  ;;  %v866_v46 = vadd.f32 %v2058_v17, %v798_v31  ;;  %v1401_v23 = vld [vmem:[%s3252_s1 + $0x3] ss:$0 sm:$0xff] }
  0xea   :  { %v467_v56 = vmul.f32 %v2290_v36, %v334_v1  ;;  %v735_v5 = vmul.f32 %v2003_v57, %v334_v1  ;;  %1171 = vrot.lane.b32.xlu1 %v990_v47, %s1404_s0  ;;  %v873_v63 = vmax.f32 %v2688_v8, 0.0  ;;  %v992_v43 = vmax.f32 %v864_v7, 0.0  ;;  %v3435_v7 = vld [vmem:[#allocation66_spill] sm:$0xff] }
  0xeb   :  { %v2708_v20 = vadd.f32 %v468_v54, %v2556_v44  ;;  %1169 = vrot.lane.b32.xlu0 %v989_v41, %s1404_s0  ;;  %v865_v57 = vadd.f32 %v2058_v17, %v797_v24  ;;  %v800_v28 = vadd.f32 %v736_v9, %v2563_v11  ;;  %v991_v16 = vmax.f32 %v863_v55, 0.0  ;;  %v3436_v54 = vld [vmem:[#allocation68_spill] sm:$0xff] }
  0xec   :  { %v2715_v60 = vadd.f32 %v467_v56, %v2567_v51  ;;  %v340_v47 = vpop.permute.xlu1 %339  ;;  %v799_v31 = vadd.f32 %v735_v5, %v2586_v59  ;;  %v414_v24 = vmul.f32 %v2290_v36, %v3435_v7  ;;  %v413_v11 = vmul.f32 %v2290_v36, %v3436_v54 }
  0xed   :  { %v470_v44 = vmul.f32 %v2290_v36, %v340_v47  ;;  %v738_v41 = vmul.f32 %v1401_v23, %v340_v47  ;;  %v338_v8 = vpop.permute.xlu0 %337  ;;  %v994_v59 = vmax.f32 %v866_v46, 0.0  ;;  %v542_v1 = vadd.f32 %v2663_v62, %v474_v42  ;;  %v3437_v42 = vld [vmem:[#allocation6_spill] sm:$0xff] }
  0xee   :  { %v469_v51 = vmul.f32 %v2290_v36, %v338_v8  ;;  %v737_v9 = vmul.f32 %v1401_v23, %v338_v8  ;;  %1175 = vrot.lane.b32.xlu1 %v992_v43, %s1404_s0  ;;  %v544_v30 = vadd.f32 %v2663_v62, %v476_v40  ;;  %v993_v56 = vmax.f32 %v865_v57, 0.0  ;;  %v3438_v40 = vld [vmem:[#allocation7_spill] sm:$0xff] }
  0xef   :  { %v2729_v55 = vadd.f32 %v470_v44, %v2590_v35  ;;  %1173 = vrot.lane.b32.xlu0 %v991_v16, %s1404_s0  ;;  %v868_v5 = vadd.f32 %v2058_v17, %v800_v28  ;;  %v802_v34 = vadd.f32 %v738_v41, %v2596_v13  ;;  %v867_v46 = vadd.f32 %v2058_v17, %v799_v31  ;;  %v1402_v41 = vld [vmem:[%s3252_s1 + $0x5] ss:$0 sm:$0xff] }
  0xf0   :  { %v2737_v47 = vadd.f32 %v469_v51, %v2600_v33  ;;  %v344_v8 = vpop.permute.xlu1 %343  ;;  %v801_v35 = vadd.f32 %v737_v9, %v2616_v45  ;;  %v478_v7 = vadd.f32 %v414_v24, %v3437_v42  ;;  %v477_v57 = vadd.f32 %v413_v11, %v3438_v40 }
  0xf1   :  { %v472_v43 = vmul.f32 %v2290_v36, %v344_v8  ;;  %v740_v16 = vmul.f32 %v1401_v23, %v344_v8  ;;  %v342_v44 = vpop.permute.xlu0 %341  ;;  %v416_v13 = vmul.f32 %v2290_v36, %v2094_v50  ;;  %v415_v17 = vmul.f32 %v2290_v36, %v2099_v18  ;;  %v3440_v8 = vld [vmem:[#allocation9_spill] sm:$0xff] }
  0xf2   :  { %v471_v28 = vmul.f32 %v2290_v36, %v342_v44  ;;  %v739_v54 = vmul.f32 %v1401_v23, %v342_v44  ;;  %1179 = vrot.lane.b32.xlu1 %v994_v59, %s1404_s0  ;;  %v874_v45 = vmax.f32 %v542_v1, 0.0  ;;  %v996_v31 = vmax.f32 %v868_v5, 0.0 }
  0xf3   :  { %v2751_v33 = vadd.f32 %v472_v43, %v2620_v38  ;;  %1177 = vrot.lane.b32.xlu0 %v993_v56, %s1404_s0  ;;  %v870_v23 = vadd.f32 %v1402_v41, %v802_v34  ;;  %v804_v24 = vadd.f32 %v740_v16, %v2628_v29  ;;  %v995_v51 = vmax.f32 %v867_v46, 0.0  ;;  %v3439_v56 = vld [vmem:[#allocation8_spill] sm:$0xff] }
  0xf4   :  { %v2759_v11 = vadd.f32 %v471_v28, %v2647_v53  ;;  %v1068_v50 = vpop.permute.xlu1 %1067  ;;  %v869_v18 = vadd.f32 %v1402_v41, %v801_v35  ;;  %v803_v38 = vadd.f32 %v739_v54, %v2654_v58  ;;  %v875_v29 = vmax.f32 %v2703_v32, 0.0 }
  0xf5   :  { %v1259_v9 = vsel %vm1257_vm0, %v874_v45, %v1068_v50  ;;  %v1066_v59 = vpop.permute.xlu0 %1065  ;;  %v546_v53 = vadd.f32 %v2663_v62, %v478_v7  ;;  %v480_v5 = vadd.f32 %v416_v13, %v3439_v56  ;;  %v418_v58 = vmul.f32 %v2290_v36, %v2110_v21 }
  0xf6   :  { %1324 = vst.msk [vmem:[%s3253_s2 + $0x8] sm:$0xff] %vm1322_vm1, %v1259_v9  ;;  %v1258_v1 = vsel %vm1257_vm0, %v873_v63, %v1066_v59  ;;  %1183 = vrot.lane.b32.xlu1 %v996_v31, %s1404_s0  ;;  %v876_v34 = vmax.f32 %v544_v30, 0.0  ;;  %v545_v63 = vadd.f32 %v2663_v62, %v477_v57  ;;  %v479_v46 = vadd.f32 %v415_v17, %v3440_v8  ;;  %v3441_v57 = vld [vmem:[#allocation10_spill] sm:$0xff]  ;;  %v3442_v17 = vld [vmem:[#allocation11_spill] sm:$0xff] }
  0xf7   :  { %1323 = vst.msk [vmem:[%s3253_s2] sm:$0xff] %vm1322_vm1, %v1258_v1  ;;  %1181 = vrot.lane.b32.xlu0 %v995_v51, %s1404_s0  ;;  %v417_v32 = vmul.f32 %v2290_v36, %v2115_v3  ;;  %v998_v35 = vmax.f32 %v870_v23, 0.0  ;;  %v872_v43 = vadd.f32 %v1402_v41, %v804_v24  ;;  %v997_v44 = vmax.f32 %v869_v18, 0.0 }
  0xf8   :  { %v1072_v16 = vpop.permute.xlu1 %1071  ;;  %v871_v21 = vadd.f32 %v1402_v41, %v803_v38  ;;  %v878_v40 = vmax.f32 %v546_v53, 0.0  ;;  %v482_v3 = vadd.f32 %v418_v58, %v3441_v57  ;;  %v420_v28 = vmul.f32 %v2290_v36, %v2126_v4  ;;  %v3443_v38 = vld [vmem:[#allocation12_spill] sm:$0xff] }
  0xf9   :  { %v1261_v42 = vsel %vm1257_vm0, %v876_v34, %v1072_v16  ;;  %v1070_v7 = vpop.permute.xlu0 %1069  ;;  %v877_v54 = vmax.f32 %v545_v63, 0.0  ;;  %v548_v13 = vadd.f32 %v2663_v62, %v480_v5  ;;  %v481_v45 = vadd.f32 %v417_v32, %v3442_v17  ;;  %v3446_v16 = vld [vmem:[#allocation15_spill] sm:$0xff]  ;;  %v3448_v17 = vld [vmem:[#allocation17_spill] sm:$0xff] }
  0xfa   :  { %1326 = vst.msk [vmem:[%s3253_s2 + $0x18] sm:$0xff] %vm1322_vm1, %v1261_v42  ;;  %v1260_v30 = vsel %vm1257_vm0, %v875_v29, %v1070_v7  ;;  %1187 = vrot.lane.b32.xlu1 %v998_v35, %s1404_s0  ;;  %v419_v31 = vmul.f32 %v2290_v36, %v2131_v12  ;;  %v1000_v41 = vmax.f32 %v872_v43, 0.0  ;;  %v547_v24 = vadd.f32 %v2663_v62, %v479_v46  ;;  %v3444_v29 = vld [vmem:[#allocation13_spill] sm:$0xff]  ;;  %v3445_v46 = vld [vmem:[#allocation14_spill] sm:$0xff] }
  0xfb   :  { %1325 = vst.msk [vmem:[%s3253_s2 + $0x10] sm:$0xff] %vm1322_vm1, %v1260_v30  ;;  %1185 = vrot.lane.b32.xlu0 %v997_v44, %s1404_s0  ;;  %v999_v4 = vmax.f32 %v871_v21, 0.0  ;;  %v484_v9 = vadd.f32 %v420_v28, %v3443_v38  ;;  %v422_v12 = vmul.f32 %v2290_v36, %v2142_v14  ;;  %v880_v59 = vmax.f32 %v548_v13, 0.0 }
  0xfc   :  { %v1076_v23 = vpop.permute.xlu1 %1075  ;;  %v550_v1 = vadd.f32 %v2663_v62, %v482_v3  ;;  %v483_v53 = vadd.f32 %v419_v31, %v3444_v29  ;;  %v421_v56 = vmul.f32 %v2290_v36, %v2147_v0  ;;  %v879_v58 = vmax.f32 %v547_v24, 0.0  ;;  %v3447_v3 = vld [vmem:[#allocation16_spill] sm:$0xff] }
  0xfd   :  { %v1263_v50 = vsel %vm1257_vm0, %v878_v40, %v1076_v23  ;;  %v1074_v51 = vpop.permute.xlu0 %1073  ;;  %v549_v34 = vadd.f32 %v2663_v62, %v481_v45  ;;  %v486_v32 = vadd.f32 %v422_v12, %v3445_v46  ;;  %v424_v35 = vmul.f32 %v2290_v36, %v2158_v19  ;;  %v3450_v12 = vld [vmem:[#allocation19_spill] sm:$0xff]  ;;  %v3452_v46 = vld [vmem:[#allocation21_spill] sm:$0xff] }
  0xfe   :  { %1328 = vst.msk [vmem:[%s3253_s2 + $0x28] sm:$0xff] %vm1322_vm1, %v1263_v50  ;;  %v1262_v18 = vsel %vm1257_vm0, %v877_v54, %v1074_v51  ;;  %1191 = vrot.lane.b32.xlu1 %v1000_v41, %s1404_s0  ;;  %v882_v0 = vmax.f32 %v550_v1, 0.0  ;;  %v552_v43 = vadd.f32 %v2663_v62, %v484_v9  ;;  %v485_v44 = vadd.f32 %v421_v56, %v3446_v16  ;;  %v3449_v51 = vld [vmem:[#allocation18_spill] sm:$0xff] }
  0xff   :  { %1327 = vst.msk [vmem:[%s3253_s2 + $0x20] sm:$0xff] %vm1322_vm1, %v1262_v18  ;;  %1189 = vrot.lane.b32.xlu0 %v999_v4, %s1404_s0  ;;  %v423_v21 = vmul.f32 %v2290_v36, %v2163_v25  ;;  %v881_v7 = vmax.f32 %v549_v34, 0.0  ;;  %v551_v30 = vadd.f32 %v2663_v62, %v483_v53  ;;  %v488_v28 = vadd.f32 %v424_v35, %v3447_v3  ;;  %v3451_v34 = vld [vmem:[#allocation20_spill] sm:$0xff] }
 0x100   :  { %v1080_v5 = vpop.permute.xlu1 %1079  ;;  %v426_v54 = vmul.f32 %v2290_v36, %v2174_v22  ;;  %v884_v25 = vmax.f32 %v552_v43, 0.0  ;;  %v554_v13 = vadd.f32 %v2663_v62, %v486_v32  ;;  %v425_v31 = vmul.f32 %v2290_v36, %v2179_v49 }
 0x101   :  { %v1265_v14 = vsel %vm1257_vm0, %v880_v59, %v1080_v5  ;;  %v1078_v63 = vpop.permute.xlu0 %1077  ;;  %v487_v45 = vadd.f32 %v423_v21, %v3448_v17  ;;  %v883_v23 = vmax.f32 %v551_v30, 0.0  ;;  %v553_v24 = vadd.f32 %v2663_v62, %v485_v44  ;;  %v3454_v30 = vld [vmem:[#allocation69_spill] sm:$0xff] }
 0x102   :  { %1330 = vst.msk [vmem:[%s3253_s2 + $0x38] sm:$0xff] %vm1322_vm1, %v1265_v14  ;;  %v1264_v8 = vsel %vm1257_vm0, %v879_v58, %v1078_v63  ;;  %v490_v18 = vadd.f32 %v426_v54, %v3449_v51  ;;  %v428_v38 = vmul.f32 %v2290_v36, %v2190_v2  ;;  %v886_v49 = vmax.f32 %v554_v13, 0.0 }
 0x103   :  { %1329 = vst.msk [vmem:[%s3253_s2 + $0x30] sm:$0xff] %vm1322_vm1, %v1264_v8  ;;  %v556_v9 = vadd.f32 %v2663_v62, %v488_v28  ;;  %v489_v59 = vadd.f32 %v425_v31, %v3450_v12  ;;  %v427_v1 = vmul.f32 %v2290_v36, %v2195_v6  ;;  %v885_v53 = vmax.f32 %v553_v24, 0.0  ;;  %v3456_v28 = vld [vmem:[#allocation70_spill] sm:$0xff] }
 0x104   :  { %v1084_v42 = vpop.permute.xlu1 %1083  ;;  %v555_v56 = vadd.f32 %v2663_v62, %v487_v45  ;;  %v492_v14 = vadd.f32 %v428_v38, %v3451_v34  ;;  %v430_v63 = vmul.f32 %v2290_v36, %v2206_v15  ;;  %v558_v8 = vadd.f32 %v2663_v62, %v490_v18  ;;  %v3459_v18 = vld [vmem:[#allocation25_spill] sm:$0xff] }
 0x105   :  { %v1267_v40 = vsel %vm1257_vm0, %v882_v0, %v1084_v42  ;;  %v1082_v19 = vpop.permute.xlu0 %1081  ;;  %v888_v6 = vmax.f32 %v556_v9, 0.0  ;;  %v491_v32 = vadd.f32 %v427_v1, %v3452_v46  ;;  %v429_v35 = vmul.f32 %v2290_v36, %v2211_v37  ;;  %v3453_v42 = vld [vmem:[#allocation22_spill] sm:$0xff] }
 0x106   :  { %1332 = vst.msk [vmem:[%s3253_s2 + $0x48] sm:$0xff] %vm1322_vm1, %v1267_v40  ;;  %v1266_v57 = vsel %vm1257_vm0, %v881_v7, %v1082_v19  ;;  %v887_v43 = vmax.f32 %v555_v56, 0.0  ;;  %v557_v16 = vadd.f32 %v2663_v62, %v489_v59  ;;  %v494_v7 = vadd.f32 %v430_v63, %v3453_v42  ;;  %v3464_v46 = vld [vmem:[#allocation74_spill] sm:$0xff] }
 0x107   :  { %1331 = vst.msk [vmem:[%s3253_s2 + $0x40] sm:$0xff] %vm1322_vm1, %v1266_v57  ;;  %v432_v40 = vmul.f32 %v2290_v36, %v3454_v30  ;;  %v890_v37 = vmax.f32 %v558_v8, 0.0  ;;  %v560_v19 = vadd.f32 %v2663_v62, %v492_v14  ;;  %v3455_v57 = vld [vmem:[#allocation23_spill] sm:$0xff]  ;;  %v431_v54 = vmul.f32 %v2290_v36, %v3456_v28 }
 0x108   :  { %v1088_v41 = vpop.permute.xlu1 %1087  ;;  %v493_v3 = vadd.f32 %v429_v35, %v3455_v57  ;;  %v889_v13 = vmax.f32 %v557_v16, 0.0  ;;  %v559_v17 = vadd.f32 %v2663_v62, %v491_v32  ;;  %v562_v51 = vadd.f32 %v2663_v62, %v494_v7  ;;  %v3466_v7 = vld [vmem:[#allocation75_spill] sm:$0xff] }
 0x109   :  { %v1269_v4 = vsel %vm1257_vm0, %v884_v25, %v1088_v41  ;;  %v1086_v22 = vpop.permute.xlu0 %1085  ;;  %v495_v38 = vadd.f32 %v431_v54, %v3459_v18  ;;  %v435_v32 = vmul.f32 %v2290_v36, %v3464_v46  ;;  %v438_v30 = vmul.f32 %v2290_v36, %v3466_v7 }
 0x10a   :  { %1334 = vst.msk [vmem:[%s3253_s2 + $0x58] sm:$0xff] %vm1322_vm1, %v1269_v4  ;;  %v1268_v50 = vsel %vm1257_vm0, %v883_v23, %v1086_v22  ;;  %v3457_v23 = vld [vmem:[#allocation24_spill] sm:$0xff]  ;;  %v3458_v4 = vld [vmem:[#allocation71_spill] sm:$0xff]  ;;  %v891_v59 = vmax.f32 %v559_v17, 0.0  ;;  %v561_v1 = vadd.f32 %v2663_v62, %v493_v3  ;;  %v894_v14 = vmax.f32 %v562_v51, 0.0 }
 0x10b   :  { %1333 = vst.msk [vmem:[%s3253_s2 + $0x50] sm:$0xff] %vm1322_vm1, %v1268_v50  ;;  %v496_v24 = vadd.f32 %v432_v40, %v3457_v23  ;;  %v434_v22 = vmul.f32 %v2290_v36, %v3458_v4  ;;  %v892_v50 = vmax.f32 %v560_v19, 0.0  ;;  %v3467_v19 = vld [vmem:[#allocation29_spill] sm:$0xff]  ;;  %v3468_v3 = vld [vmem:[#allocation76_spill] sm:$0xff]  ;;  %v3470_v4 = vld [vmem:[#allocation31_spill] sm:$0xff] }
 0x10c   :  { %v1092_v29 = vpop.permute.xlu1 %1091  ;;  %v499_v57 = vadd.f32 %v435_v32, %v3467_v19  ;;  %v437_v28 = vmul.f32 %v2290_v36, %v3468_v3  ;;  %v3475_v19 = vld [vmem:[#allocation81_spill] sm:$0xff] }
 0x10d   :  { %v1271_v5 = vsel %vm1257_vm0, %v886_v49, %v1092_v29  ;;  %v1090_v2 = vpop.permute.xlu0 %1089  ;;  %v3460_v49 = vld [vmem:[#allocation72_spill] sm:$0xff]  ;;  %v564_v63 = vadd.f32 %v2663_v62, %v496_v24 }
 0x10e   :  { %1336 = vst.msk [vmem:[%s3253_s2 + $0x68] sm:$0xff] %vm1322_vm1, %v1271_v5  ;;  %v1270_v58 = vsel %vm1257_vm0, %v885_v53, %v1090_v2  ;;  %v433_v9 = vmul.f32 %v2290_v36, %v3460_v49  ;;  %v3461_v5 = vld [vmem:[#allocation26_spill] sm:$0xff]  ;;  %v567_v18 = vadd.f32 %v2663_v62, %v499_v57  ;;  %v576_v57 = vadd.f32 %v2663_v62, %v3475_v19  ;;  %v3485_v19 = vld [vmem:[#allocation37_spill] sm:$0xff] }
 0x10f   :  { %1335 = vst.msk [vmem:[%s3253_s2 + $0x60] sm:$0xff] %vm1322_vm1, %v1270_v58  ;;  %v498_v2 = vadd.f32 %v434_v22, %v3461_v5  ;;  %v3462_v58 = vld [vmem:[#allocation73_spill] sm:$0xff]  ;;  %v896_v40 = vmax.f32 %v564_v63, 0.0  ;;  %v501_v22 = vadd.f32 %v437_v28, %v3470_v4  ;;  %v3472_v63 = vld [vmem:[#allocation78_spill] sm:$0xff] }
 0x110   :  { %v1096_v0 = vpop.permute.xlu1 %1095  ;;  %v436_v34 = vmul.f32 %v2290_v36, %v3462_v58  ;;  %v3471_v58 = vld [vmem:[#allocation77_spill] sm:$0xff]  ;;  %v3476_v28 = vld [vmem:[#allocation82_spill] sm:$0xff] }
 0x111   :  { %v1273_v44 = vsel %vm1257_vm0, %v888_v6, %v1096_v0  ;;  %v1094_v15 = vpop.permute.xlu0 %1093  ;;  %v3463_v6 = vld [vmem:[#allocation27_spill] sm:$0xff]  ;;  %v893_v0 = vmax.f32 %v561_v1, 0.0 }
 0x112   :  { %1338 = vst.msk [vmem:[%s3253_s2 + $0x78] sm:$0xff] %vm1322_vm1, %v1273_v44  ;;  %v1272_v21 = vsel %vm1257_vm0, %v887_v43, %v1094_v15  ;;  %v497_v8 = vadd.f32 %v433_v9, %v3463_v6  ;;  %v563_v43 = vadd.f32 %v2663_v62, %v495_v38  ;;  %v571_v6 = vadd.f32 %v2663_v62, %v3472_v63  ;;  %v3482_v63 = vld [vmem:[#allocation48_spill] sm:$0xff] }
 0x113   :  { %1337 = vst.msk [vmem:[%s3253_s2 + $0x70] sm:$0xff] %vm1322_vm1, %v1272_v21  ;;  %v3465_v21 = vld [vmem:[#allocation28_spill] sm:$0xff] }
 0x114   :  { %v1100_v25 = vpop.permute.xlu1 %1099  ;;  %v500_v42 = vadd.f32 %v436_v34, %v3465_v21  ;;  %v572_v34 = vadd.f32 %v2663_v62, %v3471_v58  ;;  %v903_v7 = vmax.f32 %v571_v6, 0.0  ;;  %v3481_v58 = vld [vmem:[#allocation47_spill] sm:$0xff]  ;;  %v581_v6 = vadd.f32 %v2663_v62, %v3482_v63 }
 0x115   :  { %v1275_v45 = vsel %vm1257_vm0, %v890_v37, %v1100_v25  ;;  %v1098_v31 = vpop.permute.xlu0 %1097  ;;  %v566_v37 = vadd.f32 %v2663_v62, %v498_v2  ;;  %v895_v25 = vmax.f32 %v563_v43, 0.0  ;;  %v3473_v43 = vld [vmem:[#allocation79_spill] sm:$0xff] }
 0x116   :  { %1340 = vst.msk [vmem:[%s3253_s2 + $0x88] sm:$0xff] %vm1322_vm1, %v1275_v45  ;;  %v1274_v41 = vsel %vm1257_vm0, %v889_v13, %v1098_v31  ;;  %v565_v13 = vadd.f32 %v2663_v62, %v497_v8  ;;  %v568_v24 = vadd.f32 %v2663_v62, %v500_v42 }
 0x117   :  { %1339 = vst.msk [vmem:[%s3253_s2 + $0x80] sm:$0xff] %vm1322_vm1, %v1274_v41  ;;  %v3469_v41 = vld [vmem:[#allocation30_spill] sm:$0xff]  ;;  %v898_v36 = vmax.f32 %v566_v37, 0.0 }
 0x118   :  { %v1104_v12 = vpop.permute.xlu1 %1103  ;;  %v502_v23 = vadd.f32 %v438_v30, %v3469_v41  ;;  %v897_v51 = vmax.f32 %v565_v13, 0.0  ;;  %v3477_v41 = vld [vmem:[#allocation83_spill] sm:$0xff] }
 0x119   :  { %v1277_v29 = vsel %vm1257_vm0, %v892_v50, %v1104_v12  ;;  %v1102_v53 = vpop.permute.xlu0 %1101  ;;  %v900_v12 = vmax.f32 %v568_v24, 0.0  ;;  %v3478_v24 = vld [vmem:[#allocation32_spill] sm:$0xff] }
 0x11a   :  { %1342 = vst.msk [vmem:[%s3253_s2 + $0x98] sm:$0xff] %vm1322_vm1, %v1277_v29  ;;  %v1276_v56 = vsel %vm1257_vm0, %v891_v59, %v1102_v53  ;;  %v570_v59 = vadd.f32 %v2663_v62, %v502_v23  ;;  %v899_v29 = vmax.f32 %v567_v18, 0.0  ;;  %v569_v53 = vadd.f32 %v2663_v62, %v501_v22 }
 0x11b   :  { %1341 = vst.msk [vmem:[%s3253_s2 + $0x90] sm:$0xff] %vm1322_vm1, %v1276_v56  ;;  %v578_v23 = vadd.f32 %v2663_v62, %v3477_v41  ;;  %v577_v4 = vadd.f32 %v2663_v62, %v3478_v24  ;;  %v3487_v41 = vld [vmem:[#allocation49_spill] sm:$0xff]  ;;  %v3488_v24 = vld [vmem:[#allocation50_spill] sm:$0xff] }
 0x11c   :  { %v1108_v35 = vpop.permute.xlu1 %1107  ;;  %v901_v46 = vmax.f32 %v569_v53, 0.0 }
 0x11d   :  { %v1279_v16 = vsel %vm1257_vm0, %v894_v14, %v1108_v35  ;;  %v1106_v44 = vpop.permute.xlu0 %1105  ;;  %v902_v14 = vmax.f32 %v570_v59, 0.0  ;;  %v3480_v59 = vld [vmem:[#allocation34_spill] sm:$0xff]  ;;  %v909_v53 = vmax.f32 %v577_v4, 0.0  ;;  %v587_v4 = vadd.f32 %v2663_v62, %v3488_v24 }
 0x11e   :  { %1344 = vst.msk [vmem:[%s3253_s2 + $0xa8] sm:$0xff] %vm1322_vm1, %v1279_v16  ;;  %v1278_v15 = vsel %vm1257_vm0, %v893_v0, %v1106_v44  ;;  %v574_v16 = vadd.f32 %v2663_v62, %v3473_v43  ;;  %v904_v44 = vmax.f32 %v572_v34, 0.0  ;;  %v582_v34 = vadd.f32 %v2663_v62, %v3481_v58  ;;  %v3483_v43 = vld [vmem:[#allocation35_spill] sm:$0xff] }
 0x11f   :  { %1343 = vst.msk [vmem:[%s3253_s2 + $0xa0] sm:$0xff] %vm1322_vm1, %v1278_v15  ;;  %v3474_v15 = vld [vmem:[#allocation80_spill] sm:$0xff]  ;;  %v592_v58 = vadd.f32 %v2663_v62, %v2603_v52  ;;  %v602_v24 = vadd.f32 %v2663_v62, %v2729_v55 }
 0x120   :  { %v1112_v54 = vpop.permute.xlu1 %1111  ;;  %v573_v21 = vadd.f32 %v2663_v62, %v3474_v15  ;;  %v906_v3 = vmax.f32 %v574_v16, 0.0  ;;  %v584_v16 = vadd.f32 %v2663_v62, %v3483_v43  ;;  %v3484_v15 = vld [vmem:[#allocation36_spill] sm:$0xff]  ;;  %v593_v43 = vadd.f32 %v2663_v62, %v2638_v61 }
 0x121   :  { %v1281_v17 = vsel %vm1257_vm0, %v896_v40, %v1112_v54  ;;  %v1110_v45 = vpop.permute.xlu0 %1109  ;;  %v575_v54 = vadd.f32 %v2663_v62, %v3476_v28  ;;  %v3486_v28 = vld [vmem:[#allocation38_spill] sm:$0xff] }
 0x122   :  { %1346 = vst.msk [vmem:[%s3253_s2 + $0xb8] sm:$0xff] %vm1322_vm1, %v1281_v17  ;;  %v1280_v31 = vsel %vm1257_vm0, %v895_v25, %v1110_v45  ;;  %v905_v13 = vmax.f32 %v573_v21, 0.0  ;;  %v583_v21 = vadd.f32 %v2663_v62, %v3484_v15 }
 0x123   :  { %1345 = vst.msk [vmem:[%s3253_s2 + $0xb0] sm:$0xff] %vm1322_vm1, %v1280_v31 }
 0x124   :  { %v1116_v50 = vpop.permute.xlu1 %1115 }
 0x125   :  { %v1283_v38 = vsel %vm1257_vm0, %v898_v36, %v1116_v50  ;;  %v1114_v49 = vpop.permute.xlu0 %1113  ;;  %v908_v36 = vmax.f32 %v576_v57, 0.0  ;;  %v907_v50 = vmax.f32 %v575_v54, 0.0  ;;  %v586_v57 = vadd.f32 %v2663_v62, %v3485_v19 }
 0x126   :  { %1348 = vst.msk [vmem:[%s3253_s2 + $0xc8] sm:$0xff] %vm1322_vm1, %v1283_v38  ;;  %v1282_v9 = vsel %vm1257_vm0, %v897_v51, %v1114_v49  ;;  %v3479_v49 = vld [vmem:[#allocation33_spill] sm:$0xff]  ;;  %v585_v54 = vadd.f32 %v2663_v62, %v3486_v28 }
 0x127   :  { %1347 = vst.msk [vmem:[%s3253_s2 + $0xc0] sm:$0xff] %vm1322_vm1, %v1282_v9  ;;  %v580_v9 = vadd.f32 %v2663_v62, %v3479_v49  ;;  %v3489_v49 = vld [vmem:[#allocation39_spill] sm:$0xff] }
 0x128   :  { %v1120_v1 = vpop.permute.xlu1 %1119 }
 0x129   :  { %v1285_v56 = vsel %vm1257_vm0, %v900_v12, %v1120_v1  ;;  %v1118_v5 = vpop.permute.xlu0 %1117  ;;  %v910_v12 = vmax.f32 %v578_v23, 0.0  ;;  %v579_v1 = vadd.f32 %v2663_v62, %v3480_v59  ;;  %v588_v23 = vadd.f32 %v2663_v62, %v3487_v41  ;;  %v3490_v59 = vld [vmem:[#allocation40_spill] sm:$0xff] }
 0x12a   :  { %1350 = vst.msk [vmem:[%s3253_s2 + $0xd8] sm:$0xff] %vm1322_vm1, %v1285_v56  ;;  %v1284_v2 = vsel %vm1257_vm0, %v899_v29, %v1118_v5 }
 0x12b   :  { %1349 = vst.msk [vmem:[%s3253_s2 + $0xd0] sm:$0xff] %vm1322_vm1, %v1284_v2 }
 0x12c   :  { %v1124_v8 = vpop.permute.xlu1 %1123 }
 0x12d   :  { %v1287_v32 = vsel %vm1257_vm0, %v902_v14, %v1124_v8  ;;  %v1122_v35 = vpop.permute.xlu0 %1121  ;;  %v912_v14 = vmax.f32 %v580_v9, 0.0  ;;  %v590_v9 = vadd.f32 %v2663_v62, %v3489_v49  ;;  %v603_v49 = vadd.f32 %v2663_v62, %v2759_v11 }
 0x12e   :  { %1352 = vst.msk [vmem:[%s3253_s2 + $0xe8] sm:$0xff] %vm1322_vm1, %v1287_v32  ;;  %v1286_v0 = vsel %vm1257_vm0, %v901_v46, %v1122_v35  ;;  %v911_v46 = vmax.f32 %v579_v1, 0.0  ;;  %v589_v1 = vadd.f32 %v2663_v62, %v3490_v59 }
 0x12f   :  { %1351 = vst.msk [vmem:[%s3253_s2 + $0xe0] sm:$0xff] %vm1322_vm1, %v1286_v0 }
 0x130   :  { %v1128_v42 = vpop.permute.xlu1 %1127 }
 0x131   :  { %v1289_v30 = vsel %vm1257_vm0, %v904_v44, %v1128_v42  ;;  %v1126_v40 = vpop.permute.xlu0 %1125  ;;  %v914_v44 = vmax.f32 %v582_v34, 0.0  ;;  %v922_v34 = vmax.f32 %v590_v9, 0.0 }
 0x132   :  { %1354 = vst.msk [vmem:[%s3253_s2 + $0xf8] sm:$0xff] %vm1322_vm1, %v1289_v30  ;;  %v1288_v37 = vsel %vm1257_vm0, %v903_v7, %v1126_v40  ;;  %v913_v7 = vmax.f32 %v581_v6, 0.0 }
 0x133   :  { %1353 = vst.msk [vmem:[%s3253_s2 + $0xf0] sm:$0xff] %vm1322_vm1, %v1288_v37 }
 0x134   :  { %v1132_v25 = vpop.permute.xlu1 %1131 }
 0x135   :  { %v1291_v17 = vsel %vm1257_vm0, %v906_v3, %v1132_v25  ;;  %v1130_v45 = vpop.permute.xlu0 %1129  ;;  %v916_v3 = vmax.f32 %v584_v16, 0.0 }
 0x136   :  { %1356 = vst.msk [vmem:[%s3253_s2 + $0x108] sm:$0xff] %vm1322_vm1, %v1291_v17  ;;  %v1290_v31 = vsel %vm1257_vm0, %v905_v13, %v1130_v45  ;;  %v915_v13 = vmax.f32 %v583_v21, 0.0 }
 0x137   :  { %1355 = vst.msk [vmem:[%s3253_s2 + $0x100] sm:$0xff] %vm1322_vm1, %v1290_v31 }
 0x138   :  { %v1136_v22 = vpop.permute.xlu1 %1135 }
 0x139   :  { %v1293_v51 = vsel %vm1257_vm0, %v908_v36, %v1136_v22  ;;  %v1134_v18 = vpop.permute.xlu0 %1133  ;;  %v918_v36 = vmax.f32 %v586_v57, 0.0  ;;  %v598_v57 = vadd.f32 %v2663_v62, %v2683_v39 }
 0x13a   :  { %1358 = vst.msk [vmem:[%s3253_s2 + $0x118] sm:$0xff] %vm1322_vm1, %v1293_v51  ;;  %v1292_v38 = vsel %vm1257_vm0, %v907_v50, %v1134_v18  ;;  %v917_v50 = vmax.f32 %v585_v54, 0.0 }
 0x13b   :  { %1357 = vst.msk [vmem:[%s3253_s2 + $0x110] sm:$0xff] %vm1322_vm1, %v1292_v38 }
 0x13c   :  { %v1140_v29 = vpop.permute.xlu1 %1139 }
 0x13d   :  { %v1295_v56 = vsel %vm1257_vm0, %v910_v12, %v1140_v29  ;;  %v1138_v5 = vpop.permute.xlu0 %1137  ;;  %v920_v12 = vmax.f32 %v588_v23, 0.0 }
 0x13e   :  { %1360 = vst.msk [vmem:[%s3253_s2 + $0x128] sm:$0xff] %vm1322_vm1, %v1295_v56  ;;  %v1294_v2 = vsel %vm1257_vm0, %v909_v53, %v1138_v5  ;;  %v919_v53 = vmax.f32 %v587_v4, 0.0  ;;  %v601_v4 = vadd.f32 %v2663_v62, %v2737_v47  ;;  %v934_v47 = vmax.f32 %v602_v24, 0.0 }
 0x13f   :  { %1359 = vst.msk [vmem:[%s3253_s2 + $0x120] sm:$0xff] %vm1322_vm1, %v1294_v2 }
 0x140   :  { %v1144_v8 = vpop.permute.xlu1 %1143 }
 0x141   :  { %v1297_v32 = vsel %vm1257_vm0, %v912_v14, %v1144_v8  ;;  %v1142_v35 = vpop.permute.xlu0 %1141  ;;  %v3491_v14 = vld [vmem:[#allocation41_spill] sm:$0xff]  ;;  %v921_v8 = vmax.f32 %v589_v1, 0.0 }
 0x142   :  { %1362 = vst.msk [vmem:[%s3253_s2 + $0x138] sm:$0xff] %vm1322_vm1, %v1297_v32  ;;  %v1296_v0 = vsel %vm1257_vm0, %v911_v46, %v1142_v35  ;;  %v591_v63 = vadd.f32 %v2663_v62, %v3491_v14  ;;  %v594_v35 = vadd.f32 %v2663_v62, %v2632_v26 }
 0x143   :  { %1361 = vst.msk [vmem:[%s3253_s2 + $0x130] sm:$0xff] %vm1322_vm1, %v1296_v0  ;;  %v924_v0 = vmax.f32 %v592_v58, 0.0 }
 0x144   :  { %v1148_v42 = vpop.permute.xlu1 %1147  ;;  %v926_v61 = vmax.f32 %v594_v35, 0.0 }
 0x145   :  { %v1299_v30 = vsel %vm1257_vm0, %v914_v44, %v1148_v42  ;;  %v1146_v40 = vpop.permute.xlu0 %1145  ;;  %v923_v44 = vmax.f32 %v591_v63, 0.0  ;;  %v596_v42 = vadd.f32 %v2663_v62, %v2657_v48 }
 0x146   :  { %1364 = vst.msk [vmem:[%s3253_s2 + $0x148] sm:$0xff] %vm1322_vm1, %v1299_v30  ;;  %v1298_v37 = vsel %vm1257_vm0, %v913_v7, %v1146_v40  ;;  %v595_v7 = vadd.f32 %v2663_v62, %v2668_v10  ;;  %v925_v40 = vmax.f32 %v593_v43, 0.0 }
 0x147   :  { %1363 = vst.msk [vmem:[%s3253_s2 + $0x140] sm:$0xff] %vm1322_vm1, %v1298_v37  ;;  %v928_v10 = vmax.f32 %v596_v42, 0.0 }
 0x148   :  { %v1152_v25 = vpop.permute.xlu1 %1151  ;;  %v927_v54 = vmax.f32 %v595_v7, 0.0 }
 0x149   :  { %v1301_v17 = vsel %vm1257_vm0, %v916_v3, %v1152_v25  ;;  %v1150_v45 = vpop.permute.xlu0 %1149  ;;  %v597_v3 = vadd.f32 %v2663_v62, %v2692_v27  ;;  %v930_v27 = vmax.f32 %v598_v57, 0.0 }
 0x14a   :  { %1366 = vst.msk [vmem:[%s3253_s2 + $0x158] sm:$0xff] %vm1322_vm1, %v1301_v17  ;;  %v1300_v31 = vsel %vm1257_vm0, %v915_v13, %v1150_v45  ;;  %v600_v17 = vadd.f32 %v2663_v62, %v2708_v20  ;;  %v599_v45 = vadd.f32 %v2663_v62, %v2715_v60 }
 0x14b   :  { %1365 = vst.msk [vmem:[%s3253_s2 + $0x150] sm:$0xff] %vm1322_vm1, %v1300_v31  ;;  %v929_v41 = vmax.f32 %v597_v3, 0.0 }
 0x14c   :  { %v1156_v22 = vpop.permute.xlu1 %1155  ;;  %v932_v60 = vmax.f32 %v600_v17, 0.0 }
 0x14d   :  { %v1303_v51 = vsel %vm1257_vm0, %v918_v36, %v1156_v22  ;;  %v1154_v18 = vpop.permute.xlu0 %1153 }
 0x14e   :  { %1368 = vst.msk [vmem:[%s3253_s2 + $0x168] sm:$0xff] %vm1322_vm1, %v1303_v51  ;;  %v1302_v38 = vsel %vm1257_vm0, %v917_v50, %v1154_v18  ;;  %v931_v50 = vmax.f32 %v599_v45, 0.0 }
 0x14f   :  { %1367 = vst.msk [vmem:[%s3253_s2 + $0x160] sm:$0xff] %vm1322_vm1, %v1302_v38  ;;  %v604_v38 = vadd.f32 %v2663_v62, %v2751_v33  ;;  %v935_v62 = vmax.f32 %v603_v49, 0.0 }
 0x150   :  { %v1160_v29 = vpop.permute.xlu1 %1159 }
 0x151   :  { %v1305_v56 = vsel %vm1257_vm0, %v920_v12, %v1160_v29  ;;  %v1158_v5 = vpop.permute.xlu0 %1157  ;;  %v933_v12 = vmax.f32 %v601_v4, 0.0  ;;  %v936_v29 = vmax.f32 %v604_v38, 0.0 }
 0x152   :  { %1370 = vst.msk [vmem:[%s3253_s2 + $0x178] sm:$0xff] %vm1322_vm1, %v1305_v56  ;;  %v1304_v2 = vsel %vm1257_vm0, %v919_v53, %v1158_v5 }
 0x153   :  { %1369 = vst.msk [vmem:[%s3253_s2 + $0x170] sm:$0xff] %vm1322_vm1, %v1304_v2 }
 0x154   :  { %v1164_v6 = vpop.permute.xlu1 %1163 }
 0x155   :  { %v1307_v46 = vsel %vm1257_vm0, %v922_v34, %v1164_v6  ;;  %v1162_v32 = vpop.permute.xlu0 %1161 }
 0x156   :  { %1372 = vst.msk [vmem:[%s3253_s2 + $0x188] sm:$0xff] %vm1322_vm1, %v1307_v46  ;;  %v1306_v52 = vsel %vm1257_vm0, %v921_v8, %v1162_v32 }
 0x157   :  { %1371 = vst.msk [vmem:[%s3253_s2 + $0x180] sm:$0xff] %vm1322_vm1, %v1306_v52 }
 0x158   :  { %v1168_v16 = vpop.permute.xlu1 %1167 }
 0x159   :  { %v1309_v15 = vsel %vm1257_vm0, %v924_v0, %v1168_v16  ;;  %v1166_v21 = vpop.permute.xlu0 %1165 }
 0x15a   :  { %1374 = vst.msk [vmem:[%s3253_s2 + $0x198] sm:$0xff] %vm1322_vm1, %v1309_v15  ;;  %v1308_v26 = vsel %vm1257_vm0, %v923_v44, %v1166_v21 }
 0x15b   :  { %1373 = vst.msk [vmem:[%s3253_s2 + $0x190] sm:$0xff] %vm1322_vm1, %v1308_v26 }
 0x15c   :  { %v1172_v30 = vpop.permute.xlu1 %1171 }
 0x15d   :  { %v1311_v37 = vsel %vm1257_vm0, %v926_v61, %v1172_v30  ;;  %v1170_v19 = vpop.permute.xlu0 %1169 }
 0x15e   :  { %1376 = vst.msk [vmem:[%s3253_s2 + $0x1a8] sm:$0xff] %vm1322_vm1, %v1311_v37  ;;  %v1310_v48 = vsel %vm1257_vm0, %v925_v40, %v1170_v19 }
 0x15f   :  { %1375 = vst.msk [vmem:[%s3253_s2 + $0x1a0] sm:$0xff] %vm1322_vm1, %v1310_v48 }
 0x160   :  { %v1176_v28 = vpop.permute.xlu1 %1175 }
 0x161   :  { %v1313_v25 = vsel %vm1257_vm0, %v928_v10, %v1176_v28  ;;  %v1174_v13 = vpop.permute.xlu0 %1173 }
 0x162   :  { %1378 = vst.msk [vmem:[%s3253_s2 + $0x1b8] sm:$0xff] %vm1322_vm1, %v1313_v25  ;;  %v1312_v39 = vsel %vm1257_vm0, %v927_v54, %v1174_v13 }
 0x163   :  { %1377 = vst.msk [vmem:[%s3253_s2 + $0x1b0] sm:$0xff] %vm1322_vm1, %v1312_v39 }
 0x164   :  { %v1180_v31 = vpop.permute.xlu1 %1179 }
 0x165   :  { %v1315_v23 = vsel %vm1257_vm0, %v930_v27, %v1180_v31  ;;  %v1178_v36 = vpop.permute.xlu0 %1177 }
 0x166   :  { %1380 = vst.msk [vmem:[%s3253_s2 + $0x1c8] sm:$0xff] %vm1322_vm1, %v1315_v23  ;;  %v1314_v20 = vsel %vm1257_vm0, %v929_v41, %v1178_v36 }
 0x167   :  { %1379 = vst.msk [vmem:[%s3253_s2 + $0x1c0] sm:$0xff] %vm1322_vm1, %v1314_v20 }
 0x168   :  { %v1184_v22 = vpop.permute.xlu1 %1183 }
 0x169   :  { %v1317_v51 = vsel %vm1257_vm0, %v932_v60, %v1184_v22  ;;  %v1182_v18 = vpop.permute.xlu0 %1181 }
 0x16a   :  { %1382 = vst.msk [vmem:[%s3253_s2 + $0x1d8] sm:$0xff] %vm1322_vm1, %v1317_v51  ;;  %v1316_v55 = vsel %vm1257_vm0, %v931_v50, %v1182_v18 }
 0x16b   :  { %1381 = vst.msk [vmem:[%s3253_s2 + $0x1d0] sm:$0xff] %vm1322_vm1, %v1316_v55 }
 0x16c   :  { %v1188_v9 = vpop.permute.xlu1 %1187 }
 0x16d   :  { %v1319_v59 = vsel %vm1257_vm0, %v934_v47, %v1188_v9  ;;  %v1186_v1 = vpop.permute.xlu0 %1185 }
 0x16e   :  { %1384 = vst.msk [vmem:[%s3253_s2 + $0x1e8] sm:$0xff] %vm1322_vm1, %v1319_v59  ;;  %v1318_v33 = vsel %vm1257_vm0, %v933_v12, %v1186_v1 }
 0x16f   :  { %1383 = vst.msk [vmem:[%s3253_s2 + $0x1e0] sm:$0xff] %vm1322_vm1, %v1318_v33 }
 0x170   :  { %v1192_v53 = vpop.permute.xlu1 %1191 }
 0x171   :  { %v1321_v11 = vsel %vm1257_vm0, %v936_v29, %v1192_v53  ;;  %v1190_v56 = vpop.permute.xlu0 %1189 }
 0x172   :  { %1386 = vst.msk [vmem:[%s3253_s2 + $0x1f8] sm:$0xff] %vm1322_vm1, %v1321_v11  ;;  %v1320_v5 = vsel %vm1257_vm0, %v935_v62, %v1190_v56 }
 0x173   :  { %1385 = vst.msk [vmem:[%s3253_s2 + $0x1f0] sm:$0xff] %vm1322_vm1, %v1320_v5 }

// kernel: complex_conv_block_forward.7
= control target key start
LH: loop header
LB: loop body
LE: loop exit
PB: predicated region body
PF: predicated region fallthrough
CT: control target
= control target key end

     0   :  { %s1464_s11 = smov 120   ;;  %s3157_s0 = inlined_call_operand.vmem [shape: f32[512,16], index: 0, kind: input, shape index: {}]   ;;  %s3158_s1 = inlined_call_operand.vmem [shape: f32[8,8], index: 1, kind: input, shape index: {}]   ;;  %s3159_s2 = inlined_call_operand.hbm [shape: f32[512,16], index: 2, kind: output, shape index: {}]  }
   0x1   :  { %v1486_v0 = vld [vmem:[%s3157_s0 + $0x10] sm:$0xff]  ;;  %v1493_v1 = vld [vmem:[%s3157_s0] sm:$0xff]  ;;  %v1500_v2 = vld [vmem:[%s3157_s0 + $0x18] sm:$0xff] }
   0x2   :  { %222 = vrot.lane.b32.xlu1 %v1486_v0, %s1464_s11  ;;  %218 = vrot.lane.b32.xlu0 %v1493_v1, %s1464_s11  ;;  %v1505_v3 = vld [vmem:[%s3157_s0 + $0x8] sm:$0xff]  ;;  %v1519_v5 = vld [vmem:[%s3157_s0 + $0x20] sm:$0xff] }
   0x3   :  { %v1514_v4 = vld [vmem:[%s3157_s0 + $0x28] sm:$0xff]  ;;  %v1528_v6 = vld [vmem:[%s3157_s0 + $0x38] sm:$0xff]  ;;  %v1533_v7 = vld [vmem:[%s3157_s0 + $0x30] sm:$0xff] }
   0x4   :  { %v1542_v8 = vld [vmem:[%s3157_s0 + $0x48] sm:$0xff]  ;;  %v1547_v9 = vld [vmem:[%s3157_s0 + $0x40] sm:$0xff]  ;;  %v1582_v16 = vld [vmem:[%s3157_s0 + $0x118] sm:$0xff] }
   0x5   :  { %v1552_v10 = vld [vmem:[%s3158_s1] ss:$0 sm:$0xff]  ;;  %v1557_v11 = vld [vmem:[%s3158_s1 + $0x2] ss:$0 sm:$0xff]  ;;  %v1562_v12 = vld [vmem:[%s3157_s0 + $0x108] sm:$0xff] }
   0x6   :  { %224 = vrot.lane.b32.xlu1 %v1500_v2, %s1464_s11  ;;  %220 = vrot.lane.b32.xlu0 %v1505_v3, %s1464_s11  ;;  %v1568_v13 = vmul.f32 %v1552_v10, %v1562_v12  ;;  %v1572_v14 = vmul.f32 %v1557_v11, %v1562_v12  ;;  %v1577_v15 = vld [vmem:[%s3157_s0 + $0x100] sm:$0xff]  ;;  %v1589_v17 = vld [vmem:[%s3157_s0 + $0x58] sm:$0xff]  ;;  %v1601_v20 = vmul.f32 %v1552_v10, %v1582_v16 }
   0x7   :  { %v1593_v18 = vmul.f32 %v1552_v10, %v1577_v15  ;;  %v1597_v19 = vmul.f32 %v1557_v11, %v1577_v15  ;;  %v1605_v21 = vmul.f32 %v1557_v11, %v1582_v16  ;;  %v1610_v22 = vld [vmem:[%s3157_s0 + $0x110] sm:$0xff]  ;;  %v1615_v23 = vld [vmem:[%s3157_s0 + $0x128] sm:$0xff]  ;;  %v1641_v29 = vld [vmem:[%s3157_s0 + $0x120] sm:$0xff] }
   0x8   :  { %v1620_v24 = vld [vmem:[%s3157_s0 + $0x50] sm:$0xff]  ;;  %v1624_v25 = vmul.f32 %v1552_v10, %v1610_v22  ;;  %v1628_v26 = vmul.f32 %v1557_v11, %v1610_v22  ;;  %v1632_v27 = vmul.f32 %v1552_v10, %v1615_v23  ;;  %v1636_v28 = vmul.f32 %v1557_v11, %v1615_v23  ;;  %v1646_v30 = vld [vmem:[%s3157_s0 + $0x138] sm:$0xff]  ;;  %v1672_v36 = vld [vmem:[%s3157_s0 + $0x148] sm:$0xff] }
   0x9   :  { %v1650_v31 = vmul.f32 %v1552_v10, %v1641_v29  ;;  %v1654_v32 = vmul.f32 %v1557_v11, %v1641_v29  ;;  %v1658_v33 = vmul.f32 %v1552_v10, %v1646_v30  ;;  %v1662_v34 = vmul.f32 %v1557_v11, %v1646_v30  ;;  %v1667_v35 = vld [vmem:[%s3157_s0 + $0x130] sm:$0xff]  ;;  %v52_v41 = vld [vmem:[%s3157_s0 + $0x140] sm:$0xff]  ;;  %v55_v42 = vld [vmem:[%s3157_s0 + $0x158] sm:$0xff] }
   0xa   :  { %228 = vrot.lane.b32.xlu1 %v1514_v4, %s1464_s11  ;;  %226 = vrot.lane.b32.xlu0 %v1519_v5, %s1464_s11  ;;  %3219 = vst [vmem:[#allocation5_spill] sm:$0xff] %v1624_v25  ;;  %3220 = vst [vmem:[#allocation6_spill] sm:$0xff] %v1628_v26  ;;  %v1678_v37 = vmul.f32 %v1552_v10, %v1667_v35  ;;  %v1682_v38 = vmul.f32 %v1557_v11, %v1667_v35  ;;  %v1703_v43 = vld [vmem:[%s3157_s0 + $0x68] sm:$0xff]  ;;  %v54_v48 = vld [vmem:[%s3157_s0 + $0x150] sm:$0xff] }
   0xb   :  { %3221 = vst [vmem:[#allocation7_spill] sm:$0xff] %v1632_v27  ;;  %3222 = vst [vmem:[#allocation8_spill] sm:$0xff] %v1636_v28  ;;  %v1686_v39 = vmul.f32 %v1552_v10, %v1672_v36  ;;  %v1690_v40 = vmul.f32 %v1557_v11, %v1672_v36  ;;  %v1706_v44 = vmul.f32 %v1552_v10, %v52_v41  ;;  %v1723_v49 = vld [vmem:[%s3157_s0 + $0x60] sm:$0xff] }
   0xc   :  { %3223 = vst [vmem:[#allocation9_spill] sm:$0xff] %v1650_v31  ;;  %3224 = vst [vmem:[#allocation10_spill] sm:$0xff] %v1654_v32  ;;  %v1709_v45 = vmul.f32 %v1557_v11, %v52_v41  ;;  %v1712_v46 = vmul.f32 %v1552_v10, %v55_v42  ;;  %v1715_v47 = vmul.f32 %v1557_v11, %v55_v42 }
   0xd   :  { %3225 = vst [vmem:[#allocation11_spill] sm:$0xff] %v1658_v33  ;;  %3226 = vst [vmem:[#allocation12_spill] sm:$0xff] %v1662_v34  ;;  %v1726_v50 = vmul.f32 %v1552_v10, %v54_v48  ;;  %v1729_v51 = vmul.f32 %v1557_v11, %v54_v48 }
   0xe   :  { %232 = vrot.lane.b32.xlu1 %v1528_v6, %s1464_s11  ;;  %230 = vrot.lane.b32.xlu0 %v1533_v7, %s1464_s11  ;;  %3227 = vst [vmem:[#allocation13_spill] sm:$0xff] %v1678_v37  ;;  %3228 = vst [vmem:[#allocation14_spill] sm:$0xff] %v1682_v38 }
   0xf   :  { %3229 = vst [vmem:[#allocation15_spill] sm:$0xff] %v1686_v39  ;;  %3230 = vst [vmem:[#allocation16_spill] sm:$0xff] %v1690_v40 }
  0x10   :  { %3231 = vst [vmem:[#allocation17_spill] sm:$0xff] %v1706_v44  ;;  %3232 = vst [vmem:[#allocation18_spill] sm:$0xff] %v1709_v45 }
  0x11   :  { %3233 = vst [vmem:[#allocation19_spill] sm:$0xff] %v1712_v46  ;;  %3234 = vst [vmem:[#allocation20_spill] sm:$0xff] %v1715_v47 }
  0x12   :  { %236 = vrot.lane.b32.xlu1 %v1542_v8, %s1464_s11  ;;  %234 = vrot.lane.b32.xlu0 %v1547_v9, %s1464_s11  ;;  %3235 = vst [vmem:[#allocation21_spill] sm:$0xff] %v1726_v50  ;;  %3236 = vst [vmem:[#allocation22_spill] sm:$0xff] %v1729_v51 }
  0x16   :  { %240 = vrot.lane.b32.xlu1 %v1589_v17, %s1464_s11  ;;  %238 = vrot.lane.b32.xlu0 %v1620_v24, %s1464_s11 }
  0x17   :  { %7 = vsyncpa [#allocation3], 0  ;;  %v1738_v52 = vld [vmem:[%s3157_s0 + $0x78] sm:$0xff]  ;;  %v1743_v53 = vld [vmem:[%s3157_s0 + $0x70] sm:$0xff]  ;;  %v613_v38 = vmul.f32 %v1557_v11, %v1500_v2  ;;  %v611_v37 = vmul.f32 %v1557_v11, %v1505_v3  ;;  %vm1258_vm0 = vcmask 64512   ;;  %vm1323_vm1 = vcmask 130048  }
  0x18   :  { %v1752_v54 = vld [vmem:[%s3157_s0 + $0x88] sm:$0xff]  ;;  %v1757_v55 = vld [vmem:[%s3157_s0 + $0x80] sm:$0xff]  ;;  %v1766_v56 = vld [vmem:[%s3157_s0 + $0x98] sm:$0xff] }
  0x19   :  { %v1771_v57 = vld [vmem:[%s3157_s0 + $0x90] sm:$0xff]  ;;  %v1780_v58 = vld [vmem:[%s3157_s0 + $0xa8] sm:$0xff]  ;;  %v1785_v59 = vld [vmem:[%s3157_s0 + $0xa0] sm:$0xff] }
  0x1a   :  { %244 = vrot.lane.b32.xlu1 %v1703_v43, %s1464_s11  ;;  %242 = vrot.lane.b32.xlu0 %v1723_v49, %s1464_s11  ;;  %v1794_v60 = vld [vmem:[%s3157_s0 + $0xb8] sm:$0xff]  ;;  %v1799_v61 = vld [vmem:[%s3157_s0 + $0xb0] sm:$0xff] }
  0x1b   :  { %v1808_v62 = vld [vmem:[%s3157_s0 + $0xc8] sm:$0xff]  ;;  %v1813_v63 = vld [vmem:[%s3157_s0 + $0xc0] sm:$0xff]  ;;  %v1822_v51 = vld [vmem:[%s3157_s0 + $0xd8] sm:$0xff] }
  0x1c   :  { %v1827_v50 = vld [vmem:[%s3157_s0 + $0xd0] sm:$0xff]  ;;  %v1836_v47 = vld [vmem:[%s3157_s0 + $0xe8] sm:$0xff]  ;;  %v1841_v46 = vld [vmem:[%s3157_s0 + $0xe0] sm:$0xff] }
  0x1d   :  { %v1850_v45 = vld [vmem:[%s3157_s0 + $0xf8] sm:$0xff]  ;;  %v1855_v44 = vld [vmem:[%s3157_s0 + $0xf0] sm:$0xff]  ;;  %v2038_v31 = vld [vmem:[%s3158_s1 + $0x5] ss:$0 sm:$0xff] }
  0x1e   :  { %248 = vrot.lane.b32.xlu1 %v1738_v52, %s1464_s11  ;;  %246 = vrot.lane.b32.xlu0 %v1743_v53, %s1464_s11  ;;  %v1995_v39 = vld [vmem:[%s3157_s0 + $0x1d0] sm:$0xff] }
  0x1f   :  { %3251 = vst [vmem:[#allocation37_spill] sm:$0xff] %v1995_v39 }
  0x22   :  { %252 = vrot.lane.b32.xlu1 %v1752_v54, %s1464_s11  ;;  %250 = vrot.lane.b32.xlu0 %v1757_v55, %s1464_s11 }
  0x26   :  { %256 = vrot.lane.b32.xlu1 %v1766_v56, %s1464_s11  ;;  %254 = vrot.lane.b32.xlu0 %v1771_v57, %s1464_s11 }
  0x2a   :  { %260 = vrot.lane.b32.xlu1 %v1780_v58, %s1464_s11  ;;  %258 = vrot.lane.b32.xlu0 %v1785_v59, %s1464_s11 }
  0x2e   :  { %264 = vrot.lane.b32.xlu1 %v1794_v60, %s1464_s11  ;;  %262 = vrot.lane.b32.xlu0 %v1799_v61, %s1464_s11 }
  0x32   :  { %268 = vrot.lane.b32.xlu1 %v1808_v62, %s1464_s11  ;;  %266 = vrot.lane.b32.xlu0 %v1813_v63, %s1464_s11 }
  0x36   :  { %272 = vrot.lane.b32.xlu1 %v1822_v51, %s1464_s11  ;;  %270 = vrot.lane.b32.xlu0 %v1827_v50, %s1464_s11 }
  0x3a   :  { %276 = vrot.lane.b32.xlu1 %v1836_v47, %s1464_s11  ;;  %274 = vrot.lane.b32.xlu0 %v1841_v46, %s1464_s11 }
  0x3e   :  { %280 = vrot.lane.b32.xlu1 %v1850_v45, %s1464_s11  ;;  %278 = vrot.lane.b32.xlu0 %v1855_v44, %s1464_s11 }
  0x42   :  { %284 = vrot.lane.b32.xlu1 %v1562_v12, %s1464_s11  ;;  %282 = vrot.lane.b32.xlu0 %v1577_v15, %s1464_s11  ;;  %v1885_v12 = vld [vmem:[%s3157_s0 + $0x168] sm:$0xff]  ;;  %v1890_v15 = vld [vmem:[%s3157_s0 + $0x160] sm:$0xff] }
  0x46   :  { %288 = vrot.lane.b32.xlu1 %v1582_v16, %s1464_s11  ;;  %286 = vrot.lane.b32.xlu0 %v1610_v22, %s1464_s11  ;;  %v1899_v16 = vld [vmem:[%s3157_s0 + $0x178] sm:$0xff]  ;;  %v1904_v22 = vld [vmem:[%s3157_s0 + $0x170] sm:$0xff] }
  0x47   :  { %3237 = vst [vmem:[#allocation23_spill] sm:$0xff] %v1899_v16  ;;  %3238 = vst [vmem:[#allocation24_spill] sm:$0xff] %v1904_v22 }
  0x4a   :  { %292 = vrot.lane.b32.xlu1 %v1615_v23, %s1464_s11  ;;  %290 = vrot.lane.b32.xlu0 %v1641_v29, %s1464_s11  ;;  %v1913_v23 = vld [vmem:[%s3157_s0 + $0x188] sm:$0xff]  ;;  %v1918_v29 = vld [vmem:[%s3157_s0 + $0x180] sm:$0xff] }
  0x4b   :  { %3239 = vst [vmem:[#allocation25_spill] sm:$0xff] %v1913_v23  ;;  %3240 = vst [vmem:[#allocation26_spill] sm:$0xff] %v1918_v29 }
  0x4e   :  { %296 = vrot.lane.b32.xlu1 %v1646_v30, %s1464_s11  ;;  %294 = vrot.lane.b32.xlu0 %v1667_v35, %s1464_s11  ;;  %v1927_v30 = vld [vmem:[%s3157_s0 + $0x198] sm:$0xff]  ;;  %v1932_v35 = vld [vmem:[%s3157_s0 + $0x190] sm:$0xff] }
  0x4f   :  { %3241 = vst [vmem:[#allocation27_spill] sm:$0xff] %v1927_v30  ;;  %3242 = vst [vmem:[#allocation28_spill] sm:$0xff] %v1932_v35 }
  0x52   :  { %300 = vrot.lane.b32.xlu1 %v1672_v36, %s1464_s11  ;;  %298 = vrot.lane.b32.xlu0 %v52_v41, %s1464_s11  ;;  %v1941_v36 = vld [vmem:[%s3157_s0 + $0x1a8] sm:$0xff]  ;;  %v1946_v41 = vld [vmem:[%s3157_s0 + $0x1a0] sm:$0xff] }
  0x53   :  { %3243 = vst [vmem:[#allocation29_spill] sm:$0xff] %v1941_v36  ;;  %3244 = vst [vmem:[#allocation30_spill] sm:$0xff] %v1946_v41 }
  0x56   :  { %304 = vrot.lane.b32.xlu1 %v55_v42, %s1464_s11  ;;  %302 = vrot.lane.b32.xlu0 %v54_v48, %s1464_s11  ;;  %v1955_v42 = vld [vmem:[%s3157_s0 + $0x1b8] sm:$0xff]  ;;  %v1960_v48 = vld [vmem:[%s3157_s0 + $0x1b0] sm:$0xff] }
  0x57   :  { %3245 = vst [vmem:[#allocation31_spill] sm:$0xff] %v1955_v42  ;;  %3246 = vst [vmem:[#allocation32_spill] sm:$0xff] %v1960_v48 }
  0x5a   :  { %308 = vrot.lane.b32.xlu1 %v1885_v12, %s1464_s11  ;;  %306 = vrot.lane.b32.xlu0 %v1890_v15, %s1464_s11 }
  0x5e   :  { %312 = vrot.lane.b32.xlu1 %v1899_v16, %s1464_s11  ;;  %310 = vrot.lane.b32.xlu0 %v1904_v22, %s1464_s11 }
  0x62   :  { %316 = vrot.lane.b32.xlu1 %v1913_v23, %s1464_s11  ;;  %314 = vrot.lane.b32.xlu0 %v1918_v29, %s1464_s11 }
  0x66   :  { %320 = vrot.lane.b32.xlu1 %v1927_v30, %s1464_s11  ;;  %318 = vrot.lane.b32.xlu0 %v1932_v35, %s1464_s11  ;;  %v2010_v30 = vld [vmem:[%s3157_s0 + $0x1e8] sm:$0xff] }
  0x67   :  { %3253 = vst [vmem:[#allocation39_spill] sm:$0xff] %v2010_v30 }
  0x6a   :  { %324 = vrot.lane.b32.xlu1 %v1941_v36, %s1464_s11  ;;  %322 = vrot.lane.b32.xlu0 %v1946_v41, %s1464_s11  ;;  %v1969_v41 = vld [vmem:[%s3157_s0 + $0x1c8] sm:$0xff]  ;;  %v1974_v36 = vld [vmem:[%s3157_s0 + $0x1c0] sm:$0xff] }
  0x6b   :  { %3247 = vst [vmem:[#allocation33_spill] sm:$0xff] %v1969_v41  ;;  %3248 = vst [vmem:[#allocation34_spill] sm:$0xff] %v1974_v36 }
  0x6e   :  { %328 = vrot.lane.b32.xlu1 %v1955_v42, %s1464_s11  ;;  %326 = vrot.lane.b32.xlu0 %v1960_v48, %s1464_s11  ;;  %v1983_v48 = vld [vmem:[%s3158_s1 + $0x3] ss:$0 sm:$0xff]  ;;  %v1988_v42 = vld [vmem:[%s3157_s0 + $0x1d8] sm:$0xff] }
  0x6f   :  { %3249 = vst [vmem:[#allocation35_spill] sm:$0xff] %v1988_v42 }
  0x72   :  { %332 = vrot.lane.b32.xlu1 %v1969_v41, %s1464_s11  ;;  %330 = vrot.lane.b32.xlu0 %v1974_v36, %s1464_s11  ;;  %v610_v36 = vmul.f32 %v1557_v11, %v1493_v1 }
  0x74   :  { %v1990_v40 = vpop.permute.xlu1 %222  ;;  %v1999_v41 = vpop.permute.xlu0 %218 }
  0x75   :  { %3250 = vst [vmem:[#allocation36_spill] sm:$0xff] %v1990_v40  ;;  %3252 = vst [vmem:[#allocation38_spill] sm:$0xff] %v1999_v41  ;;  %v678_v35 = vmul.f32 %v1983_v48, %v1999_v41  ;;  %v2021_v41 = vld [vmem:[%s3157_s0 + $0x1e0] sm:$0xff] }
  0x76   :  { %336 = vrot.lane.b32.xlu1 %v1988_v42, %s1464_s11  ;;  %334 = vrot.lane.b32.xlu0 %v1995_v39, %s1464_s11  ;;  %3255 = vst [vmem:[#allocation41_spill] sm:$0xff] %v2021_v41  ;;  %v612_v39 = vmul.f32 %v1557_v11, %v1486_v0  ;;  %v680_v42 = vmul.f32 %v1983_v48, %v1990_v40 }
  0x77   :  { %v742_v33 = vadd.f32 %v678_v35, %v610_v36  ;;  %v2045_v35 = vld [vmem:[%s3157_s0 + $0x1f8] sm:$0xff]  ;;  %v615_v36 = vmul.f32 %v1557_v11, %v1514_v4 }
  0x78   :  { %v2016_v34 = vpop.permute.xlu1 %224  ;;  %v2029_v23 = vpop.permute.xlu0 %220  ;;  %3257 = vst [vmem:[#allocation43_spill] sm:$0xff] %v2045_v35  ;;  %v744_v28 = vadd.f32 %v680_v42, %v612_v39  ;;  %v616_v39 = vmul.f32 %v1557_v11, %v1533_v7 }
  0x79   :  { %3254 = vst [vmem:[#allocation40_spill] sm:$0xff] %v2016_v34  ;;  %v681_v29 = vmul.f32 %v1983_v48, %v2016_v34  ;;  %3256 = vst [vmem:[#allocation42_spill] sm:$0xff] %v2029_v23  ;;  %v679_v32 = vmul.f32 %v1983_v48, %v2029_v23  ;;  %v810_v16 = vadd.f32 %v2038_v31, %v742_v33 }
  0x7a   :  { %340 = vrot.lane.b32.xlu1 %v2010_v30, %s1464_s11  ;;  %338 = vrot.lane.b32.xlu0 %v2021_v41, %s1464_s11  ;;  %v2054_v30 = vld [vmem:[%s3157_s0 + $0x1f0] sm:$0xff]  ;;  %v614_v41 = vmul.f32 %v1557_v11, %v1519_v5  ;;  %v812_v25 = vadd.f32 %v2038_v31, %v744_v28 }
  0x7b   :  { %v745_v23 = vadd.f32 %v681_v29, %v613_v38  ;;  %v743_v34 = vadd.f32 %v679_v32, %v611_v37  ;;  %3259 = vst [vmem:[#allocation45_spill] sm:$0xff] %v2054_v30  ;;  %v617_v38 = vmul.f32 %v1557_v11, %v1528_v6  ;;  %v938_v26 = vmax.f32 %v810_v16, 0.0 }
  0x7c   :  { %v2049_v40 = vpop.permute.xlu1 %228  ;;  %v2060_v22 = vpop.permute.xlu0 %226 }
  0x7d   :  { %3258 = vst [vmem:[#allocation44_spill] sm:$0xff] %v2049_v40  ;;  %v683_v27 = vmul.f32 %v1983_v48, %v2049_v40  ;;  %3260 = vst [vmem:[#allocation46_spill] sm:$0xff] %v2060_v22  ;;  %v682_v32 = vmul.f32 %v1983_v48, %v2060_v22  ;;  %v811_v37 = vadd.f32 %v2038_v31, %v743_v34 }
  0x7e   :  { %344 = vrot.lane.b32.xlu1 %v2045_v35, %s1464_s11  ;;  %342 = vrot.lane.b32.xlu0 %v2054_v30, %s1464_s11  ;;  %v813_v22 = vadd.f32 %v2038_v31, %v745_v23  ;;  %s1465_s11 = smov 8   ;;  %v618_v23 = vmul.f32 %v1557_v11, %v1547_v9  ;;  %v621_v9 = vmul.f32 %v1557_v11, %v1589_v17 }
  0x7f   :  { %v747_v29 = vadd.f32 %v683_v27, %v615_v36  ;;  %v939_v33 = vmax.f32 %v811_v37, 0.0  ;;  %v746_v40 = vadd.f32 %v682_v32, %v614_v41  ;;  %v619_v27 = vmul.f32 %v1557_v11, %v1542_v8 }
  0x80   :  { %v2074_v42 = vpop.permute.xlu1 %232  ;;  %v2079_v34 = vpop.permute.xlu0 %230  ;;  %v941_v16 = vmax.f32 %v813_v22, 0.0  ;;  %v620_v22 = vmul.f32 %v1557_v11, %v1620_v24  ;;  %v623_v24 = vmul.f32 %v1557_v11, %v1703_v43 }
  0x81   :  { %3261 = vst [vmem:[#allocation47_spill] sm:$0xff] %v2074_v42  ;;  %v685_v35 = vmul.f32 %v1983_v48, %v2074_v42  ;;  %3262 = vst [vmem:[#allocation48_spill] sm:$0xff] %v2079_v34  ;;  %v684_v30 = vmul.f32 %v1983_v48, %v2079_v34  ;;  %v815_v28 = vadd.f32 %v2038_v31, %v747_v29 }
  0x82   :  { %1068 = vrot.lane.b32.xlu1 %v939_v33, %s1465_s11  ;;  %1066 = vrot.lane.b32.xlu0 %v938_v26, %s1465_s11  ;;  %v940_v33 = vmax.f32 %v812_v25, 0.0  ;;  %v814_v42 = vadd.f32 %v2038_v31, %v746_v40 }
  0x83   :  { %v749_v41 = vadd.f32 %v685_v35, %v617_v38  ;;  %v748_v32 = vadd.f32 %v684_v30, %v616_v39  ;;  %v943_v38 = vmax.f32 %v815_v28, 0.0 }
  0x84   :  { %v2090_v36 = vpop.permute.xlu1 %236  ;;  %v2095_v34 = vpop.permute.xlu0 %234 }
  0x85   :  { %v687_v37 = vmul.f32 %v1983_v48, %v2090_v36  ;;  %v686_v26 = vmul.f32 %v1983_v48, %v2095_v34  ;;  %v817_v25 = vadd.f32 %v2038_v31, %v749_v41  ;;  %v816_v17 = vadd.f32 %v2038_v31, %v748_v32 }
  0x86   :  { %1072 = vrot.lane.b32.xlu1 %v941_v16, %s1465_s11  ;;  %1070 = vrot.lane.b32.xlu0 %v940_v33, %s1465_s11  ;;  %v942_v16 = vmax.f32 %v814_v42, 0.0 }
  0x87   :  { %v751_v30 = vadd.f32 %v687_v37, %v619_v27  ;;  %v750_v40 = vadd.f32 %v686_v26, %v618_v23  ;;  %v622_v27 = vmul.f32 %v1557_v11, %v1723_v49  ;;  %v945_v28 = vmax.f32 %v817_v25, 0.0 }
  0x88   :  { %v2106_v35 = vpop.permute.xlu1 %240  ;;  %v2111_v29 = vpop.permute.xlu0 %238  ;;  %v625_v49 = vmul.f32 %v1557_v11, %v1738_v52 }
  0x89   :  { %v689_v39 = vmul.f32 %v1983_v48, %v2106_v35  ;;  %v688_v33 = vmul.f32 %v1983_v48, %v2111_v29  ;;  %v819_v42 = vadd.f32 %v2038_v31, %v751_v30  ;;  %v818_v43 = vadd.f32 %v2038_v31, %v750_v40 }
  0x8a   :  { %1076 = vrot.lane.b32.xlu1 %v943_v38, %s1465_s11  ;;  %1074 = vrot.lane.b32.xlu0 %v942_v16, %s1465_s11  ;;  %v944_v38 = vmax.f32 %v816_v17, 0.0 }
  0x8b   :  { %v753_v23 = vadd.f32 %v689_v39, %v621_v9  ;;  %v752_v32 = vadd.f32 %v688_v33, %v620_v22  ;;  %v624_v9 = vmul.f32 %v1557_v11, %v1743_v53  ;;  %v947_v25 = vmax.f32 %v819_v42, 0.0 }
  0x8c   :  { %v2122_v41 = vpop.permute.xlu1 %244  ;;  %v2127_v26 = vpop.permute.xlu0 %242  ;;  %v627_v53 = vmul.f32 %v1557_v11, %v1752_v54 }
  0x8d   :  { %v691_v37 = vmul.f32 %v1983_v48, %v2122_v41  ;;  %v690_v16 = vmul.f32 %v1983_v48, %v2127_v26  ;;  %v821_v39 = vadd.f32 %v2038_v31, %v753_v23  ;;  %v820_v52 = vadd.f32 %v2038_v31, %v752_v32 }
  0x8e   :  { %1080 = vrot.lane.b32.xlu1 %v945_v28, %s1465_s11  ;;  %1078 = vrot.lane.b32.xlu0 %v944_v38, %s1465_s11  ;;  %v946_v28 = vmax.f32 %v818_v43, 0.0 }
  0x8f   :  { %v755_v22 = vadd.f32 %v691_v37, %v623_v24  ;;  %v754_v40 = vadd.f32 %v690_v16, %v622_v27  ;;  %v626_v24 = vmul.f32 %v1557_v11, %v1757_v55  ;;  %v949_v42 = vmax.f32 %v821_v39, 0.0 }
  0x90   :  { %v2138_v30 = vpop.permute.xlu1 %248  ;;  %v2143_v33 = vpop.permute.xlu0 %246  ;;  %v629_v55 = vmul.f32 %v1557_v11, %v1766_v56 }
  0x91   :  { %v693_v17 = vmul.f32 %v1983_v48, %v2138_v30  ;;  %3263 = vst [vmem:[#allocation49_spill] sm:$0xff] %v2143_v33  ;;  %v692_v38 = vmul.f32 %v1983_v48, %v2143_v33  ;;  %v823_v37 = vadd.f32 %v2038_v31, %v755_v22  ;;  %v822_v54 = vadd.f32 %v2038_v31, %v754_v40 }
  0x92   :  { %1084 = vrot.lane.b32.xlu1 %v947_v25, %s1465_s11  ;;  %1082 = vrot.lane.b32.xlu0 %v946_v28, %s1465_s11  ;;  %v948_v25 = vmax.f32 %v820_v52, 0.0 }
  0x93   :  { %v757_v27 = vadd.f32 %v693_v17, %v625_v49  ;;  %v756_v32 = vadd.f32 %v692_v38, %v624_v9  ;;  %v628_v49 = vmul.f32 %v1557_v11, %v1771_v57  ;;  %v951_v39 = vmax.f32 %v823_v37, 0.0 }
  0x94   :  { %v2154_v23 = vpop.permute.xlu1 %252  ;;  %v2159_v16 = vpop.permute.xlu0 %250  ;;  %v631_v57 = vmul.f32 %v1557_v11, %v1780_v58 }
  0x95   :  { %3264 = vst [vmem:[#allocation50_spill] sm:$0xff] %v2154_v23  ;;  %v695_v43 = vmul.f32 %v1983_v48, %v2154_v23  ;;  %3265 = vst [vmem:[#allocation51_spill] sm:$0xff] %v2159_v16  ;;  %v694_v28 = vmul.f32 %v1983_v48, %v2159_v16  ;;  %v825_v17 = vadd.f32 %v2038_v31, %v757_v27  ;;  %v3317_v16 = vld [vmem:[#allocation22_spill] sm:$0xff] }
  0x96   :  { %1088 = vrot.lane.b32.xlu1 %v949_v42, %s1465_s11  ;;  %1086 = vrot.lane.b32.xlu0 %v948_v25, %s1465_s11  ;;  %v950_v42 = vmax.f32 %v822_v54, 0.0  ;;  %v824_v56 = vadd.f32 %v2038_v31, %v756_v32 }
  0x97   :  { %v759_v9 = vadd.f32 %v695_v43, %v627_v53  ;;  %v758_v40 = vadd.f32 %v694_v28, %v626_v24  ;;  %v630_v53 = vmul.f32 %v1557_v11, %v1785_v59  ;;  %v953_v37 = vmax.f32 %v825_v17, 0.0 }
  0x98   :  { %v2170_v22 = vpop.permute.xlu1 %256  ;;  %v2175_v38 = vpop.permute.xlu0 %254  ;;  %v633_v59 = vmul.f32 %v1557_v11, %v1794_v60 }
  0x99   :  { %3266 = vst [vmem:[#allocation52_spill] sm:$0xff] %v2170_v22  ;;  %v697_v52 = vmul.f32 %v1983_v48, %v2170_v22  ;;  %3267 = vst [vmem:[#allocation53_spill] sm:$0xff] %v2175_v38  ;;  %v696_v25 = vmul.f32 %v1983_v48, %v2175_v38  ;;  %v827_v43 = vadd.f32 %v2038_v31, %v759_v9 }
  0x9a   :  { %1092 = vrot.lane.b32.xlu1 %v951_v39, %s1465_s11  ;;  %1090 = vrot.lane.b32.xlu0 %v950_v42, %s1465_s11  ;;  %v952_v39 = vmax.f32 %v824_v56, 0.0  ;;  %v826_v58 = vadd.f32 %v2038_v31, %v758_v40 }
  0x9b   :  { %v761_v24 = vadd.f32 %v697_v52, %v629_v55  ;;  %v760_v32 = vadd.f32 %v696_v25, %v628_v49  ;;  %v632_v55 = vmul.f32 %v1557_v11, %v1799_v61  ;;  %v955_v17 = vmax.f32 %v827_v43, 0.0 }
  0x9c   :  { %v2186_v27 = vpop.permute.xlu1 %260  ;;  %v2191_v28 = vpop.permute.xlu0 %258  ;;  %v635_v61 = vmul.f32 %v1557_v11, %v1808_v62 }
  0x9d   :  { %3268 = vst [vmem:[#allocation54_spill] sm:$0xff] %v2186_v27  ;;  %v699_v54 = vmul.f32 %v1983_v48, %v2186_v27  ;;  %3269 = vst [vmem:[#allocation55_spill] sm:$0xff] %v2191_v28  ;;  %v698_v42 = vmul.f32 %v1983_v48, %v2191_v28  ;;  %v829_v52 = vadd.f32 %v2038_v31, %v761_v24  ;;  %v3309_v28 = vld [vmem:[#allocation18_spill] sm:$0xff] }
  0x9e   :  { %1096 = vrot.lane.b32.xlu1 %v953_v37, %s1465_s11  ;;  %1094 = vrot.lane.b32.xlu0 %v952_v39, %s1465_s11  ;;  %v954_v37 = vmax.f32 %v826_v58, 0.0  ;;  %v828_v60 = vadd.f32 %v2038_v31, %v760_v32 }
  0x9f   :  { %v763_v49 = vadd.f32 %v699_v54, %v631_v57  ;;  %v762_v40 = vadd.f32 %v698_v42, %v630_v53  ;;  %v634_v57 = vmul.f32 %v1557_v11, %v1813_v63  ;;  %v957_v43 = vmax.f32 %v829_v52, 0.0 }
  0xa0   :  { %v2202_v9 = vpop.permute.xlu1 %264  ;;  %v2207_v25 = vpop.permute.xlu0 %262  ;;  %v637_v63 = vmul.f32 %v1557_v11, %v1822_v51 }
  0xa1   :  { %3270 = vst [vmem:[#allocation56_spill] sm:$0xff] %v2202_v9  ;;  %v701_v56 = vmul.f32 %v1983_v48, %v2202_v9  ;;  %3271 = vst [vmem:[#allocation57_spill] sm:$0xff] %v2207_v25  ;;  %v700_v39 = vmul.f32 %v1983_v48, %v2207_v25  ;;  %v831_v54 = vadd.f32 %v2038_v31, %v763_v49 }
  0xa2   :  { %1100 = vrot.lane.b32.xlu1 %v955_v17, %s1465_s11  ;;  %1098 = vrot.lane.b32.xlu0 %v954_v37, %s1465_s11  ;;  %v956_v17 = vmax.f32 %v828_v60, 0.0  ;;  %v830_v62 = vadd.f32 %v2038_v31, %v762_v40 }
  0xa3   :  { %v765_v53 = vadd.f32 %v701_v56, %v633_v59  ;;  %v764_v32 = vadd.f32 %v700_v39, %v632_v55  ;;  %v636_v59 = vmul.f32 %v1557_v11, %v1827_v50  ;;  %v959_v52 = vmax.f32 %v831_v54, 0.0 }
  0xa4   :  { %v2218_v24 = vpop.permute.xlu1 %268  ;;  %v2223_v42 = vpop.permute.xlu0 %266 }
  0xa5   :  { %3272 = vst [vmem:[#allocation58_spill] sm:$0xff] %v2218_v24  ;;  %v703_v58 = vmul.f32 %v1983_v48, %v2218_v24  ;;  %3273 = vst [vmem:[#allocation59_spill] sm:$0xff] %v2223_v42  ;;  %v702_v37 = vmul.f32 %v1983_v48, %v2223_v42  ;;  %v833_v56 = vadd.f32 %v2038_v31, %v765_v53 }
  0xa6   :  { %1104 = vrot.lane.b32.xlu1 %v957_v43, %s1465_s11  ;;  %1102 = vrot.lane.b32.xlu0 %v956_v17, %s1465_s11  ;;  %v958_v43 = vmax.f32 %v830_v62, 0.0  ;;  %v832_v51 = vadd.f32 %v2038_v31, %v764_v32  ;;  %v638_v32 = vmul.f32 %v1557_v11, %v1841_v46  ;;  %v116_v46 = vmul.f32 %v1552_v10, %v1855_v44 }
  0xa7   :  { %v767_v55 = vadd.f32 %v703_v58, %v635_v61  ;;  %v766_v40 = vadd.f32 %v702_v37, %v634_v57  ;;  %v639_v61 = vmul.f32 %v1557_v11, %v1836_v47  ;;  %v961_v54 = vmax.f32 %v833_v56, 0.0 }
  0xa8   :  { %v2234_v49 = vpop.permute.xlu1 %272  ;;  %v2239_v39 = vpop.permute.xlu0 %270 }
  0xa9   :  { %3274 = vst [vmem:[#allocation60_spill] sm:$0xff] %v2234_v49  ;;  %v705_v60 = vmul.f32 %v1983_v48, %v2234_v49  ;;  %3275 = vst [vmem:[#allocation61_spill] sm:$0xff] %v2239_v39  ;;  %v704_v17 = vmul.f32 %v1983_v48, %v2239_v39  ;;  %v835_v58 = vadd.f32 %v2038_v31, %v767_v55 }
  0xaa   :  { %1108 = vrot.lane.b32.xlu1 %v959_v52, %s1465_s11  ;;  %1106 = vrot.lane.b32.xlu0 %v958_v43, %s1465_s11  ;;  %v834_v52 = vadd.f32 %v2038_v31, %v766_v40  ;;  %v641_v55 = vmul.f32 %v1557_v11, %v1850_v45  ;;  %v640_v40 = vmul.f32 %v1557_v11, %v1855_v44 }
  0xab   :  { %v769_v50 = vadd.f32 %v705_v60, %v637_v63  ;;  %v768_v57 = vadd.f32 %v704_v17, %v636_v59  ;;  %v960_v63 = vmax.f32 %v832_v51, 0.0  ;;  %v117_v59 = vmul.f32 %v1552_v10, %v1850_v45  ;;  %v2274_v60 = vld [vmem:[%s3158_s1 + $0x1] ss:$0 sm:$0xff] }
  0xac   :  { %v2248_v53 = vpop.permute.xlu1 %276  ;;  %v2255_v37 = vpop.permute.xlu0 %274  ;;  %v963_v17 = vmax.f32 %v835_v58, 0.0  ;;  %v2281_v44 = vmul.f32 %v1552_v10, %v1486_v0  ;;  %v2285_v39 = vmul.f32 %v1552_v10, %v1493_v1 }
  0xad   :  { %3276 = vst [vmem:[#allocation62_spill] sm:$0xff] %v2248_v53  ;;  %v707_v62 = vmul.f32 %v1983_v48, %v2248_v53  ;;  %3277 = vst [vmem:[#allocation63_spill] sm:$0xff] %v2255_v37  ;;  %v706_v47 = vmul.f32 %v1983_v48, %v2255_v37  ;;  %v837_v56 = vadd.f32 %v2038_v31, %v769_v50  ;;  %v962_v50 = vmax.f32 %v834_v52, 0.0 }
  0xae   :  { %1112 = vrot.lane.b32.xlu1 %v961_v54, %s1465_s11  ;;  %1110 = vrot.lane.b32.xlu0 %v960_v63, %s1465_s11  ;;  %v836_v45 = vadd.f32 %v2038_v31, %v768_v57  ;;  %v2292_v57 = vmul.f32 %v1552_v10, %v1500_v2 }
  0xaf   :  { %v771_v43 = vadd.f32 %v707_v62, %v639_v61  ;;  %v770_v54 = vadd.f32 %v706_v47, %v638_v32  ;;  %v2296_v32 = vmul.f32 %v1552_v10, %v1505_v3  ;;  %v965_v1 = vmax.f32 %v837_v56, 0.0 }
  0xb0   :  { %v281_v51 = vpop.permute.xlu1 %280  ;;  %v279_v53 = vpop.permute.xlu0 %278  ;;  %v2320_v56 = vmul.f32 %v1552_v10, %v1528_v6 }
  0xb1   :  { %v441_v37 = vmul.f32 %v2274_v60, %v281_v51  ;;  %v709_v63 = vmul.f32 %v1983_v48, %v281_v51  ;;  %v440_v61 = vmul.f32 %v2274_v60, %v279_v53  ;;  %v708_v58 = vmul.f32 %v1983_v48, %v279_v53 }
  0xb2   :  { %1116 = vrot.lane.b32.xlu1 %v963_v17, %s1465_s11  ;;  %1114 = vrot.lane.b32.xlu0 %v962_v50, %s1465_s11  ;;  %v964_v53 = vmax.f32 %v836_v45, 0.0  ;;  %v839_v51 = vadd.f32 %v2038_v31, %v771_v43  ;;  %v838_v3 = vadd.f32 %v2038_v31, %v770_v54 }
  0xb3   :  { %v2298_v0 = vadd.f32 %v441_v37, %v117_v59  ;;  %v773_v62 = vadd.f32 %v709_v63, %v641_v55  ;;  %v2301_v52 = vadd.f32 %v440_v61, %v116_v46  ;;  %v772_v17 = vadd.f32 %v708_v58, %v640_v40 }
  0xb4   :  { %v285_v47 = vpop.permute.xlu1 %284  ;;  %v283_v42 = vpop.permute.xlu0 %282  ;;  %v2309_v37 = vmul.f32 %v1552_v10, %v1514_v4  ;;  %v2313_v59 = vmul.f32 %v1552_v10, %v1519_v5  ;;  %v2324_v40 = vmul.f32 %v1552_v10, %v1533_v7  ;;  %v967_v54 = vmax.f32 %v839_v51, 0.0 }
  0xb5   :  { %3278 = vst [vmem:[#allocation64_spill] sm:$0xff] %v2298_v0  ;;  %3279 = vst [vmem:[#allocation65_spill] sm:$0xff] %v2301_v52  ;;  %v443_v2 = vmul.f32 %v2274_v60, %v285_v47  ;;  %v711_v49 = vmul.f32 %v1983_v48, %v285_v47  ;;  %v442_v55 = vmul.f32 %v2274_v60, %v283_v42 }
  0xb6   :  { %v710_v46 = vmul.f32 %v1983_v48, %v283_v42  ;;  %1120 = vrot.lane.b32.xlu1 %v965_v1, %s1465_s11  ;;  %1118 = vrot.lane.b32.xlu0 %v964_v53, %s1465_s11  ;;  %v841_v6 = vadd.f32 %v2038_v31, %v773_v62  ;;  %v840_v61 = vadd.f32 %v2038_v31, %v772_v17  ;;  %v3283_v53 = vld [vmem:[#allocation5_spill] sm:$0xff] }
  0xb7   :  { %v2327_v4 = vadd.f32 %v443_v2, %v1568_v13  ;;  %v775_v5 = vadd.f32 %v711_v49, %v1572_v14  ;;  %v2332_v43 = vadd.f32 %v442_v55, %v1593_v18  ;;  %v966_v13 = vmax.f32 %v838_v3, 0.0  ;;  %v3285_v3 = vld [vmem:[#allocation6_spill] sm:$0xff] }
  0xb8   :  { %v774_v42 = vadd.f32 %v710_v46, %v1597_v19  ;;  %v289_v45 = vpop.permute.xlu1 %288  ;;  %v287_v50 = vpop.permute.xlu0 %286  ;;  %v2341_v14 = vmul.f32 %v1552_v10, %v1542_v8  ;;  %v2345_v18 = vmul.f32 %v1552_v10, %v1885_v12  ;;  %v2352_v58 = vmul.f32 %v1557_v11, %v1885_v12 }
  0xb9   :  { %3280 = vst [vmem:[#allocation66_spill] sm:$0xff] %v2327_v4  ;;  %3281 = vst [vmem:[#allocation67_spill] sm:$0xff] %v2332_v43  ;;  %v445_v63 = vmul.f32 %v2274_v60, %v289_v45  ;;  %v713_v7 = vmul.f32 %v1983_v48, %v289_v45  ;;  %v444_v19 = vmul.f32 %v2274_v60, %v287_v50  ;;  %v969_v2 = vmax.f32 %v841_v6, 0.0 }
  0xba   :  { %v712_v49 = vmul.f32 %v1983_v48, %v287_v50  ;;  %1124 = vrot.lane.b32.xlu1 %v967_v54, %s1465_s11  ;;  %v2356_v1 = vmul.f32 %v1552_v10, %v1890_v15  ;;  %1122 = vrot.lane.b32.xlu0 %v966_v13, %s1465_s11  ;;  %v843_v62 = vadd.f32 %v2038_v31, %v775_v5  ;;  %v968_v54 = vmax.f32 %v840_v61, 0.0  ;;  %v3287_v50 = vld [vmem:[#allocation24_spill] sm:$0xff] }
  0xbb   :  { %v2359_v8 = vadd.f32 %v445_v63, %v1601_v20  ;;  %v777_v47 = vadd.f32 %v713_v7, %v1605_v21  ;;  %v2365_v51 = vadd.f32 %v444_v19, %v3283_v53  ;;  %v842_v12 = vadd.f32 %v2038_v31, %v774_v42  ;;  %v3286_v21 = vld [vmem:[#allocation23_spill] sm:$0xff]  ;;  %v3290_v53 = vld [vmem:[#allocation8_spill] sm:$0xff] }
  0xbc   :  { %v293_v17 = vpop.permute.xlu1 %292  ;;  %v776_v55 = vadd.f32 %v712_v49, %v3285_v3  ;;  %v291_v45 = vpop.permute.xlu0 %290  ;;  %v2373_v5 = vmul.f32 %v1557_v11, %v1890_v15  ;;  %v2377_v63 = vmul.f32 %v1552_v10, %v3286_v21  ;;  %v2384_v7 = vmul.f32 %v1557_v11, %v3286_v21  ;;  %v3288_v15 = vld [vmem:[#allocation7_spill] sm:$0xff]  ;;  %v3291_v3 = vld [vmem:[#allocation9_spill] sm:$0xff] }
  0xbd   :  { %3282 = vst [vmem:[#allocation68_spill] sm:$0xff] %v2359_v8  ;;  %3284 = vst [vmem:[#allocation5_spill] sm:$0xff] %v2365_v51  ;;  %v447_v46 = vmul.f32 %v2274_v60, %v293_v17  ;;  %v715_v20 = vmul.f32 %v1983_v48, %v293_v17  ;;  %v446_v6 = vmul.f32 %v2274_v60, %v291_v45  ;;  %v971_v19 = vmax.f32 %v843_v62, 0.0  ;;  %v3293_v8 = vld [vmem:[#allocation10_spill] sm:$0xff] }
  0xbe   :  { %v714_v42 = vmul.f32 %v1983_v48, %v291_v45  ;;  %1128 = vrot.lane.b32.xlu1 %v969_v2, %s1465_s11  ;;  %v2388_v13 = vmul.f32 %v1552_v10, %v3287_v50  ;;  %1126 = vrot.lane.b32.xlu0 %v968_v54, %s1465_s11  ;;  %v845_v49 = vadd.f32 %v2038_v31, %v777_v47  ;;  %v970_v21 = vmax.f32 %v842_v12, 0.0  ;;  %v3294_v47 = vld [vmem:[#allocation25_spill] sm:$0xff] }
  0xbf   :  { %v2391_v61 = vadd.f32 %v447_v46, %v3288_v15  ;;  %v779_v17 = vadd.f32 %v715_v20, %v3290_v53  ;;  %v2397_v2 = vadd.f32 %v446_v6, %v3291_v3  ;;  %v844_v51 = vadd.f32 %v2038_v31, %v776_v55  ;;  %v3295_v55 = vld [vmem:[#allocation26_spill] sm:$0xff]  ;;  %v3298_v53 = vld [vmem:[#allocation12_spill] sm:$0xff] }
  0xc0   :  { %v297_v45 = vpop.permute.xlu1 %296  ;;  %v778_v43 = vadd.f32 %v714_v42, %v3293_v8  ;;  %v295_v15 = vpop.permute.xlu0 %294  ;;  %v2405_v62 = vmul.f32 %v1557_v11, %v3287_v50  ;;  %v2409_v20 = vmul.f32 %v1552_v10, %v3294_v47  ;;  %v2416_v8 = vmul.f32 %v1557_v11, %v3294_v47  ;;  %v3296_v42 = vld [vmem:[#allocation11_spill] sm:$0xff] }
  0xc1   :  { %3289 = vst [vmem:[#allocation6_spill] sm:$0xff] %v2391_v61  ;;  %3292 = vst [vmem:[#allocation23_spill] sm:$0xff] %v2397_v2  ;;  %v449_v4 = vmul.f32 %v2274_v60, %v297_v45  ;;  %v717_v46 = vmul.f32 %v1983_v48, %v297_v45  ;;  %v448_v54 = vmul.f32 %v2274_v60, %v295_v15  ;;  %v973_v45 = vmax.f32 %v845_v49, 0.0  ;;  %v3299_v2 = vld [vmem:[#allocation13_spill] sm:$0xff]  ;;  %v3301_v61 = vld [vmem:[#allocation14_spill] sm:$0xff] }
  0xc2   :  { %v716_v12 = vmul.f32 %v1983_v48, %v295_v15  ;;  %1132 = vrot.lane.b32.xlu1 %v971_v19, %s1465_s11  ;;  %v2420_v6 = vmul.f32 %v1552_v10, %v3295_v55  ;;  %1130 = vrot.lane.b32.xlu0 %v970_v21, %s1465_s11  ;;  %v847_v15 = vadd.f32 %v2038_v31, %v779_v17  ;;  %v972_v0 = vmax.f32 %v844_v51, 0.0  ;;  %v3302_v49 = vld [vmem:[#allocation27_spill] sm:$0xff] }
  0xc3   :  { %v2423_v50 = vadd.f32 %v449_v4, %v3296_v42  ;;  %v781_v3 = vadd.f32 %v717_v46, %v3298_v53  ;;  %v2429_v19 = vadd.f32 %v448_v54, %v3299_v2  ;;  %v846_v24 = vadd.f32 %v2038_v31, %v778_v43  ;;  %v3304_v54 = vld [vmem:[#allocation15_spill] sm:$0xff] }
  0xc4   :  { %v780_v47 = vadd.f32 %v716_v12, %v3301_v61  ;;  %v301_v52 = vpop.permute.xlu1 %300  ;;  %v299_v42 = vpop.permute.xlu0 %298  ;;  %v2437_v21 = vmul.f32 %v1557_v11, %v3295_v55  ;;  %v2441_v17 = vmul.f32 %v1552_v10, %v3302_v49  ;;  %v2448_v43 = vmul.f32 %v1557_v11, %v3302_v49 }
  0xc5   :  { %3297 = vst [vmem:[#allocation24_spill] sm:$0xff] %v2423_v50  ;;  %3300 = vst [vmem:[#allocation7_spill] sm:$0xff] %v2429_v19  ;;  %v451_v25 = vmul.f32 %v2274_v60, %v301_v52  ;;  %v719_v4 = vmul.f32 %v1983_v48, %v301_v52  ;;  %v450_v2 = vmul.f32 %v2274_v60, %v299_v42  ;;  %v3303_v52 = vld [vmem:[#allocation28_spill] sm:$0xff]  ;;  %v975_v55 = vmax.f32 %v847_v15, 0.0  ;;  %v3307_v19 = vld [vmem:[#allocation17_spill] sm:$0xff] }
  0xc6   :  { %v718_v61 = vmul.f32 %v1983_v48, %v299_v42  ;;  %1136 = vrot.lane.b32.xlu1 %v973_v45, %s1465_s11  ;;  %v2452_v51 = vmul.f32 %v1552_v10, %v3303_v52  ;;  %v849_v46 = vadd.f32 %v2038_v31, %v781_v3  ;;  %1134 = vrot.lane.b32.xlu0 %v972_v0, %s1465_s11  ;;  %v3306_v42 = vld [vmem:[#allocation16_spill] sm:$0xff]  ;;  %v974_v9 = vmax.f32 %v846_v24, 0.0  ;;  %v3310_v15 = vld [vmem:[#allocation29_spill] sm:$0xff]  ;;  %v3311_v24 = vld [vmem:[#allocation30_spill] sm:$0xff] }
  0xc7   :  { %v2456_v12 = vadd.f32 %v451_v25, %v3304_v54  ;;  %v848_v53 = vadd.f32 %v2038_v31, %v780_v47  ;;  %v783_v45 = vadd.f32 %v719_v4, %v3306_v42  ;;  %v2462_v50 = vadd.f32 %v450_v2, %v3307_v19 }
  0xc8   :  { %v305_v49 = vpop.permute.xlu1 %304  ;;  %v782_v27 = vadd.f32 %v718_v61, %v3309_v28  ;;  %v303_v25 = vpop.permute.xlu0 %302  ;;  %v2469_v0 = vmul.f32 %v1557_v11, %v3303_v52  ;;  %v2473_v47 = vmul.f32 %v1552_v10, %v3310_v15  ;;  %v2480_v28 = vmul.f32 %v1557_v11, %v3310_v15  ;;  %v3312_v52 = vld [vmem:[#allocation19_spill] sm:$0xff] }
  0xc9   :  { %3305 = vst [vmem:[#allocation8_spill] sm:$0xff] %v2456_v12  ;;  %3308 = vst [vmem:[#allocation9_spill] sm:$0xff] %v2462_v50  ;;  %v453_v38 = vmul.f32 %v2274_v60, %v305_v49  ;;  %v721_v3 = vmul.f32 %v1983_v48, %v305_v49  ;;  %v452_v19 = vmul.f32 %v2274_v60, %v303_v25  ;;  %v977_v61 = vmax.f32 %v849_v46, 0.0 }
  0xca   :  { %v720_v4 = vmul.f32 %v1983_v48, %v303_v25  ;;  %1140 = vrot.lane.b32.xlu1 %v975_v55, %s1465_s11  ;;  %v2484_v2 = vmul.f32 %v1552_v10, %v3311_v24  ;;  %1138 = vrot.lane.b32.xlu0 %v974_v9, %s1465_s11  ;;  %v976_v42 = vmax.f32 %v848_v53, 0.0  ;;  %v851_v49 = vadd.f32 %v2038_v31, %v783_v45  ;;  %v3314_v25 = vld [vmem:[#allocation20_spill] sm:$0xff]  ;;  %v3315_v55 = vld [vmem:[#allocation21_spill] sm:$0xff]  ;;  %v3318_v53 = vld [vmem:[#allocation31_spill] sm:$0xff] }
  0xcb   :  { %v2487_v54 = vadd.f32 %v453_v38, %v3312_v52  ;;  %v785_v50 = vadd.f32 %v721_v3, %v3314_v25  ;;  %v2493_v12 = vadd.f32 %v452_v19, %v3315_v55  ;;  %v850_v22 = vadd.f32 %v2038_v31, %v782_v27  ;;  %v3319_v27 = vld [vmem:[#allocation32_spill] sm:$0xff] }
  0xcc   :  { %v309_v15 = vpop.permute.xlu1 %308  ;;  %v784_v23 = vadd.f32 %v720_v4, %v3317_v16  ;;  %v307_v52 = vpop.permute.xlu0 %306  ;;  %v2501_v9 = vmul.f32 %v1557_v11, %v3311_v24  ;;  %v2505_v45 = vmul.f32 %v1552_v10, %v3318_v53  ;;  %v2512_v16 = vmul.f32 %v1557_v11, %v3318_v53 }
  0xcd   :  { %3313 = vst [vmem:[#allocation10_spill] sm:$0xff] %v2487_v54  ;;  %3316 = vst [vmem:[#allocation25_spill] sm:$0xff] %v2493_v12  ;;  %v455_v46 = vmul.f32 %v2274_v60, %v309_v15  ;;  %v723_v38 = vmul.f32 %v1983_v48, %v309_v15  ;;  %v454_v3 = vmul.f32 %v2274_v60, %v307_v52  ;;  %v979_v55 = vmax.f32 %v851_v49, 0.0  ;;  %v3323_v49 = vld [vmem:[#allocation34_spill] sm:$0xff] }
  0xce   :  { %v722_v19 = vmul.f32 %v1983_v48, %v307_v52  ;;  %1144 = vrot.lane.b32.xlu1 %v977_v61, %s1465_s11  ;;  %v2516_v4 = vmul.f32 %v1552_v10, %v3319_v27  ;;  %1142 = vrot.lane.b32.xlu0 %v976_v42, %s1465_s11  ;;  %v853_v15 = vadd.f32 %v2038_v31, %v785_v50  ;;  %v978_v12 = vmax.f32 %v850_v22, 0.0  ;;  %v3322_v42 = vld [vmem:[#allocation33_spill] sm:$0xff] }
  0xcf   :  { %v2519_v24 = vadd.f32 %v455_v46, %v2345_v18  ;;  %v787_v25 = vadd.f32 %v723_v38, %v2352_v58  ;;  %v2525_v61 = vadd.f32 %v454_v3, %v2356_v1  ;;  %v852_v54 = vadd.f32 %v2038_v31, %v784_v23  ;;  %v2549_v22 = vld [vmem:[%s3158_s1] ss:$0 sm:$0xff] }
  0xd0   :  { %v786_v52 = vadd.f32 %v722_v19, %v2373_v5  ;;  %v313_v53 = vpop.permute.xlu1 %312  ;;  %v311_v46 = vpop.permute.xlu0 %310  ;;  %v2533_v58 = vmul.f32 %v1557_v11, %v3319_v27  ;;  %v2537_v50 = vmul.f32 %v1552_v10, %v3322_v42  ;;  %v2544_v23 = vmul.f32 %v1557_v11, %v3322_v42 }
  0xd1   :  { %3320 = vst [vmem:[#allocation26_spill] sm:$0xff] %v2519_v24  ;;  %3321 = vst [vmem:[#allocation11_spill] sm:$0xff] %v2525_v61  ;;  %v457_v33 = vmul.f32 %v2274_v60, %v313_v53  ;;  %v725_v18 = vmul.f32 %v1983_v48, %v313_v53  ;;  %v456_v1 = vmul.f32 %v2274_v60, %v311_v46  ;;  %v981_v19 = vmax.f32 %v853_v15, 0.0 }
  0xd2   :  { %v724_v5 = vmul.f32 %v1983_v48, %v311_v46  ;;  %1148 = vrot.lane.b32.xlu1 %v979_v55, %s1465_s11  ;;  %v2553_v38 = vmul.f32 %v2549_v22, %v3323_v49  ;;  %v855_v10 = vadd.f32 %v2038_v31, %v787_v25  ;;  %1146 = vrot.lane.b32.xlu0 %v978_v12, %s1465_s11  ;;  %v980_v46 = vmax.f32 %v852_v54, 0.0 }
  0xd3   :  { %v2557_v3 = vadd.f32 %v457_v33, %v2377_v63  ;;  %v854_v11 = vadd.f32 %v2038_v31, %v786_v52  ;;  %v789_v27 = vadd.f32 %v725_v18, %v2384_v7  ;;  %v2563_v55 = vadd.f32 %v456_v1, %v2388_v13  ;;  %v2571_v63 = vld [vmem:[%s3158_s1 + $0x2] ss:$0 sm:$0xff]  ;;  %v3326_v13 = vld [vmem:[#allocation35_spill] sm:$0xff] }
  0xd4   :  { %v317_v53 = vpop.permute.xlu1 %316  ;;  %v788_v42 = vadd.f32 %v724_v5, %v2405_v62  ;;  %v315_v33 = vpop.permute.xlu0 %314  ;;  %v2575_v7 = vmul.f32 %v2571_v63, %v3323_v49  ;;  %v2579_v12 = vmul.f32 %v2549_v22, %v3326_v13  ;;  %v2586_v15 = vmul.f32 %v2571_v63, %v3326_v13  ;;  %v3327_v52 = vld [vmem:[#allocation37_spill] sm:$0xff] }
  0xd5   :  { %3324 = vst [vmem:[#allocation12_spill] sm:$0xff] %v2557_v3  ;;  %3325 = vst [vmem:[#allocation13_spill] sm:$0xff] %v2563_v55  ;;  %v459_v61 = vmul.f32 %v2274_v60, %v317_v53  ;;  %v727_v25 = vmul.f32 %v1983_v48, %v317_v53  ;;  %v458_v62 = vmul.f32 %v2274_v60, %v315_v33  ;;  %v983_v1 = vmax.f32 %v855_v10, 0.0 }
  0xd6   :  { %v726_v54 = vmul.f32 %v1983_v48, %v315_v33  ;;  %1152 = vrot.lane.b32.xlu1 %v981_v19, %s1465_s11  ;;  %v2590_v18 = vmul.f32 %v2549_v22, %v3327_v52  ;;  %1150 = vrot.lane.b32.xlu0 %v980_v46, %s1465_s11  ;;  %v982_v49 = vmax.f32 %v854_v11, 0.0  ;;  %v857_v53 = vadd.f32 %v2038_v31, %v789_v27  ;;  %v3330_v27 = vld [vmem:[#allocation39_spill] sm:$0xff] }
  0xd7   :  { %v2593_v5 = vadd.f32 %v459_v61, %v2409_v20  ;;  %v791_v33 = vadd.f32 %v727_v25, %v2416_v8  ;;  %v2599_v19 = vadd.f32 %v458_v62, %v2420_v6  ;;  %v856_v55 = vadd.f32 %v2038_v31, %v788_v42  ;;  %v3331_v42 = vld [vmem:[#allocation41_spill] sm:$0xff] }
  0xd8   :  { %v321_v13 = vpop.permute.xlu1 %320  ;;  %v790_v3 = vadd.f32 %v726_v54, %v2437_v21  ;;  %v319_v61 = vpop.permute.xlu0 %318  ;;  %v2607_v11 = vmul.f32 %v2571_v63, %v3327_v52  ;;  %v2611_v8 = vmul.f32 %v2549_v22, %v3330_v27  ;;  %v2618_v21 = vmul.f32 %v2571_v63, %v3330_v27 }
  0xd9   :  { %3328 = vst [vmem:[#allocation14_spill] sm:$0xff] %v2593_v5  ;;  %3329 = vst [vmem:[#allocation27_spill] sm:$0xff] %v2599_v19  ;;  %v461_v10 = vmul.f32 %v2274_v60, %v321_v13  ;;  %v729_v20 = vmul.f32 %v1983_v48, %v321_v13  ;;  %v460_v6 = vmul.f32 %v2274_v60, %v319_v61  ;;  %v985_v52 = vmax.f32 %v857_v53, 0.0 }
  0xda   :  { %v728_v46 = vmul.f32 %v1983_v48, %v319_v61  ;;  %1156 = vrot.lane.b32.xlu1 %v983_v1, %s1465_s11  ;;  %v2622_v25 = vmul.f32 %v2549_v22, %v3331_v42  ;;  %1154 = vrot.lane.b32.xlu0 %v982_v49, %s1465_s11  ;;  %v859_v13 = vadd.f32 %v2038_v31, %v791_v33  ;;  %v984_v19 = vmax.f32 %v856_v55, 0.0  ;;  %v3333_v49 = vld [vmem:[#allocation43_spill] sm:$0xff] }
  0xdb   :  { %v2625_v62 = vadd.f32 %v461_v10, %v2441_v17  ;;  %v793_v54 = vadd.f32 %v729_v20, %v2448_v43  ;;  %v2631_v1 = vadd.f32 %v460_v6, %v2452_v51  ;;  %v858_v5 = vadd.f32 %v2038_v31, %v790_v3  ;;  %v3334_v3 = vld [vmem:[#allocation38_spill] sm:$0xff] }
  0xdc   :  { %v792_v61 = vadd.f32 %v728_v46, %v2469_v0  ;;  %v325_v27 = vpop.permute.xlu1 %324  ;;  %v323_v10 = vpop.permute.xlu0 %322  ;;  %v2639_v43 = vmul.f32 %v2571_v63, %v3331_v42  ;;  %v2643_v53 = vmul.f32 %v2549_v22, %v3333_v49  ;;  %v410_v55 = vmul.f32 %v2274_v60, %v3334_v3 }
  0xdd   :  { %3332 = vst [vmem:[#allocation28_spill] sm:$0xff] %v2631_v1  ;;  %v463_v24 = vmul.f32 %v2274_v60, %v325_v27  ;;  %v731_v17 = vmul.f32 %v1983_v48, %v325_v27  ;;  %v462_v51 = vmul.f32 %v2274_v60, %v323_v10  ;;  %v730_v0 = vmul.f32 %v1983_v48, %v323_v10 }
  0xde   :  { %1160 = vrot.lane.b32.xlu1 %v985_v52, %s1465_s11  ;;  %v2652_v33 = vmul.f32 %v2571_v63, %v3333_v49  ;;  %v861_v20 = vadd.f32 %v2038_v31, %v793_v54  ;;  %1158 = vrot.lane.b32.xlu0 %v984_v19, %s1465_s11  ;;  %v987_v46 = vmax.f32 %v859_v13, 0.0  ;;  %v860_v42 = vadd.f32 %v2038_v31, %v792_v61  ;;  %v3336_v13 = vld [vmem:[#allocation45_spill] sm:$0xff] }
  0xdf   :  { %v2656_v6 = vadd.f32 %v463_v24, %v2473_v47  ;;  %v795_v27 = vadd.f32 %v731_v17, %v2480_v28  ;;  %v2662_v52 = vadd.f32 %v462_v51, %v2484_v2  ;;  %v986_v3 = vmax.f32 %v858_v5, 0.0  ;;  %v3335_v24 = vld [vmem:[#allocation36_spill] sm:$0xff] }
  0xe0   :  { %v329_v10 = vpop.permute.xlu1 %328  ;;  %v794_v49 = vadd.f32 %v730_v0, %v2501_v9  ;;  %v327_v47 = vpop.permute.xlu0 %326  ;;  %v412_v19 = vmul.f32 %v2274_v60, %v3335_v24  ;;  %v2671_v61 = vmul.f32 %v2549_v22, %v3336_v13  ;;  %v474_v9 = vadd.f32 %v410_v55, %v2285_v39  ;;  %v2688_v0 = vld [vmem:[%s3158_s1 + $0x4] ss:$0 sm:$0xff] }
  0xe1   :  { %v465_v1 = vmul.f32 %v2274_v60, %v329_v10  ;;  %v733_v54 = vmul.f32 %v1983_v48, %v329_v10  ;;  %v464_v28 = vmul.f32 %v2274_v60, %v327_v47  ;;  %v732_v2 = vmul.f32 %v1983_v48, %v327_v47 }
  0xe2   :  { %1164 = vrot.lane.b32.xlu1 %v987_v46, %s1465_s11  ;;  %v2679_v5 = vmul.f32 %v2571_v63, %v3336_v13  ;;  %v989_v17 = vmax.f32 %v861_v20, 0.0  ;;  %1162 = vrot.lane.b32.xlu0 %v986_v3, %s1465_s11  ;;  %v988_v10 = vmax.f32 %v860_v42, 0.0  ;;  %v863_v46 = vadd.f32 %v2038_v31, %v795_v27  ;;  %v3337_v42 = vld [vmem:[#allocation40_spill] sm:$0xff] }
  0xe3   :  { %v2682_v51 = vadd.f32 %v465_v1, %v2505_v45  ;;  %v797_v39 = vadd.f32 %v733_v54, %v2512_v16  ;;  %v2693_v55 = vadd.f32 %v464_v28, %v2516_v4  ;;  %v862_v20 = vadd.f32 %v2038_v31, %v794_v49  ;;  %v3338_v54 = vld [vmem:[#allocation42_spill] sm:$0xff] }
  0xe4   :  { %v333_v63 = vpop.permute.xlu1 %332  ;;  %v796_v45 = vadd.f32 %v732_v2, %v2533_v58  ;;  %v331_v47 = vpop.permute.xlu0 %330  ;;  %v476_v24 = vadd.f32 %v412_v19, %v2281_v44  ;;  %v413_v27 = vmul.f32 %v2274_v60, %v3337_v42  ;;  %v411_v49 = vmul.f32 %v2274_v60, %v3338_v54 }
  0xe5   :  { %v467_v1 = vmul.f32 %v2274_v60, %v333_v63  ;;  %v735_v3 = vmul.f32 %v1983_v48, %v333_v63  ;;  %v466_v16 = vmul.f32 %v2274_v60, %v331_v47  ;;  %v734_v4 = vmul.f32 %v1983_v48, %v331_v47 }
  0xe6   :  { %1168 = vrot.lane.b32.xlu1 %v989_v17, %s1465_s11  ;;  %1166 = vrot.lane.b32.xlu0 %v988_v10, %s1465_s11  ;;  %v2713_v44 = vadd.f32 %v2688_v0, %v474_v9  ;;  %v991_v19 = vmax.f32 %v863_v46, 0.0  ;;  %v865_v28 = vadd.f32 %v2038_v31, %v797_v39  ;;  %v990_v47 = vmax.f32 %v862_v20, 0.0 }
  0xe7   :  { %v2708_v58 = vadd.f32 %v467_v1, %v2537_v50  ;;  %v799_v13 = vadd.f32 %v735_v3, %v2544_v23  ;;  %v2717_v2 = vadd.f32 %v466_v16, %v2553_v38  ;;  %v798_v17 = vadd.f32 %v734_v4, %v2575_v7  ;;  %v1416_v4 = vld [vmem:[%s3158_s1 + $0x3] ss:$0 sm:$0xff] }
  0xe8   :  { %v337_v63 = vpop.permute.xlu1 %336  ;;  %v864_v50 = vadd.f32 %v2038_v31, %v796_v45  ;;  %v335_v10 = vpop.permute.xlu0 %334  ;;  %v477_v9 = vadd.f32 %v413_v27, %v2292_v57  ;;  %v2728_v38 = vadd.f32 %v2688_v0, %v476_v24  ;;  %v475_v7 = vadd.f32 %v411_v49, %v2296_v32 }
  0xe9   :  { %v469_v1 = vmul.f32 %v2274_v60, %v337_v63  ;;  %v737_v23 = vmul.f32 %v1983_v48, %v337_v63  ;;  %v468_v46 = vmul.f32 %v2274_v60, %v335_v10  ;;  %v736_v39 = vmul.f32 %v1983_v48, %v335_v10 }
  0xea   :  { %1172 = vrot.lane.b32.xlu1 %v991_v19, %s1465_s11  ;;  %v867_v20 = vadd.f32 %v2038_v31, %v799_v13  ;;  %1170 = vrot.lane.b32.xlu0 %v990_v47, %s1465_s11  ;;  %v874_v57 = vmax.f32 %v2713_v44, 0.0  ;;  %v993_v3 = vmax.f32 %v865_v28, 0.0  ;;  %v866_v48 = vadd.f32 %v2038_v31, %v798_v17  ;;  %v3339_v13 = vld [vmem:[#allocation44_spill] sm:$0xff]  ;;  %v3340_v44 = vld [vmem:[#allocation46_spill] sm:$0xff] }
  0xeb   :  { %v2733_v45 = vadd.f32 %v469_v1, %v2579_v12  ;;  %v801_v42 = vadd.f32 %v737_v23, %v2586_v15  ;;  %v2740_v24 = vadd.f32 %v468_v46, %v2590_v18  ;;  %v992_v32 = vmax.f32 %v864_v50, 0.0  ;;  %v1417_v50 = vld [vmem:[%s3158_s1 + $0x5] ss:$0 sm:$0xff] }
  0xec   :  { %v341_v27 = vpop.permute.xlu1 %340  ;;  %v800_v16 = vadd.f32 %v736_v39, %v2607_v11  ;;  %v339_v49 = vpop.permute.xlu0 %338  ;;  %v415_v31 = vmul.f32 %v2274_v60, %v3339_v13  ;;  %v414_v15 = vmul.f32 %v2274_v60, %v3340_v44  ;;  %v995_v11 = vmax.f32 %v867_v20, 0.0 }
  0xed   :  { %v471_v12 = vmul.f32 %v2274_v60, %v341_v27  ;;  %v739_v54 = vmul.f32 %v1416_v4, %v341_v27  ;;  %v470_v18 = vmul.f32 %v2274_v60, %v339_v49  ;;  %v738_v19 = vmul.f32 %v1416_v4, %v339_v49 }
  0xee   :  { %1176 = vrot.lane.b32.xlu1 %v993_v3, %s1465_s11  ;;  %1174 = vrot.lane.b32.xlu0 %v992_v32, %s1465_s11  ;;  %v543_v17 = vadd.f32 %v2688_v0, %v475_v7  ;;  %v545_v63 = vadd.f32 %v2688_v0, %v477_v9  ;;  %v994_v47 = vmax.f32 %v866_v48, 0.0  ;;  %v869_v1 = vadd.f32 %v1417_v50, %v801_v42  ;;  %v3342_v32 = vld [vmem:[#allocation48_spill] sm:$0xff] }
  0xef   :  { %v2754_v28 = vadd.f32 %v471_v12, %v2611_v8  ;;  %v803_v23 = vadd.f32 %v739_v54, %v2618_v21  ;;  %v2764_v10 = vadd.f32 %v470_v18, %v2622_v25  ;;  %v868_v8 = vadd.f32 %v1417_v50, %v800_v16  ;;  %v3341_v21 = vld [vmem:[#allocation47_spill] sm:$0xff] }
  0xf0   :  { %v345_v46 = vpop.permute.xlu1 %344  ;;  %v802_v39 = vadd.f32 %v738_v19, %v2639_v43  ;;  %v343_v3 = vpop.permute.xlu0 %342  ;;  %v479_v9 = vadd.f32 %v415_v31, %v2309_v37  ;;  %v478_v48 = vadd.f32 %v414_v15, %v2313_v59  ;;  %v417_v25 = vmul.f32 %v2274_v60, %v3341_v21 }
  0xf1   :  { %v473_v20 = vmul.f32 %v2274_v60, %v345_v46  ;;  %v741_v7 = vmul.f32 %v1416_v4, %v345_v46  ;;  %v472_v27 = vmul.f32 %v2274_v60, %v343_v3  ;;  %v740_v42 = vmul.f32 %v1416_v4, %v343_v3 }
  0xf2   :  { %1180 = vrot.lane.b32.xlu1 %v995_v11, %s1465_s11  ;;  %v416_v16 = vmul.f32 %v2274_v60, %v3342_v32  ;;  %1178 = vrot.lane.b32.xlu0 %v994_v47, %s1465_s11  ;;  %v875_v12 = vmax.f32 %v543_v17, 0.0  ;;  %v997_v37 = vmax.f32 %v869_v1, 0.0  ;;  %v871_v54 = vadd.f32 %v1417_v50, %v803_v23 }
  0xf3   :  { %v2777_v43 = vadd.f32 %v473_v20, %v2643_v53  ;;  %v805_v59 = vadd.f32 %v741_v7, %v2652_v33  ;;  %v2782_v4 = vadd.f32 %v472_v27, %v2671_v61  ;;  %v996_v13 = vmax.f32 %v868_v8, 0.0  ;;  %v1418_v53 = vld [vmem:[%s3157_s0 + $0x40] sm:$0xff]  ;;  %v1419_v7 = vld [vmem:[%s3157_s0 + $0x58] sm:$0xff] }
  0xf4   :  { %v1069_v49 = vpop.permute.xlu1 %1068  ;;  %v870_v31 = vadd.f32 %v1417_v50, %v802_v39  ;;  %v804_v44 = vadd.f32 %v740_v42, %v2679_v5  ;;  %v1067_v18 = vpop.permute.xlu0 %1066  ;;  %v94_v19 = vmul.f32 %v1418_v53, %v2549_v22  ;;  %v876_v61 = vmax.f32 %v2728_v38, 0.0 }
  0xf5   :  { %v1260_v15 = vsel %vm1258_vm0, %v875_v12, %v1069_v49  ;;  %v1259_v33 = vsel %vm1258_vm0, %v874_v57, %v1067_v18  ;;  %v547_v11 = vadd.f32 %v2688_v0, %v479_v9  ;;  %v481_v5 = vadd.f32 %v417_v25, %v2320_v56  ;;  %v1422_v49 = vld [vmem:[%s3157_s0 + $0x60] sm:$0xff] }
  0xf6   :  { %1325 = vst.msk [vmem:[#allocation2 + $0x8] sm:$0xff] %vm1323_vm1, %v1260_v15  ;;  %1184 = vrot.lane.b32.xlu1 %v997_v37, %s1465_s11  ;;  %v419_v17 = vmul.f32 %v2274_v60, %v2090_v36  ;;  %1324 = vst.msk [vmem:[#allocation2] sm:$0xff] %vm1323_vm1, %v1259_v33  ;;  %1182 = vrot.lane.b32.xlu0 %v996_v13, %s1465_s11  ;;  %v877_v47 = vmax.f32 %v545_v63, 0.0  ;;  %v546_v1 = vadd.f32 %v2688_v0, %v478_v48 }
  0xf7   :  { %v480_v57 = vadd.f32 %v416_v16, %v2324_v40  ;;  %v418_v23 = vmul.f32 %v2274_v60, %v2095_v34  ;;  %v999_v38 = vmax.f32 %v871_v54, 0.0  ;;  %v873_v46 = vadd.f32 %v1417_v50, %v805_v59  ;;  %v1420_v40 = vld [vmem:[%s3157_s0 + $0x50] sm:$0xff] }
  0xf8   :  { %v1073_v8 = vpop.permute.xlu1 %1072  ;;  %v998_v39 = vmax.f32 %v870_v31, 0.0  ;;  %v872_v56 = vadd.f32 %v1417_v50, %v804_v44  ;;  %v1071_v36 = vpop.permute.xlu0 %1070  ;;  %v97_v63 = vmul.f32 %v1419_v7, %v2549_v22  ;;  %v96_v34 = vmul.f32 %v1420_v40, %v2549_v22 }
  0xf9   :  { %v1262_v20 = vsel %vm1258_vm0, %v877_v47, %v1073_v8  ;;  %v1261_v3 = vsel %vm1258_vm0, %v876_v61, %v1071_v36  ;;  %v879_v50 = vmax.f32 %v547_v11, 0.0  ;;  %v483_v9 = vadd.f32 %v419_v17, %v2341_v14 }
  0xfa   :  { %1327 = vst.msk [vmem:[#allocation2 + $0x18] sm:$0xff] %vm1323_vm1, %v1262_v20  ;;  %1188 = vrot.lane.b32.xlu1 %v999_v38, %s1465_s11  ;;  %v421_v48 = vmul.f32 %v2274_v60, %v2106_v35  ;;  %1326 = vst.msk [vmem:[#allocation2 + $0x10] sm:$0xff] %vm1323_vm1, %v1261_v3  ;;  %1186 = vrot.lane.b32.xlu0 %v998_v39, %s1465_s11  ;;  %v878_v27 = vmax.f32 %v546_v1, 0.0  ;;  %v549_v42 = vadd.f32 %v2688_v0, %v481_v5  ;;  %v1421_v35 = vld [vmem:[%s3157_s0 + $0x68] sm:$0xff]  ;;  %v1424_v1 = vld [vmem:[%s3157_s0 + $0x70] sm:$0xff] }
  0xfb   :  { %v482_v21 = vadd.f32 %v418_v23, %v94_v19  ;;  %v420_v25 = vmul.f32 %v2274_v60, %v2111_v29  ;;  %v1001_v32 = vmax.f32 %v873_v46, 0.0  ;;  %v548_v12 = vadd.f32 %v2688_v0, %v480_v57 }
  0xfc   :  { %v1077_v16 = vpop.permute.xlu1 %1076  ;;  %v1000_v37 = vmax.f32 %v872_v56, 0.0  ;;  %v1075_v54 = vpop.permute.xlu0 %1074  ;;  %v99_v59 = vmul.f32 %v1421_v35, %v2549_v22  ;;  %v98_v29 = vmul.f32 %v1422_v49, %v2549_v22  ;;  %v485_v31 = vadd.f32 %v421_v48, %v97_v63  ;;  %v3343_v56 = vld [vmem:[#allocation49_spill] sm:$0xff] }
  0xfd   :  { %v1264_v14 = vsel %vm1258_vm0, %v879_v50, %v1077_v16  ;;  %v1263_v13 = vsel %vm1258_vm0, %v878_v27, %v1075_v54  ;;  %v423_v44 = vmul.f32 %v2274_v60, %v2122_v41  ;;  %v881_v15 = vmax.f32 %v549_v42, 0.0  ;;  %v1423_v41 = vld [vmem:[%s3157_s0 + $0x78] sm:$0xff]  ;;  %v1426_v50 = vld [vmem:[%s3157_s0 + $0x80] sm:$0xff]  ;;  %v3344_v42 = vld [vmem:[#allocation50_spill] sm:$0xff] }
  0xfe   :  { %1329 = vst.msk [vmem:[#allocation2 + $0x28] sm:$0xff] %vm1323_vm1, %v1264_v14  ;;  %1192 = vrot.lane.b32.xlu1 %v1001_v32, %s1465_s11  ;;  %1328 = vst.msk [vmem:[#allocation2 + $0x20] sm:$0xff] %vm1323_vm1, %v1263_v13  ;;  %1190 = vrot.lane.b32.xlu0 %v1000_v37, %s1465_s11  ;;  %v551_v18 = vadd.f32 %v2688_v0, %v483_v9  ;;  %v484_v53 = vadd.f32 %v420_v25, %v96_v34  ;;  %v880_v61 = vmax.f32 %v548_v12, 0.0  ;;  %v3345_v12 = vld [vmem:[#allocation51_spill] sm:$0xff] }
  0xff   :  { %v422_v19 = vmul.f32 %v2274_v60, %v2127_v26  ;;  %v550_v11 = vadd.f32 %v2688_v0, %v482_v21  ;;  %v101_v47 = vmul.f32 %v1423_v41, %v2549_v22  ;;  %v100_v57 = vmul.f32 %v1424_v1, %v2549_v22 }
 0x100   :  { %v1081_v33 = vpop.permute.xlu1 %1080  ;;  %v1079_v17 = vpop.permute.xlu0 %1078  ;;  %v487_v23 = vadd.f32 %v423_v44, %v99_v59  ;;  %v425_v38 = vmul.f32 %v2274_v60, %v2138_v30  ;;  %v883_v46 = vmax.f32 %v551_v18, 0.0  ;;  %v553_v8 = vadd.f32 %v2688_v0, %v485_v31  ;;  %v1425_v30 = vld [vmem:[%s3157_s0 + $0x88] sm:$0xff]  ;;  %v1428_v31 = vld [vmem:[%s3157_s0 + $0x90] sm:$0xff] }
 0x101   :  { %v1266_v5 = vsel %vm1258_vm0, %v881_v15, %v1081_v33  ;;  %v1265_v26 = vsel %vm1258_vm0, %v880_v61, %v1079_v17  ;;  %v486_v39 = vadd.f32 %v422_v19, %v98_v29  ;;  %v424_v20 = vmul.f32 %v2274_v60, %v3343_v56  ;;  %v1427_v29 = vld [vmem:[%s3157_s0 + $0x98] sm:$0xff] }
 0x102   :  { %1331 = vst.msk [vmem:[#allocation2 + $0x38] sm:$0xff] %vm1323_vm1, %v1266_v5  ;;  %1330 = vst.msk [vmem:[#allocation2 + $0x30] sm:$0xff] %vm1323_vm1, %v1265_v26  ;;  %v882_v7 = vmax.f32 %v550_v11, 0.0  ;;  %v552_v63 = vadd.f32 %v2688_v0, %v484_v53  ;;  %v103_v3 = vmul.f32 %v1425_v30, %v2549_v22  ;;  %v102_v9 = vmul.f32 %v1426_v50, %v2549_v22  ;;  %v3346_v53 = vld [vmem:[#allocation52_spill] sm:$0xff]  ;;  %v3347_v5 = vld [vmem:[#allocation53_spill] sm:$0xff] }
 0x103   :  { %v489_v27 = vadd.f32 %v425_v38, %v101_v47  ;;  %v427_v21 = vmul.f32 %v2274_v60, %v3344_v42  ;;  %v885_v25 = vmax.f32 %v553_v8, 0.0  ;;  %v555_v32 = vadd.f32 %v2688_v0, %v487_v23  ;;  %v1429_v23 = vld [vmem:[%s3157_s0 + $0xa8] sm:$0xff]  ;;  %v1431_v42 = vld [vmem:[%s3157_s0 + $0xb8] sm:$0xff] }
 0x104   :  { %v1085_v36 = vpop.permute.xlu1 %1084  ;;  %v1083_v34 = vpop.permute.xlu0 %1082  ;;  %v488_v16 = vadd.f32 %v424_v20, %v100_v57  ;;  %v426_v37 = vmul.f32 %v2274_v60, %v3345_v12  ;;  %v884_v54 = vmax.f32 %v552_v63, 0.0  ;;  %v554_v35 = vadd.f32 %v2688_v0, %v486_v39  ;;  %v3348_v20 = vld [vmem:[#allocation54_spill] sm:$0xff] }
 0x105   :  { %v1268_v40 = vsel %vm1258_vm0, %v883_v46, %v1085_v36  ;;  %v1267_v48 = vsel %vm1258_vm0, %v882_v7, %v1083_v34  ;;  %v105_v13 = vmul.f32 %v1427_v29, %v2549_v22  ;;  %v104_v44 = vmul.f32 %v1428_v31, %v2549_v22  ;;  %v1430_v46 = vld [vmem:[%s3157_s0 + $0xa0] sm:$0xff]  ;;  %v3349_v34 = vld [vmem:[#allocation55_spill] sm:$0xff] }
 0x106   :  { %1333 = vst.msk [vmem:[#allocation2 + $0x48] sm:$0xff] %vm1323_vm1, %v1268_v40  ;;  %1332 = vst.msk [vmem:[#allocation2 + $0x40] sm:$0xff] %vm1323_vm1, %v1267_v48  ;;  %v491_v18 = vadd.f32 %v427_v21, %v103_v3  ;;  %v429_v19 = vmul.f32 %v2274_v60, %v3346_v53  ;;  %v887_v33 = vmax.f32 %v555_v32, 0.0  ;;  %v557_v61 = vadd.f32 %v2688_v0, %v489_v27  ;;  %v1433_v53 = vld [vmem:[%s3157_s0 + $0xc8] sm:$0xff] }
 0x107   :  { %v490_v11 = vadd.f32 %v426_v37, %v102_v9  ;;  %v428_v17 = vmul.f32 %v2274_v60, %v3347_v5  ;;  %v886_v47 = vmax.f32 %v554_v35, 0.0  ;;  %v556_v1 = vadd.f32 %v2688_v0, %v488_v16  ;;  %v3350_v37 = vld [vmem:[#allocation56_spill] sm:$0xff] }
 0x108   :  { %v1089_v14 = vpop.permute.xlu1 %1088  ;;  %v1087_v49 = vpop.permute.xlu0 %1086  ;;  %v107_v38 = vmul.f32 %v1429_v23, %v2549_v22  ;;  %v106_v8 = vmul.f32 %v1430_v46, %v2549_v22  ;;  %v493_v56 = vadd.f32 %v429_v19, %v105_v13  ;;  %v431_v36 = vmul.f32 %v2274_v60, %v3348_v20  ;;  %v1435_v20 = vld [vmem:[%s3157_s0 + $0xd8] sm:$0xff] }
 0x109   :  { %v1270_v59 = vsel %vm1258_vm0, %v885_v25, %v1089_v14  ;;  %v1269_v15 = vsel %vm1258_vm0, %v884_v54, %v1087_v49  ;;  %v889_v7 = vmax.f32 %v557_v61, 0.0  ;;  %v559_v63 = vadd.f32 %v2688_v0, %v491_v18  ;;  %v1432_v25 = vld [vmem:[%s3157_s0 + $0xb0] sm:$0xff]  ;;  %v3351_v49 = vld [vmem:[#allocation57_spill] sm:$0xff] }
 0x10a   :  { %1335 = vst.msk [vmem:[#allocation2 + $0x58] sm:$0xff] %vm1323_vm1, %v1270_v59  ;;  %1334 = vst.msk [vmem:[#allocation2 + $0x50] sm:$0xff] %vm1323_vm1, %v1269_v15  ;;  %v492_v40 = vadd.f32 %v428_v17, %v104_v44  ;;  %v430_v30 = vmul.f32 %v2274_v60, %v3349_v34  ;;  %v888_v50 = vmax.f32 %v556_v1, 0.0  ;;  %v558_v9 = vadd.f32 %v2688_v0, %v490_v11  ;;  %v3352_v17 = vld [vmem:[#allocation58_spill] sm:$0xff]  ;;  %v1437_v34 = vld [vmem:[%s3158_s1 + $0x1] ss:$0 sm:$0xff] }
 0x10b   :  { %v109_v21 = vmul.f32 %v1431_v42, %v2549_v22  ;;  %v108_v32 = vmul.f32 %v1432_v25, %v2549_v22  ;;  %v495_v12 = vadd.f32 %v431_v36, %v107_v38  ;;  %v433_v14 = vmul.f32 %v2274_v60, %v3350_v37  ;;  %v1438_v37 = vld [vmem:[%s3157_s0 + $0xe8] sm:$0xff] }
 0x10c   :  { %v1093_v41 = vpop.permute.xlu1 %1092  ;;  %v1091_v26 = vpop.permute.xlu0 %1090  ;;  %v891_v54 = vmax.f32 %v559_v63, 0.0  ;;  %v561_v35 = vadd.f32 %v2688_v0, %v493_v56  ;;  %v494_v59 = vadd.f32 %v430_v30, %v106_v8  ;;  %v432_v29 = vmul.f32 %v2274_v60, %v3351_v49  ;;  %v3354_v30 = vld [vmem:[#allocation60_spill] sm:$0xff] }
 0x10d   :  { %v1272_v57 = vsel %vm1258_vm0, %v887_v33, %v1093_v41  ;;  %v1271_v39 = vsel %vm1258_vm0, %v886_v47, %v1091_v26  ;;  %v890_v31 = vmax.f32 %v558_v9, 0.0  ;;  %v560_v44 = vadd.f32 %v2688_v0, %v492_v40  ;;  %v1434_v33 = vld [vmem:[%s3157_s0 + $0xc0] sm:$0xff]  ;;  %v3353_v26 = vld [vmem:[#allocation59_spill] sm:$0xff] }
 0x10e   :  { %1337 = vst.msk [vmem:[#allocation2 + $0x68] sm:$0xff] %vm1323_vm1, %v1272_v57  ;;  %1336 = vst.msk [vmem:[#allocation2 + $0x60] sm:$0xff] %vm1323_vm1, %v1271_v39  ;;  %v111_v19 = vmul.f32 %v1433_v53, %v2549_v22  ;;  %v110_v61 = vmul.f32 %v1434_v33, %v2549_v22  ;;  %v497_v5 = vadd.f32 %v433_v14, %v109_v21  ;;  %v893_v47 = vmax.f32 %v561_v35, 0.0 }
 0x10f   :  { %v435_v41 = vmul.f32 %v2274_v60, %v3352_v17  ;;  %v563_v1 = vadd.f32 %v2688_v0, %v495_v12  ;;  %v496_v57 = vadd.f32 %v432_v29, %v108_v32  ;;  %v434_v23 = vmul.f32 %v2274_v60, %v3353_v26  ;;  %v3356_v29 = vld [vmem:[#allocation62_spill] sm:$0xff] }
 0x110   :  { %v1097_v3 = vpop.permute.xlu1 %1096  ;;  %v1095_v27 = vpop.permute.xlu0 %1094  ;;  %v892_v46 = vmax.f32 %v560_v44, 0.0  ;;  %v562_v8 = vadd.f32 %v2688_v0, %v494_v59  ;;  %v113_v36 = vmul.f32 %v1435_v20, %v2549_v22  ;;  %v565_v9 = vadd.f32 %v2688_v0, %v497_v5 }
 0x111   :  { %v1274_v48 = vsel %vm1258_vm0, %v889_v7, %v1097_v3  ;;  %v1273_v16 = vsel %vm1258_vm0, %v888_v50, %v1095_v27  ;;  %v1436_v7 = vld [vmem:[%s3157_s0 + $0xd0] sm:$0xff]  ;;  %v499_v40 = vadd.f32 %v435_v41, %v111_v19  ;;  %v437_v3 = vmul.f32 %v1437_v34, %v3354_v30  ;;  %v3355_v27 = vld [vmem:[#allocation61_spill] sm:$0xff] }
 0x112   :  { %1339 = vst.msk [vmem:[#allocation2 + $0x78] sm:$0xff] %vm1323_vm1, %v1274_v48  ;;  %1338 = vst.msk [vmem:[#allocation2 + $0x70] sm:$0xff] %vm1323_vm1, %v1273_v16  ;;  %v112_v63 = vmul.f32 %v1436_v7, %v2549_v22  ;;  %v895_v50 = vmax.f32 %v563_v1, 0.0  ;;  %v498_v48 = vadd.f32 %v434_v23, %v110_v61  ;;  %v436_v42 = vmul.f32 %v1437_v34, %v3355_v27 }
 0x113   :  { %v894_v25 = vmax.f32 %v562_v8, 0.0  ;;  %v564_v32 = vadd.f32 %v2688_v0, %v496_v57  ;;  %v115_v14 = vmul.f32 %v1438_v37, %v2549_v22  ;;  %v501_v49 = vadd.f32 %v437_v3, %v113_v36  ;;  %v3361_v37 = vld [vmem:[#allocation67_spill] sm:$0xff] }
 0x114   :  { %v1101_v13 = vpop.permute.xlu1 %1100  ;;  %v1099_v18 = vpop.permute.xlu0 %1098  ;;  %v567_v44 = vadd.f32 %v2688_v0, %v499_v40  ;;  %v566_v61 = vadd.f32 %v2688_v0, %v498_v48 }
 0x115   :  { %v1276_v15 = vsel %vm1258_vm0, %v891_v54, %v1101_v13  ;;  %v1275_v11 = vsel %vm1258_vm0, %v890_v31, %v1099_v18  ;;  %v1439_v54 = vld [vmem:[%s3157_s0 + $0xe0] sm:$0xff]  ;;  %v439_v13 = vmul.f32 %v1437_v34, %v3356_v29  ;;  %v897_v31 = vmax.f32 %v565_v9, 0.0  ;;  %v3357_v18 = vld [vmem:[#allocation63_spill] sm:$0xff]  ;;  %s1466_s0 = smov [#allocation2]  }
 0x116   :  { %1341 = vst.msk [vmem:[#allocation2 + $0x88] sm:$0xff] %vm1323_vm1, %v1276_v15  ;;  %1340 = vst.msk [vmem:[#allocation2 + $0x80] sm:$0xff] %vm1323_vm1, %v1275_v11  ;;  %v114_v35 = vmul.f32 %v1439_v54, %v2549_v22  ;;  %v500_v15 = vadd.f32 %v436_v42, %v112_v63  ;;  %v438_v53 = vmul.f32 %v1437_v34, %v3357_v18  ;;  %v896_v33 = vmax.f32 %v564_v32, 0.0  ;;  %v3358_v34 = vld [vmem:[#allocation64_spill] sm:$0xff]  ;;  %v3360_v32 = vld [vmem:[#allocation66_spill] sm:$0xff]  ;;  %s1393_s12 = sshll.u32 %s1466_s0, 4  ;;  %s1394_s12 = int_to_ptr.vmem [resolvable:$true] %s1393_s12 }
 0x117   :  { %v503_v17 = vadd.f32 %v439_v13, %v115_v14  ;;  %v899_v41 = vmax.f32 %v567_v44, 0.0  ;;  %v898_v26 = vmax.f32 %v566_v61, 0.0  ;;  %v573_v30 = vadd.f32 %v2688_v0, %v3358_v34  ;;  %v3362_v13 = vld [vmem:[#allocation68_spill] sm:$0xff]  ;;  %s1440_s13 = scalar_lea.vmem %s1394_s12, 8192  ;;  %p1445_p1 = scmp.lt.s32.totalorder %s1394_s12, %s1394_s12 }
 0x118   :  { %v1105_v38 = vpop.permute.xlu1 %1104  ;;  %v1103_v56 = vpop.permute.xlu0 %1102  ;;  %v502_v1 = vadd.f32 %v438_v53, %v114_v35  ;;  %v568_v23 = vadd.f32 %v2688_v0, %v500_v15  ;;  %v574_v14 = vadd.f32 %v2688_v0, %v3361_v37  ;;  %v3363_v15 = vld [vmem:[#allocation5_spill] sm:$0xff]  ;;  %v3368_v34 = vld [vmem:[#allocation8_spill] sm:$0xff]  ;;  %p1441_p0 = scmp.ne.s32.totalorder %s1394_s12, %s1440_s13  ;;  %p1446_p2 = scmp.lt.s32.totalorder %s1440_s13, %s1440_s13 }
 0x119   :  { %v1278_v39 = vsel %vm1258_vm0, %v893_v47, %v1105_v38  ;;  %v1277_v60 = vsel %vm1258_vm0, %v892_v46, %v1103_v56  ;;  %v569_v47 = vadd.f32 %v2688_v0, %v501_v49  ;;  %v571_v56 = vadd.f32 %v2688_v0, %v503_v17  ;;  %v3371_v37 = vld [vmem:[#allocation25_spill] sm:$0xff] }
 0x11a   :  { %1343 = vst.msk [vmem:[#allocation2 + $0x98] sm:$0xff] %vm1323_vm1, %v1278_v39  ;;  %1342 = vst.msk [vmem:[#allocation2 + $0x90] sm:$0xff] %vm1323_vm1, %v1277_v60  ;;  %v900_v36 = vmax.f32 %v568_v23, 0.0  ;;  %v570_v7 = vadd.f32 %v2688_v0, %v502_v1  ;;  %v576_v18 = vadd.f32 %v2688_v0, %v3363_v15  ;;  %v3373_v15 = vld [vmem:[#allocation11_spill] sm:$0xff]  ;;  %p1447_p3 = por %p1446_p2, %p1445_p1 }
 0x11b   :  { %v901_v39 = vmax.f32 %v569_v47, 0.0  ;;  %v903_v3 = vmax.f32 %v571_v56, 0.0  ;;  %v3367_v56 = vld [vmem:[#allocation7_spill] sm:$0xff] }
 0x11c   :  { %v1109_v21 = vpop.permute.xlu1 %1108  ;;  %v1107_v12 = vpop.permute.xlu0 %1106  ;;  %v902_v27 = vmax.f32 %v570_v7, 0.0  ;;  %p1448_p4 = pnand %p1447_p3, %p1441_p0 }
 0x11d   :  { %v1280_v16 = vsel %vm1258_vm0, %v895_v50, %v1109_v21  ;;  %v1279_v59 = vsel %vm1258_vm0, %v894_v25, %v1107_v12  ;;  %v3359_v50 = vld [vmem:[#allocation65_spill] sm:$0xff]  ;;  %v905_v12 = vmax.f32 %v573_v30, 0.0  ;;  %v583_v30 = vadd.f32 %v2688_v0, %v3368_v34 }
 0x11e   :  { %1345 = vst.msk [vmem:[#allocation2 + $0xa8] sm:$0xff] %vm1323_vm1, %v1280_v16  ;;  %1344 = vst.msk [vmem:[#allocation2 + $0xa0] sm:$0xff] %vm1323_vm1, %v1279_v59  ;;  %v572_v9 = vadd.f32 %v2688_v0, %v3359_v50  ;;  %v575_v16 = vadd.f32 %v2688_v0, %v3360_v32  ;;  %v3369_v50 = vld [vmem:[#allocation9_spill] sm:$0xff]  ;;  %v3370_v32 = vld [vmem:[#allocation10_spill] sm:$0xff]  ;;  %v593_v34 = vadd.f32 %v2688_v0, %v2625_v62 }
 0x120   :  { %v1113_v19 = vpop.permute.xlu1 %1112  ;;  %v1111_v11 = vpop.permute.xlu0 %1110  ;;  %v904_v35 = vmax.f32 %v572_v9, 0.0  ;;  %v907_v44 = vmax.f32 %v575_v16, 0.0  ;;  %v582_v9 = vadd.f32 %v2688_v0, %v3369_v50  ;;  %v585_v16 = vadd.f32 %v2688_v0, %v3370_v32 }
 0x121   :  { %v1282_v22 = vsel %vm1258_vm0, %v897_v31, %v1113_v19  ;;  %v1281_v5 = vsel %vm1258_vm0, %v896_v33, %v1111_v11  ;;  %v577_v31 = vadd.f32 %v2688_v0, %v3362_v13  ;;  %v906_v19 = vmax.f32 %v574_v14, 0.0  ;;  %v3364_v11 = vld [vmem:[#allocation6_spill] sm:$0xff] }
 0x122   :  { %1347 = vst.msk [vmem:[#allocation2 + $0xb8] sm:$0xff] %vm1323_vm1, %v1282_v22  ;;  %1346 = vst.msk [vmem:[#allocation2 + $0xb0] sm:$0xff] %vm1323_vm1, %v1281_v5  ;;  %v579_v5 = vadd.f32 %v2688_v0, %v3364_v11  ;;  %v584_v14 = vadd.f32 %v2688_v0, %v3371_v37  ;;  %v3372_v13 = vld [vmem:[#allocation26_spill] sm:$0xff]  ;;  %v3374_v11 = vld [vmem:[#allocation12_spill] sm:$0xff]  ;;  %v925_v62 = vmax.f32 %v593_v34, 0.0  ;;  %v594_v32 = vadd.f32 %v2688_v0, %v2662_v52 }
 0x123   :  { %v909_v17 = vmax.f32 %v577_v31, 0.0  ;;  %v587_v31 = vadd.f32 %v2688_v0, %v3372_v13 }
 0x124   :  { %v1117_v57 = vpop.permute.xlu1 %1116  ;;  %v1115_v46 = vpop.permute.xlu0 %1114  ;;  %v926_v52 = vmax.f32 %v594_v32, 0.0 }
 0x125   :  { %v1284_v38 = vsel %vm1258_vm0, %v899_v41, %v1117_v57  ;;  %v1283_v8 = vsel %vm1258_vm0, %v898_v26, %v1115_v46  ;;  %v3365_v41 = vld [vmem:[#allocation23_spill] sm:$0xff]  ;;  %v908_v57 = vmax.f32 %v576_v18, 0.0  ;;  %v3366_v46 = vld [vmem:[#allocation24_spill] sm:$0xff]  ;;  %v586_v18 = vadd.f32 %v2688_v0, %v3373_v15 }
 0x126   :  { %1349 = vst.msk [vmem:[#allocation2 + $0xc8] sm:$0xff] %vm1323_vm1, %v1284_v38  ;;  %1348 = vst.msk [vmem:[#allocation2 + $0xc0] sm:$0xff] %vm1323_vm1, %v1283_v8  ;;  %v578_v47 = vadd.f32 %v2688_v0, %v3365_v41  ;;  %v581_v8 = vadd.f32 %v2688_v0, %v3366_v46  ;;  %v3375_v41 = vld [vmem:[#allocation13_spill] sm:$0xff]  ;;  %v3376_v46 = vld [vmem:[#allocation14_spill] sm:$0xff]  ;;  %v598_v15 = vadd.f32 %v2688_v0, %v2717_v2 }
 0x128   :  { %v1121_v20 = vpop.permute.xlu1 %1120  ;;  %v1119_v60 = vpop.permute.xlu0 %1118  ;;  %v910_v7 = vmax.f32 %v578_v47, 0.0  ;;  %v588_v47 = vadd.f32 %v2688_v0, %v3375_v41  ;;  %v930_v2 = vmax.f32 %v598_v15, 0.0 }
 0x129   :  { %v1286_v63 = vsel %vm1258_vm0, %v901_v39, %v1121_v20  ;;  %v1285_v40 = vsel %vm1258_vm0, %v900_v36, %v1119_v60  ;;  %v911_v39 = vmax.f32 %v579_v5, 0.0  ;;  %v580_v20 = vadd.f32 %v2688_v0, %v3367_v56  ;;  %v3377_v56 = vld [vmem:[#allocation27_spill] sm:$0xff] }
 0x12a   :  { %1351 = vst.msk [vmem:[#allocation2 + $0xd8] sm:$0xff] %vm1323_vm1, %v1286_v63  ;;  %1350 = vst.msk [vmem:[#allocation2 + $0xd0] sm:$0xff] %vm1323_vm1, %v1285_v40  ;;  %v589_v5 = vadd.f32 %v2688_v0, %v3374_v11 }
 0x12c   :  { %v1125_v48 = vpop.permute.xlu1 %1124  ;;  %v1123_v21 = vpop.permute.xlu0 %1122 }
 0x12d   :  { %v1288_v42 = vsel %vm1258_vm0, %v903_v3, %v1125_v48  ;;  %v1287_v25 = vsel %vm1258_vm0, %v902_v27, %v1123_v21  ;;  %v913_v3 = vmax.f32 %v581_v8, 0.0  ;;  %v912_v27 = vmax.f32 %v580_v20, 0.0 }
 0x12e   :  { %1353 = vst.msk [vmem:[#allocation2 + $0xe8] sm:$0xff] %vm1323_vm1, %v1288_v42  ;;  %1352 = vst.msk [vmem:[#allocation2 + $0xe0] sm:$0xff] %vm1323_vm1, %v1287_v25  ;;  %v591_v8 = vadd.f32 %v2688_v0, %v3376_v46  ;;  %v590_v20 = vadd.f32 %v2688_v0, %v3377_v56  ;;  %v605_v46 = vadd.f32 %v2688_v0, %v2777_v43 }
 0x130   :  { %v1129_v54 = vpop.permute.xlu1 %1128  ;;  %v1127_v49 = vpop.permute.xlu0 %1126  ;;  %v937_v43 = vmax.f32 %v605_v46, 0.0 }
 0x131   :  { %v1290_v59 = vsel %vm1258_vm0, %v905_v12, %v1129_v54  ;;  %v1289_v29 = vsel %vm1258_vm0, %v904_v35, %v1127_v49  ;;  %v915_v12 = vmax.f32 %v583_v30, 0.0  ;;  %v914_v35 = vmax.f32 %v582_v9, 0.0 }
 0x132   :  { %1355 = vst.msk [vmem:[#allocation2 + $0xf8] sm:$0xff] %vm1323_vm1, %v1290_v59  ;;  %1354 = vst.msk [vmem:[#allocation2 + $0xf0] sm:$0xff] %vm1323_vm1, %v1289_v29  ;;  %v923_v30 = vmax.f32 %v591_v8, 0.0  ;;  %v604_v8 = vadd.f32 %v2688_v0, %v2782_v4 }
 0x134   :  { %v1133_v53 = vpop.permute.xlu1 %1132  ;;  %v1131_v61 = vpop.permute.xlu0 %1130 }
 0x135   :  { %v1292_v33 = vsel %vm1258_vm0, %v907_v44, %v1133_v53  ;;  %v1291_v22 = vsel %vm1258_vm0, %v906_v19, %v1131_v61  ;;  %v917_v44 = vmax.f32 %v585_v16, 0.0  ;;  %v916_v19 = vmax.f32 %v584_v14, 0.0 }
 0x136   :  { %1357 = vst.msk [vmem:[#allocation2 + $0x108] sm:$0xff] %vm1323_vm1, %v1292_v33  ;;  %1356 = vst.msk [vmem:[#allocation2 + $0x100] sm:$0xff] %vm1323_vm1, %v1291_v22 }
 0x138   :  { %v1137_v1 = vpop.permute.xlu1 %1136  ;;  %v1135_v23 = vpop.permute.xlu0 %1134 }
 0x139   :  { %v1294_v26 = vsel %vm1258_vm0, %v909_v17, %v1137_v1  ;;  %v1293_v38 = vsel %vm1258_vm0, %v908_v57, %v1135_v23  ;;  %v919_v17 = vmax.f32 %v587_v31, 0.0  ;;  %v918_v57 = vmax.f32 %v586_v18, 0.0 }
 0x13a   :  { %1359 = vst.msk [vmem:[#allocation2 + $0x118] sm:$0xff] %vm1323_vm1, %v1294_v26  ;;  %1358 = vst.msk [vmem:[#allocation2 + $0x110] sm:$0xff] %vm1323_vm1, %v1293_v38 }
 0x13c   :  { %v1141_v36 = vpop.permute.xlu1 %1140  ;;  %v1139_v60 = vpop.permute.xlu0 %1138 }
 0x13d   :  { %v1296_v63 = vsel %vm1258_vm0, %v911_v39, %v1141_v36  ;;  %v1295_v40 = vsel %vm1258_vm0, %v910_v7, %v1139_v60  ;;  %v921_v39 = vmax.f32 %v589_v5, 0.0  ;;  %v920_v7 = vmax.f32 %v588_v47, 0.0 }
 0x13e   :  { %1361 = vst.msk [vmem:[#allocation2 + $0x128] sm:$0xff] %vm1323_vm1, %v1296_v63  ;;  %1360 = vst.msk [vmem:[#allocation2 + $0x120] sm:$0xff] %vm1323_vm1, %v1295_v40  ;;  %v603_v47 = vadd.f32 %v2688_v0, %v2754_v28 }
 0x140   :  { %v1145_v48 = vpop.permute.xlu1 %1144  ;;  %v1143_v21 = vpop.permute.xlu0 %1142  ;;  %v935_v28 = vmax.f32 %v603_v47, 0.0 }
 0x141   :  { %v1298_v42 = vsel %vm1258_vm0, %v913_v3, %v1145_v48  ;;  %v1297_v25 = vsel %vm1258_vm0, %v912_v27, %v1143_v21  ;;  %v3378_v3 = vld [vmem:[#allocation28_spill] sm:$0xff]  ;;  %v922_v48 = vmax.f32 %v590_v20, 0.0 }
 0x142   :  { %1363 = vst.msk [vmem:[#allocation2 + $0x138] sm:$0xff] %vm1323_vm1, %v1298_v42  ;;  %1362 = vst.msk [vmem:[#allocation2 + $0x130] sm:$0xff] %vm1323_vm1, %v1297_v25  ;;  %v592_v50 = vadd.f32 %v2688_v0, %v3378_v3  ;;  %v595_v25 = vadd.f32 %v2688_v0, %v2656_v6 }
 0x144   :  { %v1149_v54 = vpop.permute.xlu1 %1148  ;;  %v1147_v49 = vpop.permute.xlu0 %1146  ;;  %v927_v6 = vmax.f32 %v595_v25, 0.0 }
 0x145   :  { %v1300_v59 = vsel %vm1258_vm0, %v915_v12, %v1149_v54  ;;  %v1299_v29 = vsel %vm1258_vm0, %v914_v35, %v1147_v49  ;;  %v924_v12 = vmax.f32 %v592_v50, 0.0  ;;  %v597_v35 = vadd.f32 %v2688_v0, %v2682_v51 }
 0x146   :  { %1365 = vst.msk [vmem:[#allocation2 + $0x148] sm:$0xff] %vm1323_vm1, %v1300_v59  ;;  %1364 = vst.msk [vmem:[#allocation2 + $0x140] sm:$0xff] %vm1323_vm1, %v1299_v29  ;;  %v596_v59 = vadd.f32 %v2688_v0, %v2693_v55 }
 0x147   :  { %v929_v51 = vmax.f32 %v597_v35, 0.0 }
 0x148   :  { %v1153_v53 = vpop.permute.xlu1 %1152  ;;  %v1151_v61 = vpop.permute.xlu0 %1150  ;;  %v928_v55 = vmax.f32 %v596_v59, 0.0 }
 0x149   :  { %v1302_v33 = vsel %vm1258_vm0, %v917_v44, %v1153_v53  ;;  %v1301_v22 = vsel %vm1258_vm0, %v916_v19, %v1151_v61  ;;  %v599_v44 = vadd.f32 %v2688_v0, %v2708_v58  ;;  %v601_v61 = vadd.f32 %v2688_v0, %v2733_v45 }
 0x14a   :  { %1367 = vst.msk [vmem:[#allocation2 + $0x158] sm:$0xff] %vm1323_vm1, %v1302_v33  ;;  %1366 = vst.msk [vmem:[#allocation2 + $0x150] sm:$0xff] %vm1323_vm1, %v1301_v22  ;;  %v600_v22 = vadd.f32 %v2688_v0, %v2740_v24 }
 0x14b   :  { %v931_v58 = vmax.f32 %v599_v44, 0.0  ;;  %v933_v45 = vmax.f32 %v601_v61, 0.0 }
 0x14c   :  { %v1157_v1 = vpop.permute.xlu1 %1156  ;;  %v1155_v23 = vpop.permute.xlu0 %1154  ;;  %v932_v24 = vmax.f32 %v600_v22, 0.0 }
 0x14d   :  { %v1304_v26 = vsel %vm1258_vm0, %v919_v17, %v1157_v1  ;;  %v1303_v38 = vsel %vm1258_vm0, %v918_v57, %v1155_v23  ;;  %v602_v1 = vadd.f32 %v2688_v0, %v2764_v10 }
 0x14e   :  { %1369 = vst.msk [vmem:[#allocation2 + $0x168] sm:$0xff] %vm1323_vm1, %v1304_v26  ;;  %1368 = vst.msk [vmem:[#allocation2 + $0x160] sm:$0xff] %vm1323_vm1, %v1303_v38 }
 0x14f   :  { %v934_v10 = vmax.f32 %v602_v1, 0.0 }
 0x150   :  { %v1161_v36 = vpop.permute.xlu1 %1160  ;;  %v1159_v60 = vpop.permute.xlu0 %1158 }
 0x151   :  { %v1306_v63 = vsel %vm1258_vm0, %v921_v39, %v1161_v36  ;;  %v1305_v40 = vsel %vm1258_vm0, %v920_v7, %v1159_v60 }
 0x152   :  { %1371 = vst.msk [vmem:[#allocation2 + $0x178] sm:$0xff] %vm1323_vm1, %v1306_v63  ;;  %1370 = vst.msk [vmem:[#allocation2 + $0x170] sm:$0xff] %vm1323_vm1, %v1305_v40  ;;  %v936_v63 = vmax.f32 %v604_v8, 0.0 }
 0x154   :  { %v1165_v9 = vpop.permute.xlu1 %1164  ;;  %v1163_v42 = vpop.permute.xlu0 %1162 }
 0x155   :  { %v1308_v27 = vsel %vm1258_vm0, %v923_v30, %v1165_v9  ;;  %v1307_v21 = vsel %vm1258_vm0, %v922_v48, %v1163_v42 }
 0x156   :  { %1373 = vst.msk [vmem:[#allocation2 + $0x188] sm:$0xff] %vm1323_vm1, %v1308_v27  ;;  %1372 = vst.msk [vmem:[#allocation2 + $0x180] sm:$0xff] %vm1323_vm1, %v1307_v21 }
 0x158   :  { %v1169_v16 = vpop.permute.xlu1 %1168  ;;  %v1167_v14 = vpop.permute.xlu0 %1166 }
 0x159   :  { %v1310_v37 = vsel %vm1258_vm0, %v925_v62, %v1169_v16  ;;  %v1309_v54 = vsel %vm1258_vm0, %v924_v12, %v1167_v14 }
 0x15a   :  { %1375 = vst.msk [vmem:[#allocation2 + $0x198] sm:$0xff] %vm1323_vm1, %v1310_v37  ;;  %1374 = vst.msk [vmem:[#allocation2 + $0x190] sm:$0xff] %vm1323_vm1, %v1309_v54 }
 0x15c   :  { %v1173_v49 = vpop.permute.xlu1 %1172  ;;  %v1171_v13 = vpop.permute.xlu0 %1170 }
 0x15d   :  { %v1312_v29 = vsel %vm1258_vm0, %v927_v6, %v1173_v49  ;;  %v1311_v31 = vsel %vm1258_vm0, %v926_v52, %v1171_v13 }
 0x15e   :  { %1377 = vst.msk [vmem:[#allocation2 + $0x1a8] sm:$0xff] %vm1323_vm1, %v1312_v29  ;;  %1376 = vst.msk [vmem:[#allocation2 + $0x1a0] sm:$0xff] %vm1323_vm1, %v1311_v31 }
 0x160   :  { %v1177_v18 = vpop.permute.xlu1 %1176  ;;  %v1175_v19 = vpop.permute.xlu0 %1174 }
 0x161   :  { %v1314_v53 = vsel %vm1258_vm0, %v929_v51, %v1177_v18  ;;  %v1313_v33 = vsel %vm1258_vm0, %v928_v55, %v1175_v19 }
 0x162   :  { %1379 = vst.msk [vmem:[#allocation2 + $0x1b8] sm:$0xff] %vm1323_vm1, %v1314_v53  ;;  %1378 = vst.msk [vmem:[#allocation2 + $0x1b0] sm:$0xff] %vm1323_vm1, %v1313_v33 }
 0x164   :  { %v1181_v11 = vpop.permute.xlu1 %1180  ;;  %v1179_v17 = vpop.permute.xlu0 %1178 }
 0x165   :  { %v1316_v5 = vsel %vm1258_vm0, %v931_v58, %v1181_v11  ;;  %v1315_v41 = vsel %vm1258_vm0, %v930_v2, %v1179_v17 }
 0x166   :  { %1381 = vst.msk [vmem:[#allocation2 + $0x1c8] sm:$0xff] %vm1323_vm1, %v1316_v5  ;;  %1380 = vst.msk [vmem:[#allocation2 + $0x1c0] sm:$0xff] %vm1323_vm1, %v1315_v41 }
 0x168   :  { %v1185_v57 = vpop.permute.xlu1 %1184  ;;  %v1183_v23 = vpop.permute.xlu0 %1182 }
 0x169   :  { %v1318_v26 = vsel %vm1258_vm0, %v933_v45, %v1185_v57  ;;  %v1317_v38 = vsel %vm1258_vm0, %v932_v24, %v1183_v23 }
 0x16a   :  { %1383 = vst.msk [vmem:[#allocation2 + $0x1d8] sm:$0xff] %vm1323_vm1, %v1318_v26  ;;  %1382 = vst.msk [vmem:[#allocation2 + $0x1d0] sm:$0xff] %vm1323_vm1, %v1317_v38 }
 0x16c   :  { %v1189_v39 = vpop.permute.xlu1 %1188  ;;  %v1187_v20 = vpop.permute.xlu0 %1186 }
 0x16d   :  { %v1320_v56 = vsel %vm1258_vm0, %v935_v28, %v1189_v39  ;;  %v1319_v36 = vsel %vm1258_vm0, %v934_v10, %v1187_v20 }
 0x16e   :  { %1385 = vst.msk [vmem:[#allocation2 + $0x1e8] sm:$0xff] %vm1323_vm1, %v1320_v56  ;;  %1384 = vst.msk [vmem:[#allocation2 + $0x1e0] sm:$0xff] %vm1323_vm1, %v1319_v36 }
 0x170   :  { %v1193_v7 = vpop.permute.xlu1 %1192  ;;  %v1191_v40 = vpop.permute.xlu0 %1190 }
 0x171   :  { %v1322_v60 = vsel %vm1258_vm0, %v937_v43, %v1193_v7  ;;  %v1321_v0 = vsel %vm1258_vm0, %v936_v63, %v1191_v40 }
 0x172   :  { %1387 = vst.msk [vmem:[#allocation2 + $0x1f8] sm:$0xff] %vm1323_vm1, %v1322_v60  ;;  %1386 = vst.msk [vmem:[#allocation2 + $0x1f0] sm:$0xff] %vm1323_vm1, %v1321_v0 }
 0x173   :  { %1451 = shalt.err (!%p1448_p4)
}
 0x174   :  { %s1452_s16 = scalar_lea.hbm %s3159_s2, 8192 }
 0x175   :  { %p1453_p5 = scmp.ne.s32.totalorder %s3159_s2, %s1452_s16  ;;  %p1456_p6 = scmp.lt.u32.totalorder %s1452_s16, %s3159_s2 }
 0x177   :  { %p1458_p7 = pnand %p1456_p6, %p1453_p5 }
 0x179   :  { %1461 = shalt.err (!%p1458_p7)
}
 0x17a   :  { %s1467_s21 = smov 128  }
 0x17b   :  { %1399 = dma.vmem_to_hbm [thread:$0]  %s1394_s12, 8192, %s3159_s2, [#allocation3], %s1467_s21, %s1467_s21, %s1465_s11  }
 0x17c   :  { %1462 = dma.done.wait [#allocation3], 8192  }
 0x17d   :  { %1463 = vsyncadd [#allocation3], 4294959104 }
 0x17e   :  { %1403 = vsyncpa [#allocation3], 1 }

// kernel: complex_conv_block_forward.4
= control target key start
LH: loop header
LB: loop body
LE: loop exit
PB: predicated region body
PF: predicated region fallthrough
CT: control target
= control target key end

     0   :  { %s2961_s15 = smov 0   ;;  %s2963_s16 = smov 0   ;;  %s5018_s0 = inlined_call_operand.vmem [shape: f32[2,1,18,18,8], index: 0, kind: input, shape index: {}]   ;;  %s5019_s1 = inlined_call_operand.vmem [shape: f32[72,16], index: 1, kind: input, shape index: {}]   ;;  %s5020_s2 = inlined_call_operand.vmem [shape: f32[1,16], index: 2, kind: input, shape index: {}]   ;;  %s5021_s3 = inlined_call_operand.vmem [shape: f32[2,1,256,16], index: 3, kind: output, shape index: {0}]   ;;  %s5022_s4 = inlined_call_operand.vmem [shape: f32[2,8,8], index: 4, kind: output, shape index: {1}]  }
   0x1   :  { %s2965_s17 = smov 0  }
   0x2 LB: > { %s27_s18 = sadd.s32 1, %s2920_s16  ;;  %p2693_p0 = scmp.ge.s32.totalorder %s2924_s17, 1  ;;  %s2924_s17 = sphi %s2965_s17, %s15_s17   ;;  %s2920_s16 = sphi %s2963_s16, %s5162_s16   ;;  %s2916_s15 = sphi %s2961_s15, %s5161_s15  }
   0x3   : > { %p29_p1 = scmp.ge.s32.totalorder %s27_s18, 2  ;;  %p185_p2 = scmp.lt.s32.totalorder %s2924_s17, 3 }
   0x5   : > { %s5164_s18 = smov (%p29_p1, %s27_s18), 0  ;;  %p186_p3 = pnand %p2693_p0, %p185_p2 }
   0x7   : > { %189 = sbr.rel (%p186_p3) target bundleno = 1011 (0x3f3), region = 32 }
   0xe   : > { %p223_p4 = scmp.lt.s32.totalorder %s2916_s15, 1  ;;  %vm299_vm0 = vcmask 64512   ;;  %vm380_vm1 = vcmask 1046528   ;;  %s2926_s23 = smov 8   ;;  %vm590_vm2 = vcmask 1045504   ;;  %vm557_vm3 = vcmask 130112  }
   0xf   : > { %s2927_s24 = smov 16   ;;  %s2928_s25 = smov 24   ;;  %vm767_vm4 = vcmask 195712   ;;  %vm898_vm5 = vcmask 261312   ;;  %vm1033_vm6 = vcmask 326912   ;;  %vm1167_vm7 = vcmask 392512  }
  0x10   : > { %s5166_s15 = smov (!%p223_p4, %s2916_s15), 1  ;;  %s2929_s30 = smov 32   ;;  %vm1298_vm8 = vcmask 458112   ;;  %vm1433_vm9 = vcmask 523712   ;;  %vm1567_vm10 = vcmask 589312   ;;  %vm1648_vm11 = vcmask 588800  }
  0x11   : > { %s2867_s19 = smul.u32 432, %s5166_s15  ;;  %s2930_s9 = smov 40   ;;  %vm1970_vm12 = vcmask 130048   ;;  %vm2548_vm13 = vcmask 1040384   ;;  %vm2550_vm14 = vcmask 1041408   ;;  %vm2552_vm15 = vcmask 1042432  }
  0x12   : > { %s2931_s14 = smov 48   ;;  %s2933_s28 = smov 64  }
  0x13   : > { %s2985_s22 = scalar_lea.vmem %s5018_s0, %s2867_s19  ;;  %s2934_s7 = smov 120  }
  0x14   : > { %v2988_v0 = vld [vmem:[%s2985_s22] sm:$0xff]  ;;  %v2991_v1 = vld [vmem:[%s2985_s22 + $0x8] sm:$0xff]  ;;  %v2994_v2 = vld [vmem:[%s2985_s22 + $0x18] sm:$0xff]  ;;  %s2697_s8 = sshll.u32 %s5166_s15, 3 }
  0x15   : > { %v381_v3 = vrot.slane %v2988_v0, 1  ;;  %v382_v4 = vrot.slane %v2991_v1, 1  ;;  %v2999_v5 = vld [vmem:[%s2985_s22 + $0x20] sm:$0xff]  ;;  %v386_v6 = vrot.slane %v2994_v2, 1  ;;  %v3003_v7 = vld [vmem:[%s2985_s22 + $0x10] sm:$0x3]  ;;  %s4862_s11 = scalar_lea.vmem %s5022_s4, %s2697_s8 }
  0x16   : > { %300 = vst.msk [vmem:[#allocation2] sm:$0xff] %vm299_vm0, %v2988_v0  ;;  %301 = vst.msk [vmem:[#allocation2 + $0x8] sm:$0xff] %vm299_vm0, %v2991_v1  ;;  %v387_v8 = vrot.slane %v2999_v5, 1  ;;  %v384_v9 = vrot.slane %v3003_v7, 1  ;;  %v3014_v10 = vld [vmem:[%s2985_s22 + $0x28] sm:$0x3] }
  0x17   : > { %302 = vst.msk [vmem:[#allocation2 + $0x10] sm:$0xff] %vm299_vm0, %v2994_v2  ;;  %v3017_v11 = vld [vmem:[%s2985_s22 + $0x30] sm:$0xff]  ;;  %v3020_v12 = vld [vmem:[%s2985_s22 + $0x38] sm:$0xff]  ;;  %303 = vst.msk [vmem:[#allocation2 + $0x18] sm:$0xff] %vm299_vm0, %v2999_v5  ;;  %v383_v13 = vsel %vm380_vm1, %v381_v3, %v382_v4  ;;  %v389_v14 = vrot.slane %v3014_v10, 1 }
  0x18   : > { %v3027_v15 = vld [vmem:[%s2985_s22 + $0x40] sm:$0x3]  ;;  %v3030_v16 = vld [vmem:[%s2985_s22 + $0x48] sm:$0xff]  ;;  %304 = vst.msk [vmem:[#allocation2 + $0x20] sm:$0xff] %vm299_vm0, %v3017_v11  ;;  %305 = vst.msk [vmem:[#allocation2 + $0x28] sm:$0xff] %vm299_vm0, %v3020_v12  ;;  %461 = vrot.lane.b32.xlu0 %v383_v13, %s2926_s23  ;;  %v3038_v17 = vsel %vm380_vm1, %v386_v6, %v387_v8  ;;  %v385_v20 = vsel %vm380_vm1, %v382_v4, %v384_v9  ;;  %v391_v21 = vrot.slane %v3017_v11, 1 }
  0x19   : > { %v3041_v18 = vld [vmem:[%s2985_s22 + $0x50] sm:$0xff]  ;;  %v3044_v19 = vld [vmem:[%s2985_s22 + $0x60] sm:$0xff]  ;;  %306 = vst.msk [vmem:[#allocation2 + $0x30] sm:$0xff] %vm299_vm0, %v3030_v16  ;;  %465 = vrot.lane.b32.xlu1 %v3038_v17, %s2926_s23  ;;  %v392_v22 = vrot.slane %v3020_v12, 1  ;;  %v3054_v23 = vld [vmem:[%s2985_s22 + $0x68] sm:$0xff]  ;;  %v3064_v25 = vsel %vm380_vm1, %v387_v8, %v389_v14  ;;  %v394_v26 = vrot.slane %v3027_v15, 1 }
  0x1a   : > { %v3057_v24 = vld [vmem:[%s2985_s22 + $0x78] sm:$0xff]  ;;  %307 = vst.msk [vmem:[#allocation2 + $0x38] sm:$0xff] %vm299_vm0, %v3041_v18  ;;  %308 = vst.msk [vmem:[#allocation2 + $0x40] sm:$0xff] %vm299_vm0, %v3044_v19  ;;  %v3068_v27 = vld [vmem:[%s2985_s22 + $0x80] sm:$0xff]  ;;  %v396_v34 = vrot.slane %v3030_v16, 1  ;;  %v397_v35 = vrot.slane %v3041_v18, 1 }
  0x1b   : > { %309 = vst.msk [vmem:[#allocation2 + $0x48] sm:$0xff] %vm299_vm0, %v3054_v23  ;;  %310 = vst.msk [vmem:[#allocation2 + $0x50] sm:$0xff] %vm299_vm0, %v3057_v24  ;;  %v3075_v28 = vld [vmem:[%s2985_s22 + $0x58] sm:$0x3]  ;;  %v3078_v29 = vld [vmem:[%s2985_s22 + $0x90] sm:$0xff]  ;;  %v3099_v33 = vsel %vm380_vm1, %v391_v21, %v392_v22  ;;  %v3117_v39 = vsel %vm380_vm1, %v392_v22, %v394_v26  ;;  %v401_v48 = vrot.slane %v3044_v19, 1 }
  0x1c   : > { %v3081_v30 = vld [vmem:[%s2985_s22 + $0x98] sm:$0xff]  ;;  %311 = vst.msk [vmem:[#allocation2 + $0x58] sm:$0xff] %vm299_vm0, %v3068_v27  ;;  %463 = vrot.lane.b32.xlu0 %v385_v20, %s2926_s23  ;;  %v3087_v31 = vld [vmem:[%s2985_s22 + $0xa8] sm:$0xff]  ;;  %v3090_v32 = vld [vmem:[%s2985_s22 + $0xb0] sm:$0xff]  ;;  %v399_v40 = vrot.slane %v3075_v28, 1  ;;  %v3155_v47 = vsel %vm380_vm1, %v396_v34, %v397_v35  ;;  %v402_v49 = vrot.slane %v3054_v23, 1 }
  0x1d   : > { %5092 = vst [vmem:[#allocation3_spill] sm:$0xff] %v3090_v32  ;;  %312 = vst.msk [vmem:[#allocation2 + $0x60] sm:$0xff] %vm299_vm0, %v3078_v29  ;;  %467 = vrot.lane.b32.xlu1 %v3064_v25, %s2926_s23  ;;  %v3104_v36 = vld [vmem:[%s2985_s22 + $0xc0] sm:$0xff]  ;;  %v3107_v37 = vld [vmem:[%s2985_s22 + $0xc8] sm:$0xff]  ;;  %v406_v60 = vrot.slane %v3057_v24, 1  ;;  %v407_v61 = vrot.slane %v3068_v27, 1 }
  0x1e   : > { %313 = vst.msk [vmem:[#allocation2 + $0x68] sm:$0xff] %vm299_vm0, %v3081_v30  ;;  %5093 = vst [vmem:[#allocation4_spill] sm:$0xff] %v3107_v37  ;;  %v3110_v38 = vld [vmem:[%s2985_s22 + $0xd8] sm:$0xff]  ;;  %v3121_v41 = vld [vmem:[%s2985_s22 + $0xe0] sm:$0xff]  ;;  %v3170_v52 = vsel %vm380_vm1, %v397_v35, %v399_v40  ;;  %v3201_v59 = vsel %vm380_vm1, %v401_v48, %v402_v49  ;;  %v591_v8 = vrot.slane %v2988_v0, 2  ;;  %v411_v13 = vrot.slane %v3078_v29, 1 }
  0x1f   : > { %314 = vst.msk [vmem:[#allocation2 + $0x70] sm:$0xff] %vm299_vm0, %v3087_v31  ;;  %315 = vst.msk [vmem:[#allocation2 + $0x78] sm:$0xff] %vm299_vm0, %v3090_v32  ;;  %v3130_v42 = vld [vmem:[%s2985_s22 + $0x70] sm:$0x3]  ;;  %v3136_v44 = vld [vmem:[%s2985_s22 + $0xf8] sm:$0xff]  ;;  %v3232_v9 = vsel %vm380_vm1, %v406_v60, %v407_v61  ;;  %v412_v14 = vrot.slane %v3081_v30, 1 }
  0x20   : > { %5094 = vst [vmem:[#allocation5_spill] sm:$0xff] %v3121_v41  ;;  %316 = vst.msk [vmem:[#allocation2 + $0x80] sm:$0xff] %vm299_vm0, %v3104_v36  ;;  %v3133_v43 = vld [vmem:[%s2985_s22 + $0xf0] sm:$0xff]  ;;  %469 = vrot.lane.b32.xlu0 %v3099_v33, %s2926_s23  ;;  %v3143_v45 = vld [vmem:[%s2985_s22 + $0x108] sm:$0xff]  ;;  %v404_v53 = vrot.slane %v3130_v42, 1  ;;  %v5023_v20 = vrot.slane %v2991_v1, 2 }
  0x21   : > { %317 = vst.msk [vmem:[#allocation2 + $0x88] sm:$0xff] %vm299_vm0, %v3107_v37  ;;  %318 = vst.msk [vmem:[#allocation2 + $0x90] sm:$0xff] %vm299_vm0, %v3110_v38  ;;  %v3146_v46 = vld [vmem:[%s2985_s22 + $0x110] sm:$0xff]  ;;  %471 = vrot.lane.b32.xlu1 %v3117_v39, %s2926_s23  ;;  %v3160_v50 = vld [vmem:[%s2985_s22 + $0x120] sm:$0xff]  ;;  %v3254_v34 = vsel %vm380_vm1, %v411_v13, %v412_v14  ;;  %v416_v35 = vrot.slane %v3087_v31, 1  ;;  %v417_v40 = vrot.slane %v3090_v32, 1 }
  0x22   : > { %5095 = vst [vmem:[#allocation6_spill] sm:$0xff] %v3136_v44  ;;  %319 = vst.msk [vmem:[#allocation2 + $0x98] sm:$0xff] %vm299_vm0, %v3121_v41  ;;  %v3163_v51 = vld [vmem:[%s2985_s22 + $0x128] sm:$0xff]  ;;  %v3174_v54 = vld [vmem:[%s2985_s22 + $0x138] sm:$0xff]  ;;  %v3216_v3 = vsel %vm380_vm1, %v402_v49, %v404_v53  ;;  %v3247_v0 = vsel %vm590_vm2, %v591_v8, %v5023_v20  ;;  %v427_v20 = vrot.slane %v3121_v41, 1 }
  0x23   : > { %5096 = vst [vmem:[#allocation7_spill] sm:$0xff] %v3146_v46  ;;  %320 = vst.msk [vmem:[#allocation2 + $0xa0] sm:$0xff] %vm299_vm0, %v3133_v43  ;;  %v3181_v55 = vld [vmem:[%s2985_s22 + $0x88] sm:$0x3]  ;;  %v3184_v56 = vld [vmem:[%s2985_s22 + $0x140] sm:$0xff]  ;;  %v3270_v60 = vsel %vm380_vm1, %v416_v35, %v417_v40  ;;  %v426_v35 = vrot.slane %v3110_v38, 1 }
  0x24   : > { %321 = vst.msk [vmem:[#allocation2 + $0xa8] sm:$0xff] %vm299_vm0, %v3136_v44  ;;  %5097 = vst [vmem:[#allocation8_spill] sm:$0xff] %v3163_v51  ;;  %473 = vrot.lane.b32.xlu0 %v3155_v47, %s2926_s23  ;;  %v3191_v57 = vld [vmem:[%s2985_s22 + $0x150] sm:$0xff]  ;;  %v3194_v58 = vld [vmem:[%s2985_s22 + $0x158] sm:$0xff]  ;;  %v409_v4 = vrot.slane %v3181_v55, 1 }
  0x25   : > { %322 = vst.msk [vmem:[#allocation2 + $0xb0] sm:$0xff] %vm299_vm0, %v3143_v45  ;;  %323 = vst.msk [vmem:[#allocation2 + $0xb8] sm:$0xff] %vm299_vm0, %v3146_v46  ;;  %475 = vrot.lane.b32.xlu1 %v3170_v52, %s2926_s23  ;;  %v3206_v62 = vld [vmem:[%s2985_s22 + $0x168] sm:$0xff]  ;;  %v3209_v63 = vld [vmem:[%s2985_s22 + $0x170] sm:$0xff] }
  0x26   : > { %324 = vst.msk [vmem:[#allocation2 + $0xc0] sm:$0xff] %vm299_vm0, %v3160_v50  ;;  %325 = vst.msk [vmem:[#allocation2 + $0xc8] sm:$0xff] %vm299_vm0, %v3163_v51  ;;  %v3224_v6 = vld [vmem:[%s2985_s22 + $0xa0] sm:$0x3]  ;;  %v3238_v21 = vsel %vm380_vm1, %v407_v61, %v409_v4  ;;  %v3242_v26 = vld [vmem:[%s2985_s22 + $0xb8] sm:$0x3] }
  0x27   : > { %5098 = vst [vmem:[#allocation9_spill] sm:$0xff] %v3184_v56  ;;  %326 = vst.msk [vmem:[#allocation2 + $0xd0] sm:$0xff] %vm299_vm0, %v3174_v54  ;;  %v414_v22 = vrot.slane %v3224_v6, 1  ;;  %v419_v49 = vrot.slane %v3242_v26, 1  ;;  %v3263_v53 = vld [vmem:[%s2985_s22 + $0xd0] sm:$0x3] }
  0x28   : > { %5099 = vst [vmem:[#allocation10_spill] sm:$0xff] %v3194_v58  ;;  %327 = vst.msk [vmem:[#allocation2 + $0xd8] sm:$0xff] %vm299_vm0, %v3184_v56  ;;  %477 = vrot.lane.b32.xlu0 %v3201_v59, %s2926_s23  ;;  %v421_v61 = vrot.slane %v3104_v36, 1  ;;  %v422_v4 = vrot.slane %v3107_v37, 1  ;;  %v424_v13 = vrot.slane %v3263_v53, 1 }
  0x29   : > { %5100 = vst [vmem:[#allocation11_spill] sm:$0xff] %v3201_v59  ;;  %5101 = vst [vmem:[#allocation12_spill] sm:$0xff] %v3209_v63  ;;  %479 = vrot.lane.b32.xlu1 %v3216_v3, %s2926_s23  ;;  %v3259_v48 = vsel %vm380_vm1, %v412_v14, %v414_v22  ;;  %v3275_v8 = vsel %vm380_vm1, %v417_v40, %v419_v49  ;;  %v3279_v14 = vld [vmem:[%s2985_s22 + $0xe8] sm:$0x3]  ;;  %v3375_v59 = vld [vmem:[%s2985_s22 + $0x178] sm:$0x3] }
  0x2a   : > { %328 = vst.msk [vmem:[#allocation2 + $0xe0] sm:$0xff] %vm299_vm0, %v3191_v57  ;;  %329 = vst.msk [vmem:[#allocation2 + $0xe8] sm:$0xff] %vm299_vm0, %v3194_v58  ;;  %v3286_v22 = vsel %vm380_vm1, %v421_v61, %v422_v4  ;;  %v3291_v40 = vsel %vm380_vm1, %v422_v4, %v424_v13  ;;  %v429_v49 = vrot.slane %v3279_v14, 1  ;;  %v3302_v61 = vsel %vm380_vm1, %v426_v35, %v427_v20 }
  0x2b   : > { %5102 = vst [vmem:[#allocation13_spill] sm:$0xff] %v3216_v3  ;;  %330 = vst.msk [vmem:[#allocation2 + $0xf0] sm:$0xff] %vm299_vm0, %v3206_v62  ;;  %v3359_v3 = vld [vmem:[%s2985_s22 + $0x160] sm:$0x3] }
  0x2c   : > { %331 = vst.msk [vmem:[#allocation2 + $0xf8] sm:$0xff] %vm299_vm0, %v3209_v63  ;;  %5103 = vst [vmem:[#allocation14_spill] sm:$0xff] %v3232_v9  ;;  %481 = vrot.lane.b32.xlu0 %v3232_v9, %s2926_s23  ;;  %v3307_v4 = vsel %vm380_vm1, %v427_v20, %v429_v49  ;;  %v3343_v9 = vld [vmem:[%s2985_s22 + $0x148] sm:$0x3] }
  0x2d   : > { %5104 = vst [vmem:[#allocation15_spill] sm:$0xff] %v3238_v21  ;;  %483 = vrot.lane.b32.xlu1 %v3238_v21, %s2926_s23  ;;  %5105 = vst [vmem:[#allocation16_spill] sm:$0xff] %v3254_v34  ;;  %v3327_v21 = vld [vmem:[%s2985_s22 + $0x130] sm:$0x3] }
  0x2e   : > { %5106 = vst [vmem:[#allocation17_spill] sm:$0xff] %v3259_v48  ;;  %5107 = vst [vmem:[#allocation18_spill] sm:$0xff] %v3270_v60 }
  0x2f   : > { %5108 = vst [vmem:[#allocation19_spill] sm:$0xff] %v3275_v8  ;;  %5109 = vst [vmem:[#allocation20_spill] sm:$0xff] %v3286_v22 }
  0x30   : > { %485 = vrot.lane.b32.xlu0 %v3254_v34, %s2926_s23  ;;  %5110 = vst [vmem:[#allocation21_spill] sm:$0xff] %v3291_v40  ;;  %5111 = vst [vmem:[#allocation22_spill] sm:$0xff] %v3302_v61  ;;  %v3311_v34 = vld [vmem:[%s2985_s22 + $0x118] sm:$0x3] }
  0x31   : > { %487 = vrot.lane.b32.xlu1 %v3259_v48, %s2926_s23  ;;  %v3295_v48 = vld [vmem:[%s2985_s22 + $0x100] sm:$0x3]  ;;  %5112 = vst [vmem:[#allocation23_spill] sm:$0xff] %v3307_v4  ;;  %v439_v49 = vrot.slane %v3311_v34, 1 }
  0x32   : > { %v434_v13 = vrot.slane %v3295_v48, 1 }
  0x34   : > { %489 = vrot.lane.b32.xlu0 %v3270_v60, %s2926_s23  ;;  %v432_v60 = vrot.slane %v3136_v44, 1 }
  0x35   : > { %491 = vrot.lane.b32.xlu1 %v3275_v8, %s2926_s23  ;;  %v431_v8 = vrot.slane %v3133_v43, 1 }
  0x36   : > { %v3323_v20 = vsel %vm380_vm1, %v432_v60, %v434_v13  ;;  %v444_v13 = vrot.slane %v3327_v21, 1 }
  0x37   : > { %v3318_v35 = vsel %vm380_vm1, %v431_v8, %v432_v60  ;;  %5114 = vst [vmem:[#allocation25_spill] sm:$0xff] %v3323_v20 }
  0x38   : > { %493 = vrot.lane.b32.xlu0 %v3286_v22, %s2926_s23  ;;  %5113 = vst [vmem:[#allocation24_spill] sm:$0xff] %v3318_v35  ;;  %v437_v22 = vrot.slane %v3146_v46, 1 }
  0x39   : > { %495 = vrot.lane.b32.xlu1 %v3291_v40, %s2926_s23  ;;  %v436_v40 = vrot.slane %v3143_v45, 1 }
  0x3a   : > { %v3339_v60 = vsel %vm380_vm1, %v437_v22, %v439_v49  ;;  %v449_v49 = vrot.slane %v3343_v9, 1 }
  0x3b   : > { %v3334_v8 = vsel %vm380_vm1, %v436_v40, %v437_v22  ;;  %5116 = vst [vmem:[#allocation27_spill] sm:$0xff] %v3339_v60 }
  0x3c   : > { %497 = vrot.lane.b32.xlu0 %v3302_v61, %s2926_s23  ;;  %5115 = vst [vmem:[#allocation26_spill] sm:$0xff] %v3334_v8  ;;  %v442_v61 = vrot.slane %v3163_v51, 1 }
  0x3d   : > { %499 = vrot.lane.b32.xlu1 %v3307_v4, %s2926_s23  ;;  %v441_v4 = vrot.slane %v3160_v50, 1 }
  0x3e   : > { %v3355_v22 = vsel %vm380_vm1, %v442_v61, %v444_v13  ;;  %v454_v13 = vrot.slane %v3359_v3, 1 }
  0x3f   : > { %v3350_v40 = vsel %vm380_vm1, %v441_v4, %v442_v61  ;;  %5118 = vst [vmem:[#allocation29_spill] sm:$0xff] %v3355_v22 }
  0x40   : > { %501 = vrot.lane.b32.xlu0 %v3318_v35, %s2926_s23  ;;  %5117 = vst [vmem:[#allocation28_spill] sm:$0xff] %v3350_v40  ;;  %v447_v35 = vrot.slane %v3184_v56, 1 }
  0x41   : > { %503 = vrot.lane.b32.xlu1 %v3323_v20, %s2926_s23  ;;  %v446_v20 = vrot.slane %v3174_v54, 1 }
  0x42   : > { %v3371_v61 = vsel %vm380_vm1, %v447_v35, %v449_v49  ;;  %v459_v49 = vrot.slane %v3375_v59, 1 }
  0x43   : > { %v3366_v4 = vsel %vm380_vm1, %v446_v20, %v447_v35  ;;  %5120 = vst [vmem:[#allocation31_spill] sm:$0xff] %v3371_v61 }
  0x44   : > { %505 = vrot.lane.b32.xlu0 %v3334_v8, %s2926_s23  ;;  %5119 = vst [vmem:[#allocation30_spill] sm:$0xff] %v3366_v4  ;;  %v452_v8 = vrot.slane %v3194_v58, 1 }
  0x45   : > { %507 = vrot.lane.b32.xlu1 %v3339_v60, %s2926_s23  ;;  %v451_v60 = vrot.slane %v3191_v57, 1 }
  0x46   : > { %v3387_v35 = vsel %vm380_vm1, %v452_v8, %v454_v13  ;;  %v597_v13 = vrot.slane %v2999_v5, 2 }
  0x47   : > { %v3382_v20 = vsel %vm380_vm1, %v451_v60, %v452_v8  ;;  %5122 = vst [vmem:[#allocation33_spill] sm:$0xff] %v3387_v35  ;;  %v596_v8 = vrot.slane %v2994_v2, 2 }
  0x48   : > { %509 = vrot.lane.b32.xlu0 %v3350_v40, %s2926_s23  ;;  %5121 = vst [vmem:[#allocation32_spill] sm:$0xff] %v3382_v20  ;;  %v457_v40 = vrot.slane %v3209_v63, 1 }
  0x49   : > { %511 = vrot.lane.b32.xlu1 %v3355_v22, %s2926_s23  ;;  %v456_v22 = vrot.slane %v3206_v62, 1 }
  0x4a   : > { %v3398_v60 = vsel %vm380_vm1, %v457_v40, %v459_v49  ;;  %v602_v49 = vrot.slane %v3020_v12, 2 }
  0x4b   : > { %5124 = vst [vmem:[#allocation35_spill] sm:$0xff] %v3398_v60 }
  0x4c   : > { %513 = vrot.lane.b32.xlu0 %v3366_v4, %s2926_s23  ;;  %v594_v4 = vrot.slane %v3003_v7, 2  ;;  %v3415_v7 = vsel %vm590_vm2, %v596_v8, %v597_v13  ;;  %v611_v8 = vrot.slane %v3044_v19, 2 }
  0x4d   : > { %515 = vrot.lane.b32.xlu1 %v3371_v61, %s2926_s23  ;;  %v3395_v61 = vsel %vm380_vm1, %v456_v22, %v457_v40  ;;  %v601_v40 = vrot.slane %v3017_v11, 2 }
  0x4e   : > { %5123 = vst [vmem:[#allocation34_spill] sm:$0xff] %v3395_v61 }
  0x50   : > { %517 = vrot.lane.b32.xlu0 %v3382_v20, %s2926_s23  ;;  %v599_v20 = vrot.slane %v3014_v10, 2  ;;  %v3428_v10 = vsel %vm590_vm2, %v601_v40, %v602_v49  ;;  %v614_v40 = vrot.slane %v3130_v42, 2 }
  0x51   : > { %519 = vrot.lane.b32.xlu1 %v3387_v35, %s2926_s23  ;;  %v5125_v35 = vrot.slane %v2991_v1, 2  ;;  %v604_v1 = vrot.slane %v3027_v15, 2 }
  0x53   : > { %v595_v22 = vsel %vm590_vm2, %v5125_v35, %v594_v4  ;;  %v607_v4 = vrot.slane %v3041_v18, 2  ;;  %v3433_v35 = vsel %vm590_vm2, %v602_v49, %v604_v1  ;;  %v616_v49 = vrot.slane %v3057_v24, 2 }
  0x54   : > { %521 = vrot.lane.b32.xlu0 %v3395_v61, %s2926_s23  ;;  %v617_v1 = vrot.slane %v3068_v27, 2 }
  0x55   : > { %523 = vrot.lane.b32.xlu1 %v3398_v60, %s2926_s23  ;;  %v3420_v60 = vsel %vm590_vm2, %v597_v13, %v599_v20  ;;  %v609_v20 = vrot.slane %v3075_v28, 2  ;;  %v612_v13 = vrot.slane %v3054_v23, 2 }
  0x56   : > { %v3467_v42 = vsel %vm590_vm2, %v616_v49, %v617_v1  ;;  %v627_v49 = vrot.slane %v3090_v32, 2 }
  0x57   : > { %v3454_v28 = vsel %vm590_vm2, %v611_v8, %v612_v13  ;;  %v622_v8 = vrot.slane %v3081_v30, 2 }
  0x58   : > { %671 = vrot.lane.b32.xlu0 %v3247_v0, %s2927_s24  ;;  %v606_v0 = vrot.slane %v3030_v16, 2 }
  0x59   : > { %673 = vrot.lane.b32.xlu1 %v595_v22, %s2927_s24  ;;  %v3446_v22 = vsel %vm590_vm2, %v607_v4, %v609_v20  ;;  %v621_v20 = vrot.slane %v3078_v29, 2 }
  0x5a   : > { %v3441_v15 = vsel %vm590_vm2, %v606_v0, %v607_v4  ;;  %v3459_v0 = vsel %vm590_vm2, %v612_v13, %v614_v40  ;;  %v619_v4 = vrot.slane %v3181_v55, 2  ;;  %v624_v13 = vrot.slane %v3224_v6, 2 }
  0x5b   : > { %5126 = vst [vmem:[#allocation36_spill] sm:$0xff] %v3459_v0  ;;  %v3480_v55 = vsel %vm590_vm2, %v621_v20, %v622_v8  ;;  %v626_v40 = vrot.slane %v3087_v31, 2  ;;  %v632_v20 = vrot.slane %v3107_v37, 2 }
  0x5c   : > { %675 = vrot.lane.b32.xlu0 %v3415_v7, %s2927_s24  ;;  %v3472_v61 = vsel %vm590_vm2, %v617_v1, %v619_v4  ;;  %v629_v1 = vrot.slane %v3242_v26, 2  ;;  %v631_v4 = vrot.slane %v3104_v36, 2 }
  0x5d   : > { %677 = vrot.lane.b32.xlu1 %v3420_v60, %s2927_s24  ;;  %v3493_v6 = vsel %vm590_vm2, %v626_v40, %v627_v49  ;;  %v637_v40 = vrot.slane %v3121_v41, 2 }
  0x5e   : > { %v3498_v32 = vsel %vm590_vm2, %v627_v49, %v629_v1  ;;  %v3506_v26 = vsel %vm590_vm2, %v631_v4, %v632_v20  ;;  %v639_v49 = vrot.slane %v3279_v14, 2  ;;  %v641_v1 = vrot.slane %v3133_v43, 2 }
  0x5f   : > { %v642_v4 = vrot.slane %v3136_v44, 2 }
  0x60   : > { %679 = vrot.lane.b32.xlu0 %v3428_v10, %s2927_s24  ;;  %v3524_v41 = vsel %vm590_vm2, %v637_v40, %v639_v49  ;;  %v651_v49 = vrot.slane %v3160_v50, 2 }
  0x61   : > { %681 = vrot.lane.b32.xlu1 %v3433_v35, %s2927_s24  ;;  %v3532_v14 = vsel %vm590_vm2, %v641_v1, %v642_v4  ;;  %v652_v1 = vrot.slane %v3163_v51, 2 }
  0x64   : > { %683 = vrot.lane.b32.xlu0 %v3441_v15, %s2927_s24 }
  0x65   : > { %685 = vrot.lane.b32.xlu1 %v3446_v22, %s2927_s24 }
  0x68   : > { %687 = vrot.lane.b32.xlu0 %v3454_v28, %s2927_s24 }
  0x69   : > { %689 = vrot.lane.b32.xlu1 %v3459_v0, %s2927_s24  ;;  %v3485_v0 = vsel %vm590_vm2, %v622_v8, %v624_v13  ;;  %v634_v8 = vrot.slane %v3263_v53, 2  ;;  %v636_v13 = vrot.slane %v3110_v38, 2 }
  0x6b   : > { %v3511_v37 = vsel %vm590_vm2, %v632_v20, %v634_v8  ;;  %v3519_v53 = vsel %vm590_vm2, %v636_v13, %v637_v40  ;;  %v644_v20 = vrot.slane %v3295_v48, 2  ;;  %v646_v8 = vrot.slane %v3143_v45, 2 }
  0x6c   : > { %691 = vrot.lane.b32.xlu0 %v3467_v42, %s2927_s24  ;;  %v647_v13 = vrot.slane %v3146_v46, 2  ;;  %v649_v40 = vrot.slane %v3311_v34, 2  ;;  %v3558_v34 = vsel %vm590_vm2, %v651_v49, %v652_v1  ;;  %v662_v49 = vrot.slane %v3194_v58, 2 }
  0x6d   : > { %693 = vrot.lane.b32.xlu1 %v3472_v61, %s2927_s24  ;;  %v3537_v44 = vsel %vm590_vm2, %v642_v4, %v644_v20  ;;  %v654_v4 = vrot.slane %v3327_v21, 2  ;;  %v656_v20 = vrot.slane %v3174_v54, 2  ;;  %v666_v58 = vrot.slane %v3206_v62, 2 }
  0x6e   : > { %v3545_v48 = vsel %vm590_vm2, %v646_v8, %v647_v13  ;;  %v3550_v46 = vsel %vm590_vm2, %v647_v13, %v649_v40  ;;  %v657_v8 = vrot.slane %v3184_v56, 2  ;;  %v659_v13 = vrot.slane %v3343_v9, 2 }
  0x6f   : > { %v3563_v51 = vsel %vm590_vm2, %v652_v1, %v654_v4  ;;  %v661_v40 = vrot.slane %v3191_v57, 2  ;;  %v664_v9 = vrot.slane %v3359_v3, 2 }
  0x70   : > { %695 = vrot.lane.b32.xlu0 %v3480_v55, %s2927_s24  ;;  %v3571_v21 = vsel %vm590_vm2, %v656_v20, %v657_v8  ;;  %v3576_v1 = vsel %vm590_vm2, %v657_v8, %v659_v13  ;;  %v667_v8 = vrot.slane %v3209_v63, 2 }
  0x71   : > { %697 = vrot.lane.b32.xlu1 %v3485_v0, %s2927_s24  ;;  %v3586_v20 = vsel %vm590_vm2, %v661_v40, %v662_v49  ;;  %v3591_v3 = vsel %vm590_vm2, %v662_v49, %v664_v9 }
  0x72   : > { %v3601_v40 = vsel %vm590_vm2, %v666_v58, %v667_v8 }
  0x74   : > { %699 = vrot.lane.b32.xlu0 %v3493_v6, %s2927_s24 }
  0x75   : > { %701 = vrot.lane.b32.xlu1 %v3498_v32, %s2927_s24 }
  0x78   : > { %703 = vrot.lane.b32.xlu0 %v3506_v26, %s2927_s24 }
  0x79   : > { %705 = vrot.lane.b32.xlu1 %v3511_v37, %s2927_s24 }
  0x7c   : > { %707 = vrot.lane.b32.xlu0 %v3519_v53, %s2927_s24 }
  0x7d   : > { %709 = vrot.lane.b32.xlu1 %v3524_v41, %s2927_s24 }
  0x80   : > { %711 = vrot.lane.b32.xlu0 %v3532_v14, %s2927_s24 }
  0x81   : > { %713 = vrot.lane.b32.xlu1 %v3537_v44, %s2927_s24 }
  0x84   : > { %715 = vrot.lane.b32.xlu0 %v3545_v48, %s2927_s24 }
  0x85   : > { %717 = vrot.lane.b32.xlu1 %v3550_v46, %s2927_s24 }
  0x88   : > { %719 = vrot.lane.b32.xlu0 %v3558_v34, %s2927_s24 }
  0x89   : > { %721 = vrot.lane.b32.xlu1 %v3563_v51, %s2927_s24 }
  0x8a   : > { %v462_v56 = vpop.permute.xlu0 %461 }
  0x8b   : > { %558 = vst.msk [vmem:[#allocation2] sm:$0xff] %vm557_vm3, %v462_v56  ;;  %v466_v4 = vpop.permute.xlu1 %465  ;;  %v669_v56 = vrot.slane %v3375_v59, 2 }
  0x8c   : > { %560 = vst.msk [vmem:[#allocation2 + $0x10] sm:$0xff] %vm557_vm3, %v466_v4  ;;  %723 = vrot.lane.b32.xlu0 %v3571_v21, %s2927_s24 }
  0x8d   : > { %725 = vrot.lane.b32.xlu1 %v3576_v1, %s2927_s24  ;;  %v3604_v49 = vsel %vm590_vm2, %v667_v8, %v669_v56 }
  0x8e   : > { %v464_v13 = vpop.permute.xlu0 %463 }
  0x8f   : > { %559 = vst.msk [vmem:[#allocation2 + $0x8] sm:$0xff] %vm557_vm3, %v464_v13  ;;  %v468_v4 = vpop.permute.xlu1 %467 }
  0x90   : > { %561 = vst.msk [vmem:[#allocation2 + $0x18] sm:$0xff] %vm557_vm3, %v468_v4  ;;  %727 = vrot.lane.b32.xlu0 %v3586_v20, %s2927_s24 }
  0x91   : > { %729 = vrot.lane.b32.xlu1 %v3591_v3, %s2927_s24 }
  0x92   : > { %v470_v63 = vpop.permute.xlu0 %469 }
  0x93   : > { %562 = vst.msk [vmem:[#allocation2 + $0x20] sm:$0xff] %vm557_vm3, %v470_v63  ;;  %v472_v59 = vpop.permute.xlu1 %471 }
  0x94   : > { %563 = vst.msk [vmem:[#allocation2 + $0x28] sm:$0xff] %vm557_vm3, %v472_v59  ;;  %731 = vrot.lane.b32.xlu0 %v3601_v40, %s2927_s24 }
  0x95   : > { %733 = vrot.lane.b32.xlu1 %v3604_v49, %s2927_s24  ;;  %s2932_s24 = smov 56  }
  0x96   : > { %v474_v9 = vpop.permute.xlu0 %473 }
  0x97   : > { %564 = vst.msk [vmem:[#allocation2 + $0x30] sm:$0xff] %vm557_vm3, %v474_v9  ;;  %v476_v58 = vpop.permute.xlu1 %475 }
  0x98   : > { %565 = vst.msk [vmem:[#allocation2 + $0x38] sm:$0xff] %vm557_vm3, %v476_v58  ;;  %802 = vrot.lane.b32.xlu0 %v2994_v2, %s2928_s25 }
  0x99   : > { %804 = vrot.lane.b32.xlu1 %v2999_v5, %s2928_s25 }
  0x9a   : > { %v478_v63 = vpop.permute.xlu0 %477 }
  0x9b   : > { %566 = vst.msk [vmem:[#allocation2 + $0x40] sm:$0xff] %vm557_vm3, %v478_v63  ;;  %v480_v8 = vpop.permute.xlu1 %479 }
  0x9c   : > { %567 = vst.msk [vmem:[#allocation2 + $0x48] sm:$0xff] %vm557_vm3, %v480_v8  ;;  %806 = vrot.lane.b32.xlu0 %v3017_v11, %s2928_s25  ;;  %v1632_v8 = vld [vmem:[%s5019_s1] sm:$0xff] }
  0x9d   : > { %808 = vrot.lane.b32.xlu1 %v3020_v12, %s2928_s25 }
  0x9e   : > { %v482_v13 = vpop.permute.xlu0 %481 }
  0x9f   : > { %568 = vst.msk [vmem:[#allocation2 + $0x50] sm:$0xff] %vm557_vm3, %v482_v13  ;;  %v484_v56 = vpop.permute.xlu1 %483  ;;  %v1633_v13 = vld [vmem:[%s5019_s1 + $0x8] sm:$0xff] }
  0xa0   : > { %569 = vst.msk [vmem:[#allocation2 + $0x58] sm:$0xff] %vm557_vm3, %v484_v56  ;;  %810 = vrot.lane.b32.xlu0 %v3030_v16, %s2928_s25 }
  0xa1   : > { %812 = vrot.lane.b32.xlu1 %v3041_v18, %s2928_s25 }
  0xa2   : > { %v486_v2 = vpop.permute.xlu0 %485 }
  0xa3   : > { %570 = vst.msk [vmem:[#allocation2 + $0x60] sm:$0xff] %vm557_vm3, %v486_v2  ;;  %v488_v5 = vpop.permute.xlu1 %487  ;;  %v2841_v2 = vpack.c.bf16 %v1633_v13, %v1632_v8 }
  0xa4   : > { %571 = vst.msk [vmem:[#allocation2 + $0x68] sm:$0xff] %vm557_vm3, %v488_v5  ;;  %814 = vrot.lane.b32.xlu0 %v3044_v19, %s2928_s25 }
  0xa5   : > { %816 = vrot.lane.b32.xlu1 %v3054_v23, %s2928_s25  ;;  %2842 = vmatprep.subr.bf16.mxu0 %v2841_v2 }
  0xa6   : > { %v490_v4 = vpop.permute.xlu0 %489  ;;  %2844 = vmatpush3.bf16.msra.mxu0 %v2841_v2  ;;  %2857 = vmatprep.subr.bf16.mxu1 %v2841_v2 }
  0xa7   : > { %572 = vst.msk [vmem:[#allocation2 + $0x70] sm:$0xff] %vm557_vm3, %v490_v4  ;;  %v492_v59 = vpop.permute.xlu1 %491  ;;  %v1634_v4 = vld [vmem:[%s5019_s1 + $0x10] sm:$0xff]  ;;  %2862 = vmatpush3.bf16.msra.mxu1 %v2841_v2 }
  0xa8   : > { %573 = vst.msk [vmem:[#allocation2 + $0x78] sm:$0xff] %vm557_vm3, %v492_v59  ;;  %818 = vrot.lane.b32.xlu0 %v3057_v24, %s2928_s25  ;;  %v1635_v59 = vld [vmem:[%s5019_s1 + $0x18] sm:$0xff] }
  0xa9   : > { %820 = vrot.lane.b32.xlu1 %v3068_v27, %s2928_s25 }
  0xaa   : > { %v494_v9 = vpop.permute.xlu0 %493 }
  0xab   : > { %574 = vst.msk [vmem:[#allocation2 + $0x80] sm:$0xff] %vm557_vm3, %v494_v9  ;;  %v496_v58 = vpop.permute.xlu1 %495 }
  0xac   : > { %575 = vst.msk [vmem:[#allocation2 + $0x88] sm:$0xff] %vm557_vm3, %v496_v58  ;;  %822 = vrot.lane.b32.xlu0 %v3078_v29, %s2928_s25  ;;  %v2845_v58 = vpack.c.bf16 %v1635_v59, %v1634_v4  ;;  %v1640_v4 = vld [vmem:[%s5019_s1 + $0x40] sm:$0xff] }
  0xad   : > { %824 = vrot.lane.b32.xlu1 %v3081_v30, %s2928_s25 }
  0xae   : > { %v498_v63 = vpop.permute.xlu0 %497  ;;  %2846 = vmatprep.subr.bf16.mxu0 %v2845_v58  ;;  %2858 = vmatprep.subr.bf16.mxu1 %v2845_v58 }
  0xaf   : > { %576 = vst.msk [vmem:[#allocation2 + $0x90] sm:$0xff] %vm557_vm3, %v498_v63  ;;  %v500_v56 = vpop.permute.xlu1 %499  ;;  %2848 = vmatpush3.bf16.msra.mxu0 %v2845_v58  ;;  %v1637_v63 = vld [vmem:[%s5019_s1 + $0x28] sm:$0xff]  ;;  %2863 = vmatpush3.bf16.msra.mxu1 %v2845_v58 }
  0xb0   : > { %577 = vst.msk [vmem:[#allocation2 + $0x98] sm:$0xff] %vm557_vm3, %v500_v56  ;;  %937 = vrot.lane.b32.xlu0 %v3038_v17, %s2929_s30  ;;  %v1639_v56 = vld [vmem:[%s5019_s1 + $0x38] sm:$0xff] }
  0xb1   : > { %939 = vrot.lane.b32.xlu1 %v3064_v25, %s2929_s30  ;;  %v1636_v25 = vld [vmem:[%s5019_s1 + $0x20] sm:$0xff] }
  0xb2   : > { %v502_v5 = vpop.permute.xlu0 %501  ;;  %v2849_v13 = vpack.c.bf16 %v1637_v63, %v1636_v25 }
  0xb3   : > { %578 = vst.msk [vmem:[#allocation2 + $0xa0] sm:$0xff] %vm557_vm3, %v502_v5  ;;  %v504_v9 = vpop.permute.xlu1 %503 }
  0xb4   : > { %579 = vst.msk [vmem:[#allocation2 + $0xa8] sm:$0xff] %vm557_vm3, %v504_v9  ;;  %1071 = vrot.lane.b32.xlu0 %v3415_v7, %s2930_s9  ;;  %2850 = vmatprep.subr.bf16.mxu0 %v2849_v13  ;;  %v1638_v7 = vld [vmem:[%s5019_s1 + $0x30] sm:$0xff] }
  0xb5   : > { %1073 = vrot.lane.b32.xlu1 %v3420_v60, %s2930_s9  ;;  %2852 = vmatpush3.bf16.msra.mxu0 %v2849_v13  ;;  %v2853_v5 = vpack.c.bf16 %v1639_v56, %v1638_v7 }
  0xb6   : > { %v506_v17 = vpop.permute.xlu0 %505  ;;  %2859 = vmatprep.subr.bf16.mxu1 %v2849_v13 }
  0xb7   : > { %580 = vst.msk [vmem:[#allocation2 + $0xb0] sm:$0xff] %vm557_vm3, %v506_v17  ;;  %v508_v8 = vpop.permute.xlu1 %507  ;;  %2864 = vmatpush3.bf16.msra.mxu1 %v2849_v13  ;;  %2854 = vmatprep.subr.bf16.mxu0 %v2853_v5 }
  0xb8   : > { %581 = vst.msk [vmem:[#allocation2 + $0xb8] sm:$0xff] %vm557_vm3, %v508_v8  ;;  %1202 = vrot.lane.b32.xlu0 %v3017_v11, %s2931_s14  ;;  %2860 = vmatprep.subr.bf16.mxu1 %v2853_v5 }
  0xb9   : > { %1204 = vrot.lane.b32.xlu1 %v3020_v12, %s2931_s14  ;;  %2856 = vmatpush3.bf16.msra.mxu0 %v2853_v5 }
  0xba   : > { %v510_v60 = vpop.permute.xlu0 %509  ;;  %2791 = vmatprep.subr.mxu0 %v1640_v4 }
  0xbb   : > { %582 = vst.msk [vmem:[#allocation2 + $0xc0] sm:$0xff] %vm557_vm3, %v510_v60  ;;  %v512_v2 = vpop.permute.xlu1 %511  ;;  %2865 = vmatpush3.bf16.msra.mxu1 %v2853_v5 }
  0xbc   : > { %583 = vst.msk [vmem:[#allocation2 + $0xc8] sm:$0xff] %vm557_vm3, %v512_v2  ;;  %1337 = vrot.lane.b32.xlu0 %v3099_v33, %s2932_s24  ;;  %2861 = vmatprep.subr.mxu1 %v1640_v4 }
  0xbd   : > { %941 = vrot.lane.b32.xlu1 %v3099_v33, %s2929_s30  ;;  %2792 = vmatpush3.msra.mxu0 %v1640_v4 }
  0xbe   : > { %v514_v11 = vpop.permute.xlu0 %513 }
  0xbf   : > { %584 = vst.msk [vmem:[#allocation2 + $0xd0] sm:$0xff] %vm557_vm3, %v514_v11  ;;  %v516_v12 = vpop.permute.xlu1 %515  ;;  %2866 = vmatpush3.msra.mxu1 %v1640_v4 }
  0xc0   : > { %585 = vst.msk [vmem:[#allocation2 + $0xd8] sm:$0xff] %vm557_vm3, %v516_v12  ;;  %1339 = vrot.lane.b32.xlu0 %v3117_v39, %s2932_s24  ;;  %v5129_v12 = vld [vmem:[#allocation36_spill] sm:$0xff] }
  0xc1   : > { %1471 = vrot.lane.b32.xlu1 %v3428_v10, %s2933_s28 }
  0xc2   : > { %v518_v33 = vpop.permute.xlu0 %517 }
  0xc3   : > { %586 = vst.msk [vmem:[#allocation2 + $0xe0] sm:$0xff] %vm557_vm3, %v518_v33  ;;  %v520_v59 = vpop.permute.xlu1 %519 }
  0xc4   : > { %587 = vst.msk [vmem:[#allocation2 + $0xe8] sm:$0xff] %vm557_vm3, %v520_v59  ;;  %943 = vrot.lane.b32.xlu0 %v3117_v39, %s2929_s30 }
  0xc5   : > { %1075 = vrot.lane.b32.xlu1 %v3428_v10, %s2930_s9 }
  0xc6   : > { %v522_v9 = vpop.permute.xlu0 %521 }
  0xc7   : > { %588 = vst.msk [vmem:[#allocation2 + $0xf0] sm:$0xff] %vm557_vm3, %v522_v9  ;;  %v524_v58 = vpop.permute.xlu1 %523  ;;  %v5130_v9 = vld [vmem:[#allocation14_spill] sm:$0xff] }
  0xc8   : > { %589 = vst.msk [vmem:[#allocation2 + $0xf8] sm:$0xff] %vm557_vm3, %v524_v58  ;;  %1473 = vrot.lane.b32.xlu0 %v3433_v35, %s2933_s28 }
  0xc9   : > { %1077 = vrot.lane.b32.xlu1 %v3433_v35, %s2930_s9 }
  0xca   : > { %v672_v17 = vpop.permute.xlu0 %671 }
  0xcb   : > { %768 = vst.msk [vmem:[#allocation2] sm:$0xff] %vm767_vm4, %v672_v17  ;;  %v674_v39 = vpop.permute.xlu1 %673 }
  0xcc   : > { %769 = vst.msk [vmem:[#allocation2 + $0x8] sm:$0xff] %vm767_vm4, %v674_v39  ;;  %1206 = vrot.lane.b32.xlu0 %v3030_v16, %s2931_s14 }
  0xcd   : > { %1208 = vrot.lane.b32.xlu1 %v3041_v18, %s2931_s14 }
  0xce   : > { %v676_v10 = vpop.permute.xlu0 %675 }
  0xcf   : > { %770 = vst.msk [vmem:[#allocation2 + $0x10] sm:$0xff] %vm767_vm4, %v676_v10  ;;  %v678_v25 = vpop.permute.xlu1 %677 }
  0xd0   : > { %771 = vst.msk [vmem:[#allocation2 + $0x18] sm:$0xff] %vm767_vm4, %v678_v25  ;;  %1341 = vrot.lane.b32.xlu0 %v3155_v47, %s2932_s24 }
  0xd1   : > { %945 = vrot.lane.b32.xlu1 %v3155_v47, %s2929_s30 }
  0xd2   : > { %v680_v35 = vpop.permute.xlu0 %679 }
  0xd3   : > { %772 = vst.msk [vmem:[#allocation2 + $0x20] sm:$0xff] %vm767_vm4, %v680_v35  ;;  %v682_v63 = vpop.permute.xlu1 %681 }
  0xd4   : > { %773 = vst.msk [vmem:[#allocation2 + $0x28] sm:$0xff] %vm767_vm4, %v682_v63  ;;  %1343 = vrot.lane.b32.xlu0 %v3170_v52, %s2932_s24 }
  0xd5   : > { %1475 = vrot.lane.b32.xlu1 %v3441_v15, %s2933_s28 }
  0xd6   : > { %v684_v16 = vpop.permute.xlu0 %683 }
  0xd7   : > { %774 = vst.msk [vmem:[#allocation2 + $0x30] sm:$0xff] %vm767_vm4, %v684_v16  ;;  %v686_v18 = vpop.permute.xlu1 %685 }
  0xd8   : > { %775 = vst.msk [vmem:[#allocation2 + $0x38] sm:$0xff] %vm767_vm4, %v686_v18  ;;  %947 = vrot.lane.b32.xlu0 %v3170_v52, %s2929_s30 }
  0xd9   : > { %1079 = vrot.lane.b32.xlu1 %v3441_v15, %s2930_s9 }
  0xda   : > { %v688_v47 = vpop.permute.xlu0 %687 }
  0xdb   : > { %776 = vst.msk [vmem:[#allocation2 + $0x40] sm:$0xff] %vm767_vm4, %v688_v47  ;;  %v690_v8 = vpop.permute.xlu1 %689 }
  0xdc   : > { %777 = vst.msk [vmem:[#allocation2 + $0x48] sm:$0xff] %vm767_vm4, %v690_v8  ;;  %1477 = vrot.lane.b32.xlu0 %v3446_v22, %s2933_s28 }
  0xdd   : > { %1081 = vrot.lane.b32.xlu1 %v3446_v22, %s2930_s9  ;;  %v5127_v22 = vld [vmem:[#allocation11_spill] sm:$0xff] }
  0xde   : > { %v692_v13 = vpop.permute.xlu0 %691 }
  0xdf   : > { %778 = vst.msk [vmem:[#allocation2 + $0x50] sm:$0xff] %vm767_vm4, %v692_v13  ;;  %v694_v60 = vpop.permute.xlu1 %693 }
  0xe0   : > { %779 = vst.msk [vmem:[#allocation2 + $0x58] sm:$0xff] %vm767_vm4, %v694_v60  ;;  %1210 = vrot.lane.b32.xlu0 %v3044_v19, %s2931_s14  ;;  %v5128_v19 = vld [vmem:[#allocation13_spill] sm:$0xff] }
  0xe1   : > { %1212 = vrot.lane.b32.xlu1 %v3054_v23, %s2931_s14 }
  0xe2   : > { %v696_v52 = vpop.permute.xlu0 %695 }
  0xe3   : > { %780 = vst.msk [vmem:[#allocation2 + $0x60] sm:$0xff] %vm767_vm4, %v696_v52  ;;  %v698_v15 = vpop.permute.xlu1 %697 }
  0xe4   : > { %781 = vst.msk [vmem:[#allocation2 + $0x68] sm:$0xff] %vm767_vm4, %v698_v15  ;;  %1345 = vrot.lane.b32.xlu0 %v5127_v22, %s2932_s24 }
  0xe5   : > { %949 = vrot.lane.b32.xlu1 %v5127_v22, %s2929_s30 }
  0xe6   : > { %v700_v7 = vpop.permute.xlu0 %699 }
  0xe7   : > { %782 = vst.msk [vmem:[#allocation2 + $0x70] sm:$0xff] %vm767_vm4, %v700_v7  ;;  %v702_v56 = vpop.permute.xlu1 %701  ;;  %v5135_v7 = vld [vmem:[#allocation18_spill] sm:$0xff] }
  0xe8   : > { %783 = vst.msk [vmem:[#allocation2 + $0x78] sm:$0xff] %vm767_vm4, %v702_v56  ;;  %1347 = vrot.lane.b32.xlu0 %v5128_v19, %s2932_s24 }
  0xe9   : > { %1479 = vrot.lane.b32.xlu1 %v3454_v28, %s2933_s28 }
  0xea   : > { %v704_v23 = vpop.permute.xlu0 %703 }
  0xeb   : > { %784 = vst.msk [vmem:[#allocation2 + $0x80] sm:$0xff] %vm767_vm4, %v704_v23  ;;  %v706_v2 = vpop.permute.xlu1 %705 }
  0xec   : > { %785 = vst.msk [vmem:[#allocation2 + $0x88] sm:$0xff] %vm767_vm4, %v706_v2  ;;  %951 = vrot.lane.b32.xlu0 %v5128_v19, %s2929_s30  ;;  %v5136_v2 = vld [vmem:[#allocation19_spill] sm:$0xff] }
  0xed   : > { %1083 = vrot.lane.b32.xlu1 %v3454_v28, %s2930_s9 }
  0xee   : > { %v708_v5 = vpop.permute.xlu0 %707 }
  0xef   : > { %786 = vst.msk [vmem:[#allocation2 + $0x90] sm:$0xff] %vm767_vm4, %v708_v5  ;;  %v710_v11 = vpop.permute.xlu1 %709 }
  0xf0   : > { %787 = vst.msk [vmem:[#allocation2 + $0x98] sm:$0xff] %vm767_vm4, %v710_v11  ;;  %1481 = vrot.lane.b32.xlu0 %v5129_v12, %s2933_s28 }
  0xf1   : > { %1085 = vrot.lane.b32.xlu1 %v5129_v12, %s2930_s9 }
  0xf2   : > { %v712_v4 = vpop.permute.xlu0 %711 }
  0xf3   : > { %788 = vst.msk [vmem:[#allocation2 + $0xa0] sm:$0xff] %vm767_vm4, %v712_v4  ;;  %v714_v33 = vpop.permute.xlu1 %713 }
  0xf4   : > { %789 = vst.msk [vmem:[#allocation2 + $0xa8] sm:$0xff] %vm767_vm4, %v714_v33  ;;  %1214 = vrot.lane.b32.xlu0 %v3057_v24, %s2931_s14  ;;  %v5131_v24 = vld [vmem:[#allocation15_spill] sm:$0xff] }
  0xf5   : > { %1216 = vrot.lane.b32.xlu1 %v3068_v27, %s2931_s14 }
  0xf6   : > { %v716_v28 = vpop.permute.xlu0 %715 }
  0xf7   : > { %790 = vst.msk [vmem:[#allocation2 + $0xb0] sm:$0xff] %vm767_vm4, %v716_v28  ;;  %v718_v59 = vpop.permute.xlu1 %717 }
  0xf8   : > { %791 = vst.msk [vmem:[#allocation2 + $0xb8] sm:$0xff] %vm767_vm4, %v718_v59  ;;  %1349 = vrot.lane.b32.xlu0 %v5130_v9, %s2932_s24 }
  0xf9   : > { %953 = vrot.lane.b32.xlu1 %v5130_v9, %s2929_s30  ;;  %v5138_v9 = vld [vmem:[#allocation20_spill] sm:$0xff] }
  0xfa   : > { %v720_v58 = vpop.permute.xlu0 %719 }
  0xfb   : > { %792 = vst.msk [vmem:[#allocation2 + $0xc0] sm:$0xff] %vm767_vm4, %v720_v58  ;;  %v722_v17 = vpop.permute.xlu1 %721 }
  0xfc   : > { %793 = vst.msk [vmem:[#allocation2 + $0xc8] sm:$0xff] %vm767_vm4, %v722_v17  ;;  %1351 = vrot.lane.b32.xlu0 %v5131_v24, %s2932_s24 }
  0xfd   : > { %1483 = vrot.lane.b32.xlu1 %v3467_v42, %s2933_s28 }
  0xfe   : > { %v724_v27 = vpop.permute.xlu0 %723 }
  0xff   : > { %794 = vst.msk [vmem:[#allocation2 + $0xd0] sm:$0xff] %vm767_vm4, %v724_v27  ;;  %v726_v39 = vpop.permute.xlu1 %725 }
 0x100   : > { %795 = vst.msk [vmem:[#allocation2 + $0xd8] sm:$0xff] %vm767_vm4, %v726_v39  ;;  %955 = vrot.lane.b32.xlu0 %v5131_v24, %s2929_s30  ;;  %v5139_v39 = vld [vmem:[#allocation21_spill] sm:$0xff] }
 0x101   : > { %1087 = vrot.lane.b32.xlu1 %v3467_v42, %s2930_s9 }
 0x102   : > { %v728_v10 = vpop.permute.xlu0 %727 }
 0x103   : > { %796 = vst.msk [vmem:[#allocation2 + $0xe0] sm:$0xff] %vm767_vm4, %v728_v10  ;;  %v730_v25 = vpop.permute.xlu1 %729 }
 0x104   : > { %797 = vst.msk [vmem:[#allocation2 + $0xe8] sm:$0xff] %vm767_vm4, %v730_v25  ;;  %1485 = vrot.lane.b32.xlu0 %v3472_v61, %s2933_s28 }
 0x105   : > { %1089 = vrot.lane.b32.xlu1 %v3472_v61, %s2930_s9  ;;  %v5132_v61 = vld [vmem:[#allocation16_spill] sm:$0xff] }
 0x106   : > { %v732_v35 = vpop.permute.xlu0 %731 }
 0x107   : > { %798 = vst.msk [vmem:[#allocation2 + $0xf0] sm:$0xff] %vm767_vm4, %v732_v35  ;;  %v734_v63 = vpop.permute.xlu1 %733 }
 0x108   : > { %799 = vst.msk [vmem:[#allocation2 + $0xf8] sm:$0xff] %vm767_vm4, %v734_v63  ;;  %1218 = vrot.lane.b32.xlu0 %v3078_v29, %s2931_s14 }
 0x109   : > { %1220 = vrot.lane.b32.xlu1 %v3081_v30, %s2931_s14  ;;  %v5133_v30 = vld [vmem:[#allocation17_spill] sm:$0xff] }
 0x10a   : > { %v803_v42 = vpop.permute.xlu0 %802 }
 0x10b   : > { %899 = vst.msk [vmem:[#allocation2] sm:$0xff] %vm898_vm5, %v803_v42  ;;  %v805_v16 = vpop.permute.xlu1 %804 }
 0x10c   : > { %900 = vst.msk [vmem:[#allocation2 + $0x8] sm:$0xff] %vm898_vm5, %v805_v16  ;;  %1353 = vrot.lane.b32.xlu0 %v5132_v61, %s2932_s24 }
 0x10d   : > { %957 = vrot.lane.b32.xlu1 %v5132_v61, %s2929_s30 }
 0x10e   : > { %v807_v18 = vpop.permute.xlu0 %806 }
 0x10f   : > { %901 = vst.msk [vmem:[#allocation2 + $0x10] sm:$0xff] %vm898_vm5, %v807_v18  ;;  %v809_v29 = vpop.permute.xlu1 %808 }
 0x110   : > { %902 = vst.msk [vmem:[#allocation2 + $0x18] sm:$0xff] %vm898_vm5, %v809_v29  ;;  %1355 = vrot.lane.b32.xlu0 %v5133_v30, %s2932_s24 }
 0x111   : > { %1487 = vrot.lane.b32.xlu1 %v3480_v55, %s2933_s28 }
 0x112   : > { %v811_v47 = vpop.permute.xlu0 %810 }
 0x113   : > { %903 = vst.msk [vmem:[#allocation2 + $0x20] sm:$0xff] %vm898_vm5, %v811_v47  ;;  %v813_v8 = vpop.permute.xlu1 %812 }
 0x114   : > { %904 = vst.msk [vmem:[#allocation2 + $0x28] sm:$0xff] %vm898_vm5, %v813_v8  ;;  %959 = vrot.lane.b32.xlu0 %v5133_v30, %s2929_s30  ;;  %v5141_v30 = vld [vmem:[#allocation22_spill] sm:$0xff] }
 0x115   : > { %1091 = vrot.lane.b32.xlu1 %v3480_v55, %s2930_s9 }
 0x116   : > { %v815_v13 = vpop.permute.xlu0 %814 }
 0x117   : > { %905 = vst.msk [vmem:[#allocation2 + $0x30] sm:$0xff] %vm898_vm5, %v815_v13  ;;  %v817_v60 = vpop.permute.xlu1 %816 }
 0x118   : > { %906 = vst.msk [vmem:[#allocation2 + $0x38] sm:$0xff] %vm898_vm5, %v817_v60  ;;  %1489 = vrot.lane.b32.xlu0 %v3485_v0, %s2933_s28 }
 0x119   : > { %1093 = vrot.lane.b32.xlu1 %v3485_v0, %s2930_s9  ;;  %v5134_v0 = vld [vmem:[#allocation3_spill] sm:$0xff] }
 0x11a   : > { %v819_v52 = vpop.permute.xlu0 %818 }
 0x11b   : > { %907 = vst.msk [vmem:[#allocation2 + $0x40] sm:$0xff] %vm898_vm5, %v819_v52  ;;  %v821_v15 = vpop.permute.xlu1 %820  ;;  %v5142_v52 = vld [vmem:[#allocation23_spill] sm:$0xff] }
 0x11c   : > { %908 = vst.msk [vmem:[#allocation2 + $0x48] sm:$0xff] %vm898_vm5, %v821_v15  ;;  %1222 = vrot.lane.b32.xlu0 %v3087_v31, %s2931_s14 }
 0x11d   : > { %826 = vrot.lane.b32.xlu1 %v3087_v31, %s2928_s25 }
 0x11e   : > { %v823_v55 = vpop.permute.xlu0 %822 }
 0x11f   : > { %909 = vst.msk [vmem:[#allocation2 + $0x50] sm:$0xff] %vm898_vm5, %v823_v55  ;;  %v825_v22 = vpop.permute.xlu1 %824 }
 0x120   : > { %910 = vst.msk [vmem:[#allocation2 + $0x58] sm:$0xff] %vm898_vm5, %v825_v22  ;;  %1224 = vrot.lane.b32.xlu0 %v5134_v0, %s2931_s14 }
 0x121   : > { %1357 = vrot.lane.b32.xlu1 %v5135_v7, %s2932_s24 }
 0x122   : > { %v938_v56 = vpop.permute.xlu0 %937 }
 0x123   : > { %1034 = vst.msk [vmem:[#allocation2] sm:$0xff] %vm1033_vm6, %v938_v56  ;;  %v940_v19 = vpop.permute.xlu1 %939 }
 0x124   : > { %1035 = vst.msk [vmem:[#allocation2 + $0x8] sm:$0xff] %vm1033_vm6, %v940_v19  ;;  %828 = vrot.lane.b32.xlu0 %v5134_v0, %s2928_s25 }
 0x125   : > { %961 = vrot.lane.b32.xlu1 %v5135_v7, %s2929_s30 }
 0x126   : > { %v1072_v31 = vpop.permute.xlu0 %1071 }
 0x127   : > { %1168 = vst.msk [vmem:[#allocation2] sm:$0xff] %vm1167_vm7, %v1072_v31  ;;  %v1074_v23 = vpop.permute.xlu1 %1073 }
 0x128   : > { %1169 = vst.msk [vmem:[#allocation2 + $0x8] sm:$0xff] %vm1167_vm7, %v1074_v23  ;;  %1359 = vrot.lane.b32.xlu0 %v5136_v2, %s2932_s24  ;;  %v5144_v23 = vld [vmem:[#allocation24_spill] sm:$0xff] }
 0x129   : > { %1491 = vrot.lane.b32.xlu1 %v3493_v6, %s2933_s28 }
 0x12a   : > { %v1203_v5 = vpop.permute.xlu0 %1202 }
 0x12b   : > { %1299 = vst.msk [vmem:[#allocation2] sm:$0xff] %vm1298_vm8, %v1203_v5  ;;  %v1205_v11 = vpop.permute.xlu1 %1204 }
 0x12c   : > { %1300 = vst.msk [vmem:[#allocation2 + $0x8] sm:$0xff] %vm1298_vm8, %v1205_v11  ;;  %963 = vrot.lane.b32.xlu0 %v5136_v2, %s2929_s30 }
 0x12d   : > { %1095 = vrot.lane.b32.xlu1 %v3493_v6, %s2930_s9 }
 0x12e   : > { %v1338_v12 = vpop.permute.xlu0 %1337 }
 0x12f   : > { %1434 = vst.msk [vmem:[#allocation2] sm:$0xff] %vm1433_vm9, %v1338_v12  ;;  %v942_v4 = vpop.permute.xlu1 %941 }
 0x130   : > { %1036 = vst.msk [vmem:[#allocation2 + $0x10] sm:$0xff] %vm1033_vm6, %v942_v4  ;;  %1493 = vrot.lane.b32.xlu0 %v3498_v32, %s2933_s28  ;;  %v5145_v4 = vld [vmem:[#allocation25_spill] sm:$0xff] }
 0x131   : > { %1097 = vrot.lane.b32.xlu1 %v3498_v32, %s2930_s9  ;;  %v5137_v32 = vld [vmem:[#allocation4_spill] sm:$0xff] }
 0x132   : > { %v1340_v33 = vpop.permute.xlu0 %1339 }
 0x133   : > { %1435 = vst.msk [vmem:[#allocation2 + $0x8] sm:$0xff] %vm1433_vm9, %v1340_v33  ;;  %v1472_v28 = vpop.permute.xlu1 %1471 }
 0x134   : > { %1568 = vst.msk [vmem:[#allocation2] sm:$0xff] %vm1567_vm10, %v1472_v28  ;;  %1226 = vrot.lane.b32.xlu0 %v3104_v36, %s2931_s14 }
 0x135   : > { %830 = vrot.lane.b32.xlu1 %v3104_v36, %s2928_s25 }
 0x136   : > { %v944_v6 = vpop.permute.xlu0 %943 }
 0x137   : > { %1037 = vst.msk [vmem:[#allocation2 + $0x18] sm:$0xff] %vm1033_vm6, %v944_v6  ;;  %v1076_v59 = vpop.permute.xlu1 %1075 }
 0x138   : > { %1170 = vst.msk [vmem:[#allocation2 + $0x10] sm:$0xff] %vm1167_vm7, %v1076_v59  ;;  %1228 = vrot.lane.b32.xlu0 %v5137_v32, %s2931_s14 }
 0x139   : > { %1361 = vrot.lane.b32.xlu1 %v5138_v9, %s2932_s24 }
 0x13a   : > { %v1474_v58 = vpop.permute.xlu0 %1473 }
 0x13b   : > { %1569 = vst.msk [vmem:[#allocation2 + $0x8] sm:$0xff] %vm1567_vm10, %v1474_v58  ;;  %v1078_v17 = vpop.permute.xlu1 %1077  ;;  %v1600_v24 = vld [vmem:[#allocation2] sm:$0xff] }
 0x13c   : > { %1171 = vst.msk [vmem:[#allocation2 + $0x18] sm:$0xff] %vm1167_vm7, %v1078_v17  ;;  %832 = vrot.lane.b32.xlu0 %v5137_v32, %s2928_s25  ;;  %2793 = vmatprep.mubr.msk.f32.mxu0 %vm1648_vm11, %v1600_v24 }
 0x13d   : > { %965 = vrot.lane.b32.xlu1 %v5138_v9, %s2929_s30 }
 0x13e   : > { %v1207_v36 = vpop.permute.xlu0 %1206 }
 0x13f   : > { %1301 = vst.msk [vmem:[#allocation2 + $0x10] sm:$0xff] %vm1298_vm8, %v1207_v36  ;;  %v1209_v27 = vpop.permute.xlu1 %1208  ;;  %v5147_v36 = vld [vmem:[#allocation26_spill] sm:$0xff] }
 0x140   : > { %1302 = vst.msk [vmem:[#allocation2 + $0x18] sm:$0xff] %vm1298_vm8, %v1209_v27  ;;  %1363 = vrot.lane.b32.xlu0 %v5139_v39, %s2932_s24 }
 0x141   : > { %1495 = vrot.lane.b32.xlu1 %v3506_v26, %s2933_s28 }
 0x142   : > { %v1342_v10 = vpop.permute.xlu0 %1341  ;;  %v1601_v25 = vld [vmem:[#allocation2 + $0x8] sm:$0xff] }
 0x143   : > { %1436 = vst.msk [vmem:[#allocation2 + $0x10] sm:$0xff] %vm1433_vm9, %v1342_v10  ;;  %v946_v35 = vpop.permute.xlu1 %945  ;;  %2794 = vmatmul.mubr.msk.f32.vlgmr.msra.gmra.mrb[0].mxu0 %vm1648_vm11, %v1601_v25  ;;  %v5148_v25 = vld [vmem:[#allocation27_spill] sm:$0xff] }
 0x144   : > { %1038 = vst.msk [vmem:[#allocation2 + $0x20] sm:$0xff] %vm1033_vm6, %v946_v35  ;;  %967 = vrot.lane.b32.xlu0 %v5139_v39, %s2929_s30 }
 0x145   : > { %1099 = vrot.lane.b32.xlu1 %v3506_v26, %s2930_s9 }
 0x146   : > { %v1344_v63 = vpop.permute.xlu0 %1343 }
 0x147   : > { %1437 = vst.msk [vmem:[#allocation2 + $0x18] sm:$0xff] %vm1433_vm9, %v1344_v63  ;;  %v1476_v42 = vpop.permute.xlu1 %1475 }
 0x148   : > { %1570 = vst.msk [vmem:[#allocation2 + $0x10] sm:$0xff] %vm1567_vm10, %v1476_v42  ;;  %1497 = vrot.lane.b32.xlu0 %v3511_v37, %s2933_s28 }
 0x149   : > { %1101 = vrot.lane.b32.xlu1 %v3511_v37, %s2930_s9  ;;  %v5140_v37 = vld [vmem:[#allocation5_spill] sm:$0xff] }
 0x14a   : > { %v948_v16 = vpop.permute.xlu0 %947 }
 0x14b   : > { %1039 = vst.msk [vmem:[#allocation2 + $0x28] sm:$0xff] %vm1033_vm6, %v948_v16  ;;  %v1080_v61 = vpop.permute.xlu1 %1079 }
 0x14c   : > { %1172 = vst.msk [vmem:[#allocation2 + $0x20] sm:$0xff] %vm1167_vm7, %v1080_v61  ;;  %1230 = vrot.lane.b32.xlu0 %v3110_v38, %s2931_s14 }
 0x14d   : > { %834 = vrot.lane.b32.xlu1 %v3110_v38, %s2928_s25 }
 0x14e   : > { %v1478_v26 = vpop.permute.xlu0 %1477 }
 0x14f   : > { %1571 = vst.msk [vmem:[#allocation2 + $0x18] sm:$0xff] %vm1567_vm10, %v1478_v26  ;;  %v1082_v18 = vpop.permute.xlu1 %1081  ;;  %v1602_v29 = vld [vmem:[#allocation2 + $0x10] sm:$0xff] }
 0x150   : > { %1173 = vst.msk [vmem:[#allocation2 + $0x28] sm:$0xff] %vm1167_vm7, %v1082_v18  ;;  %1232 = vrot.lane.b32.xlu0 %v5140_v37, %s2931_s14  ;;  %2796 = vmatprep.mubr.msk.f32.mxu0 %vm1648_vm11, %v1602_v29 }
 0x151   : > { %1365 = vrot.lane.b32.xlu1 %v5141_v30, %s2932_s24 }
 0x152   : > { %v1211_v47 = vpop.permute.xlu0 %1210 }
 0x153   : > { %1303 = vst.msk [vmem:[#allocation2 + $0x20] sm:$0xff] %vm1298_vm8, %v1211_v47  ;;  %v1213_v8 = vpop.permute.xlu1 %1212 }
 0x154   : > { %1304 = vst.msk [vmem:[#allocation2 + $0x28] sm:$0xff] %vm1298_vm8, %v1213_v8  ;;  %836 = vrot.lane.b32.xlu0 %v5140_v37, %s2928_s25 }
 0x155   : > { %969 = vrot.lane.b32.xlu1 %v5141_v30, %s2929_s30  ;;  %v5150_v30 = vld [vmem:[#allocation28_spill] sm:$0xff] }
 0x156   : > { %v1346_v38 = vpop.permute.xlu0 %1345  ;;  %v1603_v13 = vld [vmem:[#allocation2 + $0x18] sm:$0xff] }
 0x157   : > { %1438 = vst.msk [vmem:[#allocation2 + $0x20] sm:$0xff] %vm1433_vm9, %v1346_v38  ;;  %v950_v60 = vpop.permute.xlu1 %949  ;;  %2797 = vmatmul.mubr.msk.f32.gmra.mrb[2].mxu0 %vm1648_vm11, %v1603_v13  ;;  %v5151_v13 = vld [vmem:[#allocation29_spill] sm:$0xff] }
 0x158   : > { %1040 = vst.msk [vmem:[#allocation2 + $0x30] sm:$0xff] %vm1033_vm6, %v950_v60  ;;  %1367 = vrot.lane.b32.xlu0 %v5142_v52, %s2932_s24 }
 0x159   : > { %1499 = vrot.lane.b32.xlu1 %v3519_v53, %s2933_s28 }
 0x15a   : > { %v1348_v15 = vpop.permute.xlu0 %1347 }
 0x15b   : > { %1439 = vst.msk [vmem:[#allocation2 + $0x28] sm:$0xff] %vm1433_vm9, %v1348_v15  ;;  %v1480_v55 = vpop.permute.xlu1 %1479 }
 0x15c   : > { %1572 = vst.msk [vmem:[#allocation2 + $0x20] sm:$0xff] %vm1567_vm10, %v1480_v55  ;;  %971 = vrot.lane.b32.xlu0 %v5142_v52, %s2929_s30 }
 0x15d   : > { %1103 = vrot.lane.b32.xlu1 %v3519_v53, %s2930_s9 }
 0x15e   : > { %v952_v22 = vpop.permute.xlu0 %951 }
 0x15f   : > { %1041 = vst.msk [vmem:[#allocation2 + $0x38] sm:$0xff] %vm1033_vm6, %v952_v22  ;;  %v1084_v0 = vpop.permute.xlu1 %1083 }
 0x160   : > { %1174 = vst.msk [vmem:[#allocation2 + $0x30] sm:$0xff] %vm1167_vm7, %v1084_v0  ;;  %1501 = vrot.lane.b32.xlu0 %v3524_v41, %s2933_s28 }
 0x161   : > { %1105 = vrot.lane.b32.xlu1 %v3524_v41, %s2930_s9  ;;  %v5143_v41 = vld [vmem:[#allocation6_spill] sm:$0xff] }
 0x162   : > { %v1482_v7 = vpop.permute.xlu0 %1481 }
 0x163   : > { %1573 = vst.msk [vmem:[#allocation2 + $0x28] sm:$0xff] %vm1567_vm10, %v1482_v7  ;;  %v1086_v56 = vpop.permute.xlu1 %1085  ;;  %v1604_v19 = vld [vmem:[#allocation2 + $0x20] sm:$0xff] }
 0x164   : > { %1175 = vst.msk [vmem:[#allocation2 + $0x38] sm:$0xff] %vm1167_vm7, %v1086_v56  ;;  %1234 = vrot.lane.b32.xlu0 %v3133_v43, %s2931_s14  ;;  %2799 = vmatprep.mubr.msk.f32.mxu0 %vm1648_vm11, %v1604_v19 }
 0x165   : > { %838 = vrot.lane.b32.xlu1 %v3133_v43, %s2928_s25 }
 0x166   : > { %v1215_v53 = vpop.permute.xlu0 %1214 }
 0x167   : > { %1305 = vst.msk [vmem:[#allocation2 + $0x30] sm:$0xff] %vm1298_vm8, %v1215_v53  ;;  %v1217_v31 = vpop.permute.xlu1 %1216  ;;  %v5153_v53 = vld [vmem:[#allocation30_spill] sm:$0xff] }
 0x168   : > { %1306 = vst.msk [vmem:[#allocation2 + $0x38] sm:$0xff] %vm1298_vm8, %v1217_v31  ;;  %1236 = vrot.lane.b32.xlu0 %v5143_v41, %s2931_s14 }
 0x169   : > { %1369 = vrot.lane.b32.xlu1 %v5144_v23, %s2932_s24 }
 0x16a   : > { %v1350_v2 = vpop.permute.xlu0 %1349  ;;  %v1605_v5 = vld [vmem:[#allocation2 + $0x28] sm:$0xff] }
 0x16b   : > { %1440 = vst.msk [vmem:[#allocation2 + $0x30] sm:$0xff] %vm1433_vm9, %v1350_v2  ;;  %v954_v11 = vpop.permute.xlu1 %953  ;;  %2800 = vmatmul.mubr.msk.f32.gmra.mrb[4].mxu0 %vm1648_vm11, %v1605_v5  ;;  %v5154_v2 = vld [vmem:[#allocation31_spill] sm:$0xff] }
 0x16c   : > { %1042 = vst.msk [vmem:[#allocation2 + $0x40] sm:$0xff] %vm1033_vm6, %v954_v11  ;;  %840 = vrot.lane.b32.xlu0 %v5143_v41, %s2928_s25 }
 0x16d   : > { %973 = vrot.lane.b32.xlu1 %v5144_v23, %s2929_s30 }
 0x16e   : > { %v1352_v43 = vpop.permute.xlu0 %1351 }
 0x16f   : > { %1441 = vst.msk [vmem:[#allocation2 + $0x38] sm:$0xff] %vm1433_vm9, %v1352_v43  ;;  %v1484_v12 = vpop.permute.xlu1 %1483 }
 0x170   : > { %1574 = vst.msk [vmem:[#allocation2 + $0x30] sm:$0xff] %vm1567_vm10, %v1484_v12  ;;  %1371 = vrot.lane.b32.xlu0 %v5145_v4, %s2932_s24 }
 0x171   : > { %1503 = vrot.lane.b32.xlu1 %v3532_v14, %s2933_s28 }
 0x172   : > { %v956_v33 = vpop.permute.xlu0 %955 }
 0x173   : > { %1043 = vst.msk [vmem:[#allocation2 + $0x48] sm:$0xff] %vm1033_vm6, %v956_v33  ;;  %v1088_v28 = vpop.permute.xlu1 %1087 }
 0x174   : > { %1176 = vst.msk [vmem:[#allocation2 + $0x40] sm:$0xff] %vm1167_vm7, %v1088_v28  ;;  %975 = vrot.lane.b32.xlu0 %v5145_v4, %s2929_s30 }
 0x175   : > { %1107 = vrot.lane.b32.xlu1 %v3532_v14, %s2930_s9 }
 0x176   : > { %v1486_v6 = vpop.permute.xlu0 %1485 }
 0x177   : > { %1575 = vst.msk [vmem:[#allocation2 + $0x38] sm:$0xff] %vm1567_vm10, %v1486_v6  ;;  %v1090_v59 = vpop.permute.xlu1 %1089  ;;  %v1606_v32 = vld [vmem:[#allocation2 + $0x30] sm:$0xff] }
 0x178   : > { %1177 = vst.msk [vmem:[#allocation2 + $0x48] sm:$0xff] %vm1167_vm7, %v1090_v59  ;;  %1505 = vrot.lane.b32.xlu0 %v3537_v44, %s2933_s28  ;;  %2802 = vmatprep.mubr.msk.f32.mxu0 %vm1648_vm11, %v1606_v32  ;;  %v5156_v32 = vld [vmem:[#allocation32_spill] sm:$0xff] }
 0x179   : > { %1109 = vrot.lane.b32.xlu1 %v3537_v44, %s2930_s9  ;;  %v5146_v44 = vld [vmem:[#allocation7_spill] sm:$0xff] }
 0x17a   : > { %v1219_v9 = vpop.permute.xlu0 %1218 }
 0x17b   : > { %1307 = vst.msk [vmem:[#allocation2 + $0x40] sm:$0xff] %vm1298_vm8, %v1219_v9  ;;  %v1221_v58 = vpop.permute.xlu1 %1220 }
 0x17c   : > { %1308 = vst.msk [vmem:[#allocation2 + $0x48] sm:$0xff] %vm1298_vm8, %v1221_v58  ;;  %1238 = vrot.lane.b32.xlu0 %v3143_v45, %s2931_s14 }
 0x17d   : > { %842 = vrot.lane.b32.xlu1 %v3143_v45, %s2928_s25 }
 0x17e   : > { %v1354_v14 = vpop.permute.xlu0 %1353  ;;  %v1607_v17 = vld [vmem:[#allocation2 + $0x38] sm:$0xff] }
 0x17f   : > { %1442 = vst.msk [vmem:[#allocation2 + $0x40] sm:$0xff] %vm1433_vm9, %v1354_v14  ;;  %v958_v24 = vpop.permute.xlu1 %957  ;;  %2803 = vmatmul.mubr.msk.f32.gmra.mrb[6].mxu0 %vm1648_vm11, %v1607_v17  ;;  %v5157_v17 = vld [vmem:[#allocation33_spill] sm:$0xff] }
 0x180   : > { %1044 = vst.msk [vmem:[#allocation2 + $0x50] sm:$0xff] %vm1033_vm6, %v958_v24  ;;  %1240 = vrot.lane.b32.xlu0 %v5146_v44, %s2931_s14 }
 0x181   : > { %1373 = vrot.lane.b32.xlu1 %v5147_v36, %s2932_s24 }
 0x182   : > { %v1356_v27 = vpop.permute.xlu0 %1355 }
 0x183   : > { %1443 = vst.msk [vmem:[#allocation2 + $0x48] sm:$0xff] %vm1433_vm9, %v1356_v27  ;;  %v1488_v39 = vpop.permute.xlu1 %1487 }
 0x184   : > { %1576 = vst.msk [vmem:[#allocation2 + $0x40] sm:$0xff] %vm1567_vm10, %v1488_v39  ;;  %844 = vrot.lane.b32.xlu0 %v5146_v44, %s2928_s25 }
 0x185   : > { %977 = vrot.lane.b32.xlu1 %v5147_v36, %s2929_s30 }
 0x186   : > { %v960_v45 = vpop.permute.xlu0 %959 }
 0x187   : > { %1045 = vst.msk [vmem:[#allocation2 + $0x58] sm:$0xff] %vm1033_vm6, %v960_v45  ;;  %v1092_v10 = vpop.permute.xlu1 %1091 }
 0x188   : > { %1178 = vst.msk [vmem:[#allocation2 + $0x50] sm:$0xff] %vm1167_vm7, %v1092_v10  ;;  %1375 = vrot.lane.b32.xlu0 %v5148_v25, %s2932_s24 }
 0x189   : > { %1507 = vrot.lane.b32.xlu1 %v3545_v48, %s2933_s28 }
 0x18a   : > { %v1490_v35 = vpop.permute.xlu0 %1489 }
 0x18b   : > { %1577 = vst.msk [vmem:[#allocation2 + $0x48] sm:$0xff] %vm1567_vm10, %v1490_v35  ;;  %v1094_v63 = vpop.permute.xlu1 %1093  ;;  %v1608_v42 = vld [vmem:[#allocation2 + $0x40] sm:$0xff] }
 0x18c   : > { %1179 = vst.msk [vmem:[#allocation2 + $0x58] sm:$0xff] %vm1167_vm7, %v1094_v63  ;;  %979 = vrot.lane.b32.xlu0 %v5148_v25, %s2929_s30  ;;  %2805 = vmatprep.mubr.msk.f32.mxu0 %vm1648_vm11, %v1608_v42  ;;  %v5159_v63 = vld [vmem:[#allocation34_spill] sm:$0xff] }
 0x18d   : > { %1111 = vrot.lane.b32.xlu1 %v3545_v48, %s2930_s9 }
 0x18e   : > { %v1223_v16 = vpop.permute.xlu0 %1222 }
 0x18f   : > { %1309 = vst.msk [vmem:[#allocation2 + $0x50] sm:$0xff] %vm1298_vm8, %v1223_v16  ;;  %v827_v61 = vpop.permute.xlu1 %826 }
 0x190   : > { %911 = vst.msk [vmem:[#allocation2 + $0x60] sm:$0xff] %vm898_vm5, %v827_v61  ;;  %1509 = vrot.lane.b32.xlu0 %v3550_v46, %s2933_s28 }
 0x191   : > { %1113 = vrot.lane.b32.xlu1 %v3550_v46, %s2930_s9  ;;  %v5149_v46 = vld [vmem:[#allocation8_spill] sm:$0xff] }
 0x192   : > { %v1225_v26 = vpop.permute.xlu0 %1224  ;;  %v1609_v18 = vld [vmem:[#allocation2 + $0x48] sm:$0xff] }
 0x193   : > { %1310 = vst.msk [vmem:[#allocation2 + $0x58] sm:$0xff] %vm1298_vm8, %v1225_v26  ;;  %v1358_v29 = vpop.permute.xlu1 %1357  ;;  %2806 = vmatmul.mubr.msk.f32.gmra.mrb[8].mxu0 %vm1648_vm11, %v1609_v18  ;;  %v5160_v26 = vld [vmem:[#allocation35_spill] sm:$0xff] }
 0x194   : > { %1444 = vst.msk [vmem:[#allocation2 + $0x50] sm:$0xff] %vm1433_vm9, %v1358_v29  ;;  %1242 = vrot.lane.b32.xlu0 %v3160_v50, %s2931_s14 }
 0x195   : > { %846 = vrot.lane.b32.xlu1 %v3160_v50, %s2928_s25 }
 0x196   : > { %v829_v48 = vpop.permute.xlu0 %828 }
 0x197   : > { %912 = vst.msk [vmem:[#allocation2 + $0x68] sm:$0xff] %vm898_vm5, %v829_v48  ;;  %v962_v37 = vpop.permute.xlu1 %961 }
 0x198   : > { %1046 = vst.msk [vmem:[#allocation2 + $0x60] sm:$0xff] %vm1033_vm6, %v962_v37  ;;  %1244 = vrot.lane.b32.xlu0 %v5149_v46, %s2931_s14 }
 0x199   : > { %1377 = vrot.lane.b32.xlu1 %v5150_v30, %s2932_s24 }
 0x19a   : > { %v1360_v47 = vpop.permute.xlu0 %1359 }
 0x19b   : > { %1445 = vst.msk [vmem:[#allocation2 + $0x58] sm:$0xff] %vm1433_vm9, %v1360_v47  ;;  %v1492_v8 = vpop.permute.xlu1 %1491  ;;  %v293_v47 = vld [vmem:[%s2985_s22 + $0x180] sm:$0xff] }
 0x19c   : > { %1578 = vst.msk [vmem:[#allocation2 + $0x50] sm:$0xff] %vm1567_vm10, %v1492_v8  ;;  %848 = vrot.lane.b32.xlu0 %v5149_v46, %s2928_s25 }
 0x19d   : > { %981 = vrot.lane.b32.xlu1 %v5150_v30, %s2929_s30  ;;  %v294_v30 = vld [vmem:[%s2985_s22 + $0x188] sm:$0xff] }
 0x19e   : > { %v964_v50 = vpop.permute.xlu0 %963 }
 0x19f   : > { %1047 = vst.msk [vmem:[#allocation2 + $0x68] sm:$0xff] %vm1033_vm6, %v964_v50  ;;  %v1096_v38 = vpop.permute.xlu1 %1095 }
 0x1a0   : > { %1180 = vst.msk [vmem:[#allocation2 + $0x60] sm:$0xff] %vm1167_vm7, %v1096_v38  ;;  %1379 = vrot.lane.b32.xlu0 %v5151_v13, %s2932_s24  ;;  %v932_v38 = vrot.slane %v293_v47, 1 }
 0x1a1   : > { %1511 = vrot.lane.b32.xlu1 %v3558_v34, %s2933_s28 }
 0x1a2   : > { %v1494_v60 = vpop.permute.xlu0 %1493 }
 0x1a3   : > { %1579 = vst.msk [vmem:[#allocation2 + $0x58] sm:$0xff] %vm1567_vm10, %v1494_v60  ;;  %v1098_v52 = vpop.permute.xlu1 %1097  ;;  %v1610_v15 = vld [vmem:[#allocation2 + $0x50] sm:$0xff] }
 0x1a4   : > { %1181 = vst.msk [vmem:[#allocation2 + $0x68] sm:$0xff] %vm1167_vm7, %v1098_v52  ;;  %983 = vrot.lane.b32.xlu0 %v5151_v13, %s2929_s30  ;;  %2808 = vmatprep.mubr.msk.f32.mxu0 %vm1648_vm11, %v1610_v15  ;;  %v933_v13 = vrot.slane %v294_v30, 1 }
 0x1a5   : > { %1115 = vrot.lane.b32.xlu1 %v3558_v34, %s2930_s9 }
 0x1a6   : > { %v1227_v55 = vpop.permute.xlu0 %1226  ;;  %v934_v52 = vsel %vm380_vm1, %v932_v38, %v933_v13 }
 0x1a7   : > { %1311 = vst.msk [vmem:[#allocation2 + $0x60] sm:$0xff] %vm1298_vm8, %v1227_v55  ;;  %v831_v22 = vpop.permute.xlu1 %830 }
 0x1a8   : > { %913 = vst.msk [vmem:[#allocation2 + $0x70] sm:$0xff] %vm898_vm5, %v831_v22  ;;  %1513 = vrot.lane.b32.xlu0 %v3563_v51, %s2933_s28  ;;  %v1066_v22 = vrot.slane %v293_v47, 2 }
 0x1a9   : > { %1117 = vrot.lane.b32.xlu1 %v3563_v51, %s2930_s9  ;;  %v5152_v51 = vld [vmem:[#allocation9_spill] sm:$0xff] }
 0x1aa   : > { %v1229_v0 = vpop.permute.xlu0 %1228  ;;  %v1611_v7 = vld [vmem:[#allocation2 + $0x58] sm:$0xff] }
 0x1ab   : > { %1312 = vst.msk [vmem:[#allocation2 + $0x68] sm:$0xff] %vm1298_vm8, %v1229_v0  ;;  %v1362_v56 = vpop.permute.xlu1 %1361  ;;  %2809 = vmatmul.mubr.msk.f32.gmra.mrb[10].mxu0 %vm1648_vm11, %v1611_v7  ;;  %v1067_v0 = vrot.slane %v294_v30, 2 }
 0x1ac   : > { %1446 = vst.msk [vmem:[#allocation2 + $0x60] sm:$0xff] %vm1433_vm9, %v1362_v56  ;;  %1246 = vrot.lane.b32.xlu0 %v3174_v54, %s2931_s14 }
 0x1ad   : > { %850 = vrot.lane.b32.xlu1 %v3174_v54, %s2928_s25 }
 0x1ae   : > { %v833_v34 = vpop.permute.xlu0 %832 }
 0x1af   : > { %914 = vst.msk [vmem:[#allocation2 + $0x78] sm:$0xff] %vm898_vm5, %v833_v34  ;;  %v966_v19 = vpop.permute.xlu1 %965 }
 0x1b0   : > { %1048 = vst.msk [vmem:[#allocation2 + $0x70] sm:$0xff] %vm1033_vm6, %v966_v19  ;;  %1248 = vrot.lane.b32.xlu0 %v5152_v51, %s2931_s14 }
 0x1b1   : > { %1381 = vrot.lane.b32.xlu1 %v5153_v53, %s2932_s24 }
 0x1b2   : > { %v1364_v31 = vpop.permute.xlu0 %1363 }
 0x1b3   : > { %1447 = vst.msk [vmem:[#allocation2 + $0x68] sm:$0xff] %vm1433_vm9, %v1364_v31  ;;  %v1496_v41 = vpop.permute.xlu1 %1495 }
 0x1b4   : > { %1580 = vst.msk [vmem:[#allocation2 + $0x60] sm:$0xff] %vm1567_vm10, %v1496_v41  ;;  %852 = vrot.lane.b32.xlu0 %v5152_v51, %s2928_s25  ;;  %v1068_v51 = vsel %vm590_vm2, %v1066_v22, %v1067_v0 }
 0x1b5   : > { %985 = vrot.lane.b32.xlu1 %v5153_v53, %s2929_s30 }
 0x1b6   : > { %v968_v54 = vpop.permute.xlu0 %967 }
 0x1b7   : > { %1049 = vst.msk [vmem:[#allocation2 + $0x78] sm:$0xff] %vm1033_vm6, %v968_v54  ;;  %v1100_v23 = vpop.permute.xlu1 %1099 }
 0x1b8   : > { %1182 = vst.msk [vmem:[#allocation2 + $0x70] sm:$0xff] %vm1167_vm7, %v1100_v23  ;;  %1383 = vrot.lane.b32.xlu0 %v5154_v2, %s2932_s24 }
 0x1b9   : > { %1515 = vrot.lane.b32.xlu1 %v3571_v21, %s2933_s28 }
 0x1ba   : > { %v1498_v5 = vpop.permute.xlu0 %1497 }
 0x1bb   : > { %1581 = vst.msk [vmem:[#allocation2 + $0x68] sm:$0xff] %vm1567_vm10, %v1498_v5  ;;  %v1102_v11 = vpop.permute.xlu1 %1101  ;;  %v1612_v43 = vld [vmem:[#allocation2 + $0x60] sm:$0xff] }
 0x1bc   : > { %1183 = vst.msk [vmem:[#allocation2 + $0x78] sm:$0xff] %vm1167_vm7, %v1102_v11  ;;  %987 = vrot.lane.b32.xlu0 %v5154_v2, %s2929_s30  ;;  %2811 = vmatprep.mubr.msk.f32.mxu0 %vm1648_vm11, %v1612_v43  ;;  %v296_v11 = vld [vmem:[%s2985_s22 + $0x198] sm:$0xff]  ;;  %v297_v43 = vld [vmem:[%s2985_s22 + $0x1a0] sm:$0xff] }
 0x1bd   : > { %1119 = vrot.lane.b32.xlu1 %v3571_v21, %s2930_s9 }
 0x1be   : > { %v1231_v12 = vpop.permute.xlu0 %1230 }
 0x1bf   : > { %1313 = vst.msk [vmem:[#allocation2 + $0x70] sm:$0xff] %vm1298_vm8, %v1231_v12  ;;  %v835_v4 = vpop.permute.xlu1 %834 }
 0x1c0   : > { %915 = vst.msk [vmem:[#allocation2 + $0x80] sm:$0xff] %vm898_vm5, %v835_v4  ;;  %1517 = vrot.lane.b32.xlu0 %v3576_v1, %s2933_s28  ;;  %v298_v4 = vld [vmem:[%s2985_s22 + $0x1a8] sm:$0x3] }
 0x1c1   : > { %1121 = vrot.lane.b32.xlu1 %v3576_v1, %s2930_s9  ;;  %v5155_v1 = vld [vmem:[#allocation10_spill] sm:$0xff] }
 0x1c2   : > { %v1233_v33 = vpop.permute.xlu0 %1232  ;;  %v1613_v28 = vld [vmem:[#allocation2 + $0x68] sm:$0xff] }
 0x1c3   : > { %1314 = vst.msk [vmem:[#allocation2 + $0x78] sm:$0xff] %vm1298_vm8, %v1233_v33  ;;  %v1366_v6 = vpop.permute.xlu1 %1365  ;;  %2812 = vmatmul.mubr.msk.f32.gmra.mrb[12].mxu0 %vm1648_vm11, %v1613_v28  ;;  %v1332_v33 = vrot.slane %v296_v11, 1  ;;  %v1333_v28 = vrot.slane %v297_v43, 1 }
 0x1c4   : > { %1448 = vst.msk [vmem:[#allocation2 + $0x70] sm:$0xff] %vm1433_vm9, %v1366_v6  ;;  %1250 = vrot.lane.b32.xlu0 %v3191_v57, %s2931_s14 }
 0x1c5   : > { %854 = vrot.lane.b32.xlu1 %v3191_v57, %s2928_s25 }
 0x1c6   : > { %v837_v21 = vpop.permute.xlu0 %836 }
 0x1c7   : > { %916 = vst.msk [vmem:[#allocation2 + $0x88] sm:$0xff] %vm898_vm5, %v837_v21  ;;  %v970_v59 = vpop.permute.xlu1 %969 }
 0x1c8   : > { %1050 = vst.msk [vmem:[#allocation2 + $0x80] sm:$0xff] %vm1033_vm6, %v970_v59  ;;  %1252 = vrot.lane.b32.xlu0 %v5155_v1, %s2931_s14  ;;  %v1335_v59 = vrot.slane %v298_v4, 1 }
 0x1c9   : > { %1385 = vrot.lane.b32.xlu1 %v5156_v32, %s2932_s24 }
 0x1ca   : > { %v1368_v9 = vpop.permute.xlu0 %1367 }
 0x1cb   : > { %1449 = vst.msk [vmem:[#allocation2 + $0x78] sm:$0xff] %vm1433_vm9, %v1368_v9  ;;  %v1500_v58 = vpop.permute.xlu1 %1499  ;;  %v1467_v9 = vrot.slane %v297_v43, 2 }
 0x1cc   : > { %1582 = vst.msk [vmem:[#allocation2 + $0x70] sm:$0xff] %vm1567_vm10, %v1500_v58  ;;  %856 = vrot.lane.b32.xlu0 %v5155_v1, %s2928_s25  ;;  %v1334_v58 = vsel %vm380_vm1, %v1332_v33, %v1333_v28 }
 0x1cd   : > { %989 = vrot.lane.b32.xlu1 %v5156_v32, %s2929_s30  ;;  %v1466_v32 = vrot.slane %v296_v11, 2 }
 0x1ce   : > { %v972_v57 = vpop.permute.xlu0 %971 }
 0x1cf   : > { %1051 = vst.msk [vmem:[#allocation2 + $0x88] sm:$0xff] %vm1033_vm6, %v972_v57  ;;  %v1104_v14 = vpop.permute.xlu1 %1103 }
 0x1d0   : > { %1184 = vst.msk [vmem:[#allocation2 + $0x80] sm:$0xff] %vm1167_vm7, %v1104_v14  ;;  %1387 = vrot.lane.b32.xlu0 %v5157_v17, %s2932_s24  ;;  %v1336_v14 = vsel %vm380_vm1, %v1333_v28, %v1335_v59 }
 0x1d1   : > { %1519 = vrot.lane.b32.xlu1 %v3586_v20, %s2933_s28 }
 0x1d2   : > { %v1502_v24 = vpop.permute.xlu0 %1501 }
 0x1d3   : > { %1583 = vst.msk [vmem:[#allocation2 + $0x78] sm:$0xff] %vm1567_vm10, %v1502_v24  ;;  %v1106_v44 = vpop.permute.xlu1 %1105  ;;  %v1614_v36 = vld [vmem:[#allocation2 + $0x70] sm:$0xff] }
 0x1d4   : > { %1185 = vst.msk [vmem:[#allocation2 + $0x88] sm:$0xff] %vm1167_vm7, %v1106_v44  ;;  %991 = vrot.lane.b32.xlu0 %v5157_v17, %s2929_s30  ;;  %2814 = vmatprep.mubr.msk.f32.mxu0 %vm1648_vm11, %v1614_v36  ;;  %v1469_v17 = vrot.slane %v298_v4, 2  ;;  %v1468_v44 = vsel %vm590_vm2, %v1466_v32, %v1467_v9 }
 0x1d5   : > { %1123 = vrot.lane.b32.xlu1 %v3586_v20, %s2930_s9 }
 0x1d6   : > { %v1235_v27 = vpop.permute.xlu0 %1234 }
 0x1d7   : > { %1315 = vst.msk [vmem:[#allocation2 + $0x80] sm:$0xff] %vm1298_vm8, %v1235_v27  ;;  %v839_v39 = vpop.permute.xlu1 %838  ;;  %v1470_v27 = vsel %vm590_vm2, %v1467_v9, %v1469_v17 }
 0x1d8   : > { %917 = vst.msk [vmem:[#allocation2 + $0x90] sm:$0xff] %vm898_vm5, %v839_v39  ;;  %1521 = vrot.lane.b32.xlu0 %v3591_v3, %s2933_s28 }
 0x1d9   : > { %1125 = vrot.lane.b32.xlu1 %v3591_v3, %s2930_s9  ;;  %v5158_v3 = vld [vmem:[#allocation12_spill] sm:$0xff] }
 0x1da   : > { %v1237_v45 = vpop.permute.xlu0 %1236  ;;  %v1615_v10 = vld [vmem:[#allocation2 + $0x78] sm:$0xff] }
 0x1db   : > { %1316 = vst.msk [vmem:[#allocation2 + $0x88] sm:$0xff] %vm1298_vm8, %v1237_v45  ;;  %v1370_v25 = vpop.permute.xlu1 %1369  ;;  %2815 = vmatmul.mubr.msk.f32.gmra.mrb[14].mxu0 %vm1648_vm11, %v1615_v10  ;;  %v4234_v45 = vld [vmem:[%s5020_s2] ss:$0 sm:$0xff] }
 0x1dc   : > { %1450 = vst.msk [vmem:[#allocation2 + $0x80] sm:$0xff] %vm1433_vm9, %v1370_v25  ;;  %1254 = vrot.lane.b32.xlu0 %v3206_v62, %s2931_s14 }
 0x1dd   : > { %858 = vrot.lane.b32.xlu1 %v3206_v62, %s2928_s25 }
 0x1de   : > { %v841_v20 = vpop.permute.xlu0 %840 }
 0x1df   : > { %918 = vst.msk [vmem:[#allocation2 + $0x98] sm:$0xff] %vm898_vm5, %v841_v20  ;;  %v974_v35 = vpop.permute.xlu1 %973 }
 0x1e0   : > { %1052 = vst.msk [vmem:[#allocation2 + $0x90] sm:$0xff] %vm1033_vm6, %v974_v35  ;;  %1256 = vrot.lane.b32.xlu0 %v5158_v3, %s2931_s14 }
 0x1e1   : > { %1389 = vrot.lane.b32.xlu1 %v5159_v63, %s2932_s24 }
 0x1e2   : > { %v1372_v42 = vpop.permute.xlu0 %1371 }
 0x1e3   : > { %1451 = vst.msk [vmem:[#allocation2 + $0x88] sm:$0xff] %vm1433_vm9, %v1372_v42  ;;  %v1504_v16 = vpop.permute.xlu1 %1503 }
 0x1e4   : > { %1584 = vst.msk [vmem:[#allocation2 + $0x80] sm:$0xff] %vm1567_vm10, %v1504_v16  ;;  %860 = vrot.lane.b32.xlu0 %v5158_v3, %s2928_s25 }
 0x1e5   : > { %993 = vrot.lane.b32.xlu1 %v5159_v63, %s2929_s30 }
 0x1e6   : > { %v976_v62 = vpop.permute.xlu0 %975 }
 0x1e7   : > { %1053 = vst.msk [vmem:[#allocation2 + $0x98] sm:$0xff] %vm1033_vm6, %v976_v62  ;;  %v1108_v61 = vpop.permute.xlu1 %1107 }
 0x1e8   : > { %1186 = vst.msk [vmem:[#allocation2 + $0x90] sm:$0xff] %vm1167_vm7, %v1108_v61  ;;  %1391 = vrot.lane.b32.xlu0 %v5160_v26, %s2932_s24 }
 0x1e9   : > { %1523 = vrot.lane.b32.xlu1 %v3601_v40, %s2933_s28 }
 0x1ea   : > { %v1506_v18 = vpop.permute.xlu0 %1505 }
 0x1eb   : > { %1585 = vst.msk [vmem:[#allocation2 + $0x88] sm:$0xff] %vm1567_vm10, %v1506_v18  ;;  %v1110_v29 = vpop.permute.xlu1 %1109  ;;  %v1616_v48 = vld [vmem:[#allocation2 + $0x80] sm:$0xff] }
 0x1ec   : > { %1187 = vst.msk [vmem:[#allocation2 + $0x98] sm:$0xff] %vm1167_vm7, %v1110_v29  ;;  %995 = vrot.lane.b32.xlu0 %v5160_v26, %s2929_s30  ;;  %2817 = vmatprep.mubr.msk.f32.mxu1 %vm1648_vm11, %v1616_v48 }
 0x1ed   : > { %1127 = vrot.lane.b32.xlu1 %v3601_v40, %s2930_s9 }
 0x1ee   : > { %v1239_v37 = vpop.permute.xlu0 %1238 }
 0x1ef   : > { %1317 = vst.msk [vmem:[#allocation2 + $0x90] sm:$0xff] %vm1298_vm8, %v1239_v37  ;;  %v843_v46 = vpop.permute.xlu1 %842 }
 0x1f0   : > { %919 = vst.msk [vmem:[#allocation2 + $0xa0] sm:$0xff] %vm898_vm5, %v843_v46  ;;  %1525 = vrot.lane.b32.xlu0 %v3604_v49, %s2933_s28 }
 0x1f1   : > { %1129 = vrot.lane.b32.xlu1 %v3604_v49, %s2930_s9  ;;  %v295_v49 = vld [vmem:[%s2985_s22 + $0x190] sm:$0x3]  ;;  %s2733_s22 = sshll.u32 %s5166_s15, 8 }
 0x1f2   : > { %v1241_v8 = vpop.permute.xlu0 %1240  ;;  %v1617_v50 = vld [vmem:[#allocation2 + $0x88] sm:$0xff]  ;;  %v935_v55 = vrot.slane %v295_v49, 1  ;;  %v1069_v31 = vrot.slane %v295_v49, 2  ;;  %s4240_s6 = scalar_lea.vmem %s5021_s3, %s2733_s22 }
 0x1f3   : > { %1318 = vst.msk [vmem:[#allocation2 + $0x98] sm:$0xff] %vm1298_vm8, %v1241_v8  ;;  %v1374_v40 = vpop.permute.xlu1 %1373  ;;  %2818 = vmatmul.mubr.msk.f32.vlgmr.msra.gmra.mrb[0].mxu1 %vm1648_vm11, %v1617_v50 }
 0x1f4   : > { %1452 = vst.msk [vmem:[#allocation2 + $0x90] sm:$0xff] %vm1433_vm9, %v1374_v40  ;;  %1258 = vrot.lane.b32.xlu0 %v293_v47, %s2931_s14  ;;  %v936_v34 = vsel %vm380_vm1, %v933_v13, %v935_v55  ;;  %v1070_v2 = vsel %vm590_vm2, %v1067_v0, %v1069_v31  ;;  %vm2554_vm1 = vcmask 1043456   ;;  %vm2556_vm2 = vcmask 1044480  }
 0x1f5   : > { %862 = vrot.lane.b32.xlu1 %v293_v47, %s2928_s25 }
 0x1f6   : > { %v845_v60 = vpop.permute.xlu0 %844 }
 0x1f7   : > { %920 = vst.msk [vmem:[#allocation2 + $0xa8] sm:$0xff] %vm898_vm5, %v845_v60  ;;  %v978_v15 = vpop.permute.xlu1 %977 }
 0x1f8   : > { %1054 = vst.msk [vmem:[#allocation2 + $0xa0] sm:$0xff] %vm1033_vm6, %v978_v15  ;;  %1260 = vrot.lane.b32.xlu0 %v294_v30, %s2931_s14 }
 0x1f9   : > { %1393 = vrot.lane.b32.xlu1 %v934_v52, %s2932_s24 }
 0x1fa   : > { %v1376_v7 = vpop.permute.xlu0 %1375 }
 0x1fb   : > { %1453 = vst.msk [vmem:[#allocation2 + $0x98] sm:$0xff] %vm1433_vm9, %v1376_v7  ;;  %v1508_v56 = vpop.permute.xlu1 %1507 }
 0x1fc   : > { %1586 = vst.msk [vmem:[#allocation2 + $0x90] sm:$0xff] %vm1567_vm10, %v1508_v56  ;;  %864 = vrot.lane.b32.xlu0 %v294_v30, %s2928_s25 }
 0x1fd   : > { %997 = vrot.lane.b32.xlu1 %v934_v52, %s2929_s30 }
 0x1fe   : > { %v980_v19 = vpop.permute.xlu0 %979 }
 0x1ff   : > { %1055 = vst.msk [vmem:[#allocation2 + $0xa8] sm:$0xff] %vm1033_vm6, %v980_v19  ;;  %v1112_v53 = vpop.permute.xlu1 %1111 }
 0x200   : > { %1188 = vst.msk [vmem:[#allocation2 + $0xa0] sm:$0xff] %vm1167_vm7, %v1112_v53  ;;  %1395 = vrot.lane.b32.xlu0 %v936_v34, %s2932_s24 }
 0x201   : > { %1527 = vrot.lane.b32.xlu1 %v1068_v51, %s2933_s28 }
 0x202   : > { %v1510_v41 = vpop.permute.xlu0 %1509 }
 0x203   : > { %1587 = vst.msk [vmem:[#allocation2 + $0x98] sm:$0xff] %vm1567_vm10, %v1510_v41  ;;  %v1114_v54 = vpop.permute.xlu1 %1113  ;;  %v1618_v23 = vld [vmem:[#allocation2 + $0x90] sm:$0xff] }
 0x204   : > { %1189 = vst.msk [vmem:[#allocation2 + $0xa8] sm:$0xff] %vm1167_vm7, %v1114_v54  ;;  %999 = vrot.lane.b32.xlu0 %v936_v34, %s2929_s30  ;;  %2820 = vmatprep.mubr.msk.f32.mxu1 %vm1648_vm11, %v1618_v23 }
 0x205   : > { %1131 = vrot.lane.b32.xlu1 %v1068_v51, %s2930_s9 }
 0x206   : > { %v1243_v5 = vpop.permute.xlu0 %1242 }
 0x207   : > { %1319 = vst.msk [vmem:[#allocation2 + $0xa0] sm:$0xff] %vm1298_vm8, %v1243_v5  ;;  %v847_v12 = vpop.permute.xlu1 %846 }
 0x208   : > { %921 = vst.msk [vmem:[#allocation2 + $0xb0] sm:$0xff] %vm898_vm5, %v847_v12  ;;  %1529 = vrot.lane.b32.xlu0 %v1070_v2, %s2933_s28 }
 0x209   : > { %1133 = vrot.lane.b32.xlu1 %v1070_v2, %s2930_s9 }
 0x20a   : > { %v1245_v6 = vpop.permute.xlu0 %1244  ;;  %v1619_v21 = vld [vmem:[#allocation2 + $0x98] sm:$0xff] }
 0x20b   : > { %1320 = vst.msk [vmem:[#allocation2 + $0xa8] sm:$0xff] %vm1298_vm8, %v1245_v6  ;;  %v1378_v1 = vpop.permute.xlu1 %1377  ;;  %2821 = vmatmul.mubr.msk.f32.gmra.mrb[2].mxu1 %vm1648_vm11, %v1619_v21 }
 0x20c   : > { %1454 = vst.msk [vmem:[#allocation2 + $0xa0] sm:$0xff] %vm1433_vm9, %v1378_v1  ;;  %1262 = vrot.lane.b32.xlu0 %v296_v11, %s2931_s14 }
 0x20d   : > { %1264 = vrot.lane.b32.xlu1 %v297_v43, %s2931_s14 }
 0x20e   : > { %v849_v57 = vpop.permute.xlu0 %848 }
 0x20f   : > { %922 = vst.msk [vmem:[#allocation2 + $0xb8] sm:$0xff] %vm898_vm5, %v849_v57  ;;  %v982_v24 = vpop.permute.xlu1 %981 }
 0x210   : > { %1056 = vst.msk [vmem:[#allocation2 + $0xb0] sm:$0xff] %vm1033_vm6, %v982_v24  ;;  %1397 = vrot.lane.b32.xlu0 %v1334_v58, %s2932_s24 }
 0x211   : > { %1399 = vrot.lane.b32.xlu1 %v1336_v14, %s2932_s24 }
 0x212   : > { %v1380_v36 = vpop.permute.xlu0 %1379 }
 0x213   : > { %1455 = vst.msk [vmem:[#allocation2 + $0xa8] sm:$0xff] %vm1433_vm9, %v1380_v36  ;;  %v1512_v39 = vpop.permute.xlu1 %1511 }
 0x214   : > { %1588 = vst.msk [vmem:[#allocation2 + $0xa0] sm:$0xff] %vm1567_vm10, %v1512_v39  ;;  %1531 = vrot.lane.b32.xlu0 %v1468_v44, %s2933_s28 }
 0x215   : > { %1533 = vrot.lane.b32.xlu1 %v1470_v27, %s2933_s28 }
 0x216   : > { %v984_v10 = vpop.permute.xlu0 %983  ;;  %v2795_v25 = vpop.f32.mrb[0].mxu0 }
 0x217   : > { %1057 = vst.msk [vmem:[#allocation2 + $0xb8] sm:$0xff] %vm1033_vm6, %v984_v10  ;;  %v4244_v20 = vadd.f32 %v2795_v25, %v4234_v45  ;;  %v1116_v35 = vpop.permute.xlu1 %1115  ;;  %v1811_v3 = vpop.f32.mrb[1].mxu0 }
 0x218   : > { %1190 = vst.msk [vmem:[#allocation2 + $0xb0] sm:$0xff] %vm1167_vm7, %v1116_v35  ;;  %v4248_v63 = vadd.f32 %v4234_v45, %v1811_v3 }
 0x219   : > { %1972 = vst.msk [vmem:[%s4240_s6 + $0x8] sm:$0xff] %vm1970_vm12, %v4244_v20  ;;  %v4255_v42 = vmul.f32 %v4244_v20, %v4244_v20  ;;  %2345 = vrot.lane.b32.xlu1 %v4244_v20, %s2934_s7 }
 0x21a   : > { %1971 = vst.msk [vmem:[%s4240_s6] sm:$0xff] %vm1970_vm12, %v4248_v63  ;;  %v4264_v16 = vmul.f32 %v4248_v63, %v4248_v63  ;;  %v1514_v62 = vpop.permute.xlu0 %1513  ;;  %2343 = vrot.lane.b32.xlu0 %v4248_v63, %s2934_s7 }
 0x21b   : > { %v2174_v61 = vsel %vm299_vm0, %v4255_v42, 0.0  ;;  %1589 = vst.msk [vmem:[#allocation2 + $0xa8] sm:$0xff] %vm1567_vm10, %v1514_v62  ;;  %v1118_v26 = vpop.permute.xlu1 %1117  ;;  %v1620_v18 = vld [vmem:[#allocation2 + $0xa0] sm:$0xff] }
 0x21c   : > { %v2173_v29 = vsel %vm299_vm0, %v4264_v16, 0.0  ;;  %1191 = vst.msk [vmem:[#allocation2 + $0xb8] sm:$0xff] %vm1167_vm7, %v1118_v26  ;;  %2823 = vmatprep.mubr.msk.f32.mxu1 %vm1648_vm11, %v1620_v18 }
 0x21d   : > { %v2175_v48 = vadd.f32 %v2174_v61, %v2173_v29 }
 0x21e   : > { %v1247_v37 = vpop.permute.xlu0 %1246 }
 0x21f   : > { %1321 = vst.msk [vmem:[#allocation2 + $0xb0] sm:$0xff] %vm1298_vm8, %v1247_v37  ;;  %v851_v46 = vpop.permute.xlu1 %850 }
 0x220   : > { %923 = vst.msk [vmem:[#allocation2 + $0xc0] sm:$0xff] %vm898_vm5, %v851_v46 }
 0x222   : > { %v1249_v30 = vpop.permute.xlu0 %1248  ;;  %v1621_v47 = vld [vmem:[#allocation2 + $0xa8] sm:$0xff] }
 0x223   : > { %1322 = vst.msk [vmem:[#allocation2 + $0xb8] sm:$0xff] %vm1298_vm8, %v1249_v30  ;;  %v1382_v8 = vpop.permute.xlu1 %1381  ;;  %2824 = vmatmul.mubr.msk.f32.gmra.mrb[4].mxu1 %vm1648_vm11, %v1621_v47 }
 0x224   : > { %1456 = vst.msk [vmem:[#allocation2 + $0xb0] sm:$0xff] %vm1433_vm9, %v1382_v8 }
 0x226   : > { %v853_v50 = vpop.permute.xlu0 %852 }
 0x227   : > { %924 = vst.msk [vmem:[#allocation2 + $0xc8] sm:$0xff] %vm898_vm5, %v853_v50  ;;  %v986_v38 = vpop.permute.xlu1 %985 }
 0x228   : > { %1058 = vst.msk [vmem:[#allocation2 + $0xc0] sm:$0xff] %vm1033_vm6, %v986_v38 }
 0x22a   : > { %v1384_v13 = vpop.permute.xlu0 %1383  ;;  %v2798_v40 = vpop.f32.mrb[2].mxu0 }
 0x22b   : > { %1457 = vst.msk [vmem:[#allocation2 + $0xb8] sm:$0xff] %vm1433_vm9, %v1384_v13  ;;  %v4284_v60 = vadd.f32 %v2798_v40, %v4234_v45  ;;  %v1516_v52 = vpop.permute.xlu1 %1515  ;;  %v1821_v49 = vpop.f32.mrb[3].mxu0 }
 0x22c   : > { %1590 = vst.msk [vmem:[#allocation2 + $0xb0] sm:$0xff] %vm1567_vm10, %v1516_v52  ;;  %v4288_v15 = vadd.f32 %v4234_v45, %v1821_v49 }
 0x22d   : > { %1974 = vst.msk [vmem:[%s4240_s6 + $0x18] sm:$0xff] %vm1970_vm12, %v4284_v60  ;;  %2349 = vrot.lane.b32.xlu1 %v4284_v60, %s2934_s7  ;;  %v4297_v55 = vmul.f32 %v4284_v60, %v4284_v60 }
 0x22e   : > { %1973 = vst.msk [vmem:[%s4240_s6 + $0x10] sm:$0xff] %vm1970_vm12, %v4288_v15  ;;  %v4304_v22 = vmul.f32 %v4288_v15, %v4288_v15  ;;  %v988_v0 = vpop.permute.xlu0 %987  ;;  %2347 = vrot.lane.b32.xlu0 %v4288_v15, %s2934_s7 }
 0x22f   : > { %1059 = vst.msk [vmem:[#allocation2 + $0xc8] sm:$0xff] %vm1033_vm6, %v988_v0  ;;  %v1120_v7 = vpop.permute.xlu1 %1119  ;;  %v2178_v19 = vsel %vm299_vm0, %v4297_v55, 0.0 }
 0x230   : > { %v2176_v56 = vsel %vm299_vm0, %v4304_v22, 0.0  ;;  %1192 = vst.msk [vmem:[#allocation2 + $0xc0] sm:$0xff] %vm1167_vm7, %v1120_v7 }
 0x231   : > { %v2177_v34 = vadd.f32 %v2176_v56, %v2175_v48 }
 0x232   : > { %v1518_v51 = vpop.permute.xlu0 %1517 }
 0x233   : > { %1591 = vst.msk [vmem:[#allocation2 + $0xb8] sm:$0xff] %vm1567_vm10, %v1518_v51  ;;  %v1122_v53 = vpop.permute.xlu1 %1121  ;;  %v1622_v31 = vld [vmem:[#allocation2 + $0xb0] sm:$0xff]  ;;  %v2179_v41 = vadd.f32 %v2178_v19, %v2177_v34 }
 0x234   : > { %1193 = vst.msk [vmem:[#allocation2 + $0xc8] sm:$0xff] %vm1167_vm7, %v1122_v53  ;;  %2826 = vmatprep.mubr.msk.f32.mxu1 %vm1648_vm11, %v1622_v31 }
 0x236   : > { %v1251_v54 = vpop.permute.xlu0 %1250 }
 0x237   : > { %1323 = vst.msk [vmem:[#allocation2 + $0xc0] sm:$0xff] %vm1298_vm8, %v1251_v54  ;;  %v855_v23 = vpop.permute.xlu1 %854 }
 0x238   : > { %925 = vst.msk [vmem:[#allocation2 + $0xd0] sm:$0xff] %vm898_vm5, %v855_v23 }
 0x23a   : > { %v1253_v2 = vpop.permute.xlu0 %1252  ;;  %v1623_v5 = vld [vmem:[#allocation2 + $0xb8] sm:$0xff] }
 0x23b   : > { %1324 = vst.msk [vmem:[#allocation2 + $0xc8] sm:$0xff] %vm1298_vm8, %v1253_v2  ;;  %v1386_v11 = vpop.permute.xlu1 %1385  ;;  %2827 = vmatmul.mubr.msk.f32.gmra.mrb[6].mxu1 %vm1648_vm11, %v1623_v5 }
 0x23c   : > { %1458 = vst.msk [vmem:[#allocation2 + $0xc0] sm:$0xff] %vm1433_vm9, %v1386_v11 }
 0x23e   : > { %v857_v43 = vpop.permute.xlu0 %856  ;;  %v2801_v12 = vpop.f32.mrb[4].mxu0 }
 0x23f   : > { %926 = vst.msk [vmem:[#allocation2 + $0xd8] sm:$0xff] %vm898_vm5, %v857_v43  ;;  %v4324_v4 = vadd.f32 %v2801_v12, %v4234_v45  ;;  %v990_v33 = vpop.permute.xlu1 %989  ;;  %v1831_v28 = vpop.f32.mrb[5].mxu0 }
 0x240   : > { %1060 = vst.msk [vmem:[#allocation2 + $0xd0] sm:$0xff] %vm1033_vm6, %v990_v33  ;;  %v4328_v6 = vadd.f32 %v4234_v45, %v1831_v28 }
 0x241   : > { %1976 = vst.msk [vmem:[%s4240_s6 + $0x28] sm:$0xff] %vm1970_vm12, %v4324_v4  ;;  %2353 = vrot.lane.b32.xlu1 %v4324_v4, %s2934_s7  ;;  %v4337_v21 = vmul.f32 %v4324_v4, %v4324_v4 }
 0x242   : > { %1975 = vst.msk [vmem:[%s4240_s6 + $0x20] sm:$0xff] %vm1970_vm12, %v4328_v6  ;;  %v4344_v59 = vmul.f32 %v4328_v6, %v4328_v6  ;;  %v1388_v1 = vpop.permute.xlu0 %1387  ;;  %2351 = vrot.lane.b32.xlu0 %v4328_v6, %s2934_s7 }
 0x243   : > { %1459 = vst.msk [vmem:[#allocation2 + $0xc8] sm:$0xff] %vm1433_vm9, %v1388_v1  ;;  %v1520_v32 = vpop.permute.xlu1 %1519  ;;  %v2182_v57 = vsel %vm299_vm0, %v4337_v21, 0.0 }
 0x244   : > { %v2180_v9 = vsel %vm299_vm0, %v4344_v59, 0.0  ;;  %1592 = vst.msk [vmem:[#allocation2 + $0xc0] sm:$0xff] %vm1567_vm10, %v1520_v32 }
 0x245   : > { %v2181_v58 = vadd.f32 %v2180_v9, %v2179_v41 }
 0x246   : > { %v992_v14 = vpop.permute.xlu0 %991 }
 0x247   : > { %1061 = vst.msk [vmem:[#allocation2 + $0xd8] sm:$0xff] %vm1033_vm6, %v992_v14  ;;  %v1124_v17 = vpop.permute.xlu1 %1123  ;;  %v2183_v24 = vadd.f32 %v2182_v57, %v2181_v58 }
 0x248   : > { %1194 = vst.msk [vmem:[#allocation2 + $0xd0] sm:$0xff] %vm1167_vm7, %v1124_v17 }
 0x24a   : > { %v1522_v44 = vpop.permute.xlu0 %1521 }
 0x24b   : > { %1593 = vst.msk [vmem:[#allocation2 + $0xc8] sm:$0xff] %vm1567_vm10, %v1522_v44  ;;  %v1126_v36 = vpop.permute.xlu1 %1125  ;;  %v1624_v27 = vld [vmem:[#allocation2 + $0xc0] sm:$0xff] }
 0x24c   : > { %1195 = vst.msk [vmem:[#allocation2 + $0xd8] sm:$0xff] %vm1167_vm7, %v1126_v36  ;;  %2829 = vmatprep.mubr.msk.f32.mxu1 %vm1648_vm11, %v1624_v27 }
 0x24e   : > { %v1255_v39 = vpop.permute.xlu0 %1254 }
 0x24f   : > { %1325 = vst.msk [vmem:[#allocation2 + $0xd0] sm:$0xff] %vm1298_vm8, %v1255_v39  ;;  %v859_v10 = vpop.permute.xlu1 %858 }
 0x250   : > { %927 = vst.msk [vmem:[#allocation2 + $0xe0] sm:$0xff] %vm898_vm5, %v859_v10 }
 0x252   : > { %v1257_v25 = vpop.permute.xlu0 %1256  ;;  %v2804_v35 = vpop.f32.mrb[6].mxu0  ;;  %v1625_v3 = vld [vmem:[#allocation2 + $0xc8] sm:$0xff] }
 0x253   : > { %1326 = vst.msk [vmem:[#allocation2 + $0xd8] sm:$0xff] %vm1298_vm8, %v1257_v25  ;;  %v4363_v62 = vadd.f32 %v2804_v35, %v4234_v45  ;;  %v1390_v61 = vpop.permute.xlu1 %1389  ;;  %v1841_v26 = vpop.f32.mrb[7].mxu0  ;;  %2830 = vmatmul.mubr.msk.f32.gmra.mrb[8].mxu1 %vm1648_vm11, %v1625_v3 }
 0x254   : > { %1460 = vst.msk [vmem:[#allocation2 + $0xd0] sm:$0xff] %vm1433_vm9, %v1390_v61  ;;  %v4368_v18 = vadd.f32 %v4234_v45, %v1841_v26 }
 0x255   : > { %1978 = vst.msk [vmem:[%s4240_s6 + $0x38] sm:$0xff] %vm1970_vm12, %v4363_v62  ;;  %2357 = vrot.lane.b32.xlu1 %v4363_v62, %s2934_s7  ;;  %v4377_v29 = vmul.f32 %v4363_v62, %v4363_v62 }
 0x256   : > { %1977 = vst.msk [vmem:[%s4240_s6 + $0x30] sm:$0xff] %vm1970_vm12, %v4368_v18  ;;  %v4384_v48 = vmul.f32 %v4368_v18, %v4368_v18  ;;  %v861_v37 = vpop.permute.xlu0 %860  ;;  %2355 = vrot.lane.b32.xlu0 %v4368_v18, %s2934_s7 }
 0x257   : > { %928 = vst.msk [vmem:[#allocation2 + $0xe8] sm:$0xff] %vm898_vm5, %v861_v37  ;;  %v994_v46 = vpop.permute.xlu1 %993  ;;  %v2186_v8 = vsel %vm299_vm0, %v4377_v29, 0.0 }
 0x258   : > { %v2184_v30 = vsel %vm299_vm0, %v4384_v48, 0.0  ;;  %1062 = vst.msk [vmem:[#allocation2 + $0xe0] sm:$0xff] %vm1033_vm6, %v994_v46 }
 0x259   : > { %v2185_v47 = vadd.f32 %v2184_v30, %v2183_v24 }
 0x25a   : > { %v1392_v50 = vpop.permute.xlu0 %1391 }
 0x25b   : > { %1461 = vst.msk [vmem:[#allocation2 + $0xd8] sm:$0xff] %vm1433_vm9, %v1392_v50  ;;  %v1524_v38 = vpop.permute.xlu1 %1523  ;;  %v2187_v13 = vadd.f32 %v2186_v8, %v2185_v47 }
 0x25c   : > { %1594 = vst.msk [vmem:[#allocation2 + $0xd0] sm:$0xff] %vm1567_vm10, %v1524_v38 }
 0x25e   : > { %v996_v40 = vpop.permute.xlu0 %995 }
 0x25f   : > { %1063 = vst.msk [vmem:[#allocation2 + $0xe8] sm:$0xff] %vm1033_vm6, %v996_v40  ;;  %v1128_v52 = vpop.permute.xlu1 %1127 }
 0x260   : > { %1196 = vst.msk [vmem:[#allocation2 + $0xe0] sm:$0xff] %vm1167_vm7, %v1128_v52 }
 0x262   : > { %v1526_v49 = vpop.permute.xlu0 %1525 }
 0x263   : > { %1595 = vst.msk [vmem:[#allocation2 + $0xd8] sm:$0xff] %vm1567_vm10, %v1526_v49  ;;  %v1130_v0 = vpop.permute.xlu1 %1129  ;;  %v1626_v7 = vld [vmem:[#allocation2 + $0xd0] sm:$0xff] }
 0x264   : > { %1197 = vst.msk [vmem:[#allocation2 + $0xe8] sm:$0xff] %vm1167_vm7, %v1130_v0  ;;  %2832 = vmatprep.mubr.msk.f32.mxu1 %vm1648_vm11, %v1626_v7 }
 0x266   : > { %v1259_v56 = vpop.permute.xlu0 %1258  ;;  %v2807_v34 = vpop.f32.mrb[8].mxu0 }
 0x267   : > { %1327 = vst.msk [vmem:[#allocation2 + $0xe0] sm:$0xff] %vm1298_vm8, %v1259_v56  ;;  %v4403_v19 = vadd.f32 %v2807_v34, %v4234_v45  ;;  %v863_v51 = vpop.permute.xlu1 %862  ;;  %v1851_v53 = vpop.f32.mrb[9].mxu0 }
 0x268   : > { %929 = vst.msk [vmem:[#allocation2 + $0xf0] sm:$0xff] %vm898_vm5, %v863_v51  ;;  %v4407_v31 = vadd.f32 %v4234_v45, %v1851_v53 }
 0x269   : > { %1980 = vst.msk [vmem:[%s4240_s6 + $0x48] sm:$0xff] %vm1970_vm12, %v4403_v19  ;;  %2361 = vrot.lane.b32.xlu1 %v4403_v19, %s2934_s7  ;;  %v4416_v41 = vmul.f32 %v4403_v19, %v4403_v19 }
 0x26a   : > { %1979 = vst.msk [vmem:[%s4240_s6 + $0x40] sm:$0xff] %vm1970_vm12, %v4407_v31  ;;  %v4423_v54 = vmul.f32 %v4407_v31, %v4407_v31  ;;  %v1261_v23 = vpop.permute.xlu0 %1260  ;;  %2359 = vrot.lane.b32.xlu0 %v4407_v31, %s2934_s7  ;;  %v1627_v2 = vld [vmem:[#allocation2 + $0xd8] sm:$0xff] }
 0x26b   : > { %1328 = vst.msk [vmem:[#allocation2 + $0xe8] sm:$0xff] %vm1298_vm8, %v1261_v23  ;;  %v1394_v5 = vpop.permute.xlu1 %1393  ;;  %2833 = vmatmul.mubr.msk.f32.gmra.mrb[10].mxu1 %vm1648_vm11, %v1627_v2  ;;  %v2190_v12 = vsel %vm299_vm0, %v4416_v41, 0.0 }
 0x26c   : > { %v2188_v11 = vsel %vm299_vm0, %v4423_v54, 0.0  ;;  %1462 = vst.msk [vmem:[#allocation2 + $0xe0] sm:$0xff] %vm1433_vm9, %v1394_v5 }
 0x26d   : > { %v2189_v43 = vadd.f32 %v2188_v11, %v2187_v13 }
 0x26e   : > { %v865_v33 = vpop.permute.xlu0 %864 }
 0x26f   : > { %930 = vst.msk [vmem:[#allocation2 + $0xf8] sm:$0xff] %vm898_vm5, %v865_v33  ;;  %v998_v28 = vpop.permute.xlu1 %997  ;;  %v2191_v1 = vadd.f32 %v2190_v12, %v2189_v43 }
 0x270   : > { %1064 = vst.msk [vmem:[#allocation2 + $0xf0] sm:$0xff] %vm1033_vm6, %v998_v28 }
 0x272   : > { %v1396_v32 = vpop.permute.xlu0 %1395 }
 0x273   : > { %1463 = vst.msk [vmem:[#allocation2 + $0xe8] sm:$0xff] %vm1433_vm9, %v1396_v32  ;;  %v1528_v9 = vpop.permute.xlu1 %1527 }
 0x274   : > { %1596 = vst.msk [vmem:[#allocation2 + $0xe0] sm:$0xff] %vm1567_vm10, %v1528_v9 }
 0x276   : > { %v1000_v58 = vpop.permute.xlu0 %999 }
 0x277   : > { %1065 = vst.msk [vmem:[#allocation2 + $0xf8] sm:$0xff] %vm1033_vm6, %v1000_v58  ;;  %v1132_v57 = vpop.permute.xlu1 %1131 }
 0x278   : > { %1198 = vst.msk [vmem:[#allocation2 + $0xf0] sm:$0xff] %vm1167_vm7, %v1132_v57 }
 0x27a   : > { %v1530_v14 = vpop.permute.xlu0 %1529 }
 0x27b   : > { %1597 = vst.msk [vmem:[#allocation2 + $0xe8] sm:$0xff] %vm1567_vm10, %v1530_v14  ;;  %v1134_v17 = vpop.permute.xlu1 %1133  ;;  %v1628_v24 = vld [vmem:[#allocation2 + $0xe0] sm:$0xff] }
 0x27c   : > { %1199 = vst.msk [vmem:[#allocation2 + $0xf8] sm:$0xff] %vm1167_vm7, %v1134_v17  ;;  %2835 = vmatprep.mubr.msk.f32.mxu1 %vm1648_vm11, %v1628_v24 }
 0x27e   : > { %v1263_v44 = vpop.permute.xlu0 %1262  ;;  %v2810_v36 = vpop.f32.mrb[10].mxu0 }
 0x27f   : > { %1329 = vst.msk [vmem:[#allocation2 + $0xf0] sm:$0xff] %vm1298_vm8, %v1263_v44  ;;  %v4445_v27 = vadd.f32 %v2810_v36, %v4234_v45  ;;  %v1265_v39 = vpop.permute.xlu1 %1264  ;;  %v1861_v10 = vpop.f32.mrb[11].mxu0 }
 0x280   : > { %1330 = vst.msk [vmem:[#allocation2 + $0xf8] sm:$0xff] %vm1298_vm8, %v1265_v39  ;;  %v4449_v25 = vadd.f32 %v4234_v45, %v1861_v10 }
 0x281   : > { %1982 = vst.msk [vmem:[%s4240_s6 + $0x58] sm:$0xff] %vm1970_vm12, %v4445_v27  ;;  %2365 = vrot.lane.b32.xlu1 %v4445_v27, %s2934_s7  ;;  %v4458_v35 = vmul.f32 %v4445_v27, %v4445_v27 }
 0x282   : > { %1981 = vst.msk [vmem:[%s4240_s6 + $0x50] sm:$0xff] %vm1970_vm12, %v4449_v25  ;;  %v4465_v3 = vmul.f32 %v4449_v25, %v4449_v25  ;;  %v1398_v61 = vpop.permute.xlu0 %1397  ;;  %2363 = vrot.lane.b32.xlu0 %v4449_v25, %s2934_s7  ;;  %v1629_v26 = vld [vmem:[#allocation2 + $0xe8] sm:$0xff] }
 0x283   : > { %1464 = vst.msk [vmem:[#allocation2 + $0xf0] sm:$0xff] %vm1433_vm9, %v1398_v61  ;;  %v1400_v37 = vpop.permute.xlu1 %1399  ;;  %2836 = vmatmul.mubr.msk.f32.gmra.mrb[12].mxu1 %vm1648_vm11, %v1629_v26  ;;  %v2194_v47 = vsel %vm299_vm0, %v4458_v35, 0.0 }
 0x284   : > { %v2192_v46 = vsel %vm299_vm0, %v4465_v3, 0.0  ;;  %1465 = vst.msk [vmem:[#allocation2 + $0xf8] sm:$0xff] %vm1433_vm9, %v1400_v37 }
 0x285   : > { %v2193_v30 = vadd.f32 %v2192_v46, %v2191_v1 }
 0x286   : > { %v1532_v8 = vpop.permute.xlu0 %1531 }
 0x287   : > { %1598 = vst.msk [vmem:[#allocation2 + $0xf0] sm:$0xff] %vm1567_vm10, %v1532_v8  ;;  %v1534_v50 = vpop.permute.xlu1 %1533  ;;  %v2195_v38 = vadd.f32 %v2194_v47, %v2193_v30 }
 0x288   : > { %1599 = vst.msk [vmem:[#allocation2 + $0xf8] sm:$0xff] %vm1567_vm10, %v1534_v50 }
 0x28e   : > { %v1630_v13 = vld [vmem:[#allocation2 + $0xf0] sm:$0xff] }
 0x28f   : > { %2838 = vmatprep.mubr.msk.f32.mxu1 %vm1648_vm11, %v1630_v13  ;;  %v1631_v40 = vld [vmem:[#allocation2 + $0xf8] sm:$0xff] }
 0x290   : > { %2839 = vmatmul.mubr.msk.f32.gmra.mrb[14].mxu1 %vm1648_vm11, %v1631_v40 }
 0x296   : > { %v2813_v52 = vpop.f32.mrb[12].mxu0 }
 0x297   : > { %v4481_v49 = vadd.f32 %v2813_v52, %v4234_v45  ;;  %v1871_v0 = vpop.f32.mrb[13].mxu0 }
 0x298   : > { %v4484_v7 = vadd.f32 %v4234_v45, %v1871_v0 }
 0x299   : > { %1984 = vst.msk [vmem:[%s4240_s6 + $0x68] sm:$0xff] %vm1970_vm12, %v4481_v49  ;;  %2369 = vrot.lane.b32.xlu1 %v4481_v49, %s2934_s7  ;;  %v4493_v56 = vmul.f32 %v4481_v49, %v4481_v49 }
 0x29a   : > { %1983 = vst.msk [vmem:[%s4240_s6 + $0x60] sm:$0xff] %vm1970_vm12, %v4484_v7  ;;  %v4500_v34 = vmul.f32 %v4484_v7, %v4484_v7  ;;  %2367 = vrot.lane.b32.xlu0 %v4484_v7, %s2934_s7 }
 0x29b   : > { %v2198_v23 = vsel %vm299_vm0, %v4493_v56, 0.0 }
 0x29c   : > { %v2196_v51 = vsel %vm299_vm0, %v4500_v34, 0.0 }
 0x29d   : > { %v2197_v53 = vadd.f32 %v2196_v51, %v2195_v38 }
 0x29f   : > { %v2199_v2 = vadd.f32 %v2198_v23, %v2197_v53 }
 0x2ae   : > { %v2816_v5 = vpop.f32.mrb[14].mxu0 }
 0x2af   : > { %v4509_v11 = vadd.f32 %v2816_v5, %v4234_v45  ;;  %v1881_v43 = vpop.f32.mrb[15].mxu0 }
 0x2b0   : > { %v4512_v12 = vadd.f32 %v4234_v45, %v1881_v43 }
 0x2b1   : > { %1986 = vst.msk [vmem:[%s4240_s6 + $0x78] sm:$0xff] %vm1970_vm12, %v4509_v11  ;;  %2373 = vrot.lane.b32.xlu1 %v4509_v11, %s2934_s7  ;;  %v4521_v33 = vmul.f32 %v4509_v11, %v4509_v11 }
 0x2b2   : > { %1985 = vst.msk [vmem:[%s4240_s6 + $0x70] sm:$0xff] %vm1970_vm12, %v4512_v12  ;;  %v4528_v28 = vmul.f32 %v4512_v12, %v4512_v12  ;;  %2371 = vrot.lane.b32.xlu0 %v4512_v12, %s2934_s7 }
 0x2b3   : > { %v2202_v9 = vsel %vm299_vm0, %v4521_v33, 0.0 }
 0x2b4   : > { %v2200_v1 = vsel %vm299_vm0, %v4528_v28, 0.0 }
 0x2b5   : > { %v2201_v32 = vadd.f32 %v2200_v1, %v2199_v2 }
 0x2b7   : > { %v2203_v58 = vadd.f32 %v2202_v9, %v2201_v32 }
 0x2c6   : > { %v2819_v57 = vpop.f32.mrb[0].mxu1 }
 0x2c7   : > { %v4537_v14 = vadd.f32 %v2819_v57, %v4234_v45  ;;  %v1891_v17 = vpop.f32.mrb[1].mxu1  ;;  %v2073_v57 = vsel %vm557_vm3, %v4244_v20, 0.0 }
 0x2c8   : > { %v4540_v24 = vadd.f32 %v4234_v45, %v1891_v17  ;;  %v2072_v17 = vsel %vm557_vm3, %v4248_v63, 0.0 }
 0x2c9   : > { %1988 = vst.msk [vmem:[%s4240_s6 + $0x88] sm:$0xff] %vm1970_vm12, %v4537_v14  ;;  %2377 = vrot.lane.b32.xlu1 %v4537_v14, %s2934_s7  ;;  %v4549_v44 = vmul.f32 %v4537_v14, %v4537_v14 }
 0x2ca   : > { %1987 = vst.msk [vmem:[%s4240_s6 + $0x80] sm:$0xff] %vm1970_vm12, %v4540_v24  ;;  %v4556_v36 = vmul.f32 %v4540_v24, %v4540_v24  ;;  %2375 = vrot.lane.b32.xlu0 %v4540_v24, %s2934_s7 }
 0x2cb   : > { %v2206_v61 = vsel %vm299_vm0, %v4549_v44, 0.0 }
 0x2cc   : > { %v2204_v39 = vsel %vm299_vm0, %v4556_v36, 0.0 }
 0x2cd   : > { %v2205_v10 = vadd.f32 %v2204_v39, %v2203_v58 }
 0x2cf   : > { %v2207_v26 = vadd.f32 %v2206_v61, %v2205_v10 }
 0x2de   : > { %v2822_v37 = vpop.f32.mrb[2].mxu1 }
 0x2df   : > { %v4565_v46 = vadd.f32 %v2822_v37, %v4234_v45  ;;  %v1901_v30 = vpop.f32.mrb[3].mxu1  ;;  %v2242_v37 = vsel %vm557_vm3, %v4264_v16, 0.0  ;;  %v2245_v16 = vsel %vm557_vm3, %v4304_v22, 0.0  ;;  %v2247_v22 = vsel %vm557_vm3, %v4297_v55, 0.0 }
 0x2e0   : > { %v4568_v47 = vadd.f32 %v4234_v45, %v1901_v30  ;;  %v2075_v30 = vsel %vm557_vm3, %v4288_v15, 0.0 }
 0x2e1   : > { %1990 = vst.msk [vmem:[%s4240_s6 + $0x98] sm:$0xff] %vm1970_vm12, %v4565_v46  ;;  %2381 = vrot.lane.b32.xlu1 %v4565_v46, %s2934_s7  ;;  %v4577_v8 = vmul.f32 %v4565_v46, %v4565_v46 }
 0x2e2   : > { %1989 = vst.msk [vmem:[%s4240_s6 + $0x90] sm:$0xff] %vm1970_vm12, %v4568_v47  ;;  %v4584_v50 = vmul.f32 %v4568_v47, %v4568_v47  ;;  %2379 = vrot.lane.b32.xlu0 %v4568_v47, %s2934_s7 }
 0x2e3   : > { %v2210_v40 = vsel %vm299_vm0, %v4577_v8, 0.0 }
 0x2e4   : > { %v2208_v38 = vsel %vm299_vm0, %v4584_v50, 0.0 }
 0x2e5   : > { %v2209_v13 = vadd.f32 %v2208_v38, %v2207_v26  ;;  %v2243_v26 = vsel %vm557_vm3, %v4255_v42, 0.0  ;;  %v2074_v38 = vadd.f32 %v2073_v57, %v2072_v17 }
 0x2e7   : > { %v2211_v52 = vadd.f32 %v2210_v40, %v2209_v13  ;;  %v2244_v40 = vadd.f32 %v2243_v26, %v2242_v37 }
 0x2f6   : > { %v2825_v0 = vpop.f32.mrb[4].mxu1 }
 0x2f7   : > { %v4593_v51 = vadd.f32 %v2825_v0, %v4234_v45  ;;  %v1911_v53 = vpop.f32.mrb[5].mxu1 }
 0x2f8   : > { %v4596_v23 = vadd.f32 %v4234_v45, %v1911_v53 }
 0x2f9   : > { %1992 = vst.msk [vmem:[%s4240_s6 + $0xa8] sm:$0xff] %vm1970_vm12, %v4593_v51  ;;  %2385 = vrot.lane.b32.xlu1 %v4593_v51, %s2934_s7  ;;  %v4605_v2 = vmul.f32 %v4593_v51, %v4593_v51 }
 0x2fa   : > { %1991 = vst.msk [vmem:[%s4240_s6 + $0xa0] sm:$0xff] %vm1970_vm12, %v4596_v23  ;;  %v4612_v5 = vmul.f32 %v4596_v23, %v4596_v23  ;;  %2383 = vrot.lane.b32.xlu0 %v4596_v23, %s2934_s7 }
 0x2fb   : > { %v2214_v32 = vsel %vm299_vm0, %v4605_v2, 0.0 }
 0x2fc   : > { %v2212_v43 = vsel %vm299_vm0, %v4612_v5, 0.0 }
 0x2fd   : > { %v2213_v1 = vadd.f32 %v2212_v43, %v2211_v52  ;;  %v2076_v52 = vadd.f32 %v2075_v30, %v2074_v38  ;;  %v2246_v43 = vadd.f32 %v2245_v16, %v2244_v40  ;;  %v2081_v30 = vsel %vm557_vm3, %v4324_v4, 0.0 }
 0x2fe   : > { %v2083_v38 = vsel %vm557_vm3, %v4368_v18, 0.0  ;;  %v2251_v40 = vsel %vm557_vm3, %v4337_v21, 0.0  ;;  %v2257_v21 = vsel %vm557_vm3, %v4423_v54, 0.0 }
 0x2ff   : > { %v2215_v9 = vadd.f32 %v2214_v32, %v2213_v1  ;;  %v2077_v32 = vsel %vm557_vm3, %v4284_v60, 0.0 }
 0x300   : > { %v2078_v17 = vadd.f32 %v2077_v32, %v2076_v52  ;;  %v2253_v52 = vsel %vm557_vm3, %v4384_v48, 0.0  ;;  %v2255_v32 = vsel %vm557_vm3, %v4377_v29, 0.0  ;;  %v2091_v29 = vsel %vm557_vm3, %v4449_v25, 0.0 }
 0x30e   : > { %v2828_v58 = vpop.f32.mrb[6].mxu1 }
 0x30f   : > { %v4625_v39 = vadd.f32 %v2828_v58, %v4234_v45  ;;  %v1921_v10 = vpop.f32.mrb[7].mxu1  ;;  %v2079_v58 = vsel %vm557_vm3, %v4328_v6, 0.0 }
 0x310   : > { %v4628_v61 = vadd.f32 %v4234_v45, %v1921_v10  ;;  %v2249_v10 = vsel %vm557_vm3, %v4344_v59, 0.0  ;;  %v2080_v26 = vadd.f32 %v2079_v58, %v2078_v17 }
 0x311   : > { %1994 = vst.msk [vmem:[%s4240_s6 + $0xb8] sm:$0xff] %vm1970_vm12, %v4625_v39  ;;  %2389 = vrot.lane.b32.xlu1 %v4625_v39, %s2934_s7  ;;  %v4643_v13 = vmul.f32 %v4625_v39, %v4625_v39 }
 0x312   : > { %1993 = vst.msk [vmem:[%s4240_s6 + $0xb0] sm:$0xff] %vm1970_vm12, %v4628_v61  ;;  %v4650_v42 = vmul.f32 %v4628_v61, %v4628_v61  ;;  %2387 = vrot.lane.b32.xlu0 %v4628_v61, %s2934_s7  ;;  %v2082_v16 = vadd.f32 %v2081_v30, %v2080_v26 }
 0x313   : > { %v2218_v1 = vsel %vm299_vm0, %v4643_v13, 0.0 }
 0x314   : > { %v2216_v0 = vsel %vm299_vm0, %v4650_v42, 0.0  ;;  %v2084_v55 = vadd.f32 %v2083_v38, %v2082_v16  ;;  %v2259_v16 = vsel %vm557_vm3, %v4416_v41, 0.0 }
 0x315   : > { %v2217_v53 = vadd.f32 %v2216_v0, %v2215_v9  ;;  %v2248_v9 = vadd.f32 %v2247_v22, %v2246_v43  ;;  %v2087_v43 = vsel %vm557_vm3, %v4407_v31, 0.0 }
 0x317   : > { %v2219_v57 = vadd.f32 %v2218_v1, %v2217_v53  ;;  %v2250_v37 = vadd.f32 %v2249_v10, %v2248_v9  ;;  %v2085_v53 = vsel %vm557_vm3, %v4363_v62, 0.0 }
 0x318   : > { %v2086_v1 = vadd.f32 %v2085_v53, %v2084_v55 }
 0x319   : > { %v2252_v0 = vadd.f32 %v2251_v40, %v2250_v37  ;;  %v2089_v37 = vsel %vm557_vm3, %v4403_v19, 0.0  ;;  %v2261_v40 = vsel %vm557_vm3, %v4465_v3, 0.0  ;;  %v2263_v3 = vsel %vm557_vm3, %v4458_v35, 0.0 }
 0x31a   : > { %v2088_v58 = vadd.f32 %v2087_v43, %v2086_v1  ;;  %v2093_v1 = vsel %vm557_vm3, %v4445_v27, 0.0 }
 0x31b   : > { %v2254_v59 = vadd.f32 %v2253_v52, %v2252_v0 }
 0x31c   : > { %v2090_v54 = vadd.f32 %v2089_v37, %v2088_v58  ;;  %v2265_v58 = vsel %vm557_vm3, %v4500_v34, 0.0 }
 0x31d   : > { %v2256_v48 = vadd.f32 %v2255_v32, %v2254_v59  ;;  %v2095_v32 = vsel %vm557_vm3, %v4484_v7, 0.0 }
 0x31e   : > { %v2092_v52 = vadd.f32 %v2091_v29, %v2090_v54  ;;  %v2267_v29 = vsel %vm557_vm3, %v4493_v56, 0.0  ;;  %v2269_v54 = vsel %vm557_vm3, %v4528_v28, 0.0  ;;  %v2273_v56 = vsel %vm557_vm3, %v4556_v36, 0.0 }
 0x31f   : > { %v2258_v26 = vadd.f32 %v2257_v21, %v2256_v48 }
 0x320   : > { %v2094_v21 = vadd.f32 %v2093_v1, %v2092_v52  ;;  %v2103_v52 = vsel %vm557_vm3, %v4540_v24, 0.0 }
 0x321   : > { %v2260_v55 = vadd.f32 %v2259_v16, %v2258_v26  ;;  %v2099_v26 = vsel %vm557_vm3, %v4512_v12, 0.0 }
 0x322   : > { %v2096_v48 = vadd.f32 %v2095_v32, %v2094_v21 }
 0x323   : > { %v2262_v53 = vadd.f32 %v2261_v40, %v2260_v55  ;;  %v2101_v40 = vsel %vm557_vm3, %v4509_v11, 0.0 }
 0x326   : > { %v2831_v17 = vpop.f32.mrb[8].mxu1 }
 0x327   : > { %v4685_v22 = vadd.f32 %v2831_v17, %v4234_v45  ;;  %v1931_v10 = vpop.f32.mrb[9].mxu1 }
 0x328   : > { %v4688_v9 = vadd.f32 %v4234_v45, %v1931_v10  ;;  %v2097_v10 = vsel %vm557_vm3, %v4481_v49, 0.0 }
 0x329   : > { %1996 = vst.msk [vmem:[%s4240_s6 + $0xc8] sm:$0xff] %vm1970_vm12, %v4685_v22  ;;  %2393 = vrot.lane.b32.xlu1 %v4685_v22, %s2934_s7  ;;  %v4701_v30 = vmul.f32 %v4685_v22, %v4685_v22  ;;  %v2098_v37 = vadd.f32 %v2097_v10, %v2096_v48 }
 0x32a   : > { %1995 = vst.msk [vmem:[%s4240_s6 + $0xc0] sm:$0xff] %vm1970_vm12, %v4688_v9  ;;  %v4708_v38 = vmul.f32 %v4688_v9, %v4688_v9  ;;  %2391 = vrot.lane.b32.xlu0 %v4688_v9, %s2934_s7 }
 0x32b   : > { %v2222_v43 = vsel %vm299_vm0, %v4701_v30, 0.0  ;;  %v2100_v35 = vadd.f32 %v2099_v26, %v2098_v37 }
 0x32c   : > { %v2220_v0 = vsel %vm299_vm0, %v4708_v38, 0.0 }
 0x32d   : > { %v2221_v59 = vadd.f32 %v2220_v0, %v2219_v57  ;;  %v2264_v57 = vadd.f32 %v2263_v3, %v2262_v53  ;;  %v2102_v55 = vadd.f32 %v2101_v40, %v2100_v35  ;;  %v2271_v0 = vsel %vm557_vm3, %v4521_v33, 0.0 }
 0x32e   : > { %v2105_v3 = vsel %vm557_vm3, %v4537_v14, 0.0  ;;  %v2107_v33 = vsel %vm557_vm3, %v4568_v47, 0.0 }
 0x32f   : > { %v2223_v41 = vadd.f32 %v2222_v43, %v2221_v59  ;;  %v2266_v17 = vadd.f32 %v2265_v58, %v2264_v57  ;;  %v2104_v59 = vadd.f32 %v2103_v52, %v2102_v55  ;;  %v2275_v57 = vsel %vm557_vm3, %v4549_v44, 0.0 }
 0x330   : > { %v2279_v44 = vsel %vm557_vm3, %v4577_v8, 0.0 }
 0x331   : > { %v2268_v16 = vadd.f32 %v2267_v29, %v2266_v17  ;;  %v2106_v36 = vadd.f32 %v2105_v3, %v2104_v59  ;;  %v2277_v17 = vsel %vm557_vm3, %v4584_v50, 0.0  ;;  %v2281_v50 = vsel %vm557_vm3, %v4612_v5, 0.0 }
 0x332   : > { %v2115_v59 = vsel %vm557_vm3, %v4628_v61, 0.0  ;;  %v2117_v3 = vsel %vm557_vm3, %v4625_v39, 0.0 }
 0x333   : > { %v2270_v34 = vadd.f32 %v2269_v54, %v2268_v16  ;;  %v2108_v10 = vadd.f32 %v2107_v33, %v2106_v36  ;;  %v2109_v16 = vsel %vm557_vm3, %v4565_v46, 0.0  ;;  %v2119_v33 = vsel %vm557_vm3, %v4688_v9, 0.0 }
 0x335   : > { %v2272_v28 = vadd.f32 %v2271_v0, %v2270_v34  ;;  %v2111_v34 = vsel %vm557_vm3, %v4596_v23, 0.0  ;;  %v2110_v52 = vadd.f32 %v2109_v16, %v2108_v10 }
 0x337   : > { %v2274_v32 = vadd.f32 %v2273_v56, %v2272_v28  ;;  %v2112_v55 = vadd.f32 %v2111_v34, %v2110_v52  ;;  %v2113_v56 = vsel %vm557_vm3, %v4593_v51, 0.0  ;;  %v2291_v52 = vsel %vm557_vm3, %v4701_v30, 0.0 }
 0x339   : > { %v2276_v26 = vadd.f32 %v2275_v57, %v2274_v32  ;;  %v2114_v28 = vadd.f32 %v2113_v56, %v2112_v55  ;;  %v2287_v57 = vsel %vm557_vm3, %v4643_v13, 0.0 }
 0x33b   : > { %v2278_v54 = vadd.f32 %v2277_v17, %v2276_v26  ;;  %v2116_v8 = vadd.f32 %v2115_v59, %v2114_v28 }
 0x33d   : > { %v2280_v0 = vadd.f32 %v2279_v44, %v2278_v54  ;;  %v2118_v36 = vadd.f32 %v2117_v3, %v2116_v8 }
 0x33e   : > { %v2834_v53 = vpop.f32.mrb[10].mxu1 }
 0x33f   : > { %v4745_v43 = vadd.f32 %v2834_v53, %v4234_v45  ;;  %v1941_v1 = vpop.f32.mrb[11].mxu1  ;;  %v2283_v53 = vsel %vm557_vm3, %v4605_v2, 0.0  ;;  %v2289_v2 = vsel %vm557_vm3, %v4708_v38, 0.0  ;;  %v2120_v17 = vadd.f32 %v2119_v33, %v2118_v36 }
 0x340   : > { %v4748_v21 = vadd.f32 %v4234_v45, %v1941_v1  ;;  %v2285_v1 = vsel %vm557_vm3, %v4650_v42, 0.0 }
 0x341   : > { %1998 = vst.msk [vmem:[%s4240_s6 + $0xd8] sm:$0xff] %vm1970_vm12, %v4745_v43  ;;  %2397 = vrot.lane.b32.xlu1 %v4745_v43, %s2934_s7  ;;  %v2168_v58 = vmul.f32 %v4745_v43, %v4745_v43  ;;  %v2125_v28 = vsel %vm557_vm3, %v4745_v43, 0.0 }
 0x342   : > { %1997 = vst.msk [vmem:[%s4240_s6 + $0xd0] sm:$0xff] %vm1970_vm12, %v4748_v21  ;;  %v2167_v48 = vmul.f32 %v4748_v21, %v4748_v21  ;;  %2395 = vrot.lane.b32.xlu0 %v4748_v21, %s2934_s7  ;;  %v2123_v13 = vsel %vm557_vm3, %v4748_v21, 0.0 }
 0x343   : > { %v2226_v35 = vsel %vm299_vm0, %v2168_v58, 0.0 }
 0x344   : > { %v2224_v37 = vsel %vm299_vm0, %v2167_v48, 0.0  ;;  %v2293_v44 = vsel %vm557_vm3, %v2167_v48, 0.0  ;;  %v2295_v48 = vsel %vm557_vm3, %v2168_v58, 0.0 }
 0x345   : > { %v2225_v29 = vadd.f32 %v2224_v37, %v2223_v41  ;;  %v2282_v41 = vadd.f32 %v2281_v50, %v2280_v0 }
 0x347   : > { %v2227_v40 = vadd.f32 %v2226_v35, %v2225_v29  ;;  %v2284_v32 = vadd.f32 %v2283_v53, %v2282_v41  ;;  %v2121_v35 = vsel %vm557_vm3, %v4685_v22, 0.0 }
 0x348   : > { %v2122_v38 = vadd.f32 %v2121_v35, %v2120_v17 }
 0x349   : > { %v2286_v5 = vadd.f32 %v2285_v1, %v2284_v32 }
 0x34a   : > { %v2124_v50 = vadd.f32 %v2123_v13, %v2122_v38 }
 0x34b   : > { %v2288_v42 = vadd.f32 %v2287_v57, %v2286_v5 }
 0x34c   : > { %v2126_v30 = vadd.f32 %v2125_v28, %v2124_v50 }
 0x34d   : > { %v2290_v29 = vadd.f32 %v2289_v2, %v2288_v42 }
 0x34f   : > { %v2292_v55 = vadd.f32 %v2291_v52, %v2290_v29 }
 0x351   : > { %v2294_v56 = vadd.f32 %v2293_v44, %v2292_v55  ;;  %v2935_v44 = vmov 0.0  }
 0x352   : > { %2562 = vst.msk [vmem:[%s4862_s11] sm:$0xff] %vm299_vm0, %v2935_v44  ;;  %v2012_v44 = vsel %vm299_vm0, %v4324_v4, 0.0 }
 0x353   : > { %v2296_v5 = vadd.f32 %v2295_v48, %v2294_v56 }
 0x356   : > { %v2837_v10 = vpop.f32.mrb[12].mxu1 }
 0x357   : > { %v4799_v26 = vadd.f32 %v2837_v10, %v4234_v45  ;;  %v1951_v37 = vpop.f32.mrb[13].mxu1 }
 0x358   : > { %v4802_v54 = vadd.f32 %v4234_v45, %v1951_v37 }
 0x359   : > { %2000 = vst.msk [vmem:[%s4240_s6 + $0xe8] sm:$0xff] %vm1970_vm12, %v4799_v26  ;;  %2401 = vrot.lane.b32.xlu1 %v4799_v26, %s2934_s7  ;;  %v2170_v16 = vmul.f32 %v4799_v26, %v4799_v26  ;;  %v2129_v2 = vsel %vm557_vm3, %v4799_v26, 0.0 }
 0x35a   : > { %1999 = vst.msk [vmem:[%s4240_s6 + $0xe0] sm:$0xff] %vm1970_vm12, %v4802_v54  ;;  %v2169_v34 = vmul.f32 %v4802_v54, %v4802_v54  ;;  %2399 = vrot.lane.b32.xlu0 %v4802_v54, %s2934_s7  ;;  %v2127_v53 = vsel %vm557_vm3, %v4802_v54, 0.0 }
 0x35b   : > { %v2230_v59 = vsel %vm299_vm0, %v2170_v16, 0.0  ;;  %v2128_v32 = vadd.f32 %v2127_v53, %v2126_v30  ;;  %v2299_v10 = vsel %vm557_vm3, %v2170_v16, 0.0 }
 0x35c   : > { %v2228_v0 = vsel %vm299_vm0, %v2169_v34, 0.0  ;;  %v2297_v8 = vsel %vm557_vm3, %v2169_v34, 0.0 }
 0x35d   : > { %v2229_v41 = vadd.f32 %v2228_v0, %v2227_v40  ;;  %v2298_v36 = vadd.f32 %v2297_v8, %v2296_v5  ;;  %v2130_v58 = vadd.f32 %v2129_v2, %v2128_v32  ;;  %v2004_v32 = vsel %vm299_vm0, %v4244_v20, 0.0 }
 0x35f   : > { %v2231_v1 = vadd.f32 %v2230_v59, %v2229_v41  ;;  %v2300_v29 = vadd.f32 %v2299_v10, %v2298_v36  ;;  %v2008_v10 = vsel %vm299_vm0, %v4284_v60, 0.0 }
 0x363   : > { %v2840_v40 = vpop.f32.mrb[14].mxu1 }
 0x364   : > { %v4834_v3 = vadd.f32 %v2840_v40, %v4234_v45  ;;  %v1961_v33 = vpop.f32.mrb[15].mxu1 }
 0x365   : > { %v4837_v57 = vadd.f32 %v4234_v45, %v1961_v33  ;;  %v2006_v33 = vsel %vm299_vm0, %v4288_v15, 0.0 }
 0x366   : > { %2002 = vst.msk [vmem:[%s4240_s6 + $0xf8] sm:$0xff] %vm1970_vm12, %v4834_v3  ;;  %2405 = vrot.lane.b32.xlu1 %v4834_v3, %s2934_s7  ;;  %v2172_v42 = vmul.f32 %v4834_v3, %v4834_v3  ;;  %v2133_v35 = vsel %vm557_vm3, %v4834_v3, 0.0 }
 0x367   : > { %2001 = vst.msk [vmem:[%s4240_s6 + $0xf0] sm:$0xff] %vm1970_vm12, %v4837_v57  ;;  %2403 = vrot.lane.b32.xlu0 %v4837_v57, %s2934_s7  ;;  %v2131_v45 = vsel %vm557_vm3, %v4837_v57, 0.0  ;;  %v2171_v17 = vmul.f32 %v4837_v57, %v4837_v57 }
 0x368   : > { %v2132_v37 = vadd.f32 %v2131_v45, %v2130_v58  ;;  %v2303_v50 = vsel %vm557_vm3, %v2172_v42, 0.0  ;;  %v2234_v41 = vsel %vm299_vm0, %v2172_v42, 0.0  ;;  %v2344_v42 = vpop.permute.xlu0 %2343 }
 0x369   : > { %v2301_v13 = vsel %vm557_vm3, %v2171_v17, 0.0  ;;  %v2232_v38 = vsel %vm299_vm0, %v2171_v17, 0.0 }
 0x36a   : > { %v2134_v34 = vadd.f32 %v2133_v35, %v2132_v37  ;;  %v2302_v52 = vadd.f32 %v2301_v13, %v2300_v29  ;;  %v2233_v16 = vadd.f32 %v2232_v38, %v2231_v1  ;;  %v2003_v1 = vsel %vm299_vm0, %v4248_v63, 0.0  ;;  %v2346_v35 = vpop.permute.xlu1 %2345 }
 0x36b   : > { %v2005_v58 = vadd.f32 %v2004_v32, %v2003_v1  ;;  %v2010_v37 = vsel %vm299_vm0, %v4328_v6, 0.0 }
 0x36c   : > { %v2135_v55 = vrot.slane %v2134_v34, 4  ;;  %v2304_v0 = vadd.f32 %v2303_v50, %v2302_v52  ;;  %v4872_v56 = vadd.f32 %v2234_v41, %v2233_v16  ;;  %v2348_v38 = vpop.permute.xlu0 %2347  ;;  %v2439_v52 = vmul.f32 %v2344_v42, %v4248_v63 }
 0x36d   : > { %v2007_v17 = vadd.f32 %v2006_v33, %v2005_v58  ;;  %v2014_v16 = vsel %vm299_vm0, %v4368_v18, 0.0  ;;  %v2441_v50 = vmul.f32 %v2348_v38, %v4288_v15  ;;  %v2016_v63 = vsel %vm299_vm0, %v4363_v62, 0.0 }
 0x36e   : > { %v2136_v59 = vadd.f32 %v2135_v55, %v2134_v34  ;;  %v2305_v28 = vrot.slane %v2304_v0, 4  ;;  %v2440_v34 = vmul.f32 %v2346_v35, %v4244_v20  ;;  %v2471_v41 = vsel %vm299_vm0, %v2439_v52, 0.0 }
 0x36f   : > { %v2009_v29 = vadd.f32 %v2008_v10, %v2007_v17  ;;  %v2474_v20 = vsel %vm299_vm0, %v2441_v50, 0.0  ;;  %v2022_v17 = vsel %vm299_vm0, %v4449_v25, 0.0  ;;  %v2024_v52 = vsel %vm299_vm0, %v4445_v27, 0.0 }
 0x370   : > { %v2137_v53 = vrot.slane %v2136_v59, 2  ;;  %v2306_v30 = vadd.f32 %v2305_v28, %v2304_v0  ;;  %v2472_v0 = vsel %vm299_vm0, %v2440_v34, 0.0  ;;  %v2350_v28 = vpop.permute.xlu1 %2349 }
 0x371   : > { %v2011_v13 = vadd.f32 %v2010_v37, %v2009_v29 }
 0x372   : > { %v2138_v48 = vadd.f32 %v2137_v53, %v2136_v59  ;;  %v2307_v8 = vrot.slane %v2306_v30, 2  ;;  %v2352_v53 = vpop.permute.xlu0 %2351 }
 0x373   : > { %v2013_v55 = vadd.f32 %v2012_v44, %v2011_v13  ;;  %v2443_v15 = vmul.f32 %v2352_v53, %v4328_v6  ;;  %v2026_v44 = vsel %vm299_vm0, %v4484_v7, 0.0 }
 0x374   : > { %v2139_v5 = vrot.slane %v2138_v48, 1  ;;  %v2308_v40 = vadd.f32 %v2307_v8, %v2306_v30  ;;  %v2473_v30 = vadd.f32 %v2472_v0, %v2471_v41  ;;  %v2442_v8 = vmul.f32 %v2350_v28, %v4284_v60 }
 0x375   : > { %v2015_v59 = vadd.f32 %v2014_v16, %v2013_v55 }
 0x376   : > { %v2140_v36 = vadd.f32 %v2139_v5, %v2138_v48  ;;  %v2309_v2 = vrot.slane %v2308_v40, 1  ;;  %v2018_v48 = vsel %vm299_vm0, %v4407_v31, 0.0  ;;  %v2475_v1 = vadd.f32 %v2474_v20, %v2473_v30  ;;  %v2356_v33 = vpop.permute.xlu0 %2355 }
 0x377   : > { %v2017_v32 = vadd.f32 %v2016_v63, %v2015_v59  ;;  %v2445_v6 = vmul.f32 %v2356_v33, %v4368_v18  ;;  %v2028_v20 = vsel %vm299_vm0, %v4481_v49, 0.0  ;;  %v2030_v30 = vsel %vm299_vm0, %v4512_v12, 0.0 }
 0x378   : > { %2541 = vrot.lane.b32.xlu0 %v2140_v36, %s2934_s7  ;;  %v2310_v45 = vadd.f32 %v2309_v2, %v2308_v40  ;;  %v2354_v40 = vpop.permute.xlu1 %2353  ;;  %v2476_v36 = vsel %vm299_vm0, %v2442_v8, 0.0  ;;  %v2478_v2 = vsel %vm299_vm0, %v2443_v15, 0.0  ;;  %v2032_v33 = vsel %vm299_vm0, %v4509_v11, 0.0 }
 0x379   : > { %v2019_v5 = vadd.f32 %v2018_v48, %v2017_v32  ;;  %v2477_v58 = vadd.f32 %v2476_v36, %v2475_v1  ;;  %v2444_v60 = vmul.f32 %v2354_v40, %v4324_v4  ;;  %v2482_v38 = vsel %vm299_vm0, %v2445_v6, 0.0 }
 0x37a   : > { %2545 = vrot.lane.b32.xlu1 %v2310_v45, %s2934_s7  ;;  %v2020_v45 = vsel %vm299_vm0, %v4403_v19, 0.0  ;;  %v2360_v35 = vpop.permute.xlu0 %2359  ;;  %v2034_v36 = vsel %vm299_vm0, %v4540_v24, 0.0 }
 0x37b   : > { %v2021_v42 = vadd.f32 %v2020_v45, %v2019_v5  ;;  %v2479_v10 = vadd.f32 %v2478_v2, %v2477_v58  ;;  %v2480_v13 = vsel %vm299_vm0, %v2444_v60, 0.0  ;;  %v2447_v18 = vmul.f32 %v2360_v35, %v4407_v31 }
 0x37c   : > { %v2358_v29 = vpop.permute.xlu1 %2357 }
 0x37d   : > { %v2023_v37 = vadd.f32 %v2022_v17, %v2021_v42  ;;  %v2481_v34 = vadd.f32 %v2480_v13, %v2479_v10  ;;  %v2446_v4 = vmul.f32 %v2358_v29, %v4363_v62  ;;  %v2486_v28 = vsel %vm299_vm0, %v2447_v18, 0.0 }
 0x37e   : > { %v2364_v41 = vpop.permute.xlu0 %2363  ;;  %v2038_v29 = vsel %vm299_vm0, %v4568_v47, 0.0 }
 0x37f   : > { %v2025_v16 = vadd.f32 %v2024_v52, %v2023_v37  ;;  %v2483_v50 = vadd.f32 %v2482_v38, %v2481_v34  ;;  %v2484_v59 = vsel %vm299_vm0, %v2446_v4, 0.0  ;;  %v2449_v31 = vmul.f32 %v2364_v41, %v4449_v25 }
 0x380   : > { %v2362_v0 = vpop.permute.xlu1 %2361  ;;  %v2036_v37 = vsel %vm299_vm0, %v4537_v14, 0.0 }
 0x381   : > { %v2027_v55 = vadd.f32 %v2026_v44, %v2025_v16  ;;  %v2485_v53 = vadd.f32 %v2484_v59, %v2483_v50  ;;  %v2448_v62 = vmul.f32 %v2362_v0, %v4403_v19  ;;  %v2490_v5 = vsel %vm299_vm0, %v2449_v31, 0.0 }
 0x382   : > { %v2368_v32 = vpop.permute.xlu0 %2367  ;;  %v2040_v16 = vsel %vm299_vm0, %v4565_v46, 0.0  ;;  %v2042_v50 = vsel %vm299_vm0, %v4596_v23, 0.0  ;;  %v2046_v31 = vsel %vm299_vm0, %v4628_v61, 0.0 }
 0x383   : > { %v2029_v63 = vadd.f32 %v2028_v20, %v2027_v55  ;;  %v2487_v48 = vadd.f32 %v2486_v28, %v2485_v53  ;;  %v2488_v1 = vsel %vm299_vm0, %v2448_v62, 0.0  ;;  %v2451_v25 = vmul.f32 %v2368_v32, %v4484_v7 }
 0x384   : > { %v2366_v15 = vpop.permute.xlu1 %2365  ;;  %v2044_v62 = vsel %vm299_vm0, %v4593_v51, 0.0 }
 0x385   : > { %v2031_v8 = vadd.f32 %v2030_v30, %v2029_v63  ;;  %v2489_v40 = vadd.f32 %v2488_v1, %v2487_v48  ;;  %v2450_v19 = vmul.f32 %v2366_v15, %v4445_v27  ;;  %v2494_v42 = vsel %vm299_vm0, %v2451_v25, 0.0 }
 0x386   : > { %v2372_v60 = vpop.permute.xlu0 %2371 }
 0x387   : > { %v2033_v2 = vadd.f32 %v2032_v33, %v2031_v8  ;;  %v2491_v58 = vadd.f32 %v2490_v5, %v2489_v40  ;;  %v2492_v6 = vsel %vm299_vm0, %v2450_v19, 0.0  ;;  %v2453_v7 = vmul.f32 %v2372_v60, %v4512_v12 }
 0x388   : > { %v2370_v17 = vpop.permute.xlu1 %2369  ;;  %v2048_v33 = vsel %vm299_vm0, %v4625_v39, 0.0 }
 0x389   : > { %v2035_v45 = vadd.f32 %v2034_v36, %v2033_v2  ;;  %v2493_v10 = vadd.f32 %v2492_v6, %v2491_v58  ;;  %v2452_v27 = vmul.f32 %v2370_v17, %v4481_v49  ;;  %v2498_v4 = vsel %vm299_vm0, %v2453_v7, 0.0 }
 0x38a   : > { %v2376_v52 = vpop.permute.xlu0 %2375  ;;  %v2050_v36 = vsel %vm299_vm0, %v4688_v9, 0.0 }
 0x38b   : > { %v2037_v35 = vadd.f32 %v2036_v37, %v2035_v45  ;;  %v2495_v13 = vadd.f32 %v2494_v42, %v2493_v10  ;;  %v2496_v44 = vsel %vm299_vm0, %v2452_v27, 0.0  ;;  %v2455_v12 = vmul.f32 %v2376_v52, %v4540_v24 }
 0x38c   : > { %v2374_v34 = vpop.permute.xlu1 %2373  ;;  %v2052_v42 = vsel %vm299_vm0, %v4685_v22, 0.0  ;;  %v2054_v10 = vsel %vm299_vm0, %v4748_v21, 0.0  ;;  %v2056_v52 = vsel %vm299_vm0, %v4745_v43, 0.0 }
 0x38d   : > { %v2039_v38 = vadd.f32 %v2038_v29, %v2037_v35  ;;  %v2497_v18 = vadd.f32 %v2496_v44, %v2495_v13  ;;  %v2454_v49 = vmul.f32 %v2374_v34, %v4509_v11  ;;  %v2502_v20 = vsel %vm299_vm0, %v2455_v12, 0.0 }
 0x38e   : > { %v2380_v28 = vpop.permute.xlu0 %2379  ;;  %v2058_v44 = vsel %vm299_vm0, %v4802_v54, 0.0 }
 0x38f   : > { %v2041_v55 = vadd.f32 %v2040_v16, %v2039_v38  ;;  %v2499_v0 = vadd.f32 %v2498_v4, %v2497_v18  ;;  %v2500_v53 = vsel %vm299_vm0, %v2454_v49, 0.0  ;;  %v2457_v24 = vmul.f32 %v2380_v28, %v4568_v47 }
 0x390   : > { %v2378_v59 = vpop.permute.xlu1 %2377  ;;  %v2060_v28 = vsel %vm299_vm0, %v4799_v26, 0.0 }
 0x391   : > { %v2043_v41 = vadd.f32 %v2042_v50, %v2041_v55  ;;  %v2501_v30 = vadd.f32 %v2500_v53, %v2499_v0  ;;  %v2456_v11 = vmul.f32 %v2378_v59, %v4537_v14  ;;  %v2506_v5 = vsel %vm299_vm0, %v2457_v24, 0.0 }
 0x392   : > { %v2384_v32 = vpop.permute.xlu0 %2383 }
 0x393   : > { %v2045_v63 = vadd.f32 %v2044_v62, %v2043_v41  ;;  %v2503_v48 = vadd.f32 %v2502_v20, %v2501_v30  ;;  %v2504_v1 = vsel %vm299_vm0, %v2456_v11, 0.0  ;;  %v2459_v47 = vmul.f32 %v2384_v32, %v4596_v23 }
 0x394   : > { %v2382_v15 = vpop.permute.xlu1 %2381 }
 0x395   : > { %v2047_v8 = vadd.f32 %v2046_v31, %v2045_v63  ;;  %v2505_v40 = vadd.f32 %v2504_v1, %v2503_v48  ;;  %v2458_v14 = vmul.f32 %v2382_v15, %v4565_v46  ;;  %v2510_v60 = vsel %vm299_vm0, %v2459_v47, 0.0 }
 0x396   : > { %v2388_v45 = vpop.permute.xlu0 %2387  ;;  %v2064_v63 = vsel %vm299_vm0, %v4834_v3, 0.0 }
 0x397   : > { %v2049_v19 = vadd.f32 %v2048_v33, %v2047_v8  ;;  %v2507_v25 = vadd.f32 %v2506_v5, %v2505_v40  ;;  %v2508_v17 = vsel %vm299_vm0, %v2458_v14, 0.0  ;;  %v2461_v23 = vmul.f32 %v2388_v45, %v4628_v61 }
 0x398   : > { %v2386_v58 = vpop.permute.xlu1 %2385 }
 0x399   : > { %v2051_v2 = vadd.f32 %v2050_v36, %v2049_v19  ;;  %v2509_v6 = vadd.f32 %v2508_v17, %v2507_v25  ;;  %v2460_v46 = vmul.f32 %v2386_v58, %v4593_v51  ;;  %v2514_v38 = vsel %vm299_vm0, %v2461_v23, 0.0 }
 0x39a   : > { %v2236_v36 = vrot.slane %v4872_v56, 4 }
 0x39b   : > { %v2053_v37 = vadd.f32 %v2052_v42, %v2051_v2  ;;  %v2511_v29 = vadd.f32 %v2510_v60, %v2509_v6  ;;  %v2512_v13 = vsel %vm299_vm0, %v2460_v46, 0.0 }
 0x39c   : > { %v2390_v7 = vpop.permute.xlu1 %2389  ;;  %v2392_v35 = vpop.permute.xlu0 %2391  ;;  %v2237_v58 = vadd.f32 %v2236_v36, %v4872_v56 }
 0x39d   : > { %v2055_v27 = vadd.f32 %v2054_v10, %v2053_v37  ;;  %v2513_v34 = vadd.f32 %v2512_v13, %v2511_v29  ;;  %v2462_v51 = vmul.f32 %v2390_v7, %v4625_v39  ;;  %v2463_v61 = vmul.f32 %v2392_v35, %v4688_v9 }
 0x39e   : > { %v2062_v39 = vsel %vm299_vm0, %v4837_v57, 0.0  ;;  %v2238_v42 = vrot.slane %v2237_v58, 2 }
 0x39f   : > { %v2515_v4 = vadd.f32 %v2514_v38, %v2513_v34  ;;  %v2057_v18 = vadd.f32 %v2056_v52, %v2055_v27  ;;  %v2516_v12 = vsel %vm299_vm0, %v2462_v51, 0.0  ;;  %v2518_v55 = vsel %vm299_vm0, %v2463_v61, 0.0  ;;  %v2563_v61 = vld [vmem:[%s4862_s11] sm:$0xff] }
 0x3a0   : > { %v2394_v16 = vpop.permute.xlu1 %2393  ;;  %v2239_v37 = vadd.f32 %v2238_v42, %v2237_v58 }
 0x3a1   : > { %v2059_v49 = vadd.f32 %v2058_v44, %v2057_v18  ;;  %v2517_v0 = vadd.f32 %v2516_v12, %v2515_v4  ;;  %v2464_v41 = vmul.f32 %v2394_v16, %v4685_v22 }
 0x3a3   : > { %v2519_v9 = vadd.f32 %v2518_v55, %v2517_v0  ;;  %v2061_v53 = vadd.f32 %v2060_v28, %v2059_v49  ;;  %v2520_v31 = vsel %vm299_vm0, %v2464_v41, 0.0 }
 0x3a5   : > { %v2063_v62 = vadd.f32 %v2062_v39, %v2061_v53  ;;  %v2521_v24 = vadd.f32 %v2520_v31, %v2519_v9 }
 0x3a7   : > { %v2065_v8 = vadd.f32 %v2064_v63, %v2063_v62 }
 0x3a9   : > { %v2066_v40 = vrot.slane %v2065_v8, 4 }
 0x3b3   : > { %v2398_v20 = vpop.permute.xlu1 %2397 }
 0x3b4   : > { %v2396_v50 = vpop.permute.xlu0 %2395  ;;  %v2466_v22 = vmul.f32 %v2398_v20, %v4745_v43 }
 0x3b5   : > { %v2465_v59 = vmul.f32 %v2396_v50, %v4748_v21 }
 0x3b6   : > { %v2524_v32 = vsel %vm299_vm0, %v2466_v22, 0.0 }
 0x3b7   : > { %v2522_v11 = vsel %vm299_vm0, %v2465_v59, 0.0 }
 0x3b8   : > { %v2523_v48 = vadd.f32 %v2522_v11, %v2521_v24 }
 0x3ba   : > { %v2525_v5 = vadd.f32 %v2524_v32, %v2523_v48 }
 0x3cb   : > { %v2402_v15 = vpop.permute.xlu1 %2401 }
 0x3cc   : > { %v2400_v30 = vpop.permute.xlu0 %2399  ;;  %v2468_v33 = vmul.f32 %v2402_v15, %v4799_v26 }
 0x3cd   : > { %v2467_v21 = vmul.f32 %v2400_v30, %v4802_v54  ;;  %v2067_v54 = vadd.f32 %v2066_v40, %v2065_v8 }
 0x3ce   : > { %v2528_v19 = vsel %vm299_vm0, %v2468_v33, 0.0 }
 0x3cf   : > { %v2526_v1 = vsel %vm299_vm0, %v2467_v21, 0.0  ;;  %v2068_v6 = vrot.slane %v2067_v54, 2 }
 0x3d0   : > { %v2527_v14 = vadd.f32 %v2526_v1, %v2525_v5 }
 0x3d1   : > { %v2069_v23 = vadd.f32 %v2068_v6, %v2067_v54 }
 0x3d2   : > { %v2529_v45 = vadd.f32 %v2528_v19, %v2527_v14 }
 0x3d3   : > { %v2070_v7 = vrot.slane %v2069_v23, 1 }
 0x3d5   : > { %v2071_v56 = vadd.f32 %v2070_v7, %v2069_v23 }
 0x3d8   : > { %v2406_v43 = vpop.permute.xlu1 %2405 }
 0x3d9   : > { %v2404_v47 = vpop.permute.xlu0 %2403  ;;  %v2470_v25 = vmul.f32 %v2406_v43, %v4834_v3  ;;  %v2240_v3 = vrot.slane %v2239_v37, 1 }
 0x3da   : > { %v2469_v2 = vmul.f32 %v2404_v47, %v4837_v57 }
 0x3db   : > { %v2532_v26 = vsel %vm299_vm0, %v2470_v25, 0.0  ;;  %v2241_v38 = vadd.f32 %v2240_v3, %v2239_v37 }
 0x3dc   : > { %v2530_v17 = vsel %vm299_vm0, %v2469_v2, 0.0 }
 0x3dd   : > { %v2531_v60 = vadd.f32 %v2530_v17, %v2529_v45 }
 0x3df   : > { %v2533_v10 = vadd.f32 %v2532_v26, %v2531_v60 }
 0x3e1   : > { %v2534_v46 = vrot.slane %v2533_v10, 4 }
 0x3e3   : > { %v2535_v29 = vadd.f32 %v2534_v46, %v2533_v10 }
 0x3e5   : > { %v2536_v27 = vrot.slane %v2535_v29, 2 }
 0x3e7   : > { %v2537_v57 = vadd.f32 %v2536_v27, %v2535_v29 }
 0x3e9   : > { %v2538_v35 = vrot.slane %v2537_v57, 1 }
 0x3ea   : > { %v2542_v13 = vpop.permute.xlu0 %2541 }
 0x3eb   : > { %v2549_v34 = vsel %vm2548_vm13, %v2071_v56, %v2542_v13  ;;  %v2539_v52 = vadd.f32 %v2538_v35, %v2537_v57 }
 0x3ec   : > { %v2546_v44 = vpop.permute.xlu1 %2545  ;;  %v2551_v51 = vsel %vm2550_vm14, %v2549_v34, %v2241_v38 }
 0x3ed   : > { %v2553_v4 = vsel %vm2552_vm15, %v2551_v51, %v2546_v44 }
 0x3ee   : > { %v2555_v18 = vsel %vm2554_vm1, %v2553_v4, %v2539_v52 }
 0x3ef   : > { %v2557_v16 = vsel %vm2556_vm2, %v2555_v18, 0.0 }
 0x3f0   : > { %v2564_v50 = vadd.f32 %v2563_v61, %v2557_v16 }
 0x3f2   : > { %2565 = vst.msk [vmem:[%s4862_s11] sm:$0xff] %vm299_vm0, %v2564_v50 }
 0x3f3 PF: > { %s15_s17 = sadd.s32 1, %s2924_s17   ;;  %s5161_s15 = smov %s2920_s16 }
 0x3f4   : > { %p12_p5 = scmp.ge.s32.totalorder %s15_s17, 4   ;;  %s5162_s16 = smov %s5164_s18 }
 0x3f6   :  { %14 = sbr.rel (!%p12_p5) target bundleno = 2 (0x2), region = 78 }

// kernel: complex_conv_block_forward.6
= control target key start
LH: loop header
LB: loop body
LE: loop exit
PB: predicated region body
PF: predicated region fallthrough
CT: control target
= control target key end

     0   :  { %s2850_s15 = smov 0   ;;  %s2852_s16 = smov 0   ;;  %s4968_s0 = inlined_call_operand.vmem [shape: f32[2,1,18,18,16], index: 0, kind: input, shape index: {}]   ;;  %s4969_s1 = inlined_call_operand.vmem [shape: f32[144,16], index: 1, kind: input, shape index: {}]   ;;  %s4970_s2 = inlined_call_operand.vmem [shape: f32[1,16], index: 2, kind: input, shape index: {}]   ;;  %s4971_s3 = inlined_call_operand.vmem [shape: f32[2,1,256,16], index: 3, kind: output, shape index: {0}]   ;;  %s4972_s4 = inlined_call_operand.vmem [shape: f32[2,8,8], index: 4, kind: output, shape index: {1}]  }
   0x1   :  { %s2854_s17 = smov 0  }
   0x2 LB: > { %s27_s18 = sadd.s32 1, %s2809_s16  ;;  %p2669_p0 = scmp.ge.s32.totalorder %s2813_s17, 1  ;;  %s2813_s17 = sphi %s2854_s17, %s15_s17   ;;  %s2809_s16 = sphi %s2852_s16, %s5095_s16   ;;  %s2805_s15 = sphi %s2850_s15, %s5094_s15  }
   0x3   : > { %p29_p1 = scmp.ge.s32.totalorder %s27_s18, 2  ;;  %p185_p2 = scmp.lt.s32.totalorder %s2813_s17, 3 }
   0x5   : > { %s5097_s18 = smov (%p29_p1, %s27_s18), 0  ;;  %p186_p3 = pnand %p2669_p0, %p185_p2 }
   0x7   : > { %189 = sbr.rel (%p186_p3) target bundleno = 945 (0x3b1), region = 32 }
   0xe   : > { %p223_p4 = scmp.lt.s32.totalorder %s2805_s15, 1  ;;  %vm299_vm0 = vcmask 130048   ;;  %vm380_vm1 = vcmask 1046528   ;;  %s2815_s23 = smov 16   ;;  %vm590_vm2 = vcmask 1045504   ;;  %vm557_vm3 = vcmask 261248  }
   0xf   : > { %s2817_s10 = smov 48   ;;  %s2818_s11 = smov 32   ;;  %vm767_vm4 = vcmask 392448   ;;  %vm898_vm5 = vcmask 523648   ;;  %vm1033_vm6 = vcmask 654848   ;;  %vm1167_vm7 = vcmask 786048  }
  0x10   : > { %s5099_s15 = smov (!%p223_p4, %s2805_s15), 1  ;;  %s2819_s20 = smov 80   ;;  %vm1298_vm8 = vcmask 917248   ;;  %vm1433_vm9 = vcmask 1048448   ;;  %vm1977_vm10 = vcmask 64512   ;;  %vm2047_vm11 = vcmask 130112  }
  0x11   : > { %s2755_s19 = smul.u32 432, %s5099_s15  ;;  %s2820_s21 = smov 64   ;;  %vm2524_vm12 = vcmask 1040384   ;;  %vm2526_vm13 = vcmask 1041408   ;;  %vm2528_vm14 = vcmask 1042432   ;;  %vm2530_vm15 = vcmask 1043456  }
  0x12   : > { %s2821_s24 = smov 96   ;;  %s2822_s25 = smov 112  }
  0x13   : > { %s2874_s22 = scalar_lea.vmem %s4968_s0, %s2755_s19  ;;  %s2673_s7 = sshll.u32 %s5099_s15, 3 }
  0x14   : > { %v2877_v0 = vld [vmem:[%s2874_s22 + $0x18] sm:$0xff]  ;;  %v2880_v1 = vld [vmem:[%s2874_s22 + $0x20] sm:$0xff]  ;;  %v2888_v5 = vld [vmem:[%s2874_s22 + $0x8] sm:$0xff] }
  0x15   : > { %v2883_v2 = vld [vmem:[%s2874_s22] sm:$0xff]  ;;  %v386_v3 = vrot.slane %v2877_v0, 1  ;;  %v387_v4 = vrot.slane %v2880_v1, 1  ;;  %v2892_v7 = vld [vmem:[%s2874_s22 + $0x28] sm:$0x3]  ;;  %302 = vst.msk [vmem:[#allocation2 + $0x20] sm:$0xff] %vm299_vm0, %v2877_v0 }
  0x16   : > { %v381_v6 = vrot.slane %v2883_v2, 1  ;;  %300 = vst.msk [vmem:[#allocation2] sm:$0xff] %vm299_vm0, %v2883_v2  ;;  %303 = vst.msk [vmem:[#allocation2 + $0x30] sm:$0xff] %vm299_vm0, %v2880_v1  ;;  %v382_v8 = vrot.slane %v2888_v5, 1  ;;  %v389_v9 = vrot.slane %v2892_v7, 1  ;;  %v2906_v11 = vld [vmem:[%s2874_s22 + $0x38] sm:$0xff] }
  0x17   : > { %v2903_v10 = vld [vmem:[%s2874_s22 + $0x10] sm:$0x3]  ;;  %301 = vst.msk [vmem:[#allocation2 + $0x10] sm:$0xff] %vm299_vm0, %v2888_v5  ;;  %v2914_v13 = vsel %vm380_vm1, %v386_v3, %v387_v4  ;;  %v2918_v15 = vld [vmem:[%s2874_s22 + $0x40] sm:$0x3]  ;;  %305 = vst.msk [vmem:[#allocation2 + $0x50] sm:$0xff] %vm299_vm0, %v2906_v11 }
  0x18   : > { %v2909_v12 = vld [vmem:[%s2874_s22 + $0x30] sm:$0xff]  ;;  %v384_v14 = vrot.slane %v2903_v10, 1  ;;  %465 = vrot.lane.b32.xlu1 %v2914_v13, %s2815_s23  ;;  %v383_v17 = vsel %vm380_vm1, %v381_v6, %v382_v8  ;;  %v2931_v18 = vld [vmem:[%s2874_s22 + $0x48] sm:$0xff]  ;;  %v2940_v20 = vsel %vm380_vm1, %v387_v4, %v389_v9  ;;  %v392_v21 = vrot.slane %v2906_v11, 1  ;;  %v2945_v23 = vld [vmem:[%s2874_s22 + $0x60] sm:$0xff] }
  0x19   : > { %v2921_v16 = vld [vmem:[%s2874_s22 + $0x50] sm:$0xff]  ;;  %304 = vst.msk [vmem:[#allocation2 + $0x40] sm:$0xff] %vm299_vm0, %v2909_v12  ;;  %v2934_v19 = vld [vmem:[%s2874_s22 + $0x68] sm:$0xff]  ;;  %461 = vrot.lane.b32.xlu0 %v383_v17, %s2815_s23  ;;  %v394_v22 = vrot.slane %v2918_v15, 1  ;;  %v2948_v24 = vld [vmem:[%s2874_s22 + $0x80] sm:$0xff]  ;;  %v391_v26 = vrot.slane %v2909_v12, 1 }
  0x1a   : > { %307 = vst.msk [vmem:[#allocation2 + $0x70] sm:$0xff] %vm299_vm0, %v2921_v16  ;;  %306 = vst.msk [vmem:[#allocation2 + $0x60] sm:$0xff] %vm299_vm0, %v2931_v18  ;;  %v385_v25 = vsel %vm380_vm1, %v382_v8, %v384_v14  ;;  %v2957_v27 = vld [vmem:[%s2874_s22 + $0x58] sm:$0x3]  ;;  %v2970_v30 = vld [vmem:[%s2874_s22 + $0x90] sm:$0xff]  ;;  %v397_v34 = vrot.slane %v2921_v16, 1 }
  0x1b   : > { %309 = vst.msk [vmem:[#allocation2 + $0x90] sm:$0xff] %vm299_vm0, %v2934_v19  ;;  %v2960_v28 = vld [vmem:[%s2874_s22 + $0x78] sm:$0xff]  ;;  %308 = vst.msk [vmem:[#allocation2 + $0x80] sm:$0xff] %vm299_vm0, %v2945_v23  ;;  %v2977_v31 = vld [vmem:[%s2874_s22 + $0xb0] sm:$0xff]  ;;  %v2988_v33 = vsel %vm380_vm1, %v392_v21, %v394_v22  ;;  %v399_v35 = vrot.slane %v2957_v27, 1  ;;  %v3003_v38 = vsel %vm380_vm1, %v391_v26, %v392_v21  ;;  %v396_v39 = vrot.slane %v2931_v18, 1 }
  0x1c   : > { %311 = vst.msk [vmem:[#allocation2 + $0xb0] sm:$0xff] %vm299_vm0, %v2948_v24  ;;  %v2967_v29 = vld [vmem:[%s2874_s22 + $0x98] sm:$0xff]  ;;  %310 = vst.msk [vmem:[#allocation2 + $0xa0] sm:$0xff] %vm299_vm0, %v2960_v28  ;;  %467 = vrot.lane.b32.xlu1 %v2940_v20, %s2815_s23  ;;  %v2980_v32 = vld [vmem:[%s2874_s22 + $0xa8] sm:$0xff]  ;;  %v402_v48 = vrot.slane %v2934_v19, 1  ;;  %v401_v53 = vrot.slane %v2945_v23, 1 }
  0x1d   : > { %312 = vst.msk [vmem:[#allocation2 + $0xc0] sm:$0xff] %vm299_vm0, %v2970_v30  ;;  %313 = vst.msk [vmem:[#allocation2 + $0xd0] sm:$0xff] %vm299_vm0, %v2967_v29  ;;  %463 = vrot.lane.b32.xlu0 %v385_v25, %s2815_s23  ;;  %v2993_v36 = vld [vmem:[%s2874_s22 + $0x70] sm:$0x3]  ;;  %v2996_v37 = vld [vmem:[%s2874_s22 + $0xc8] sm:$0xff]  ;;  %v3044_v47 = vsel %vm380_vm1, %v397_v34, %v399_v35  ;;  %v3059_v52 = vsel %vm380_vm1, %v396_v39, %v397_v34  ;;  %v407_v61 = vrot.slane %v2948_v24, 1 }
  0x1e   : > { %5032 = vst [vmem:[#allocation3_spill] sm:$0xff] %v2996_v37  ;;  %314 = vst.msk [vmem:[#allocation2 + $0xe0] sm:$0xff] %vm299_vm0, %v2980_v32  ;;  %v3007_v40 = vld [vmem:[%s2874_s22 + $0xc0] sm:$0xff]  ;;  %v3013_v42 = vld [vmem:[%s2874_s22 + $0xd8] sm:$0xff]  ;;  %v404_v49 = vrot.slane %v2993_v36, 1  ;;  %v3102_v63 = vsel %vm380_vm1, %v401_v53, %v402_v48  ;;  %v406_v3 = vrot.slane %v2960_v28, 1 }
  0x1f   : > { %315 = vst.msk [vmem:[#allocation2 + $0xf0] sm:$0xff] %vm299_vm0, %v2977_v31  ;;  %5033 = vst [vmem:[#allocation4_spill] sm:$0xff] %v3007_v40  ;;  %v3010_v41 = vld [vmem:[%s2874_s22 + $0xe0] sm:$0xff]  ;;  %v3018_v43 = vld [vmem:[%s2874_s22 + $0xf8] sm:$0xff]  ;;  %v412_v4 = vrot.slane %v2967_v29, 1  ;;  %v411_v14 = vrot.slane %v2970_v30, 1 }
  0x20   : > { %5034 = vst [vmem:[#allocation5_spill] sm:$0xff] %v3013_v42  ;;  %317 = vst.msk [vmem:[#allocation2 + $0x110] sm:$0xff] %vm299_vm0, %v2996_v37  ;;  %v3021_v44 = vld [vmem:[%s2874_s22 + $0xf0] sm:$0xff]  ;;  %471 = vrot.lane.b32.xlu1 %v2988_v33, %s2815_s23  ;;  %v3035_v46 = vld [vmem:[%s2874_s22 + $0x108] sm:$0xff]  ;;  %v3093_v60 = vsel %vm380_vm1, %v402_v48, %v404_v49  ;;  %v417_v17 = vrot.slane %v2977_v31, 1  ;;  %v3120_v21 = vsel %vm380_vm1, %v406_v3, %v407_v61  ;;  %v601_v25 = vrot.slane %v2909_v12, 2 }
  0x21   : > { %316 = vst.msk [vmem:[#allocation2 + $0x100] sm:$0xff] %vm299_vm0, %v3007_v40  ;;  %318 = vst.msk [vmem:[#allocation2 + $0x120] sm:$0xff] %vm299_vm0, %v3013_v42  ;;  %v3032_v45 = vld [vmem:[%s2874_s22 + $0x110] sm:$0xff]  ;;  %469 = vrot.lane.b32.xlu0 %v3003_v38, %s2815_s23  ;;  %v3049_v50 = vld [vmem:[%s2874_s22 + $0x128] sm:$0xff]  ;;  %v602_v26 = vrot.slane %v2906_v11, 2  ;;  %v416_v35 = vrot.slane %v2980_v32, 1  ;;  %v3142_v3 = vsel %vm380_vm1, %v411_v14, %v412_v4 }
  0x22   : > { %319 = vst.msk [vmem:[#allocation2 + $0x130] sm:$0xff] %vm299_vm0, %v3010_v41  ;;  %320 = vst.msk [vmem:[#allocation2 + $0x140] sm:$0xff] %vm299_vm0, %v3021_v44  ;;  %v3052_v51 = vld [vmem:[%s2874_s22 + $0x120] sm:$0xff]  ;;  %v3063_v54 = vld [vmem:[%s2874_s22 + $0x88] sm:$0x3]  ;;  %v604_v39 = vrot.slane %v2918_v15, 2 }
  0x23   : > { %321 = vst.msk [vmem:[#allocation2 + $0x150] sm:$0xff] %vm299_vm0, %v3018_v43  ;;  %322 = vst.msk [vmem:[#allocation2 + $0x160] sm:$0xff] %vm299_vm0, %v3035_v46  ;;  %v3066_v55 = vld [vmem:[%s2874_s22 + $0x140] sm:$0xff]  ;;  %v3073_v56 = vld [vmem:[%s2874_s22 + $0x138] sm:$0xff]  ;;  %v409_v62 = vrot.slane %v3063_v54, 1  ;;  %v606_v48 = vrot.slane %v2931_v18, 2  ;;  %v3134_v49 = vsel %vm590_vm2, %v601_v25, %v602_v26 }
  0x24   : > { %323 = vst.msk [vmem:[#allocation2 + $0x170] sm:$0xff] %vm299_vm0, %v3032_v45  ;;  %324 = vst.msk [vmem:[#allocation2 + $0x180] sm:$0xff] %vm299_vm0, %v3052_v51  ;;  %475 = vrot.lane.b32.xlu1 %v3044_v47, %s2815_s23  ;;  %v3080_v57 = vld [vmem:[%s2874_s22 + $0xa0] sm:$0x3]  ;;  %v3083_v58 = vld [vmem:[%s2874_s22 + $0x158] sm:$0xff]  ;;  %v607_v53 = vrot.slane %v2921_v16, 2  ;;  %v3147_v15 = vsel %vm590_vm2, %v602_v26, %v604_v39 }
  0x25   : > { %325 = vst.msk [vmem:[#allocation2 + $0x190] sm:$0xff] %vm299_vm0, %v3049_v50  ;;  %327 = vst.msk [vmem:[#allocation2 + $0x1b0] sm:$0xff] %vm299_vm0, %v3066_v55  ;;  %v3086_v59 = vld [vmem:[%s2874_s22 + $0x150] sm:$0xff]  ;;  %473 = vrot.lane.b32.xlu0 %v3059_v52, %s2815_s23  ;;  %v414_v6 = vrot.slane %v3080_v57, 1  ;;  %v3108_v8 = vld [vmem:[%s2874_s22 + $0xb8] sm:$0x3]  ;;  %v3115_v9 = vsel %vm380_vm1, %v407_v61, %v409_v62 }
  0x26   : > { %326 = vst.msk [vmem:[#allocation2 + $0x1a0] sm:$0xff] %vm299_vm0, %v3073_v56  ;;  %328 = vst.msk [vmem:[#allocation2 + $0x1c0] sm:$0xff] %vm299_vm0, %v3086_v59  ;;  %v419_v22 = vrot.slane %v3108_v8, 1  ;;  %v609_v61 = vrot.slane %v2957_v27, 2  ;;  %v611_v62 = vrot.slane %v2945_v23, 2  ;;  %v614_v25 = vrot.slane %v2993_v36, 2 }
  0x27   : > { %329 = vst.msk [vmem:[#allocation2 + $0x1d0] sm:$0xff] %vm299_vm0, %v3083_v58  ;;  %5035 = vst [vmem:[#allocation6_spill] sm:$0xff] %v3108_v8  ;;  %v3126_v34 = vsel %vm380_vm1, %v412_v4, %v414_v6  ;;  %v612_v6 = vrot.slane %v2934_v19, 2  ;;  %v3157_v27 = vsel %vm590_vm2, %v606_v48, %v607_v53  ;;  %v631_v14 = vrot.slane %v3007_v40, 2 }
  0x28   : > { %479 = vrot.lane.b32.xlu1 %v3093_v60, %s2815_s23  ;;  %5036 = vst [vmem:[#allocation7_spill] sm:$0xff] %v3115_v9  ;;  %5037 = vst [vmem:[#allocation8_spill] sm:$0xff] %v3120_v21  ;;  %v3160_v4 = vsel %vm590_vm2, %v607_v53, %v609_v61  ;;  %v4975_v26 = vrot.slane %v2996_v37, 2  ;;  %v3188_v53 = vsel %vm380_vm1, %v417_v17, %v419_v22  ;;  %v422_v61 = vrot.slane %v2996_v37, 1 }
  0x29   : > { %477 = vrot.lane.b32.xlu0 %v3102_v63, %s2815_s23  ;;  %5038 = vst [vmem:[#allocation9_spill] sm:$0xff] %v3126_v34  ;;  %5039 = vst [vmem:[#allocation10_spill] sm:$0xff] %v3142_v3  ;;  %v3169_v36 = vsel %vm590_vm2, %v611_v62, %v612_v6  ;;  %v3172_v39 = vsel %vm590_vm2, %v612_v6, %v614_v25  ;;  %v3195_v6 = vsel %vm380_vm1, %v416_v35, %v417_v17 }
  0x2a   : > { %1503 = vst.msk [vmem:[#allocation2 + $0x8] sm:$0xff] %vm299_vm0, %v3134_v49  ;;  %1504 = vst.msk [vmem:[#allocation2 + $0x18] sm:$0xff] %vm299_vm0, %v3147_v15  ;;  %v3183_v48 = vsel %vm590_vm2, %v631_v14, %v4975_v26  ;;  %v421_v25 = vrot.slane %v3007_v40, 1  ;;  %v3199_v14 = vld [vmem:[%s2874_s22 + $0xe8] sm:$0x3]  ;;  %v427_v26 = vrot.slane %v3010_v41, 1 }
  0x2b   : > { %1505 = vst.msk [vmem:[#allocation2 + $0x28] sm:$0xff] %vm299_vm0, %v3157_v27  ;;  %1506 = vst.msk [vmem:[#allocation2 + $0x38] sm:$0xff] %vm299_vm0, %v3160_v4  ;;  %v426_v35 = vrot.slane %v3013_v42, 1  ;;  %v3215_v40 = vld [vmem:[%s2874_s22 + $0x100] sm:$0x3] }
  0x2c   : > { %483 = vrot.lane.b32.xlu1 %v3115_v9, %s2815_s23  ;;  %v3152_v9 = vld [vmem:[%s2874_s22 + $0xd0] sm:$0x3]  ;;  %5040 = vst [vmem:[#allocation11_spill] sm:$0xff] %v3169_v36  ;;  %5041 = vst [vmem:[#allocation12_spill] sm:$0xff] %v3172_v39  ;;  %v3211_v17 = vsel %vm380_vm1, %v421_v25, %v422_v61  ;;  %v432_v25 = vrot.slane %v3018_v43, 1  ;;  %v434_v8 = vrot.slane %v3215_v40, 1 }
  0x2d   : > { %481 = vrot.lane.b32.xlu0 %v3120_v21, %s2815_s23  ;;  %1507 = vst.msk [vmem:[#allocation2 + $0x48] sm:$0xff] %vm299_vm0, %v3169_v36  ;;  %1508 = vst.msk [vmem:[#allocation2 + $0x58] sm:$0xff] %vm299_vm0, %v3172_v39  ;;  %v424_v62 = vrot.slane %v3152_v9, 1  ;;  %v5053_v36 = vmov 0.0|0.0  }
  0x2e   : > { %5042 = vst [vmem:[#allocation13_spill] sm:$0xff] %v3183_v48  ;;  %5043 = vst [vmem:[#allocation14_spill] sm:$0xff] %v3188_v53 }
  0x2f   : > { %1515 = vst.msk [vmem:[#allocation2 + $0xc8] sm:$0xff] %vm299_vm0, %v3183_v48  ;;  %5044 = vst [vmem:[#allocation15_spill] sm:$0xff] %v3195_v6  ;;  %v3206_v22 = vsel %vm380_vm1, %v422_v61, %v424_v62  ;;  %v1600_v62 = vld [vmem:[%s4969_s1 + $0x8] sm:$0xff]  ;;  %v431_v48 = vrot.slane %v3021_v44, 1 }
  0x30   : > { %487 = vrot.lane.b32.xlu1 %v3126_v34, %s2815_s23  ;;  %5045 = vst [vmem:[#allocation16_spill] sm:$0xff] %v3206_v22  ;;  %v429_v34 = vrot.slane %v3199_v14, 1  ;;  %5046 = vst [vmem:[#allocation17_spill] sm:$0xff] %v3211_v17 }
  0x31   : > { %485 = vrot.lane.b32.xlu0 %v3142_v3, %s2815_s23  ;;  %v5002_v3 = vmov 0.0|0.0   ;;  %v3258_v39 = vsel %vm380_vm1, %v431_v48, %v432_v25  ;;  %v636_v48 = vrot.slane %v3013_v42, 2 }
  0x32   : > { %2710 = vmatprep.subr.bf16.mxu0 %v5002_v3  ;;  %v3229_v61 = vsel %vm380_vm1, %v427_v26, %v429_v34  ;;  %v1601_v34 = vld [vmem:[%s4969_s1 + $0x10] sm:$0xff]  ;;  %2737 = vmatprep.subr.bf16.mxu1 %v5002_v3  ;;  %5051 = vst [vmem:[#allocation22_spill] sm:$0xff] %v3258_v39 }
  0x33   : > { %5047 = vst [vmem:[#allocation18_spill] sm:$0xff] %v3229_v61 }
  0x34   : > { %491 = vrot.lane.b32.xlu1 %v3188_v53, %s2815_s23  ;;  %v1599_v53 = vld [vmem:[%s4969_s1] sm:$0xff] }
  0x35   : > { %489 = vrot.lane.b32.xlu0 %v3195_v6, %s2815_s23  ;;  %v2711_v6 = vpack.c.bf16 %v1600_v62, %v1599_v53  ;;  %v3235_v53 = vsel %vm380_vm1, %v426_v35, %v427_v26  ;;  %v3238_v62 = vld [vmem:[%s2874_s22 + $0x118] sm:$0x3]  ;;  %v437_v26 = vrot.slane %v3032_v45, 1  ;;  %v3255_v35 = vsel %vm380_vm1, %v432_v25, %v434_v8  ;;  %v1604_v8 = vld [vmem:[%s4969_s1 + $0x28] sm:$0xff] }
  0x36   : > { %5048 = vst [vmem:[#allocation19_spill] sm:$0xff] %v3235_v53  ;;  %5049 = vst [vmem:[#allocation20_spill] sm:$0xff] %v3238_v62  ;;  %v439_v21 = vrot.slane %v3238_v62, 1  ;;  %v5009_v25 = vrot.slane %v3010_v41, 2 }
  0x37   : > { %2712 = vmatpush1.bf16.msra.mxu0 %v2711_v6  ;;  %2746 = vmatpush1.bf16.msra.mxu1 %v2711_v6  ;;  %5050 = vst [vmem:[#allocation21_spill] sm:$0xff] %v3255_v35  ;;  %v436_v6 = vrot.slane %v3035_v46, 1 }
  0x38   : > { %495 = vrot.lane.b32.xlu1 %v3206_v22, %s2815_s23  ;;  %2713 = vmatprep.subr.bf16.mxu0 %v5002_v3  ;;  %v1602_v22 = vld [vmem:[%s4969_s1 + $0x18] sm:$0xff] }
  0x39   : > { %493 = vrot.lane.b32.xlu0 %v3211_v17, %s2815_s23  ;;  %v2714_v17 = vpack.c.bf16 %v1602_v22, %v1601_v34  ;;  %2738 = vmatprep.subr.bf16.mxu1 %v5002_v3  ;;  %v3263_v22 = vld [vmem:[%s2874_s22 + $0x130] sm:$0x3]  ;;  %v1603_v34 = vld [vmem:[%s4969_s1 + $0x20] sm:$0xff] }
  0x3a   : > { %5052 = vst [vmem:[#allocation23_spill] sm:$0xff] %v3263_v22  ;;  %v2717_v62 = vpack.c.bf16 %v1604_v8, %v1603_v34  ;;  %v442_v34 = vrot.slane %v3049_v50, 1  ;;  %v444_v8 = vrot.slane %v3263_v22, 1 }
  0x3b   : > { %2715 = vmatpush1.bf16.msra.mxu0 %v2714_v17  ;;  %2747 = vmatpush1.bf16.msra.mxu1 %v2714_v17  ;;  %v3292_v17 = vsel %vm380_vm1, %v437_v26, %v439_v21  ;;  %v1605_v21 = vld [vmem:[%s4969_s1 + $0x30] sm:$0xff] }
  0x3c   : > { %499 = vrot.lane.b32.xlu1 %v3229_v61, %s2815_s23  ;;  %2716 = vmatprep.subr.bf16.mxu0 %v5002_v3  ;;  %v616_v61 = vrot.slane %v2960_v28, 2  ;;  %v3281_v3 = vsel %vm590_vm2, %v636_v48, %v5009_v25  ;;  %5054 = vst [vmem:[#allocation24_spill] sm:$0xff] %v3292_v17  ;;  %v441_v48 = vrot.slane %v3052_v51, 1  ;;  %v1606_v25 = vld [vmem:[%s4969_s1 + $0x38] sm:$0xff] }
  0x3d   : > { %497 = vrot.lane.b32.xlu0 %v3235_v53, %s2815_s23  ;;  %v5008_v53 = vrot.slane %v2948_v24, 2  ;;  %2739 = vmatprep.subr.bf16.mxu1 %v5053_v36  ;;  %1517 = vst.msk [vmem:[#allocation2 + $0xe8] sm:$0xff] %vm299_vm0, %v3281_v3  ;;  %v2720_v22 = vpack.c.bf16 %v1606_v25, %v1605_v21  ;;  %v3337_v21 = vld [vmem:[%s2874_s22 + $0x160] sm:$0x3] }
  0x3e   : > { %v3333_v25 = vsel %vm380_vm1, %v441_v48, %v442_v34  ;;  %v452_v48 = vrot.slane %v3083_v58, 1 }
  0x3f   : > { %v3286_v42 = vsel %vm590_vm2, %v616_v61, %v5008_v53  ;;  %2718 = vmatpush1.bf16.msra.mxu0 %v2717_v62  ;;  %v3301_v61 = vsel %vm380_vm1, %v436_v6, %v437_v26  ;;  %v3305_v53 = vld [vmem:[%s2874_s22 + $0x148] sm:$0x3]  ;;  %2748 = vmatpush1.bf16.msra.mxu1 %v2717_v62  ;;  %v5056_v26 = vrot.slane %v2996_v37, 2 }
  0x40   : > { %503 = vrot.lane.b32.xlu1 %v3255_v35, %s2815_s23  ;;  %1509 = vst.msk [vmem:[#allocation2 + $0x68] sm:$0xff] %vm299_vm0, %v3286_v42  ;;  %5055 = vst [vmem:[#allocation25_spill] sm:$0xff] %v3305_v53  ;;  %2719 = vmatprep.subr.bf16.mxu0 %v5053_v36  ;;  %v634_v35 = vrot.slane %v3152_v9, 2  ;;  %v447_v9 = vrot.slane %v3066_v55, 1  ;;  %v449_v62 = vrot.slane %v3305_v53, 1 }
  0x41   : > { %501 = vrot.lane.b32.xlu0 %v3258_v39, %s2815_s23  ;;  %2740 = vmatprep.subr.bf16.mxu1 %v5053_v36  ;;  %v3326_v39 = vsel %vm380_vm1, %v442_v34, %v444_v8  ;;  %v1607_v8 = vld [vmem:[%s4969_s1 + $0x40] sm:$0xff] }
  0x42   : > { %v3320_v6 = vsel %vm590_vm2, %v5056_v26, %v634_v35  ;;  %5057 = vst [vmem:[#allocation26_spill] sm:$0xff] %v3326_v39  ;;  %v446_v35 = vrot.slane %v3073_v56, 1  ;;  %v1608_v26 = vld [vmem:[%s4969_s1 + $0x48] sm:$0xff]  ;;  %v3352_v34 = vsel %vm380_vm1, %v447_v9, %v449_v62  ;;  %v1610_v62 = vld [vmem:[%s4969_s1 + $0x58] sm:$0xff] }
  0x43   : > { %2721 = vmatpush1.bf16.msra.mxu0 %v2720_v22  ;;  %1516 = vst.msk [vmem:[#allocation2 + $0xd8] sm:$0xff] %vm299_vm0, %v3320_v6  ;;  %v2723_v37 = vpack.c.bf16 %v1608_v26, %v1607_v8  ;;  %2749 = vmatpush1.bf16.msra.mxu1 %v2720_v22  ;;  %v451_v22 = vrot.slane %v3086_v59, 1  ;;  %v1609_v8 = vld [vmem:[%s4969_s1 + $0x50] sm:$0xff] }
  0x44   : > { %507 = vrot.lane.b32.xlu1 %v3292_v17, %s2815_s23  ;;  %2722 = vmatprep.subr.bf16.mxu0 %v5053_v36  ;;  %v454_v17 = vrot.slane %v3337_v21, 1  ;;  %v3357_v53 = vsel %vm380_vm1, %v446_v35, %v447_v9  ;;  %v2726_v26 = vpack.c.bf16 %v1610_v62, %v1609_v8  ;;  %v592_v8 = vrot.slane %v2888_v5, 2  ;;  %v1612_v62 = vld [vmem:[%s4969_s1 + $0x68] sm:$0xff] }
  0x45   : > { %505 = vrot.lane.b32.xlu0 %v3301_v61, %s2815_s23  ;;  %2741 = vmatprep.subr.bf16.mxu1 %v5053_v36  ;;  %v3376_v35 = vsel %vm380_vm1, %v451_v22, %v452_v48  ;;  %v597_v5 = vrot.slane %v2880_v1, 2  ;;  %v1613_v22 = vld [vmem:[%s4969_s1 + $0x70] sm:$0xff] }
  0x46   : > { %v3373_v9 = vsel %vm380_vm1, %v452_v48, %v454_v17  ;;  %5059 = vst [vmem:[#allocation28_spill] sm:$0xff] %v3376_v35 }
  0x47   : > { %2724 = vmatpush1.bf16.msra.mxu0 %v2723_v37  ;;  %2750 = vmatpush1.bf16.msra.mxu1 %v2723_v37  ;;  %5058 = vst [vmem:[#allocation27_spill] sm:$0xff] %v3373_v9  ;;  %v1611_v37 = vld [vmem:[%s4969_s1 + $0x60] sm:$0xff] }
  0x48   : > { %511 = vrot.lane.b32.xlu1 %v3326_v39, %s2815_s23  ;;  %2725 = vmatprep.subr.bf16.mxu0 %v5053_v36  ;;  %v591_v39 = vrot.slane %v2883_v2, 2  ;;  %v2729_v17 = vpack.c.bf16 %v1612_v62, %v1611_v37  ;;  %v596_v2 = vrot.slane %v2877_v0, 2  ;;  %v594_v62 = vrot.slane %v2903_v10, 2 }
  0x49   : > { %509 = vrot.lane.b32.xlu0 %v3333_v25, %s2815_s23  ;;  %2742 = vmatprep.subr.bf16.mxu1 %v5053_v36  ;;  %v5060_v10 = vrot.slane %v3010_v41, 2 }
  0x4a   : > { %v593_v48 = vsel %vm590_vm2, %v591_v39, %v592_v8  ;;  %v598_v39 = vsel %vm590_vm2, %v596_v2, %v597_v5 }
  0x4b   : > { %2727 = vmatpush1.bf16.msra.mxu0 %v2726_v26  ;;  %2751 = vmatpush1.bf16.msra.mxu1 %v2726_v26  ;;  %v1614_v26 = vld [vmem:[%s4969_s1 + $0x78] sm:$0xff] }
  0x4c   : > { %515 = vrot.lane.b32.xlu1 %v3352_v34, %s2815_s23  ;;  %2728 = vmatprep.subr.bf16.mxu0 %v5053_v36  ;;  %v2732_v37 = vpack.c.bf16 %v1614_v26, %v1613_v22  ;;  %v639_v22 = vrot.slane %v3199_v14, 2  ;;  %v619_v26 = vrot.slane %v3063_v54, 2  ;;  %v1536_v54 = vld [vmem:[#allocation2 + $0x8] sm:$0xff]  ;;  %v595_v14 = vsel %vm590_vm2, %v592_v8, %v594_v62 }
  0x4d   : > { %513 = vrot.lane.b32.xlu0 %v3357_v53, %s2815_s23  ;;  %2743 = vmatprep.subr.bf16.mxu1 %v5053_v36  ;;  %v622_v8 = vrot.slane %v2967_v29, 2 }
  0x4e   : > { %v3421_v2 = vsel %vm590_vm2, %v5060_v10, %v639_v22  ;;  %2675 = vmatprep.mubr.msk.f32.mxu0 %vm299_vm0, %v1536_v54  ;;  %v626_v22 = vrot.slane %v2980_v32, 2 }
  0x4f   : > { %2730 = vmatpush1.bf16.msra.mxu0 %v2729_v17  ;;  %2752 = vmatpush1.bf16.msra.mxu1 %v2729_v17  ;;  %v1615_v17 = vld [vmem:[%s4969_s1 + $0x80] sm:$0xff]  ;;  %1518 = vst.msk [vmem:[#allocation2 + $0xf8] sm:$0xff] %vm299_vm0, %v3421_v2 }
  0x50   : > { %519 = vrot.lane.b32.xlu1 %v3373_v9, %s2815_s23  ;;  %2731 = vmatprep.subr.bf16.mxu0 %v5053_v36  ;;  %v5061_v9 = vrot.slane %v2948_v24, 2 }
  0x51   : > { %517 = vrot.lane.b32.xlu0 %v3376_v35, %s2815_s23  ;;  %2744 = vmatprep.subr.bf16.mxu1 %v5053_v36 }
  0x52   : > { %v3426_v35 = vsel %vm590_vm2, %v5061_v9, %v619_v26  ;;  %v621_v9 = vrot.slane %v2970_v30, 2 }
  0x53   : > { %2733 = vmatpush1.bf16.msra.mxu0 %v2732_v37  ;;  %2753 = vmatpush1.bf16.msra.mxu1 %v2732_v37  ;;  %1510 = vst.msk [vmem:[#allocation2 + $0x78] sm:$0xff] %vm299_vm0, %v3426_v35 }
  0x54   : > { %802 = vrot.lane.b32.xlu1 %v2877_v0, %s2817_s10  ;;  %2734 = vmatprep.subr.bf16.mxu0 %v5053_v36  ;;  %v1616_v0 = vld [vmem:[%s4969_s1 + $0x88] sm:$0xff] }
  0x55   : > { %671 = vrot.lane.b32.xlu0 %v593_v48, %s2818_s11  ;;  %v2735_v48 = vpack.c.bf16 %v1616_v0, %v1615_v17  ;;  %2745 = vmatprep.subr.bf16.mxu1 %v5053_v36  ;;  %v646_v17 = vrot.slane %v3035_v46, 2  ;;  %v647_v0 = vrot.slane %v3032_v45, 2 }
  0x57   : > { %2736 = vmatpush1.bf16.msra.mxu0 %v2735_v48  ;;  %2754 = vmatpush1.bf16.msra.mxu1 %v2735_v48  ;;  %v5062_v48 = vld [vmem:[#allocation11_spill] sm:$0xff]  ;;  %v3548_v10 = vsel %vm590_vm2, %v646_v17, %v647_v0 }
  0x58   : > { %1071 = vrot.lane.b32.xlu1 %v598_v39, %s2819_s20  ;;  %1521 = vst.msk [vmem:[#allocation2 + $0x128] sm:$0xff] %vm299_vm0, %v3548_v10 }
  0x59   : > { %937 = vrot.lane.b32.xlu0 %v2914_v13, %s2820_s21  ;;  %v599_v13 = vrot.slane %v2892_v7, 2  ;;  %v642_v7 = vrot.slane %v3018_v43, 2 }
  0x5b   : > { %v600_v36 = vsel %vm590_vm2, %v597_v5, %v599_v13  ;;  %v3466_v5 = vsel %vm590_vm2, %v621_v9, %v622_v8 }
  0x5c   : > { %1202 = vrot.lane.b32.xlu1 %v2909_v12, %s2821_s24  ;;  %1511 = vst.msk [vmem:[#allocation2 + $0x88] sm:$0xff] %vm299_vm0, %v3466_v5 }
  0x5d   : > { %673 = vrot.lane.b32.xlu0 %v595_v14, %s2818_s11 }
  0x60   : > { %1337 = vrot.lane.b32.xlu1 %v3003_v38, %s2822_s25 }
  0x61   : > { %804 = vrot.lane.b32.xlu0 %v2880_v1, %s2817_s10  ;;  %v641_v1 = vrot.slane %v3021_v44, 2 }
  0x64   : > { %1073 = vrot.lane.b32.xlu1 %v600_v36, %s2819_s20 }
  0x65   : > { %939 = vrot.lane.b32.xlu0 %v2940_v20, %s2820_s21  ;;  %v3463_v20 = vsel %vm590_vm2, %v641_v1, %v642_v7 }
  0x66   : > { %1519 = vst.msk [vmem:[#allocation2 + $0x108] sm:$0xff] %vm299_vm0, %v3463_v20 }
  0x68   : > { %1204 = vrot.lane.b32.xlu1 %v2906_v11, %s2821_s24 }
  0x69   : > { %675 = vrot.lane.b32.xlu0 %v598_v39, %s2818_s11 }
  0x6c   : > { %1339 = vrot.lane.b32.xlu1 %v2988_v33, %s2822_s25 }
  0x6d   : > { %806 = vrot.lane.b32.xlu0 %v2909_v12, %s2817_s10  ;;  %v624_v12 = vrot.slane %v3080_v57, 2 }
  0x70   : > { %1075 = vrot.lane.b32.xlu1 %v3134_v49, %s2819_s20 }
  0x71   : > { %941 = vrot.lane.b32.xlu0 %v3003_v38, %s2820_s21  ;;  %v3501_v38 = vsel %vm590_vm2, %v622_v8, %v624_v12 }
  0x72   : > { %1512 = vst.msk [vmem:[#allocation2 + $0x98] sm:$0xff] %vm299_vm0, %v3501_v38 }
  0x74   : > { %1206 = vrot.lane.b32.xlu1 %v2931_v18, %s2821_s24 }
  0x75   : > { %677 = vrot.lane.b32.xlu0 %v600_v36, %s2818_s11  ;;  %v5063_v36 = vld [vmem:[#allocation8_spill] sm:$0xff] }
  0x78   : > { %1341 = vrot.lane.b32.xlu1 %v3059_v52, %s2822_s25 }
  0x79   : > { %808 = vrot.lane.b32.xlu0 %v2906_v11, %s2817_s10  ;;  %v644_v11 = vrot.slane %v3215_v40, 2 }
  0x7c   : > { %1077 = vrot.lane.b32.xlu1 %v3147_v15, %s2819_s20 }
  0x7d   : > { %943 = vrot.lane.b32.xlu0 %v2988_v33, %s2820_s21  ;;  %v3498_v33 = vsel %vm590_vm2, %v642_v7, %v644_v11 }
  0x7e   : > { %1520 = vst.msk [vmem:[#allocation2 + $0x118] sm:$0xff] %vm299_vm0, %v3498_v33 }
  0x80   : > { %1208 = vrot.lane.b32.xlu1 %v2921_v16, %s2821_s24 }
  0x81   : > { %679 = vrot.lane.b32.xlu0 %v3134_v49, %s2818_s11 }
  0x84   : > { %1343 = vrot.lane.b32.xlu1 %v3044_v47, %s2822_s25 }
  0x85   : > { %810 = vrot.lane.b32.xlu0 %v2931_v18, %s2817_s10 }
  0x88   : > { %1079 = vrot.lane.b32.xlu1 %v3157_v27, %s2819_s20 }
  0x89   : > { %945 = vrot.lane.b32.xlu0 %v3059_v52, %s2820_s21 }
  0x8a   : > { %v466_v18 = vpop.permute.xlu1 %465 }
  0x8b   : > { %560 = vst.msk [vmem:[#allocation2 + $0x20] sm:$0xff] %vm557_vm3, %v466_v18  ;;  %v462_v40 = vpop.permute.xlu0 %461  ;;  %v5066_v18 = vld [vmem:[#allocation20_spill] sm:$0xff] }
  0x8c   : > { %558 = vst.msk [vmem:[#allocation2] sm:$0xff] %vm557_vm3, %v462_v40  ;;  %1210 = vrot.lane.b32.xlu1 %v2945_v23, %s2821_s24  ;;  %v649_v40 = vrot.slane %v5066_v18, 2 }
  0x8d   : > { %681 = vrot.lane.b32.xlu0 %v3147_v15, %s2818_s11 }
  0x8e   : > { %v468_v57 = vpop.permute.xlu1 %467 }
  0x8f   : > { %561 = vst.msk [vmem:[#allocation2 + $0x30] sm:$0xff] %vm557_vm3, %v468_v57  ;;  %v464_v52 = vpop.permute.xlu0 %463  ;;  %v5067_v57 = vld [vmem:[#allocation6_spill] sm:$0xff] }
  0x90   : > { %559 = vst.msk [vmem:[#allocation2 + $0x10] sm:$0xff] %vm557_vm3, %v464_v52  ;;  %1345 = vrot.lane.b32.xlu1 %v3102_v63, %s2822_s25  ;;  %v629_v52 = vrot.slane %v5067_v57, 2 }
  0x91   : > { %812 = vrot.lane.b32.xlu0 %v2921_v16, %s2817_s10 }
  0x92   : > { %v472_v49 = vpop.permute.xlu1 %471 }
  0x93   : > { %563 = vst.msk [vmem:[#allocation2 + $0x50] sm:$0xff] %vm557_vm3, %v472_v49  ;;  %v470_v37 = vpop.permute.xlu0 %469 }
  0x94   : > { %562 = vst.msk [vmem:[#allocation2 + $0x40] sm:$0xff] %vm557_vm3, %v470_v37  ;;  %1081 = vrot.lane.b32.xlu1 %v3160_v4, %s2819_s20  ;;  %v5068_v37 = vld [vmem:[#allocation7_spill] sm:$0xff] }
  0x95   : > { %947 = vrot.lane.b32.xlu0 %v3044_v47, %s2820_s21 }
  0x96   : > { %v476_v15 = vpop.permute.xlu1 %475 }
  0x97   : > { %565 = vst.msk [vmem:[#allocation2 + $0x70] sm:$0xff] %vm557_vm3, %v476_v15  ;;  %v474_v39 = vpop.permute.xlu0 %473  ;;  %v3596_v15 = vsel %vm590_vm2, %v647_v0, %v649_v40  ;;  %v1538_v40 = vld [vmem:[#allocation2 + $0x18] sm:$0xff] }
  0x98   : > { %564 = vst.msk [vmem:[#allocation2 + $0x60] sm:$0xff] %vm557_vm3, %v474_v39  ;;  %1212 = vrot.lane.b32.xlu1 %v2934_v19, %s2821_s24  ;;  %v5069_v39 = vld [vmem:[#allocation5_spill] sm:$0xff] }
  0x99   : > { %683 = vrot.lane.b32.xlu0 %v3157_v27, %s2818_s11  ;;  %v627_v27 = vrot.slane %v2977_v31, 2  ;;  %1522 = vst.msk [vmem:[#allocation2 + $0x138] sm:$0xff] %vm299_vm0, %v3596_v15 }
  0x9a   : > { %v480_v16 = vpop.permute.xlu1 %479 }
  0x9b   : > { %567 = vst.msk [vmem:[#allocation2 + $0x90] sm:$0xff] %vm557_vm3, %v480_v16  ;;  %v478_v62 = vpop.permute.xlu0 %477 }
  0x9c   : > { %566 = vst.msk [vmem:[#allocation2 + $0x80] sm:$0xff] %vm557_vm3, %v478_v62  ;;  %1347 = vrot.lane.b32.xlu1 %v3093_v60, %s2822_s25 }
  0x9d   : > { %814 = vrot.lane.b32.xlu0 %v2945_v23, %s2817_s10  ;;  %v3551_v23 = vsel %vm590_vm2, %v626_v22, %v627_v27 }
  0x9e   : > { %v484_v47 = vpop.permute.xlu1 %483  ;;  %1513 = vst.msk [vmem:[#allocation2 + $0xa8] sm:$0xff] %vm299_vm0, %v3551_v23 }
  0x9f   : > { %569 = vst.msk [vmem:[#allocation2 + $0xb0] sm:$0xff] %vm557_vm3, %v484_v47  ;;  %v482_v26 = vpop.permute.xlu0 %481  ;;  %v5070_v47 = vld [vmem:[#allocation19_spill] sm:$0xff] }
  0xa0   : > { %568 = vst.msk [vmem:[#allocation2 + $0xa0] sm:$0xff] %vm557_vm3, %v482_v26  ;;  %1083 = vrot.lane.b32.xlu1 %v5062_v48, %s2819_s20 }
  0xa1   : > { %949 = vrot.lane.b32.xlu0 %v3102_v63, %s2820_s21 }
  0xa2   : > { %v488_v54 = vpop.permute.xlu1 %487 }
  0xa3   : > { %571 = vst.msk [vmem:[#allocation2 + $0xd0] sm:$0xff] %vm557_vm3, %v488_v54  ;;  %v486_v14 = vpop.permute.xlu0 %485  ;;  %v1568_v54 = vld [vmem:[#allocation2 + $0x108] sm:$0xff] }
  0xa4   : > { %570 = vst.msk [vmem:[#allocation2 + $0xc0] sm:$0xff] %vm557_vm3, %v486_v14  ;;  %1214 = vrot.lane.b32.xlu1 %v2960_v28, %s2821_s24  ;;  %2691 = vmatprep.mubr.msk.f32.mxu1 %vm299_vm0, %v1568_v54 }
  0xa5   : > { %685 = vrot.lane.b32.xlu0 %v3160_v4, %s2818_s11  ;;  %v5064_v4 = vld [vmem:[#allocation12_spill] sm:$0xff] }
  0xa6   : > { %v492_v13 = vpop.permute.xlu1 %491 }
  0xa7   : > { %573 = vst.msk [vmem:[#allocation2 + $0xf0] sm:$0xff] %vm557_vm3, %v492_v13  ;;  %v490_v63 = vpop.permute.xlu0 %489 }
  0xa8   : > { %572 = vst.msk [vmem:[#allocation2 + $0xe0] sm:$0xff] %vm557_vm3, %v490_v63  ;;  %1349 = vrot.lane.b32.xlu1 %v5063_v36, %s2822_s25 }
  0xa9   : > { %816 = vrot.lane.b32.xlu0 %v2934_v19, %s2817_s10  ;;  %v5065_v19 = vld [vmem:[#allocation13_spill] sm:$0xff] }
  0xaa   : > { %v496_v1 = vpop.permute.xlu1 %495 }
  0xab   : > { %575 = vst.msk [vmem:[#allocation2 + $0x110] sm:$0xff] %vm557_vm3, %v496_v1  ;;  %v494_v7 = vpop.permute.xlu0 %493  ;;  %v652_v1 = vrot.slane %v3049_v50, 2 }
  0xac   : > { %574 = vst.msk [vmem:[#allocation2 + $0x100] sm:$0xff] %vm557_vm3, %v494_v7  ;;  %1085 = vrot.lane.b32.xlu1 %v5064_v4, %s2819_s20 }
  0xad   : > { %951 = vrot.lane.b32.xlu0 %v3093_v60, %s2820_s21 }
  0xae   : > { %v500_v9 = vpop.permute.xlu1 %499 }
  0xaf   : > { %577 = vst.msk [vmem:[#allocation2 + $0x130] sm:$0xff] %vm557_vm3, %v500_v9  ;;  %v498_v8 = vpop.permute.xlu0 %497 }
  0xb0   : > { %576 = vst.msk [vmem:[#allocation2 + $0x120] sm:$0xff] %vm557_vm3, %v498_v8  ;;  %703 = vrot.lane.b32.xlu1 %v5065_v19, %s2818_s11 }
  0xb1   : > { %687 = vrot.lane.b32.xlu0 %v5062_v48, %s2818_s11 }
  0xb2   : > { %v504_v11 = vpop.permute.xlu1 %503 }
  0xb3   : > { %579 = vst.msk [vmem:[#allocation2 + $0x150] sm:$0xff] %vm557_vm3, %v504_v11  ;;  %v502_v12 = vpop.permute.xlu0 %501 }
  0xb4   : > { %578 = vst.msk [vmem:[#allocation2 + $0x140] sm:$0xff] %vm557_vm3, %v502_v12  ;;  %818 = vrot.lane.b32.xlu1 %v2960_v28, %s2817_s10  ;;  %v3599_v28 = vsel %vm590_vm2, %v627_v27, %v629_v52  ;;  %v5073_v12 = vld [vmem:[#allocation18_spill] sm:$0xff] }
  0xb5   : > { %1216 = vrot.lane.b32.xlu0 %v2948_v24, %s2821_s24  ;;  %1514 = vst.msk [vmem:[#allocation2 + $0xb8] sm:$0xff] %vm299_vm0, %v3599_v28 }
  0xb6   : > { %v508_v60 = vpop.permute.xlu1 %507 }
  0xb7   : > { %581 = vst.msk [vmem:[#allocation2 + $0x170] sm:$0xff] %vm557_vm3, %v508_v60  ;;  %v506_v49 = vpop.permute.xlu0 %505 }
  0xb8   : > { %580 = vst.msk [vmem:[#allocation2 + $0x160] sm:$0xff] %vm557_vm3, %v506_v49  ;;  %1351 = vrot.lane.b32.xlu1 %v5068_v37, %s2822_s25 }
  0xb9   : > { %834 = vrot.lane.b32.xlu0 %v5069_v39, %s2817_s10 }
  0xba   : > { %v512_v16 = vpop.permute.xlu1 %511 }
  0xbb   : > { %583 = vst.msk [vmem:[#allocation2 + $0x190] sm:$0xff] %vm557_vm3, %v512_v16  ;;  %v510_v62 = vpop.permute.xlu0 %509 }
  0xbc   : > { %582 = vst.msk [vmem:[#allocation2 + $0x180] sm:$0xff] %vm557_vm3, %v510_v62  ;;  %969 = vrot.lane.b32.xlu1 %v5070_v47, %s2820_s21 }
  0xbd   : > { %953 = vrot.lane.b32.xlu0 %v5063_v36, %s2820_s21  ;;  %v651_v36 = vrot.slane %v3052_v51, 2 }
  0xbe   : > { %v516_v17 = vpop.permute.xlu1 %515 }
  0xbf   : > { %585 = vst.msk [vmem:[#allocation2 + $0x1b0] sm:$0xff] %vm557_vm3, %v516_v17  ;;  %v514_v0 = vpop.permute.xlu0 %513  ;;  %v3645_v9 = vsel %vm590_vm2, %v651_v36, %v652_v1  ;;  %v1542_v36 = vld [vmem:[#allocation2 + $0x38] sm:$0xff] }
  0xc0   : > { %584 = vst.msk [vmem:[#allocation2 + $0x1a0] sm:$0xff] %vm557_vm3, %v514_v0  ;;  %1103 = vrot.lane.b32.xlu1 %v3281_v3, %s2819_s20 }
  0xc1   : > { %1087 = vrot.lane.b32.xlu0 %v3286_v42, %s2819_s20  ;;  %1523 = vst.msk [vmem:[#allocation2 + $0x148] sm:$0xff] %vm299_vm0, %v3645_v9 }
  0xc2   : > { %v520_v22 = vpop.permute.xlu1 %519 }
  0xc3   : > { %587 = vst.msk [vmem:[#allocation2 + $0x1d0] sm:$0xff] %vm557_vm3, %v520_v22  ;;  %v518_v27 = vpop.permute.xlu0 %517  ;;  %v5074_v22 = vld [vmem:[#allocation23_spill] sm:$0xff] }
  0xc4   : > { %586 = vst.msk [vmem:[#allocation2 + $0x1c0] sm:$0xff] %vm557_vm3, %v518_v27  ;;  %705 = vrot.lane.b32.xlu1 %v3320_v6, %s2818_s11  ;;  %v654_v27 = vrot.slane %v5074_v22, 2 }
  0xc5   : > { %689 = vrot.lane.b32.xlu0 %v5064_v4, %s2818_s11  ;;  %v5071_v4 = vld [vmem:[#allocation22_spill] sm:$0xff] }
  0xc6   : > { %v803_v26 = vpop.permute.xlu1 %802 }
  0xc7   : > { %v672_v48 = vpop.permute.xlu0 %671 }
  0xc8   : > { %768 = vst.msk [vmem:[#allocation2] sm:$0xff] %vm767_vm4, %v672_v48  ;;  %1234 = vrot.lane.b32.xlu1 %v3021_v44, %s2821_s24  ;;  %v5075_v48 = vld [vmem:[#allocation21_spill] sm:$0xff] }
  0xc9   : > { %1218 = vrot.lane.b32.xlu0 %v2970_v30, %s2821_s24  ;;  %899 = vst.msk [vmem:[#allocation2] sm:$0xff] %vm898_vm5, %v803_v26 }
  0xca   : > { %v1072_v14 = vpop.permute.xlu1 %1071 }
  0xcb   : > { %v938_v13 = vpop.permute.xlu0 %937 }
  0xcc   : > { %1034 = vst.msk [vmem:[#allocation2] sm:$0xff] %vm1033_vm6, %v938_v13  ;;  %836 = vrot.lane.b32.xlu1 %v3010_v41, %s2817_s10 }
  0xcd   : > { %820 = vrot.lane.b32.xlu0 %v2948_v24, %s2817_s10  ;;  %1168 = vst.msk [vmem:[#allocation2] sm:$0xff] %vm1167_vm7, %v1072_v14  ;;  %v5072_v24 = vld [vmem:[#allocation10_spill] sm:$0xff] }
  0xce   : > { %v1203_v63 = vpop.permute.xlu1 %1202 }
  0xcf   : > { %1299 = vst.msk [vmem:[#allocation2] sm:$0xff] %vm1298_vm8, %v1203_v63  ;;  %v674_v7 = vpop.permute.xlu0 %673 }
  0xd0   : > { %769 = vst.msk [vmem:[#allocation2 + $0x10] sm:$0xff] %vm767_vm4, %v674_v7  ;;  %1369 = vrot.lane.b32.xlu1 %v5071_v4, %s2822_s25 }
  0xd1   : > { %1353 = vrot.lane.b32.xlu0 %v5072_v24, %s2822_s25 }
  0xd2   : > { %v1338_v8 = vpop.permute.xlu1 %1337 }
  0xd3   : > { %1434 = vst.msk [vmem:[#allocation2] sm:$0xff] %vm1433_vm9, %v1338_v8  ;;  %v805_v11 = vpop.permute.xlu0 %804  ;;  %v656_v8 = vrot.slane %v3073_v56, 2 }
  0xd4   : > { %900 = vst.msk [vmem:[#allocation2 + $0x10] sm:$0xff] %vm898_vm5, %v805_v11  ;;  %971 = vrot.lane.b32.xlu1 %v5073_v12, %s2820_s21  ;;  %v657_v11 = vrot.slane %v3066_v55, 2 }
  0xd5   : > { %955 = vrot.lane.b32.xlu0 %v5068_v37, %s2820_s21 }
  0xd6   : > { %v1074_v60 = vpop.permute.xlu1 %1073 }
  0xd7   : > { %v940_v18 = vpop.permute.xlu0 %939 }
  0xd8   : > { %1035 = vst.msk [vmem:[#allocation2 + $0x10] sm:$0xff] %vm1033_vm6, %v940_v18  ;;  %1105 = vrot.lane.b32.xlu1 %v3421_v2, %s2819_s20 }
  0xd9   : > { %1169 = vst.msk [vmem:[#allocation2 + $0x10] sm:$0xff] %vm1167_vm7, %v1074_v60  ;;  %1089 = vrot.lane.b32.xlu0 %v3426_v35, %s2819_s20 }
  0xda   : > { %v1205_v57 = vpop.permute.xlu1 %1204  ;;  %v1535_v52 = vld [vmem:[#allocation2] sm:$0xff] }
  0xdb   : > { %1300 = vst.msk [vmem:[#allocation2 + $0x10] sm:$0xff] %vm1298_vm8, %v1205_v57  ;;  %v676_v49 = vpop.permute.xlu0 %675  ;;  %1785 = vmatmul.mubr.f32.vlgmr.msra.gmra.mrb[0].mxu0 %v1535_v52 }
  0xdc   : > { %770 = vst.msk [vmem:[#allocation2 + $0x20] sm:$0xff] %vm767_vm4, %v676_v49  ;;  %707 = vrot.lane.b32.xlu1 %v3281_v3, %s2818_s11  ;;  %2676 = vmatprep.mubr.msk.f32.mxu0 %vm299_vm0, %v1538_v40  ;;  %v1544_v40 = vld [vmem:[#allocation2 + $0x48] sm:$0xff] }
  0xdd   : > { %691 = vrot.lane.b32.xlu0 %v3286_v42, %s2818_s11  ;;  %v1540_v42 = vld [vmem:[#allocation2 + $0x28] sm:$0xff] }
  0xde   : > { %v1340_v37 = vpop.permute.xlu1 %1339 }
  0xdf   : > { %1435 = vst.msk [vmem:[#allocation2 + $0x10] sm:$0xff] %vm1433_vm9, %v1340_v37  ;;  %v807_v16 = vpop.permute.xlu0 %806 }
  0xe0   : > { %901 = vst.msk [vmem:[#allocation2 + $0x20] sm:$0xff] %vm898_vm5, %v807_v16  ;;  %1236 = vrot.lane.b32.xlu1 %v3018_v43, %s2821_s24  ;;  %v5078_v16 = vld [vmem:[#allocation25_spill] sm:$0xff] }
  0xe1   : > { %1220 = vrot.lane.b32.xlu0 %v2967_v29, %s2821_s24 }
  0xe2   : > { %v1076_v62 = vpop.permute.xlu1 %1075 }
  0xe3   : > { %v942_v17 = vpop.permute.xlu0 %941 }
  0xe4   : > { %1036 = vst.msk [vmem:[#allocation2 + $0x20] sm:$0xff] %vm1033_vm6, %v942_v17  ;;  %838 = vrot.lane.b32.xlu1 %v3021_v44, %s2817_s10  ;;  %v3689_v44 = vsel %vm590_vm2, %v652_v1, %v654_v27 }
  0xe5   : > { %1170 = vst.msk [vmem:[#allocation2 + $0x20] sm:$0xff] %vm1167_vm7, %v1076_v62  ;;  %822 = vrot.lane.b32.xlu0 %v2970_v30, %s2817_s10  ;;  %v5076_v30 = vld [vmem:[#allocation9_spill] sm:$0xff] }
  0xe6   : > { %v1207_v3 = vpop.permute.xlu1 %1206  ;;  %v1537_v0 = vld [vmem:[#allocation2 + $0x10] sm:$0xff]  ;;  %1524 = vst.msk [vmem:[#allocation2 + $0x158] sm:$0xff] %vm299_vm0, %v3689_v44 }
  0xe7   : > { %1301 = vst.msk [vmem:[#allocation2 + $0x20] sm:$0xff] %vm1298_vm8, %v1207_v3  ;;  %v678_v26 = vpop.permute.xlu0 %677  ;;  %1790 = vmatmul.mubr.f32.gmra.mrb[2].mxu0 %v1537_v0  ;;  %v1546_v0 = vld [vmem:[#allocation2 + $0x58] sm:$0xff] }
  0xe8   : > { %771 = vst.msk [vmem:[#allocation2 + $0x30] sm:$0xff] %vm767_vm4, %v678_v26  ;;  %1371 = vrot.lane.b32.xlu1 %v5075_v48, %s2822_s25  ;;  %2677 = vmatprep.mubr.msk.f32.mxu0 %vm299_vm0, %v1540_v42 }
  0xe9   : > { %1355 = vrot.lane.b32.xlu0 %v5076_v30, %s2822_s25 }
  0xea   : > { %v1342_v54 = vpop.permute.xlu1 %1341 }
  0xeb   : > { %1436 = vst.msk [vmem:[#allocation2 + $0x20] sm:$0xff] %vm1433_vm9, %v1342_v54  ;;  %v809_v14 = vpop.permute.xlu0 %808  ;;  %v662_v54 = vrot.slane %v3083_v58, 2 }
  0xec   : > { %902 = vst.msk [vmem:[#allocation2 + $0x30] sm:$0xff] %vm898_vm5, %v809_v14  ;;  %973 = vrot.lane.b32.xlu1 %v5071_v4, %s2820_s21 }
  0xed   : > { %957 = vrot.lane.b32.xlu0 %v5072_v24, %s2820_s21 }
  0xee   : > { %v1078_v13 = vpop.permute.xlu1 %1077 }
  0xef   : > { %v944_v63 = vpop.permute.xlu0 %943 }
  0xf0   : > { %1037 = vst.msk [vmem:[#allocation2 + $0x30] sm:$0xff] %vm1033_vm6, %v944_v63  ;;  %1107 = vrot.lane.b32.xlu1 %v3463_v20, %s2819_s20  ;;  %v3782_v63 = vld [vmem:[%s2874_s22 + $0x168] sm:$0xff] }
  0xf1   : > { %1171 = vst.msk [vmem:[#allocation2 + $0x30] sm:$0xff] %vm1167_vm7, %v1078_v13  ;;  %1091 = vrot.lane.b32.xlu0 %v3466_v5, %s2819_s20 }
  0xf2   : > { %v1209_v1 = vpop.permute.xlu1 %1208  ;;  %v1539_v7 = vld [vmem:[#allocation2 + $0x20] sm:$0xff]  ;;  %330 = vst.msk [vmem:[#allocation2 + $0x1e0] sm:$0xff] %vm299_vm0, %v3782_v63 }
  0xf3   : > { %1302 = vst.msk [vmem:[#allocation2 + $0x30] sm:$0xff] %vm1298_vm8, %v1209_v1  ;;  %v680_v4 = vpop.permute.xlu0 %679  ;;  %1795 = vmatmul.mubr.f32.gmra.mrb[4].mxu0 %v1539_v7  ;;  %v3790_v1 = vld [vmem:[%s2874_s22 + $0x170] sm:$0xff] }
  0xf4   : > { %772 = vst.msk [vmem:[#allocation2 + $0x40] sm:$0xff] %vm767_vm4, %v680_v4  ;;  %709 = vrot.lane.b32.xlu1 %v3421_v2, %s2818_s11  ;;  %2678 = vmatprep.mubr.msk.f32.mxu0 %vm299_vm0, %v1542_v36  ;;  %v3721_v2 = vsel %vm590_vm2, %v656_v8, %v657_v11  ;;  %v1548_v36 = vld [vmem:[#allocation2 + $0x68] sm:$0xff] }
  0xf5   : > { %693 = vrot.lane.b32.xlu0 %v3426_v35, %s2818_s11  ;;  %1525 = vst.msk [vmem:[#allocation2 + $0x168] sm:$0xff] %vm299_vm0, %v3721_v2  ;;  %331 = vst.msk [vmem:[#allocation2 + $0x1f0] sm:$0xff] %vm299_vm0, %v3790_v1 }
  0xf6   : > { %v1344_v24 = vpop.permute.xlu1 %1343 }
  0xf7   : > { %1437 = vst.msk [vmem:[#allocation2 + $0x30] sm:$0xff] %vm1433_vm9, %v1344_v24  ;;  %v811_v60 = vpop.permute.xlu0 %810  ;;  %v5079_v24 = vld [vmem:[#allocation24_spill] sm:$0xff] }
  0xf8   : > { %903 = vst.msk [vmem:[#allocation2 + $0x40] sm:$0xff] %vm898_vm5, %v811_v60  ;;  %1238 = vrot.lane.b32.xlu1 %v3035_v46, %s2821_s24 }
  0xf9   : > { %1222 = vrot.lane.b32.xlu0 %v2980_v32, %s2821_s24 }
  0xfa   : > { %v1080_v35 = vpop.permute.xlu1 %1079 }
  0xfb   : > { %v946_v18 = vpop.permute.xlu0 %945 }
  0xfc   : > { %1038 = vst.msk [vmem:[#allocation2 + $0x40] sm:$0xff] %vm1033_vm6, %v946_v18  ;;  %840 = vrot.lane.b32.xlu1 %v3018_v43, %s2817_s10  ;;  %v5077_v43 = vld [vmem:[#allocation15_spill] sm:$0xff] }
  0xfd   : > { %1172 = vst.msk [vmem:[#allocation2 + $0x40] sm:$0xff] %vm1167_vm7, %v1080_v35  ;;  %824 = vrot.lane.b32.xlu0 %v2967_v29, %s2817_s10  ;;  %v659_v29 = vrot.slane %v5078_v16, 2 }
  0xfe   : > { %v1211_v57 = vpop.permute.xlu1 %1210  ;;  %v1541_v52 = vld [vmem:[#allocation2 + $0x30] sm:$0xff] }
  0xff   : > { %1303 = vst.msk [vmem:[#allocation2 + $0x40] sm:$0xff] %vm1298_vm8, %v1211_v57  ;;  %v682_v49 = vpop.permute.xlu0 %681  ;;  %1800 = vmatmul.mubr.f32.gmra.mrb[6].mxu0 %v1541_v52  ;;  %v3746_v17 = vsel %vm590_vm2, %v657_v11, %v659_v29  ;;  %v664_v11 = vrot.slane %v3337_v21, 2  ;;  %v5081_v29 = vld [vmem:[#allocation4_spill] sm:$0xff] }
 0x100   : > { %773 = vst.msk [vmem:[#allocation2 + $0x50] sm:$0xff] %vm767_vm4, %v682_v49  ;;  %1373 = vrot.lane.b32.xlu1 %v3301_v61, %s2822_s25  ;;  %2679 = vmatprep.mubr.msk.f32.mxu0 %vm299_vm0, %v1544_v40 }
 0x101   : > { %1357 = vrot.lane.b32.xlu0 %v5077_v43, %s2822_s25  ;;  %1526 = vst.msk [vmem:[#allocation2 + $0x178] sm:$0xff] %vm299_vm0, %v3746_v17  ;;  %v3807_v35 = vsel %vm590_vm2, %v662_v54, %v664_v11 }
 0x102   : > { %v1346_v37 = vpop.permute.xlu1 %1345  ;;  %1528 = vst.msk [vmem:[#allocation2 + $0x198] sm:$0xff] %vm299_vm0, %v3807_v35 }
 0x103   : > { %1438 = vst.msk [vmem:[#allocation2 + $0x40] sm:$0xff] %vm1433_vm9, %v1346_v37  ;;  %v813_v62 = vpop.permute.xlu0 %812  ;;  %v667_v37 = vrot.slane %v3790_v1, 2 }
 0x104   : > { %904 = vst.msk [vmem:[#allocation2 + $0x50] sm:$0xff] %vm898_vm5, %v813_v62  ;;  %975 = vrot.lane.b32.xlu1 %v5075_v48, %s2820_s21 }
 0x105   : > { %959 = vrot.lane.b32.xlu0 %v5076_v30, %s2820_s21  ;;  %v661_v30 = vrot.slane %v3086_v59, 2 }
 0x106   : > { %v1082_v42 = vpop.permute.xlu1 %1081 }
 0x107   : > { %v948_v3 = vpop.permute.xlu0 %947 }
 0x108   : > { %1039 = vst.msk [vmem:[#allocation2 + $0x50] sm:$0xff] %vm1033_vm6, %v948_v3  ;;  %1109 = vrot.lane.b32.xlu1 %v3498_v33, %s2819_s20 }
 0x109   : > { %1173 = vst.msk [vmem:[#allocation2 + $0x50] sm:$0xff] %vm1167_vm7, %v1082_v42  ;;  %1093 = vrot.lane.b32.xlu0 %v3501_v38, %s2819_s20 }
 0x10a   : > { %v1213_v22 = vpop.permute.xlu1 %1212  ;;  %v1543_v27 = vld [vmem:[#allocation2 + $0x40] sm:$0xff] }
 0x10b   : > { %1304 = vst.msk [vmem:[#allocation2 + $0x50] sm:$0xff] %vm1298_vm8, %v1213_v22  ;;  %v684_v26 = vpop.permute.xlu0 %683  ;;  %1805 = vmatmul.mubr.f32.gmra.mrb[8].mxu0 %v1543_v27  ;;  %v1552_v22 = vld [vmem:[#allocation2 + $0x88] sm:$0xff] }
 0x10c   : > { %774 = vst.msk [vmem:[#allocation2 + $0x60] sm:$0xff] %vm767_vm4, %v684_v26  ;;  %711 = vrot.lane.b32.xlu1 %v3463_v20, %s2818_s11  ;;  %2680 = vmatprep.mubr.msk.f32.mxu0 %vm299_vm0, %v1546_v0  ;;  %v3772_v20 = vsel %vm590_vm2, %v661_v30, %v662_v54  ;;  %v5082_v0 = vld [vmem:[#allocation17_spill] sm:$0xff] }
 0x10d   : > { %695 = vrot.lane.b32.xlu0 %v3466_v5, %s2818_s11  ;;  %1527 = vst.msk [vmem:[#allocation2 + $0x188] sm:$0xff] %vm299_vm0, %v3772_v20 }
 0x10e   : > { %v1348_v48 = vpop.permute.xlu1 %1347 }
 0x10f   : > { %1439 = vst.msk [vmem:[#allocation2 + $0x50] sm:$0xff] %vm1433_vm9, %v1348_v48  ;;  %v815_v14 = vpop.permute.xlu0 %814 }
 0x110   : > { %905 = vst.msk [vmem:[#allocation2 + $0x60] sm:$0xff] %vm898_vm5, %v815_v14  ;;  %1240 = vrot.lane.b32.xlu1 %v3032_v45, %s2821_s24 }
 0x111   : > { %1224 = vrot.lane.b32.xlu0 %v2977_v31, %s2821_s24 }
 0x112   : > { %v1084_v5 = vpop.permute.xlu1 %1083 }
 0x113   : > { %v950_v13 = vpop.permute.xlu0 %949 }
 0x114   : > { %1040 = vst.msk [vmem:[#allocation2 + $0x60] sm:$0xff] %vm1033_vm6, %v950_v13  ;;  %842 = vrot.lane.b32.xlu1 %v3035_v46, %s2817_s10 }
 0x115   : > { %1174 = vst.msk [vmem:[#allocation2 + $0x60] sm:$0xff] %vm1167_vm7, %v1084_v5  ;;  %826 = vrot.lane.b32.xlu0 %v2980_v32, %s2817_s10  ;;  %v5080_v32 = vld [vmem:[#allocation14_spill] sm:$0xff] }
 0x116   : > { %v1215_v7 = vpop.permute.xlu1 %1214  ;;  %v1545_v4 = vld [vmem:[#allocation2 + $0x50] sm:$0xff] }
 0x117   : > { %1305 = vst.msk [vmem:[#allocation2 + $0x60] sm:$0xff] %vm1298_vm8, %v1215_v7  ;;  %v686_v46 = vpop.permute.xlu0 %685  ;;  %1810 = vmatmul.mubr.f32.gmra.mrb[10].mxu0 %v1545_v4  ;;  %v3881_v4 = vld [vmem:[%s2874_s22 + $0x180] sm:$0xff] }
 0x118   : > { %775 = vst.msk [vmem:[#allocation2 + $0x70] sm:$0xff] %vm767_vm4, %v686_v46  ;;  %1375 = vrot.lane.b32.xlu1 %v5079_v24, %s2822_s25  ;;  %2681 = vmatprep.mubr.msk.f32.mxu0 %vm299_vm0, %v1548_v36  ;;  %v1066_v46 = vrot.slane %v3881_v4, 2 }
 0x119   : > { %1359 = vrot.lane.b32.xlu0 %v5080_v32, %s2822_s25 }
 0x11a   : > { %v1350_v8 = vpop.permute.xlu1 %1349 }
 0x11b   : > { %1440 = vst.msk [vmem:[#allocation2 + $0x60] sm:$0xff] %vm1433_vm9, %v1350_v8  ;;  %v817_v60 = vpop.permute.xlu0 %816 }
 0x11c   : > { %906 = vst.msk [vmem:[#allocation2 + $0x70] sm:$0xff] %vm898_vm5, %v817_v60  ;;  %977 = vrot.lane.b32.xlu1 %v3301_v61, %s2820_s21  ;;  %v1550_v61 = vld [vmem:[#allocation2 + $0x78] sm:$0xff] }
 0x11d   : > { %961 = vrot.lane.b32.xlu0 %v5077_v43, %s2820_s21  ;;  %v666_v43 = vrot.slane %v3782_v63, 2 }
 0x11e   : > { %v1086_v18 = vpop.permute.xlu1 %1085 }
 0x11f   : > { %v952_v40 = vpop.permute.xlu0 %951 }
 0x120   : > { %1041 = vst.msk [vmem:[#allocation2 + $0x70] sm:$0xff] %vm1033_vm6, %v952_v40  ;;  %1111 = vrot.lane.b32.xlu1 %v3548_v10, %s2819_s20  ;;  %v5084_v40 = vld [vmem:[#allocation26_spill] sm:$0xff] }
 0x121   : > { %1175 = vst.msk [vmem:[#allocation2 + $0x70] sm:$0xff] %vm1167_vm7, %v1086_v18  ;;  %1095 = vrot.lane.b32.xlu0 %v3551_v23, %s2819_s20 }
 0x122   : > { %v704_v21 = vpop.permute.xlu1 %703  ;;  %v1547_v57 = vld [vmem:[#allocation2 + $0x60] sm:$0xff] }
 0x123   : > { %784 = vst.msk [vmem:[#allocation2 + $0x100] sm:$0xff] %vm767_vm4, %v704_v21  ;;  %v688_v52 = vpop.permute.xlu0 %687  ;;  %1815 = vmatmul.mubr.f32.gmra.mrb[12].mxu0 %v1547_v57  ;;  %v1570_v57 = vld [vmem:[#allocation2 + $0x118] sm:$0xff] }
 0x124   : > { %776 = vst.msk [vmem:[#allocation2 + $0x80] sm:$0xff] %vm767_vm4, %v688_v52  ;;  %713 = vrot.lane.b32.xlu1 %v3498_v33, %s2818_s11  ;;  %2682 = vmatprep.mubr.msk.f32.mxu0 %vm299_vm0, %v1550_v61  ;;  %v3833_v33 = vsel %vm590_vm2, %v666_v43, %v667_v37  ;;  %v1554_v52 = vld [vmem:[#allocation2 + $0x98] sm:$0xff] }
 0x125   : > { %697 = vrot.lane.b32.xlu0 %v3501_v38, %s2818_s11  ;;  %1529 = vst.msk [vmem:[#allocation2 + $0x1a8] sm:$0xff] %vm299_vm0, %v3833_v33 }
 0x126   : > { %v819_v49 = vpop.permute.xlu1 %818 }
 0x127   : > { %907 = vst.msk [vmem:[#allocation2 + $0x80] sm:$0xff] %vm898_vm5, %v819_v49  ;;  %v1217_v16 = vpop.permute.xlu0 %1216 }
 0x128   : > { %1306 = vst.msk [vmem:[#allocation2 + $0x70] sm:$0xff] %vm1298_vm8, %v1217_v16  ;;  %1242 = vrot.lane.b32.xlu1 %v3052_v51, %s2821_s24  ;;  %v3915_v16 = vld [vmem:[%s2874_s22 + $0x1a0] sm:$0xff] }
 0x129   : > { %1226 = vrot.lane.b32.xlu0 %v5081_v29, %s2821_s24 }
 0x12a   : > { %v1352_v38 = vpop.permute.xlu1 %1351 }
 0x12b   : > { %1441 = vst.msk [vmem:[#allocation2 + $0x70] sm:$0xff] %vm1433_vm9, %v1352_v38  ;;  %v835_v62 = vpop.permute.xlu0 %834  ;;  %v1467_v38 = vrot.slane %v3915_v16, 2 }
 0x12c   : > { %915 = vst.msk [vmem:[#allocation2 + $0x100] sm:$0xff] %vm898_vm5, %v835_v62  ;;  %844 = vrot.lane.b32.xlu1 %v3032_v45, %s2817_s10  ;;  %v3926_v62 = vld [vmem:[%s2874_s22 + $0x190] sm:$0x3] }
 0x12d   : > { %828 = vrot.lane.b32.xlu0 %v2977_v31, %s2817_s10  ;;  %v3859_v31 = vld [vmem:[%s2874_s22 + $0x178] sm:$0x3] }
 0x12e   : > { %v970_v42 = vpop.permute.xlu1 %969  ;;  %v669_v30 = vrot.slane %v3859_v31, 2 }
 0x12f   : > { %1050 = vst.msk [vmem:[#allocation2 + $0x100] sm:$0xff] %vm1033_vm6, %v970_v42  ;;  %v954_v3 = vpop.permute.xlu0 %953 }
 0x130   : > { %1042 = vst.msk [vmem:[#allocation2 + $0x80] sm:$0xff] %vm1033_vm6, %v954_v3  ;;  %1377 = vrot.lane.b32.xlu1 %v3333_v25, %s2822_s25  ;;  %v3867_v14 = vsel %vm590_vm2, %v667_v37, %v669_v30  ;;  %v3912_v37 = vld [vmem:[%s2874_s22 + $0x198] sm:$0xff] }
 0x131   : > { %1361 = vrot.lane.b32.xlu0 %v5082_v0, %s2822_s25  ;;  %1530 = vst.msk [vmem:[#allocation2 + $0x1b8] sm:$0xff] %vm299_vm0, %v3867_v14 }
 0x132   : > { %v1104_v27 = vpop.permute.xlu1 %1103  ;;  %v1549_v26 = vld [vmem:[#allocation2 + $0x70] sm:$0xff] }
 0x133   : > { %1184 = vst.msk [vmem:[#allocation2 + $0x100] sm:$0xff] %vm1167_vm7, %v1104_v27  ;;  %v1088_v45 = vpop.permute.xlu0 %1087  ;;  %1820 = vmatmul.mubr.f32.gmra.mrb[14].mxu0 %v1549_v26 }
 0x134   : > { %1176 = vst.msk [vmem:[#allocation2 + $0x80] sm:$0xff] %vm1167_vm7, %v1088_v45  ;;  %979 = vrot.lane.b32.xlu1 %v5079_v24, %s2820_s21  ;;  %2683 = vmatprep.mubr.msk.f32.mxu0 %vm299_vm0, %v1552_v22  ;;  %v5083_v24 = vld [vmem:[#allocation3_spill] sm:$0xff]  ;;  %v1069_v22 = vrot.slane %v3926_v62, 2 }
 0x135   : > { %963 = vrot.lane.b32.xlu0 %v5080_v32, %s2820_s21 }
 0x136   : > { %v706_v48 = vpop.permute.xlu1 %705 }
 0x137   : > { %785 = vst.msk [vmem:[#allocation2 + $0x110] sm:$0xff] %vm767_vm4, %v706_v48  ;;  %v690_v54 = vpop.permute.xlu0 %689 }
 0x138   : > { %777 = vst.msk [vmem:[#allocation2 + $0x90] sm:$0xff] %vm767_vm4, %v690_v54  ;;  %1113 = vrot.lane.b32.xlu1 %v3596_v15, %s2819_s20 }
 0x139   : > { %1097 = vrot.lane.b32.xlu0 %v3599_v28, %s2819_s20 }
 0x13a   : > { %v1235_v5 = vpop.permute.xlu1 %1234 }
 0x13b   : > { %1315 = vst.msk [vmem:[#allocation2 + $0x100] sm:$0xff] %vm1298_vm8, %v1235_v5  ;;  %v1219_v13 = vpop.permute.xlu0 %1218 }
 0x13c   : > { %1307 = vst.msk [vmem:[#allocation2 + $0x80] sm:$0xff] %vm1298_vm8, %v1219_v13  ;;  %715 = vrot.lane.b32.xlu1 %v3548_v10, %s2818_s11  ;;  %v3890_v10 = vld [vmem:[%s2874_s22 + $0x188] sm:$0xff] }
 0x13d   : > { %699 = vrot.lane.b32.xlu0 %v3551_v23, %s2818_s11  ;;  %v1067_v23 = vrot.slane %v3890_v10, 2 }
 0x13e   : > { %v837_v36 = vpop.permute.xlu1 %836 }
 0x13f   : > { %916 = vst.msk [vmem:[#allocation2 + $0x110] sm:$0xff] %vm898_vm5, %v837_v36  ;;  %v821_v7 = vpop.permute.xlu0 %820  ;;  %v3898_v11 = vsel %vm590_vm2, %v1066_v46, %v1067_v23 }
 0x140   : > { %908 = vst.msk [vmem:[#allocation2 + $0x90] sm:$0xff] %vm898_vm5, %v821_v7  ;;  %1244 = vrot.lane.b32.xlu1 %v3049_v50, %s2821_s24  ;;  %v1572_v7 = vld [vmem:[#allocation2 + $0x128] sm:$0xff] }
 0x141   : > { %1228 = vrot.lane.b32.xlu0 %v5083_v24, %s2821_s24  ;;  %1531 = vst.msk [vmem:[#allocation2 + $0x1c8] sm:$0xff] %vm299_vm0, %v3898_v11 }
 0x142   : > { %v1370_v32 = vpop.permute.xlu1 %1369 }
 0x143   : > { %1450 = vst.msk [vmem:[#allocation2 + $0x100] sm:$0xff] %vm1433_vm9, %v1370_v32  ;;  %v1354_v8 = vpop.permute.xlu0 %1353 }
 0x144   : > { %1442 = vst.msk [vmem:[#allocation2 + $0x80] sm:$0xff] %vm1433_vm9, %v1354_v8  ;;  %846 = vrot.lane.b32.xlu1 %v3052_v51, %s2817_s10  ;;  %v5085_v51 = vld [vmem:[#allocation16_spill] sm:$0xff] }
 0x145   : > { %830 = vrot.lane.b32.xlu0 %v5081_v29, %s2817_s10  ;;  %v1466_v29 = vrot.slane %v3912_v37, 2 }
 0x146   : > { %v972_v60 = vpop.permute.xlu1 %971 }
 0x147   : > { %1051 = vst.msk [vmem:[#allocation2 + $0x110] sm:$0xff] %vm1033_vm6, %v972_v60  ;;  %v956_v18 = vpop.permute.xlu0 %955  ;;  %v1468_v3 = vsel %vm590_vm2, %v1466_v29, %v1467_v38 }
 0x148   : > { %1043 = vst.msk [vmem:[#allocation2 + $0x90] sm:$0xff] %vm1033_vm6, %v956_v18  ;;  %1379 = vrot.lane.b32.xlu1 %v5084_v40, %s2822_s25 }
 0x149   : > { %1363 = vrot.lane.b32.xlu0 %v5085_v51, %s2822_s25  ;;  %1533 = vst.msk [vmem:[#allocation2 + $0x1e8] sm:$0xff] %vm299_vm0, %v1468_v3 }
 0x14a   : > { %v1106_v61 = vpop.permute.xlu1 %1105  ;;  %v1567_v21 = vld [vmem:[#allocation2 + $0x100] sm:$0xff] }
 0x14b   : > { %1185 = vst.msk [vmem:[#allocation2 + $0x110] sm:$0xff] %vm1167_vm7, %v1106_v61  ;;  %v1090_v49 = vpop.permute.xlu0 %1089  ;;  %v1551_v43 = vld [vmem:[#allocation2 + $0x80] sm:$0xff]  ;;  %1865 = vmatmul.mubr.f32.vlgmr.msra.gmra.mrb[0].mxu1 %v1567_v21  ;;  %v1574_v61 = vld [vmem:[#allocation2 + $0x138] sm:$0xff] }
 0x14c   : > { %1177 = vst.msk [vmem:[#allocation2 + $0x90] sm:$0xff] %vm1167_vm7, %v1090_v49  ;;  %1825 = vmatmul.mubr.f32.gmra.mrb[16].mxu0 %v1551_v43  ;;  %981 = vrot.lane.b32.xlu1 %v3333_v25, %s2820_s21  ;;  %v5086_v49 = vld [vmem:[#allocation28_spill] sm:$0xff] }
 0x14d   : > { %965 = vrot.lane.b32.xlu0 %v5082_v0, %s2820_s21  ;;  %2692 = vmatprep.mubr.msk.f32.mxu1 %vm299_vm0, %v1570_v57  ;;  %v3937_v0 = vsel %vm590_vm2, %v1067_v23, %v1069_v22 }
 0x14e   : > { %v708_v42 = vpop.permute.xlu1 %707  ;;  %2684 = vmatprep.mubr.msk.f32.mxu0 %vm299_vm0, %v1554_v52  ;;  %1532 = vst.msk [vmem:[#allocation2 + $0x1d8] sm:$0xff] %vm299_vm0, %v3937_v0 }
 0x14f   : > { %786 = vst.msk [vmem:[#allocation2 + $0x120] sm:$0xff] %vm767_vm4, %v708_v42  ;;  %v692_v25 = vpop.permute.xlu0 %691 }
 0x150   : > { %778 = vst.msk [vmem:[#allocation2 + $0xa0] sm:$0xff] %vm767_vm4, %v692_v25  ;;  %1115 = vrot.lane.b32.xlu1 %v3645_v9, %s2819_s20  ;;  %v457_v25 = vrot.slane %v3790_v1, 1 }
 0x151   : > { %1099 = vrot.lane.b32.xlu0 %v5065_v19, %s2819_s20  ;;  %v3951_v19 = vld [vmem:[%s2874_s22 + $0x1a8] sm:$0x3]  ;;  %s2709_s22 = sshll.u32 %s5099_s15, 8  ;;  %s4817_s15 = scalar_lea.vmem %s4972_s4, %s2673_s7 }
 0x152   : > { %v1237_v27 = vpop.permute.xlu1 %1236  ;;  %v1469_v30 = vrot.slane %v3951_v19, 2  ;;  %s4115_s30 = scalar_lea.vmem %s4971_s3, %s2709_s22 }
 0x153   : > { %1316 = vst.msk [vmem:[#allocation2 + $0x110] sm:$0xff] %vm1298_vm8, %v1237_v27  ;;  %v1221_v26 = vpop.permute.xlu0 %1220 }
 0x154   : > { %1308 = vst.msk [vmem:[#allocation2 + $0x90] sm:$0xff] %vm1298_vm8, %v1221_v26  ;;  %717 = vrot.lane.b32.xlu1 %v3596_v15, %s2818_s11  ;;  %v1470_v54 = vsel %vm590_vm2, %v1467_v38, %v1469_v30  ;;  %v1560_v30 = vld [vmem:[#allocation2 + $0xc8] sm:$0xff] }
 0x155   : > { %701 = vrot.lane.b32.xlu0 %v3599_v28, %s2818_s11  ;;  %1534 = vst.msk [vmem:[#allocation2 + $0x1f8] sm:$0xff] %vm299_vm0, %v1470_v54 }
 0x156   : > { %v839_v45 = vpop.permute.xlu1 %838 }
 0x157   : > { %917 = vst.msk [vmem:[#allocation2 + $0x120] sm:$0xff] %vm898_vm5, %v839_v45  ;;  %v823_v48 = vpop.permute.xlu0 %822  ;;  %v1576_v45 = vld [vmem:[#allocation2 + $0x148] sm:$0xff] }
 0x158   : > { %909 = vst.msk [vmem:[#allocation2 + $0xa0] sm:$0xff] %vm898_vm5, %v823_v48  ;;  %1246 = vrot.lane.b32.xlu1 %v3073_v56, %s2821_s24 }
 0x159   : > { %1230 = vrot.lane.b32.xlu0 %v5069_v39, %s2821_s24 }
 0x15a   : > { %v1372_v15 = vpop.permute.xlu1 %1371 }
 0x15b   : > { %1451 = vst.msk [vmem:[#allocation2 + $0x110] sm:$0xff] %vm1433_vm9, %v1372_v15  ;;  %v1356_v28 = vpop.permute.xlu0 %1355 }
 0x15c   : > { %1443 = vst.msk [vmem:[#allocation2 + $0x90] sm:$0xff] %vm1433_vm9, %v1356_v28  ;;  %848 = vrot.lane.b32.xlu1 %v3049_v50, %s2817_s10 }
 0x15d   : > { %832 = vrot.lane.b32.xlu0 %v5083_v24, %s2817_s10  ;;  %v1556_v24 = vld [vmem:[#allocation2 + $0xa8] sm:$0xff] }
 0x15e   : > { %v974_v5 = vpop.permute.xlu1 %973 }
 0x15f   : > { %1052 = vst.msk [vmem:[#allocation2 + $0x120] sm:$0xff] %vm1033_vm6, %v974_v5  ;;  %v958_v39 = vpop.permute.xlu0 %957 }
 0x160   : > { %1044 = vst.msk [vmem:[#allocation2 + $0xa0] sm:$0xff] %vm1033_vm6, %v958_v39  ;;  %1381 = vrot.lane.b32.xlu1 %v3357_v53, %s2822_s25  ;;  %v459_v39 = vrot.slane %v3859_v31, 1 }
 0x161   : > { %1365 = vrot.lane.b32.xlu0 %v5070_v47, %s2822_s25 }
 0x162   : > { %v1108_v13 = vpop.permute.xlu1 %1107  ;;  %v1569_v36 = vld [vmem:[#allocation2 + $0x110] sm:$0xff] }
 0x163   : > { %1186 = vst.msk [vmem:[#allocation2 + $0x120] sm:$0xff] %vm1167_vm7, %v1108_v13  ;;  %v1092_v50 = vpop.permute.xlu0 %1091  ;;  %v1553_v46 = vld [vmem:[#allocation2 + $0x90] sm:$0xff]  ;;  %1870 = vmatmul.mubr.f32.gmra.mrb[2].mxu1 %v1569_v36 }
 0x164   : > { %1178 = vst.msk [vmem:[#allocation2 + $0xa0] sm:$0xff] %vm1167_vm7, %v1092_v50  ;;  %1830 = vmatmul.mubr.f32.gmra.mrb[18].mxu0 %v1553_v46  ;;  %983 = vrot.lane.b32.xlu1 %v5084_v40, %s2820_s21  ;;  %v932_v46 = vrot.slane %v3881_v4, 1 }
 0x165   : > { %967 = vrot.lane.b32.xlu0 %v5085_v51, %s2820_s21  ;;  %2693 = vmatprep.mubr.msk.f32.mxu1 %vm299_vm0, %v1572_v7 }
 0x166   : > { %v710_v47 = vpop.permute.xlu1 %709  ;;  %2685 = vmatprep.mubr.msk.f32.mxu0 %vm299_vm0, %v1556_v24  ;;  %v933_v24 = vrot.slane %v3890_v10, 1 }
 0x167   : > { %787 = vst.msk [vmem:[#allocation2 + $0x130] sm:$0xff] %vm767_vm4, %v710_v47  ;;  %v694_v32 = vpop.permute.xlu0 %693 }
 0x168   : > { %779 = vst.msk [vmem:[#allocation2 + $0xb0] sm:$0xff] %vm767_vm4, %v694_v32  ;;  %1117 = vrot.lane.b32.xlu1 %v3689_v44, %s2819_s20 }
 0x169   : > { %1101 = vrot.lane.b32.xlu0 %v3320_v6, %s2819_s20 }
 0x16a   : > { %v1239_v23 = vpop.permute.xlu1 %1238 }
 0x16b   : > { %1317 = vst.msk [vmem:[#allocation2 + $0x120] sm:$0xff] %vm1298_vm8, %v1239_v23  ;;  %v1223_v8 = vpop.permute.xlu0 %1222 }
 0x16c   : > { %1309 = vst.msk [vmem:[#allocation2 + $0xa0] sm:$0xff] %vm1298_vm8, %v1223_v8  ;;  %1232 = vrot.lane.b32.xlu1 %v3010_v41, %s2821_s24 }
 0x16d   : > { %719 = vrot.lane.b32.xlu0 %v3645_v9, %s2818_s11 }
 0x16e   : > { %v841_v60 = vpop.permute.xlu1 %840 }
 0x16f   : > { %918 = vst.msk [vmem:[#allocation2 + $0x130] sm:$0xff] %vm898_vm5, %v841_v60  ;;  %v825_v18 = vpop.permute.xlu0 %824  ;;  %v1562_v60 = vld [vmem:[#allocation2 + $0xd8] sm:$0xff] }
 0x170   : > { %910 = vst.msk [vmem:[#allocation2 + $0xb0] sm:$0xff] %vm898_vm5, %v825_v18  ;;  %850 = vrot.lane.b32.xlu1 %v3073_v56, %s2817_s10  ;;  %v4106_v18 = vld [vmem:[%s4970_s2] ss:$0 sm:$0xff] }
 0x171   : > { %1248 = vrot.lane.b32.xlu0 %v3066_v55, %s2821_s24 }
 0x172   : > { %v1374_v6 = vpop.permute.xlu1 %1373 }
 0x173   : > { %1452 = vst.msk [vmem:[#allocation2 + $0x120] sm:$0xff] %vm1433_vm9, %v1374_v6  ;;  %v1358_v40 = vpop.permute.xlu0 %1357  ;;  %v934_v6 = vsel %vm380_vm1, %v932_v46, %v933_v24 }
 0x174   : > { %1444 = vst.msk [vmem:[#allocation2 + $0xa0] sm:$0xff] %vm1433_vm9, %v1358_v40  ;;  %1383 = vrot.lane.b32.xlu1 %v3352_v34, %s2822_s25 }
 0x175   : > { %1367 = vrot.lane.b32.xlu0 %v5073_v12, %s2822_s25  ;;  %v1558_v12 = vld [vmem:[#allocation2 + $0xb8] sm:$0xff] }
 0x176   : > { %v976_v41 = vpop.permute.xlu1 %975 }
 0x177   : > { %1053 = vst.msk [vmem:[#allocation2 + $0x130] sm:$0xff] %vm1033_vm6, %v976_v41  ;;  %v960_v9 = vpop.permute.xlu0 %959 }
 0x178   : > { %1045 = vst.msk [vmem:[#allocation2 + $0xb0] sm:$0xff] %vm1033_vm6, %v960_v9  ;;  %1119 = vrot.lane.b32.xlu1 %v3721_v2, %s2819_s20 }
 0x179   : > { %985 = vrot.lane.b32.xlu0 %v3357_v53, %s2820_s21 }
 0x17a   : > { %v1110_v56 = vpop.permute.xlu1 %1109  ;;  %v1571_v51 = vld [vmem:[#allocation2 + $0x120] sm:$0xff] }
 0x17b   : > { %1187 = vst.msk [vmem:[#allocation2 + $0x130] sm:$0xff] %vm1167_vm7, %v1110_v56  ;;  %v1094_v21 = vpop.permute.xlu0 %1093  ;;  %v1555_v57 = vld [vmem:[#allocation2 + $0xa0] sm:$0xff]  ;;  %1875 = vmatmul.mubr.f32.gmra.mrb[4].mxu1 %v1571_v51 }
 0x17c   : > { %1179 = vst.msk [vmem:[#allocation2 + $0xb0] sm:$0xff] %vm1167_vm7, %v1094_v21  ;;  %1835 = vmatmul.mubr.f32.gmra.mrb[20].mxu0 %v1555_v57  ;;  %1250 = vrot.lane.b32.xlu1 %v3086_v59, %s2821_s24 }
 0x17d   : > { %721 = vrot.lane.b32.xlu0 %v3689_v44, %s2818_s11  ;;  %2694 = vmatprep.mubr.msk.f32.mxu1 %vm299_vm0, %v1574_v61 }
 0x17e   : > { %v712_v53 = vpop.permute.xlu1 %711  ;;  %2686 = vmatprep.mubr.msk.f32.mxu0 %vm299_vm0, %v1558_v12 }
 0x17f   : > { %788 = vst.msk [vmem:[#allocation2 + $0x140] sm:$0xff] %vm767_vm4, %v712_v53  ;;  %v696_v52 = vpop.permute.xlu0 %695  ;;  %v935_v53 = vrot.slane %v3926_v62, 1 }
 0x180   : > { %780 = vst.msk [vmem:[#allocation2 + $0xc0] sm:$0xff] %vm767_vm4, %v696_v52  ;;  %1385 = vrot.lane.b32.xlu1 %v5086_v49, %s2822_s25 }
 0x181   : > { %852 = vrot.lane.b32.xlu0 %v3066_v55, %s2817_s10 }
 0x182   : > { %v1241_v43 = vpop.permute.xlu1 %1240 }
 0x183   : > { %1318 = vst.msk [vmem:[#allocation2 + $0x130] sm:$0xff] %vm1298_vm8, %v1241_v43  ;;  %v1225_v44 = vpop.permute.xlu0 %1224 }
 0x184   : > { %1310 = vst.msk [vmem:[#allocation2 + $0xb0] sm:$0xff] %vm1298_vm8, %v1225_v44  ;;  %1121 = vrot.lane.b32.xlu1 %v3746_v17, %s2819_s20 }
 0x185   : > { %987 = vrot.lane.b32.xlu0 %v3352_v34, %s2820_s21  ;;  %v5087_v34 = vld [vmem:[#allocation27_spill] sm:$0xff] }
 0x186   : > { %v843_v29 = vpop.permute.xlu1 %842 }
 0x187   : > { %919 = vst.msk [vmem:[#allocation2 + $0x140] sm:$0xff] %vm898_vm5, %v843_v29  ;;  %v827_v38 = vpop.permute.xlu0 %826  ;;  %v936_v29 = vsel %vm380_vm1, %v933_v24, %v935_v53 }
 0x188   : > { %911 = vst.msk [vmem:[#allocation2 + $0xc0] sm:$0xff] %vm898_vm5, %v827_v38  ;;  %1252 = vrot.lane.b32.xlu1 %v3083_v58, %s2821_s24 }
 0x189   : > { %723 = vrot.lane.b32.xlu0 %v3721_v2, %s2818_s11  ;;  %v456_v2 = vrot.slane %v3782_v63, 1 }
 0x18a   : > { %v1376_v55 = vpop.permute.xlu1 %1375 }
 0x18b   : > { %1453 = vst.msk [vmem:[#allocation2 + $0x130] sm:$0xff] %vm1433_vm9, %v1376_v55  ;;  %v1360_v42 = vpop.permute.xlu0 %1359  ;;  %v4058_v15 = vsel %vm380_vm1, %v456_v2, %v457_v25 }
 0x18c   : > { %1445 = vst.msk [vmem:[#allocation2 + $0xb0] sm:$0xff] %vm1433_vm9, %v1360_v42  ;;  %1387 = vrot.lane.b32.xlu1 %v5087_v34, %s2822_s25 }
 0x18d   : > { %854 = vrot.lane.b32.xlu0 %v3086_v59, %s2817_s10 }
 0x18e   : > { %v978_v3 = vpop.permute.xlu1 %977 }
 0x18f   : > { %1054 = vst.msk [vmem:[#allocation2 + $0x140] sm:$0xff] %vm1033_vm6, %v978_v3  ;;  %v962_v22 = vpop.permute.xlu0 %961 }
 0x190   : > { %1046 = vst.msk [vmem:[#allocation2 + $0xc0] sm:$0xff] %vm1033_vm6, %v962_v22  ;;  %1123 = vrot.lane.b32.xlu1 %v3772_v20, %s2819_s20  ;;  %v1580_v22 = vld [vmem:[#allocation2 + $0x168] sm:$0xff] }
 0x191   : > { %989 = vrot.lane.b32.xlu0 %v5086_v49, %s2820_s21 }
 0x192   : > { %v1112_v27 = vpop.permute.xlu1 %1111  ;;  %v1573_v26 = vld [vmem:[#allocation2 + $0x130] sm:$0xff] }
 0x193   : > { %1188 = vst.msk [vmem:[#allocation2 + $0x140] sm:$0xff] %vm1167_vm7, %v1112_v27  ;;  %v1096_v59 = vpop.permute.xlu0 %1095  ;;  %v1557_v48 = vld [vmem:[#allocation2 + $0xb0] sm:$0xff]  ;;  %1880 = vmatmul.mubr.f32.gmra.mrb[6].mxu1 %v1573_v26  ;;  %v1564_v27 = vld [vmem:[#allocation2 + $0xe8] sm:$0xff]  ;;  %v1332_v26 = vrot.slane %v3912_v37, 1 }
 0x194   : > { %1180 = vst.msk [vmem:[#allocation2 + $0xc0] sm:$0xff] %vm1167_vm7, %v1096_v59  ;;  %1840 = vmatmul.mubr.f32.gmra.mrb[22].mxu0 %v1557_v48  ;;  %1254 = vrot.lane.b32.xlu1 %v3782_v63, %s2821_s24 }
 0x195   : > { %725 = vrot.lane.b32.xlu0 %v3746_v17, %s2818_s11  ;;  %2695 = vmatprep.mubr.msk.f32.mxu1 %vm299_vm0, %v1576_v45  ;;  %v1333_v45 = vrot.slane %v3915_v16, 1 }
 0x196   : > { %v714_v54 = vpop.permute.xlu1 %713  ;;  %2687 = vmatprep.mubr.msk.f32.mxu0 %vm299_vm0, %v1560_v30 }
 0x197   : > { %789 = vst.msk [vmem:[#allocation2 + $0x150] sm:$0xff] %vm767_vm4, %v714_v54  ;;  %v698_v28 = vpop.permute.xlu0 %697 }
 0x198   : > { %781 = vst.msk [vmem:[#allocation2 + $0xd0] sm:$0xff] %vm767_vm4, %v698_v28  ;;  %1389 = vrot.lane.b32.xlu1 %v4058_v15, %s2822_s25  ;;  %v1334_v28 = vsel %vm380_vm1, %v1332_v26, %v1333_v45 }
 0x199   : > { %856 = vrot.lane.b32.xlu0 %v3083_v58, %s2817_s10  ;;  %v4082_v58 = vsel %vm380_vm1, %v457_v25, %v459_v39 }
 0x19a   : > { %v1243_v17 = vpop.permute.xlu1 %1242 }
 0x19b   : > { %1319 = vst.msk [vmem:[#allocation2 + $0x140] sm:$0xff] %vm1298_vm8, %v1243_v17  ;;  %v1227_v5 = vpop.permute.xlu0 %1226 }
 0x19c   : > { %1311 = vst.msk [vmem:[#allocation2 + $0xc0] sm:$0xff] %vm1298_vm8, %v1227_v5  ;;  %1125 = vrot.lane.b32.xlu1 %v3807_v35, %s2819_s20 }
 0x19d   : > { %991 = vrot.lane.b32.xlu0 %v5087_v34, %s2820_s21 }
 0x19e   : > { %v845_v13 = vpop.permute.xlu1 %844 }
 0x19f   : > { %920 = vst.msk [vmem:[#allocation2 + $0x150] sm:$0xff] %vm898_vm5, %v845_v13  ;;  %v829_v36 = vpop.permute.xlu0 %828  ;;  %v1335_v13 = vrot.slane %v3951_v19, 1 }
 0x1a0   : > { %912 = vst.msk [vmem:[#allocation2 + $0xd0] sm:$0xff] %vm898_vm5, %v829_v36  ;;  %1256 = vrot.lane.b32.xlu1 %v3790_v1, %s2821_s24 }
 0x1a1   : > { %727 = vrot.lane.b32.xlu0 %v3772_v20, %s2818_s11 }
 0x1a2   : > { %v1378_v7 = vpop.permute.xlu1 %1377 }
 0x1a3   : > { %1454 = vst.msk [vmem:[#allocation2 + $0x140] sm:$0xff] %vm1433_vm9, %v1378_v7  ;;  %v1362_v50 = vpop.permute.xlu0 %1361 }
 0x1a4   : > { %1446 = vst.msk [vmem:[#allocation2 + $0xc0] sm:$0xff] %vm1433_vm9, %v1362_v50  ;;  %1391 = vrot.lane.b32.xlu1 %v4082_v58, %s2822_s25 }
 0x1a5   : > { %858 = vrot.lane.b32.xlu0 %v3782_v63, %s2817_s10  ;;  %v1578_v63 = vld [vmem:[#allocation2 + $0x158] sm:$0xff] }
 0x1a6   : > { %v980_v31 = vpop.permute.xlu1 %979 }
 0x1a7   : > { %1055 = vst.msk [vmem:[#allocation2 + $0x150] sm:$0xff] %vm1033_vm6, %v980_v31  ;;  %v964_v20 = vpop.permute.xlu0 %963 }
 0x1a8   : > { %1047 = vst.msk [vmem:[#allocation2 + $0xd0] sm:$0xff] %vm1033_vm6, %v964_v20  ;;  %1127 = vrot.lane.b32.xlu1 %v3833_v33, %s2819_s20 }
 0x1a9   : > { %993 = vrot.lane.b32.xlu0 %v4058_v15, %s2820_s21 }
 0x1aa   : > { %v1114_v47 = vpop.permute.xlu1 %1113  ;;  %v1575_v32 = vld [vmem:[#allocation2 + $0x140] sm:$0xff] }
 0x1ab   : > { %1189 = vst.msk [vmem:[#allocation2 + $0x150] sm:$0xff] %vm1167_vm7, %v1114_v47  ;;  %v1098_v23 = vpop.permute.xlu0 %1097  ;;  %v1559_v8 = vld [vmem:[#allocation2 + $0xc0] sm:$0xff]  ;;  %1885 = vmatmul.mubr.f32.gmra.mrb[8].mxu1 %v1575_v32 }
 0x1ac   : > { %1181 = vst.msk [vmem:[#allocation2 + $0xd0] sm:$0xff] %vm1167_vm7, %v1098_v23  ;;  %1845 = vmatmul.mubr.f32.gmra.mrb[24].mxu0 %v1559_v8  ;;  %1258 = vrot.lane.b32.xlu1 %v3881_v4, %s2821_s24 }
 0x1ad   : > { %729 = vrot.lane.b32.xlu0 %v3807_v35, %s2818_s11  ;;  %2696 = vmatprep.mubr.msk.f32.mxu1 %vm299_vm0, %v1578_v63 }
 0x1ae   : > { %v716_v40 = vpop.permute.xlu1 %715  ;;  %v1786_v41 = vpop.f32.mrb[0].mxu0  ;;  %2688 = vmatprep.mubr.msk.f32.mxu0 %vm299_vm0, %v1562_v60  ;;  %v1566_v60 = vld [vmem:[#allocation2 + $0xf8] sm:$0xff] }
 0x1af   : > { %790 = vst.msk [vmem:[#allocation2 + $0x160] sm:$0xff] %vm767_vm4, %v716_v40  ;;  %v700_v9 = vpop.permute.xlu0 %699  ;;  %v4120_v56 = vadd.f32 %v4106_v18, %v1786_v41  ;;  %v1788_v35 = vpop.f32.mrb[1].mxu0 }
 0x1b0   : > { %782 = vst.msk [vmem:[#allocation2 + $0xe0] sm:$0xff] %vm767_vm4, %v700_v9  ;;  %1393 = vrot.lane.b32.xlu1 %v934_v6, %s2822_s25 }
 0x1b1   : > { %5088 = vst [vmem:[#allocation11_spill] sm:$0xff] %v4120_v56  ;;  %1945 = vst.msk [vmem:[%s4115_s30] sm:$0xff] %vm299_vm0, %v4120_v56  ;;  %860 = vrot.lane.b32.xlu0 %v3790_v1, %s2817_s10  ;;  %v4144_v52 = vmul.f32 %v4120_v56, %v4120_v56 }
 0x1b2   : > { %v1245_v51 = vpop.permute.xlu1 %1244 }
 0x1b3   : > { %1320 = vst.msk [vmem:[#allocation2 + $0x150] sm:$0xff] %vm1298_vm8, %v1245_v51  ;;  %v1229_v61 = vpop.permute.xlu0 %1228  ;;  %v2149_v38 = vsel %vm1977_vm10, %v4144_v52, 0.0 }
 0x1b4   : > { %1312 = vst.msk [vmem:[#allocation2 + $0xd0] sm:$0xff] %vm1298_vm8, %v1229_v61  ;;  %521 = vrot.lane.b32.xlu1 %v4058_v15, %s2815_s23 }
 0x1b5   : > { %995 = vrot.lane.b32.xlu0 %v4082_v58, %s2820_s21 }
 0x1b6   : > { %v847_v21 = vpop.permute.xlu1 %846 }
 0x1b7   : > { %921 = vst.msk [vmem:[#allocation2 + $0x160] sm:$0xff] %vm898_vm5, %v847_v21  ;;  %v831_v57 = vpop.permute.xlu0 %830 }
 0x1b8   : > { %913 = vst.msk [vmem:[#allocation2 + $0xe0] sm:$0xff] %vm898_vm5, %v831_v57  ;;  %731 = vrot.lane.b32.xlu1 %v3833_v33, %s2818_s11 }
 0x1b9   : > { %1129 = vrot.lane.b32.xlu0 %v3867_v14, %s2819_s20 }
 0x1ba   : > { %v1380_v1 = vpop.permute.xlu1 %1379  ;;  %v1791_v12 = vpop.f32.mrb[2].mxu0 }
 0x1bb   : > { %1455 = vst.msk [vmem:[#allocation2 + $0x150] sm:$0xff] %vm1433_vm9, %v1380_v1  ;;  %v1364_v49 = vpop.permute.xlu0 %1363  ;;  %v4148_v43 = vadd.f32 %v4106_v18, %v1791_v12  ;;  %v1793_v44 = vpop.f32.mrb[3].mxu0 }
 0x1bc   : > { %1447 = vst.msk [vmem:[#allocation2 + $0xd0] sm:$0xff] %vm1433_vm9, %v1364_v49  ;;  %862 = vrot.lane.b32.xlu1 %v3881_v4, %s2817_s10 }
 0x1bd   : > { %1946 = vst.msk [vmem:[%s4115_s30 + $0x8] sm:$0xff] %vm299_vm0, %v4148_v43  ;;  %v4158_v33 = vmul.f32 %v4148_v43, %v4148_v43  ;;  %1260 = vrot.lane.b32.xlu0 %v3890_v10, %s2821_s24 }
 0x1be   : > { %v982_v62 = vpop.permute.xlu1 %981 }
 0x1bf   : > { %v2150_v4 = vsel %vm1977_vm10, %v4158_v33, 0.0  ;;  %1056 = vst.msk [vmem:[#allocation2 + $0x160] sm:$0xff] %vm1033_vm6, %v982_v62  ;;  %v966_v55 = vpop.permute.xlu0 %965 }
 0x1c0   : > { %v2151_v42 = vadd.f32 %v2150_v4, %v2149_v38  ;;  %1048 = vst.msk [vmem:[#allocation2 + $0xe0] sm:$0xff] %vm1033_vm6, %v966_v55  ;;  %997 = vrot.lane.b32.xlu1 %v934_v6, %s2820_s21  ;;  %v1584_v55 = vld [vmem:[#allocation2 + $0x188] sm:$0xff] }
 0x1c1   : > { %1395 = vrot.lane.b32.xlu0 %v936_v29, %s2822_s25 }
 0x1c2   : > { %v1116_v34 = vpop.permute.xlu1 %1115  ;;  %v1577_v3 = vld [vmem:[#allocation2 + $0x150] sm:$0xff] }
 0x1c3   : > { %1190 = vst.msk [vmem:[#allocation2 + $0x160] sm:$0xff] %vm1167_vm7, %v1116_v34  ;;  %v1100_v2 = vpop.permute.xlu0 %1099  ;;  %v1561_v25 = vld [vmem:[#allocation2 + $0xd0] sm:$0xff]  ;;  %1890 = vmatmul.mubr.f32.gmra.mrb[10].mxu1 %v1577_v3 }
 0x1c4   : > { %1182 = vst.msk [vmem:[#allocation2 + $0xe0] sm:$0xff] %vm1167_vm7, %v1100_v2  ;;  %1850 = vmatmul.mubr.f32.gmra.mrb[26].mxu0 %v1561_v25  ;;  %1131 = vrot.lane.b32.xlu1 %v3898_v11, %s2819_s20 }
 0x1c5   : > { %523 = vrot.lane.b32.xlu0 %v4082_v58, %s2815_s23  ;;  %2697 = vmatprep.mubr.msk.f32.mxu1 %vm299_vm0, %v1580_v22  ;;  %v1336_v58 = vsel %vm380_vm1, %v1333_v45, %v1335_v13  ;;  %s2823_s23 = smov 120  }
 0x1c6   : > { %v718_v59 = vpop.permute.xlu1 %717  ;;  %v1796_v48 = vpop.f32.mrb[4].mxu0  ;;  %2689 = vmatprep.mubr.msk.f32.mxu0 %vm299_vm0, %v1564_v27 }
 0x1c7   : > { %791 = vst.msk [vmem:[#allocation2 + $0x170] sm:$0xff] %vm767_vm4, %v718_v59  ;;  %v702_v30 = vpop.permute.xlu0 %701  ;;  %v4183_v15 = vadd.f32 %v4106_v18, %v1796_v48  ;;  %v1798_v11 = vpop.f32.mrb[5].mxu0 }
 0x1c8   : > { %783 = vst.msk [vmem:[#allocation2 + $0xf0] sm:$0xff] %vm767_vm4, %v702_v30  ;;  %1262 = vrot.lane.b32.xlu1 %v3912_v37, %s2821_s24 }
 0x1c9   : > { %5089 = vst [vmem:[#allocation8_spill] sm:$0xff] %v4183_v15  ;;  %1947 = vst.msk [vmem:[%s4115_s30 + $0x10] sm:$0xff] %vm299_vm0, %v4183_v15  ;;  %v4193_v54 = vmul.f32 %v4183_v15, %v4183_v15  ;;  %733 = vrot.lane.b32.xlu0 %v3867_v14, %s2818_s11 }
 0x1ca   : > { %v1247_v17 = vpop.permute.xlu1 %1246 }
 0x1cb   : > { %v2152_v5 = vsel %vm1977_vm10, %v4193_v54, 0.0  ;;  %1321 = vst.msk [vmem:[#allocation2 + $0x160] sm:$0xff] %vm1298_vm8, %v1247_v17  ;;  %v1231_v39 = vpop.permute.xlu0 %1230  ;;  %v1586_v17 = vld [vmem:[#allocation2 + $0x198] sm:$0xff] }
 0x1cc   : > { %v2153_v37 = vadd.f32 %v2152_v5, %v2151_v42  ;;  %1313 = vst.msk [vmem:[#allocation2 + $0xe0] sm:$0xff] %vm1298_vm8, %v1231_v39  ;;  %1397 = vrot.lane.b32.xlu1 %v1334_v28, %s2822_s25 }
 0x1cd   : > { %864 = vrot.lane.b32.xlu0 %v3890_v10, %s2817_s10 }
 0x1ce   : > { %v849_v14 = vpop.permute.xlu1 %848 }
 0x1cf   : > { %922 = vst.msk [vmem:[#allocation2 + $0x170] sm:$0xff] %vm898_vm5, %v849_v14  ;;  %v833_v36 = vpop.permute.xlu0 %832 }
 0x1d0   : > { %914 = vst.msk [vmem:[#allocation2 + $0xf0] sm:$0xff] %vm898_vm5, %v833_v36  ;;  %1133 = vrot.lane.b32.xlu1 %v3937_v0, %s2819_s20 }
 0x1d1   : > { %999 = vrot.lane.b32.xlu0 %v936_v29, %s2820_s21 }
 0x1d2   : > { %v1382_v7 = vpop.permute.xlu1 %1381  ;;  %v1801_v50 = vpop.f32.mrb[6].mxu0 }
 0x1d3   : > { %1456 = vst.msk [vmem:[#allocation2 + $0x160] sm:$0xff] %vm1433_vm9, %v1382_v7  ;;  %v1366_v10 = vpop.permute.xlu0 %1365  ;;  %v4214_v19 = vadd.f32 %v4106_v18, %v1801_v50  ;;  %v1803_v31 = vpop.f32.mrb[7].mxu0 }
 0x1d4   : > { %1448 = vst.msk [vmem:[#allocation2 + $0xe0] sm:$0xff] %vm1433_vm9, %v1366_v10  ;;  %1399 = vrot.lane.b32.xlu1 %v1336_v58, %s2822_s25  ;;  %v1588_v10 = vld [vmem:[#allocation2 + $0x1a8] sm:$0xff] }
 0x1d5   : > { %1948 = vst.msk [vmem:[%s4115_s30 + $0x18] sm:$0xff] %vm299_vm0, %v4214_v19  ;;  %v4223_v0 = vmul.f32 %v4214_v19, %v4214_v19  ;;  %1264 = vrot.lane.b32.xlu0 %v3915_v16, %s2821_s24  ;;  %v1582_v16 = vld [vmem:[#allocation2 + $0x178] sm:$0xff] }
 0x1d6   : > { %v984_v20 = vpop.permute.xlu1 %983 }
 0x1d7   : > { %v2154_v46 = vsel %vm1977_vm10, %v4223_v0, 0.0  ;;  %1057 = vst.msk [vmem:[#allocation2 + $0x170] sm:$0xff] %vm1033_vm6, %v984_v20  ;;  %v968_v24 = vpop.permute.xlu0 %967 }
 0x1d8   : > { %v2155_v47 = vadd.f32 %v2154_v46, %v2153_v37  ;;  %1049 = vst.msk [vmem:[#allocation2 + $0xf0] sm:$0xff] %vm1033_vm6, %v968_v24  ;;  %2321 = vrot.lane.b32.xlu1 %v4148_v43, %s2823_s23 }
 0x1d9   : > { %2319 = vrot.lane.b32.xlu0 %v4120_v56, %s2823_s23 }
 0x1da   : > { %v1118_v32 = vpop.permute.xlu1 %1117  ;;  %v1579_v63 = vld [vmem:[#allocation2 + $0x160] sm:$0xff] }
 0x1db   : > { %1191 = vst.msk [vmem:[#allocation2 + $0x170] sm:$0xff] %vm1167_vm7, %v1118_v32  ;;  %v1102_v23 = vpop.permute.xlu0 %1101  ;;  %v1563_v8 = vld [vmem:[#allocation2 + $0xe0] sm:$0xff]  ;;  %1895 = vmatmul.mubr.f32.gmra.mrb[12].mxu1 %v1579_v63 }
 0x1dc   : > { %1183 = vst.msk [vmem:[#allocation2 + $0xf0] sm:$0xff] %vm1167_vm7, %v1102_v23  ;;  %1855 = vmatmul.mubr.f32.gmra.mrb[28].mxu0 %v1563_v8  ;;  %2325 = vrot.lane.b32.xlu1 %v4214_v19, %s2823_s23 }
 0x1dd   : > { %2323 = vrot.lane.b32.xlu0 %v4183_v15, %s2823_s23  ;;  %2698 = vmatprep.mubr.msk.f32.mxu1 %vm299_vm0, %v1582_v16 }
 0x1de   : > { %v1233_v6 = vpop.permute.xlu1 %1232  ;;  %v1806_v40 = vpop.f32.mrb[8].mxu0  ;;  %2690 = vmatprep.mubr.msk.f32.mxu0 %vm299_vm0, %v1566_v60 }
 0x1df   : > { %1314 = vst.msk [vmem:[#allocation2 + $0xf0] sm:$0xff] %vm1298_vm8, %v1233_v6  ;;  %v720_v41 = vpop.permute.xlu0 %719  ;;  %v4245_v9 = vadd.f32 %v4106_v18, %v1806_v40  ;;  %v1808_v35 = vpop.f32.mrb[9].mxu0 }
 0x1e0   : > { %792 = vst.msk [vmem:[#allocation2 + $0x180] sm:$0xff] %vm767_vm4, %v720_v41  ;;  %v1590_v41 = vld [vmem:[#allocation2 + $0x1b8] sm:$0xff] }
 0x1e1   : > { %1949 = vst.msk [vmem:[%s4115_s30 + $0x20] sm:$0xff] %vm299_vm0, %v4245_v9  ;;  %v4253_v51 = vmul.f32 %v4245_v9, %v4245_v9  ;;  %2327 = vrot.lane.b32.xlu0 %v4245_v9, %s2823_s23 }
 0x1e2   : > { %v851_v61 = vpop.permute.xlu1 %850 }
 0x1e3   : > { %v2156_v21 = vsel %vm1977_vm10, %v4253_v51, 0.0  ;;  %923 = vst.msk [vmem:[#allocation2 + $0x180] sm:$0xff] %vm898_vm5, %v851_v61  ;;  %v1249_v57 = vpop.permute.xlu0 %1248 }
 0x1e4   : > { %v2157_v1 = vadd.f32 %v2156_v21, %v2155_v47  ;;  %1322 = vst.msk [vmem:[#allocation2 + $0x170] sm:$0xff] %vm1298_vm8, %v1249_v57 }
 0x1e6   : > { %v1384_v12 = vpop.permute.xlu1 %1383 }
 0x1e7   : > { %1457 = vst.msk [vmem:[#allocation2 + $0x170] sm:$0xff] %vm1433_vm9, %v1384_v12  ;;  %v1368_v53 = vpop.permute.xlu0 %1367 }
 0x1e8   : > { %1449 = vst.msk [vmem:[#allocation2 + $0xf0] sm:$0xff] %vm1433_vm9, %v1368_v53 }
 0x1ea   : > { %v1120_v49 = vpop.permute.xlu1 %1119  ;;  %v1811_v44 = vpop.f32.mrb[10].mxu0 }
 0x1eb   : > { %v986_v62 = vpop.permute.xlu0 %985  ;;  %v4264_v29 = vadd.f32 %v4106_v18, %v1811_v44  ;;  %v1813_v38 = vpop.f32.mrb[11].mxu0 }
 0x1ec   : > { %1058 = vst.msk [vmem:[#allocation2 + $0x180] sm:$0xff] %vm1033_vm6, %v986_v62 }
 0x1ed   : > { %5090 = vst [vmem:[#allocation12_spill] sm:$0xff] %v4264_v29  ;;  %1192 = vst.msk [vmem:[#allocation2 + $0x180] sm:$0xff] %vm1167_vm7, %v1120_v49  ;;  %v4273_v4 = vmul.f32 %v4264_v29, %v4264_v29  ;;  %2329 = vrot.lane.b32.xlu1 %v4264_v29, %s2823_s23  ;;  %v1592_v49 = vld [vmem:[#allocation2 + $0x1c8] sm:$0xff] }
 0x1ee   : > { %1950 = vst.msk [vmem:[%s4115_s30 + $0x28] sm:$0xff] %vm299_vm0, %v4264_v29  ;;  %v1251_v42 = vpop.permute.xlu1 %1250  ;;  %v1581_v34 = vld [vmem:[#allocation2 + $0x170] sm:$0xff] }
 0x1ef   : > { %v2158_v3 = vsel %vm1977_vm10, %v4273_v4, 0.0  ;;  %1323 = vst.msk [vmem:[#allocation2 + $0x180] sm:$0xff] %vm1298_vm8, %v1251_v42  ;;  %v722_v22 = vpop.permute.xlu0 %721  ;;  %v1565_v2 = vld [vmem:[#allocation2 + $0xf0] sm:$0xff]  ;;  %1900 = vmatmul.mubr.f32.gmra.mrb[14].mxu1 %v1581_v34 }
 0x1f0   : > { %v2159_v25 = vadd.f32 %v2158_v3, %v2157_v1  ;;  %793 = vst.msk [vmem:[#allocation2 + $0x190] sm:$0xff] %vm767_vm4, %v722_v22  ;;  %1860 = vmatmul.mubr.f32.gmra.mrb[30].mxu0 %v1565_v2  ;;  %2699 = vmatprep.mubr.msk.f32.mxu1 %vm299_vm0, %v1584_v55 }
 0x1f2   : > { %v1386_v27 = vpop.permute.xlu1 %1385 }
 0x1f3   : > { %1458 = vst.msk [vmem:[#allocation2 + $0x180] sm:$0xff] %vm1433_vm9, %v1386_v27  ;;  %v853_v26 = vpop.permute.xlu0 %852 }
 0x1f4   : > { %924 = vst.msk [vmem:[#allocation2 + $0x190] sm:$0xff] %vm898_vm5, %v853_v26 }
 0x1f6   : > { %v1122_v45 = vpop.permute.xlu1 %1121  ;;  %v1816_v59 = vpop.f32.mrb[12].mxu0 }
 0x1f7   : > { %v988_v48 = vpop.permute.xlu0 %987  ;;  %v4285_v30 = vadd.f32 %v4106_v18, %v1816_v59  ;;  %v1818_v11 = vpop.f32.mrb[13].mxu0 }
 0x1f8   : > { %1059 = vst.msk [vmem:[#allocation2 + $0x190] sm:$0xff] %vm1033_vm6, %v988_v48 }
 0x1f9   : > { %1193 = vst.msk [vmem:[#allocation2 + $0x190] sm:$0xff] %vm1167_vm7, %v1122_v45  ;;  %v4294_v28 = vmul.f32 %v4285_v30, %v4285_v30  ;;  %2331 = vrot.lane.b32.xlu0 %v4285_v30, %s2823_s23 }
 0x1fa   : > { %1951 = vst.msk [vmem:[%s4115_s30 + $0x30] sm:$0xff] %vm299_vm0, %v4285_v30  ;;  %v1253_v5 = vpop.permute.xlu1 %1252  ;;  %v1583_v39 = vld [vmem:[#allocation2 + $0x180] sm:$0xff] }
 0x1fb   : > { %v2160_v37 = vsel %vm1977_vm10, %v4294_v28, 0.0  ;;  %1324 = vst.msk [vmem:[#allocation2 + $0x190] sm:$0xff] %vm1298_vm8, %v1253_v5  ;;  %v724_v13 = vpop.permute.xlu0 %723  ;;  %1905 = vmatmul.mubr.f32.gmra.mrb[16].mxu1 %v1583_v39 }
 0x1fc   : > { %v2161_v14 = vadd.f32 %v2160_v37, %v2159_v25  ;;  %794 = vst.msk [vmem:[#allocation2 + $0x1a0] sm:$0xff] %vm767_vm4, %v724_v13  ;;  %2700 = vmatprep.mubr.msk.f32.mxu1 %vm299_vm0, %v1586_v17  ;;  %v1594_v17 = vld [vmem:[#allocation2 + $0x1d8] sm:$0xff] }
 0x1fe   : > { %v1388_v36 = vpop.permute.xlu1 %1387 }
 0x1ff   : > { %1459 = vst.msk [vmem:[#allocation2 + $0x190] sm:$0xff] %vm1433_vm9, %v1388_v36  ;;  %v855_v58 = vpop.permute.xlu0 %854 }
 0x200   : > { %925 = vst.msk [vmem:[#allocation2 + $0x1a0] sm:$0xff] %vm898_vm5, %v855_v58 }
 0x202   : > { %v1124_v7 = vpop.permute.xlu1 %1123 }
 0x203   : > { %v990_v50 = vpop.permute.xlu0 %989 }
 0x204   : > { %1060 = vst.msk [vmem:[#allocation2 + $0x1a0] sm:$0xff] %vm1033_vm6, %v990_v50 }
 0x205   : > { %1194 = vst.msk [vmem:[#allocation2 + $0x1a0] sm:$0xff] %vm1167_vm7, %v1124_v7 }
 0x206   : > { %v1255_v31 = vpop.permute.xlu1 %1254  ;;  %v1821_v20 = vpop.f32.mrb[14].mxu0  ;;  %v1585_v46 = vld [vmem:[#allocation2 + $0x190] sm:$0xff] }
 0x207   : > { %1325 = vst.msk [vmem:[#allocation2 + $0x1a0] sm:$0xff] %vm1298_vm8, %v1255_v31  ;;  %v726_v24 = vpop.permute.xlu0 %725  ;;  %v4309_v47 = vadd.f32 %v4106_v18, %v1821_v20  ;;  %v1823_v32 = vpop.f32.mrb[15].mxu0  ;;  %1910 = vmatmul.mubr.f32.gmra.mrb[18].mxu1 %v1585_v46 }
 0x208   : > { %795 = vst.msk [vmem:[#allocation2 + $0x1b0] sm:$0xff] %vm767_vm4, %v726_v24  ;;  %2701 = vmatprep.mubr.msk.f32.mxu1 %vm299_vm0, %v1588_v10 }
 0x209   : > { %1952 = vst.msk [vmem:[%s4115_s30 + $0x38] sm:$0xff] %vm299_vm0, %v4309_v47  ;;  %v4318_v63 = vmul.f32 %v4309_v47, %v4309_v47  ;;  %2333 = vrot.lane.b32.xlu1 %v4309_v47, %s2823_s23 }
 0x20a   : > { %v1390_v16 = vpop.permute.xlu1 %1389 }
 0x20b   : > { %v2162_v23 = vsel %vm1977_vm10, %v4318_v63, 0.0  ;;  %1460 = vst.msk [vmem:[#allocation2 + $0x1a0] sm:$0xff] %vm1433_vm9, %v1390_v16  ;;  %v857_v8 = vpop.permute.xlu0 %856 }
 0x20c   : > { %v2163_v60 = vadd.f32 %v2162_v23, %v2161_v14  ;;  %926 = vst.msk [vmem:[#allocation2 + $0x1b0] sm:$0xff] %vm898_vm5, %v857_v8  ;;  %v1596_v8 = vld [vmem:[#allocation2 + $0x1e8] sm:$0xff] }
 0x20e   : > { %v1126_v6 = vpop.permute.xlu1 %1125 }
 0x20f   : > { %v992_v40 = vpop.permute.xlu0 %991 }
 0x210   : > { %1061 = vst.msk [vmem:[#allocation2 + $0x1b0] sm:$0xff] %vm1033_vm6, %v992_v40 }
 0x211   : > { %1195 = vst.msk [vmem:[#allocation2 + $0x1b0] sm:$0xff] %vm1167_vm7, %v1126_v6 }
 0x212   : > { %v1257_v35 = vpop.permute.xlu1 %1256  ;;  %v1587_v61 = vld [vmem:[#allocation2 + $0x1a0] sm:$0xff] }
 0x213   : > { %1326 = vst.msk [vmem:[#allocation2 + $0x1b0] sm:$0xff] %vm1298_vm8, %v1257_v35  ;;  %v728_v21 = vpop.permute.xlu0 %727  ;;  %1915 = vmatmul.mubr.f32.gmra.mrb[20].mxu1 %v1587_v61 }
 0x214   : > { %796 = vst.msk [vmem:[#allocation2 + $0x1c0] sm:$0xff] %vm767_vm4, %v728_v21  ;;  %2702 = vmatprep.mubr.msk.f32.mxu1 %vm299_vm0, %v1590_v41 }
 0x216   : > { %v1392_v57 = vpop.permute.xlu1 %1391 }
 0x217   : > { %1461 = vst.msk [vmem:[#allocation2 + $0x1b0] sm:$0xff] %vm1433_vm9, %v1392_v57  ;;  %v859_v1 = vpop.permute.xlu0 %858 }
 0x218   : > { %927 = vst.msk [vmem:[#allocation2 + $0x1c0] sm:$0xff] %vm898_vm5, %v859_v1  ;;  %v1598_v1 = vld [vmem:[#allocation2 + $0x1f8] sm:$0xff] }
 0x21a   : > { %v1128_v12 = vpop.permute.xlu1 %1127 }
 0x21b   : > { %v994_v53 = vpop.permute.xlu0 %993 }
 0x21c   : > { %1062 = vst.msk [vmem:[#allocation2 + $0x1c0] sm:$0xff] %vm1033_vm6, %v994_v53 }
 0x21d   : > { %1196 = vst.msk [vmem:[#allocation2 + $0x1c0] sm:$0xff] %vm1167_vm7, %v1128_v12 }
 0x21e   : > { %v1259_v44 = vpop.permute.xlu1 %1258  ;;  %v1866_v62 = vpop.f32.mrb[0].mxu1  ;;  %v1589_v38 = vld [vmem:[#allocation2 + $0x1b0] sm:$0xff] }
 0x21f   : > { %1327 = vst.msk [vmem:[#allocation2 + $0x1c0] sm:$0xff] %vm1298_vm8, %v1259_v44  ;;  %v4337_v55 = vadd.f32 %v4106_v18, %v1866_v62  ;;  %v730_v42 = vpop.permute.xlu0 %729  ;;  %v1826_v34 = vpop.f32.mrb[16].mxu0  ;;  %1920 = vmatmul.mubr.f32.gmra.mrb[22].mxu1 %v1589_v38 }
 0x220   : > { %797 = vst.msk [vmem:[#allocation2 + $0x1d0] sm:$0xff] %vm767_vm4, %v730_v42  ;;  %v4341_v3 = vadd.f32 %v4106_v18, %v1826_v34  ;;  %v1828_v22 = vpop.f32.mrb[17].mxu0  ;;  %v1868_v2 = vpop.f32.mrb[1].mxu1  ;;  %2703 = vmatprep.mubr.msk.f32.mxu1 %vm299_vm0, %v1592_v49 }
 0x221   : > { %1961 = vst.msk [vmem:[%s4115_s30 + $0x80] sm:$0xff] %vm299_vm0, %v4337_v55 }
 0x222   : > { %1953 = vst.msk [vmem:[%s4115_s30 + $0x40] sm:$0xff] %vm299_vm0, %v4341_v3  ;;  %v4352_v25 = vmul.f32 %v4341_v3, %v4341_v3  ;;  %2335 = vrot.lane.b32.xlu0 %v4341_v3, %s2823_s23  ;;  %v1394_v27 = vpop.permute.xlu1 %1393 }
 0x223   : > { %1462 = vst.msk [vmem:[#allocation2 + $0x1c0] sm:$0xff] %vm1433_vm9, %v1394_v27  ;;  %v861_v26 = vpop.permute.xlu0 %860 }
 0x224   : > { %v2164_v45 = vsel %vm1977_vm10, %v4352_v25, 0.0  ;;  %928 = vst.msk [vmem:[#allocation2 + $0x1d0] sm:$0xff] %vm898_vm5, %v861_v26 }
 0x225   : > { %v2165_v59 = vadd.f32 %v2164_v45, %v2163_v60 }
 0x226   : > { %v522_v48 = vpop.permute.xlu1 %521 }
 0x227   : > { %588 = vst.msk [vmem:[#allocation2 + $0x1e0] sm:$0xff] %vm557_vm3, %v522_v48  ;;  %v996_v11 = vpop.permute.xlu0 %995 }
 0x228   : > { %1063 = vst.msk [vmem:[#allocation2 + $0x1d0] sm:$0xff] %vm1033_vm6, %v996_v11 }
 0x22a   : > { %v732_v5 = vpop.permute.xlu1 %731  ;;  %v1591_v39 = vld [vmem:[#allocation2 + $0x1c0] sm:$0xff] }
 0x22b   : > { %798 = vst.msk [vmem:[#allocation2 + $0x1e0] sm:$0xff] %vm767_vm4, %v732_v5  ;;  %v1130_v37 = vpop.permute.xlu0 %1129  ;;  %1925 = vmatmul.mubr.f32.gmra.mrb[24].mxu1 %v1591_v39 }
 0x22c   : > { %1197 = vst.msk [vmem:[#allocation2 + $0x1d0] sm:$0xff] %vm1167_vm7, %v1130_v37  ;;  %2704 = vmatprep.mubr.msk.f32.mxu1 %vm299_vm0, %v1594_v17 }
 0x22e   : > { %v863_v13 = vpop.permute.xlu1 %862 }
 0x22f   : > { %929 = vst.msk [vmem:[#allocation2 + $0x1e0] sm:$0xff] %vm898_vm5, %v863_v13  ;;  %v1261_v14 = vpop.permute.xlu0 %1260 }
 0x230   : > { %1328 = vst.msk [vmem:[#allocation2 + $0x1d0] sm:$0xff] %vm1298_vm8, %v1261_v14 }
 0x232   : > { %v998_v36 = vpop.permute.xlu1 %997 }
 0x233   : > { %1064 = vst.msk [vmem:[#allocation2 + $0x1e0] sm:$0xff] %vm1033_vm6, %v998_v36  ;;  %v1396_v58 = vpop.permute.xlu0 %1395 }
 0x234   : > { %1463 = vst.msk [vmem:[#allocation2 + $0x1d0] sm:$0xff] %vm1433_vm9, %v1396_v58 }
 0x236   : > { %v1132_v7 = vpop.permute.xlu1 %1131  ;;  %v1871_v50 = vpop.f32.mrb[2].mxu1 }
 0x237   : > { %1198 = vst.msk [vmem:[#allocation2 + $0x1e0] sm:$0xff] %vm1167_vm7, %v1132_v7  ;;  %v4371_v10 = vadd.f32 %v4106_v18, %v1871_v50  ;;  %v524_v31 = vpop.permute.xlu0 %523  ;;  %v1831_v20 = vpop.f32.mrb[18].mxu0 }
 0x238   : > { %589 = vst.msk [vmem:[#allocation2 + $0x1f0] sm:$0xff] %vm557_vm3, %v524_v31  ;;  %v4375_v46 = vadd.f32 %v4106_v18, %v1831_v20  ;;  %v1833_v24 = vpop.f32.mrb[19].mxu0  ;;  %v1873_v32 = vpop.f32.mrb[3].mxu1 }
 0x239   : > { %1962 = vst.msk [vmem:[%s4115_s30 + $0x88] sm:$0xff] %vm299_vm0, %v4371_v10 }
 0x23a   : > { %1954 = vst.msk [vmem:[%s4115_s30 + $0x48] sm:$0xff] %vm299_vm0, %v4375_v46  ;;  %v4385_v16 = vmul.f32 %v4375_v46, %v4375_v46  ;;  %2337 = vrot.lane.b32.xlu1 %v4375_v46, %s2823_s23  ;;  %v1263_v23 = vpop.permute.xlu1 %1262 }
 0x23b   : > { %1329 = vst.msk [vmem:[#allocation2 + $0x1e0] sm:$0xff] %vm1298_vm8, %v1263_v23  ;;  %v734_v60 = vpop.permute.xlu0 %733  ;;  %v1593_v6 = vld [vmem:[#allocation2 + $0x1d0] sm:$0xff] }
 0x23c   : > { %v2166_v40 = vsel %vm1977_vm10, %v4385_v16, 0.0  ;;  %799 = vst.msk [vmem:[#allocation2 + $0x1f0] sm:$0xff] %vm767_vm4, %v734_v60  ;;  %1930 = vmatmul.mubr.f32.gmra.mrb[26].mxu1 %v1593_v6 }
 0x23d   : > { %v2167_v41 = vadd.f32 %v2166_v40, %v2165_v59  ;;  %2705 = vmatprep.mubr.msk.f32.mxu1 %vm299_vm0, %v1596_v8 }
 0x23e   : > { %v1398_v35 = vpop.permute.xlu1 %1397 }
 0x23f   : > { %1464 = vst.msk [vmem:[#allocation2 + $0x1e0] sm:$0xff] %vm1433_vm9, %v1398_v35  ;;  %v865_v61 = vpop.permute.xlu0 %864 }
 0x240   : > { %930 = vst.msk [vmem:[#allocation2 + $0x1f0] sm:$0xff] %vm898_vm5, %v865_v61 }
 0x242   : > { %v1134_v21 = vpop.permute.xlu1 %1133 }
 0x243   : > { %v1000_v57 = vpop.permute.xlu0 %999 }
 0x244   : > { %1065 = vst.msk [vmem:[#allocation2 + $0x1f0] sm:$0xff] %vm1033_vm6, %v1000_v57 }
 0x245   : > { %1199 = vst.msk [vmem:[#allocation2 + $0x1f0] sm:$0xff] %vm1167_vm7, %v1134_v21 }
 0x246   : > { %v1400_v12 = vpop.permute.xlu1 %1399  ;;  %v1595_v53 = vld [vmem:[#allocation2 + $0x1e0] sm:$0xff] }
 0x247   : > { %v1265_v49 = vpop.permute.xlu0 %1264  ;;  %1935 = vmatmul.mubr.f32.gmra.mrb[28].mxu1 %v1595_v53 }
 0x248   : > { %1330 = vst.msk [vmem:[#allocation2 + $0x1f0] sm:$0xff] %vm1298_vm8, %v1265_v49  ;;  %2706 = vmatprep.mubr.msk.f32.mxu1 %vm299_vm0, %v1598_v1 }
 0x249   : > { %1465 = vst.msk [vmem:[#allocation2 + $0x1f0] sm:$0xff] %vm1433_vm9, %v1400_v12 }
 0x24e   : > { %v1876_v44 = vpop.f32.mrb[4].mxu1 }
 0x24f   : > { %v1836_v62 = vpop.f32.mrb[20].mxu0  ;;  %v4402_v38 = vadd.f32 %v4106_v18, %v1876_v44  ;;  %v1878_v22 = vpop.f32.mrb[5].mxu1 }
 0x250   : > { %v4405_v42 = vadd.f32 %v4106_v18, %v1836_v62  ;;  %v1838_v34 = vpop.f32.mrb[21].mxu0  ;;  %v1597_v2 = vld [vmem:[#allocation2 + $0x1f0] sm:$0xff] }
 0x251   : > { %1963 = vst.msk [vmem:[%s4115_s30 + $0x90] sm:$0xff] %vm299_vm0, %v4402_v38  ;;  %1940 = vmatmul.mubr.f32.gmra.mrb[30].mxu1 %v1597_v2 }
 0x252   : > { %1955 = vst.msk [vmem:[%s4115_s30 + $0x50] sm:$0xff] %vm299_vm0, %v4405_v42  ;;  %v4415_v27 = vmul.f32 %v4405_v42, %v4405_v42  ;;  %2339 = vrot.lane.b32.xlu0 %v4405_v42, %s2823_s23 }
 0x254   : > { %v2168_v26 = vsel %vm1977_vm10, %v4415_v27, 0.0 }
 0x255   : > { %v2169_v45 = vadd.f32 %v2168_v26, %v2167_v41 }
 0x266   : > { %v1881_v59 = vpop.f32.mrb[6].mxu1 }
 0x267   : > { %v1841_v48 = vpop.f32.mrb[22].mxu0  ;;  %v4422_v11 = vadd.f32 %v4106_v18, %v1881_v59  ;;  %v1883_v17 = vpop.f32.mrb[7].mxu1 }
 0x268   : > { %v4425_v5 = vadd.f32 %v4106_v18, %v1841_v48  ;;  %v1843_v39 = vpop.f32.mrb[23].mxu0 }
 0x269   : > { %1964 = vst.msk [vmem:[%s4115_s30 + $0x98] sm:$0xff] %vm299_vm0, %v4422_v11 }
 0x26a   : > { %1956 = vst.msk [vmem:[%s4115_s30 + $0x58] sm:$0xff] %vm299_vm0, %v4425_v5  ;;  %v4435_v37 = vmul.f32 %v4425_v5, %v4425_v5  ;;  %2341 = vrot.lane.b32.xlu1 %v4425_v5, %s2823_s23 }
 0x26c   : > { %v2170_v13 = vsel %vm1977_vm10, %v4435_v37, 0.0 }
 0x26d   : > { %v2171_v14 = vadd.f32 %v2170_v13, %v2169_v45  ;;  %v4520_v13 = vmul.f32 %v4337_v55, %v4337_v55 }
 0x27e   : > { %v1886_v36 = vpop.f32.mrb[8].mxu1 }
 0x27f   : > { %v1846_v58 = vpop.f32.mrb[24].mxu0  ;;  %v4442_v7 = vadd.f32 %v4106_v18, %v1886_v36  ;;  %v1888_v50 = vpop.f32.mrb[9].mxu1  ;;  %v4533_v36 = vmul.f32 %v4371_v10, %v4371_v10 }
 0x280   : > { %v4445_v31 = vadd.f32 %v4106_v18, %v1846_v58  ;;  %v1848_v20 = vpop.f32.mrb[25].mxu0 }
 0x281   : > { %1965 = vst.msk [vmem:[%s4115_s30 + $0xa0] sm:$0xff] %vm299_vm0, %v4442_v7  ;;  %v2180_v20 = vsel %vm1977_vm10, %v4520_v13, 0.0 }
 0x282   : > { %1957 = vst.msk [vmem:[%s4115_s30 + $0x60] sm:$0xff] %vm299_vm0, %v4445_v31  ;;  %v4455_v24 = vmul.f32 %v4445_v31, %v4445_v31  ;;  %2343 = vrot.lane.b32.xlu0 %v4445_v31, %s2823_s23 }
 0x284   : > { %v2172_v32 = vsel %vm1977_vm10, %v4455_v24, 0.0 }
 0x285   : > { %v2173_v23 = vadd.f32 %v2172_v32, %v2171_v14  ;;  %v4541_v32 = vmul.f32 %v4402_v38, %v4402_v38 }
 0x296   : > { %v1891_v8 = vpop.f32.mrb[10].mxu1 }
 0x297   : > { %v1851_v60 = vpop.f32.mrb[26].mxu0  ;;  %v4462_v6 = vadd.f32 %v4106_v18, %v1891_v8  ;;  %v1893_v40 = vpop.f32.mrb[11].mxu1  ;;  %v2182_v8 = vsel %vm1977_vm10, %v4533_v36, 0.0 }
 0x298   : > { %v4465_v41 = vadd.f32 %v4106_v18, %v1851_v60  ;;  %v1853_v35 = vpop.f32.mrb[27].mxu0  ;;  %v4549_v60 = vmul.f32 %v4422_v11, %v4422_v11 }
 0x299   : > { %1966 = vst.msk [vmem:[%s4115_s30 + $0xa8] sm:$0xff] %vm299_vm0, %v4462_v6  ;;  %v2184_v35 = vsel %vm1977_vm10, %v4541_v32, 0.0 }
 0x29a   : > { %1958 = vst.msk [vmem:[%s4115_s30 + $0x68] sm:$0xff] %vm299_vm0, %v4465_v41  ;;  %v4475_v61 = vmul.f32 %v4465_v41, %v4465_v41  ;;  %2345 = vrot.lane.b32.xlu1 %v4465_v41, %s2823_s23 }
 0x29c   : > { %v2174_v21 = vsel %vm1977_vm10, %v4475_v61, 0.0 }
 0x29d   : > { %v2175_v57 = vadd.f32 %v2174_v21, %v2173_v23  ;;  %v4555_v21 = vmul.f32 %v4442_v7, %v4442_v7 }
 0x2ae   : > { %v1896_v1 = vpop.f32.mrb[12].mxu1 }
 0x2af   : > { %v1856_v12 = vpop.f32.mrb[28].mxu0  ;;  %v4482_v53 = vadd.f32 %v4106_v18, %v1896_v1  ;;  %v1898_v49 = vpop.f32.mrb[13].mxu1 }
 0x2b0   : > { %v4485_v44 = vadd.f32 %v4106_v18, %v1856_v12  ;;  %v1858_v62 = vpop.f32.mrb[29].mxu0  ;;  %v2186_v49 = vsel %vm1977_vm10, %v4549_v60, 0.0 }
 0x2b1   : > { %1967 = vst.msk [vmem:[%s4115_s30 + $0xb0] sm:$0xff] %vm299_vm0, %v4482_v53  ;;  %v4563_v62 = vmul.f32 %v4462_v6, %v4462_v6 }
 0x2b2   : > { %1959 = vst.msk [vmem:[%s4115_s30 + $0x70] sm:$0xff] %vm299_vm0, %v4485_v44  ;;  %v4495_v34 = vmul.f32 %v4485_v44, %v4485_v44  ;;  %2347 = vrot.lane.b32.xlu0 %v4485_v44, %s2823_s23 }
 0x2b4   : > { %v2176_v22 = vsel %vm1977_vm10, %v4495_v34, 0.0 }
 0x2b5   : > { %v2177_v2 = vadd.f32 %v2176_v22, %v2175_v57 }
 0x2b6   : > { %2351 = vrot.lane.b32.xlu0 %v4337_v55, %s2823_s23 }
 0x2ba   : > { %2355 = vrot.lane.b32.xlu0 %v4402_v38, %s2823_s23 }
 0x2be   : > { %2359 = vrot.lane.b32.xlu0 %v4442_v7, %s2823_s23 }
 0x2c2   : > { %2363 = vrot.lane.b32.xlu0 %v4482_v53, %s2823_s23  ;;  %v1901_v26 = vpop.f32.mrb[14].mxu1 }
 0x2c3   : > { %v1861_v45 = vpop.f32.mrb[30].mxu0  ;;  %v4510_v59 = vadd.f32 %v4106_v18, %v1901_v26  ;;  %v1903_v48 = vpop.f32.mrb[15].mxu1  ;;  %v2188_v26 = vsel %vm1977_vm10, %v4555_v21, 0.0 }
 0x2c4   : > { %v4513_v17 = vadd.f32 %v4106_v18, %v1861_v45  ;;  %v1863_v39 = vpop.f32.mrb[31].mxu0  ;;  %v4572_v45 = vmul.f32 %v4482_v53, %v4482_v53 }
 0x2c5   : > { %1968 = vst.msk [vmem:[%s4115_s30 + $0xb8] sm:$0xff] %vm299_vm0, %v4510_v59  ;;  %v2190_v39 = vsel %vm1977_vm10, %v4563_v62, 0.0 }
 0x2c6   : > { %1960 = vst.msk [vmem:[%s4115_s30 + $0x78] sm:$0xff] %vm299_vm0, %v4513_v17  ;;  %v4527_v14 = vmul.f32 %v4513_v17, %v4513_v17  ;;  %2349 = vrot.lane.b32.xlu1 %v4513_v17, %s2823_s23 }
 0x2c8   : > { %v2178_v58 = vsel %vm1977_vm10, %v4527_v14, 0.0 }
 0x2c9   : > { %v2179_v50 = vadd.f32 %v2178_v58, %v2177_v2  ;;  %v4585_v58 = vmul.f32 %v4510_v59, %v4510_v59 }
 0x2ca   : > { %2353 = vrot.lane.b32.xlu1 %v4371_v10, %s2823_s23 }
 0x2cb   : > { %v2181_v23 = vadd.f32 %v2180_v20, %v2179_v50  ;;  %v2192_v20 = vsel %vm1977_vm10, %v4572_v45, 0.0 }
 0x2cd   : > { %v2183_v40 = vadd.f32 %v2182_v8, %v2181_v23  ;;  %v2049_v8 = vsel %vm2047_vm11, %v4148_v43, 0.0 }
 0x2ce   : > { %2357 = vrot.lane.b32.xlu1 %v4422_v11, %s2823_s23  ;;  %v1906_v57 = vpop.f32.mrb[16].mxu1 }
 0x2cf   : > { %v2185_v1 = vadd.f32 %v2184_v35, %v2183_v40  ;;  %v1908_v12 = vpop.f32.mrb[17].mxu1  ;;  %v4566_v22 = vadd.f32 %v4106_v18, %v1906_v57  ;;  %v2194_v35 = vsel %vm1977_vm10, %v4585_v58, 0.0  ;;  %v2048_v57 = vsel %vm2047_vm11, %v4120_v56, 0.0 }
 0x2d0   : > { %v2051_v12 = vsel %vm2047_vm11, %v4183_v15, 0.0 }
 0x2d1   : > { %v2187_v2 = vadd.f32 %v2186_v49, %v2185_v1  ;;  %1969 = vst.msk [vmem:[%s4115_s30 + $0xc0] sm:$0xff] %vm299_vm0, %v4566_v22  ;;  %2367 = vrot.lane.b32.xlu0 %v4566_v22, %s2823_s23  ;;  %v4591_v23 = vmul.f32 %v4566_v22, %v4566_v22  ;;  %v2219_v1 = vsel %vm2047_vm11, %v4158_v33, 0.0 }
 0x2d2   : > { %2361 = vrot.lane.b32.xlu1 %v4462_v6, %s2823_s23 }
 0x2d3   : > { %v2189_v48 = vadd.f32 %v2188_v26, %v2187_v2  ;;  %v2218_v2 = vsel %vm2047_vm11, %v4144_v52, 0.0  ;;  %v2050_v26 = vadd.f32 %v2049_v8, %v2048_v57  ;;  %v2223_v52 = vsel %vm2047_vm11, %v4223_v0, 0.0 }
 0x2d4   : > { %v2055_v8 = vsel %vm2047_vm11, %v4245_v9, 0.0  ;;  %v2057_v0 = vsel %vm2047_vm11, %v4264_v29, 0.0 }
 0x2d5   : > { %v2191_v50 = vadd.f32 %v2190_v39, %v2189_v48  ;;  %v2196_v48 = vsel %vm1977_vm10, %v4591_v23, 0.0 }
 0x2d6   : > { %2365 = vrot.lane.b32.xlu1 %v4510_v59, %s2823_s23 }
 0x2d7   : > { %v2193_v40 = vadd.f32 %v2192_v20, %v2191_v50  ;;  %v2221_v50 = vsel %vm2047_vm11, %v4193_v54, 0.0  ;;  %v2053_v20 = vsel %vm2047_vm11, %v4214_v19, 0.0 }
 0x2d9   : > { %v2195_v49 = vadd.f32 %v2194_v35, %v2193_v40  ;;  %v2220_v40 = vadd.f32 %v2219_v1, %v2218_v2  ;;  %v2052_v35 = vadd.f32 %v2051_v12, %v2050_v26  ;;  %v2225_v1 = vsel %vm2047_vm11, %v4253_v51, 0.0 }
 0x2da   : > { %v1911_v39 = vpop.f32.mrb[18].mxu1  ;;  %v2229_v51 = vsel %vm2047_vm11, %v4294_v28, 0.0  ;;  %v2065_v28 = vsel %vm2047_vm11, %v4375_v46, 0.0 }
 0x2db   : > { %v2197_v33 = vadd.f32 %v2196_v48, %v2195_v49  ;;  %v4614_v56 = vadd.f32 %v4106_v18, %v1911_v39  ;;  %v1913_v15 = vpop.f32.mrb[19].mxu1  ;;  %v2222_v57 = vadd.f32 %v2221_v50, %v2220_v40  ;;  %v2227_v48 = vsel %vm2047_vm11, %v4273_v4, 0.0 }
 0x2dc   : > { %v2054_v15 = vadd.f32 %v2053_v20, %v2052_v35  ;;  %v2059_v39 = vsel %vm2047_vm11, %v4285_v30, 0.0  ;;  %v2061_v40 = vsel %vm2047_vm11, %v4309_v47, 0.0  ;;  %v2063_v4 = vsel %vm2047_vm11, %v4341_v3, 0.0 }
 0x2dd   : > { %1970 = vst.msk [vmem:[%s4115_s30 + $0xc8] sm:$0xff] %vm299_vm0, %v4614_v56  ;;  %v4625_v54 = vmul.f32 %v4614_v56, %v4614_v56  ;;  %2369 = vrot.lane.b32.xlu1 %v4614_v56, %s2823_s23  ;;  %v2224_v49 = vadd.f32 %v2223_v52, %v2222_v57 }
 0x2de   : > { %v2056_v2 = vadd.f32 %v2055_v8, %v2054_v15  ;;  %v2233_v15 = vsel %vm2047_vm11, %v4352_v25, 0.0 }
 0x2df   : > { %v2198_v12 = vsel %vm1977_vm10, %v4625_v54, 0.0  ;;  %v2226_v50 = vadd.f32 %v2225_v1, %v2224_v49 }
 0x2e0   : > { %v2199_v26 = vadd.f32 %v2198_v12, %v2197_v33  ;;  %v2058_v20 = vadd.f32 %v2057_v0, %v2056_v2  ;;  %v2231_v33 = vsel %vm2047_vm11, %v4318_v63, 0.0  ;;  %v2235_v63 = vsel %vm2047_vm11, %v4385_v16, 0.0 }
 0x2e1   : > { %v2228_v35 = vadd.f32 %v2227_v48, %v2226_v50  ;;  %v2067_v2 = vsel %vm2047_vm11, %v4405_v42, 0.0  ;;  %v2237_v48 = vsel %vm2047_vm11, %v4415_v27, 0.0  ;;  %v2069_v16 = vsel %vm2047_vm11, %v4425_v5, 0.0 }
 0x2e2   : > { %v2060_v29 = vadd.f32 %v2059_v39, %v2058_v20  ;;  %v2241_v27 = vsel %vm2047_vm11, %v4455_v24, 0.0  ;;  %v2077_v24 = vsel %vm2047_vm11, %v4513_v17, 0.0 }
 0x2e3   : > { %v2230_v52 = vadd.f32 %v2229_v51, %v2228_v35  ;;  %v2071_v35 = vsel %vm2047_vm11, %v4445_v31, 0.0 }
 0x2e4   : > { %v2062_v8 = vadd.f32 %v2061_v40, %v2060_v29  ;;  %v2239_v40 = vsel %vm2047_vm11, %v4435_v37, 0.0  ;;  %v2075_v37 = vsel %vm2047_vm11, %v4485_v44, 0.0 }
 0x2e5   : > { %v2232_v12 = vadd.f32 %v2231_v33, %v2230_v52  ;;  %v2073_v52 = vsel %vm2047_vm11, %v4465_v41, 0.0 }
 0x2e6   : > { %v1916_v57 = vpop.f32.mrb[20].mxu1  ;;  %v2064_v49 = vadd.f32 %v2063_v4, %v2062_v8 }
 0x2e7   : > { %v4652_v1 = vadd.f32 %v4106_v18, %v1916_v57  ;;  %v1918_v0 = vpop.f32.mrb[21].mxu1  ;;  %v2234_v18 = vadd.f32 %v2233_v15, %v2232_v12  ;;  %v2245_v12 = vsel %vm2047_vm11, %v4495_v34, 0.0 }
 0x2e8   : > { %v2066_v25 = vadd.f32 %v2065_v28, %v2064_v49  ;;  %v4692_v49 = vld [vmem:[%s4970_s2] ss:$0 sm:$0xff] }
 0x2e9   : > { %1971 = vst.msk [vmem:[%s4115_s30 + $0xd0] sm:$0xff] %vm299_vm0, %v4652_v1  ;;  %v4663_v29 = vmul.f32 %v4652_v1, %v4652_v1  ;;  %2371 = vrot.lane.b32.xlu0 %v4652_v1, %s2823_s23  ;;  %v2236_v50 = vadd.f32 %v2235_v63, %v2234_v18 }
 0x2ea   : > { %v2068_v20 = vadd.f32 %v2067_v2, %v2066_v25  ;;  %v2247_v25 = vsel %vm2047_vm11, %v4527_v14, 0.0  ;;  %v2079_v14 = vsel %vm2047_vm11, %v4337_v55, 0.0 }
 0x2eb   : > { %v2200_v39 = vsel %vm1977_vm10, %v4663_v29, 0.0  ;;  %v2238_v33 = vadd.f32 %v2237_v48, %v2236_v50 }
 0x2ec   : > { %v2201_v51 = vadd.f32 %v2200_v39, %v2199_v26  ;;  %v2070_v4 = vadd.f32 %v2069_v16, %v2068_v20  ;;  %v2243_v26 = vsel %vm2047_vm11, %v4475_v61, 0.0 }
 0x2ed   : > { %v2240_v8 = vadd.f32 %v2239_v40, %v2238_v33 }
 0x2ee   : > { %v2072_v57 = vadd.f32 %v2071_v35, %v2070_v4  ;;  %v2249_v35 = vsel %vm2047_vm11, %v4520_v13, 0.0  ;;  %v2081_v4 = vsel %vm2047_vm11, %v4371_v10, 0.0 }
 0x2ef   : > { %v2242_v15 = vadd.f32 %v2241_v27, %v2240_v8  ;;  %v2251_v8 = vsel %vm2047_vm11, %v4533_v36, 0.0  ;;  %v2253_v36 = vsel %vm2047_vm11, %v4541_v32, 0.0  ;;  %v2257_v32 = vsel %vm2047_vm11, %v4555_v21, 0.0 }
 0x2f0   : > { %v2074_v28 = vadd.f32 %v2073_v52, %v2072_v57 }
 0x2f1   : > { %v2244_v2 = vadd.f32 %v2243_v26, %v2242_v15 }
 0x2f2   : > { %v1921_v0 = vpop.f32.mrb[22].mxu1  ;;  %v2076_v18 = vadd.f32 %v2075_v37, %v2074_v28  ;;  %v2083_v37 = vsel %vm2047_vm11, %v4402_v38, 0.0 }
 0x2f3   : > { %v4695_v63 = vadd.f32 %v4692_v49, %v1921_v0  ;;  %v1923_v61 = vpop.f32.mrb[23].mxu1  ;;  %v2246_v48 = vadd.f32 %v2245_v12, %v2244_v2  ;;  %v2255_v2 = vsel %vm2047_vm11, %v4549_v60, 0.0 }
 0x2f4   : > { %v2078_v16 = vadd.f32 %v2077_v24, %v2076_v18  ;;  %v2085_v24 = vsel %vm2047_vm11, %v4422_v11, 0.0 }
 0x2f5   : > { %1972 = vst.msk [vmem:[%s4115_s30 + $0xd8] sm:$0xff] %vm299_vm0, %v4695_v63  ;;  %v4704_v34 = vmul.f32 %v4695_v63, %v4695_v63  ;;  %2373 = vrot.lane.b32.xlu1 %v4695_v63, %s2823_s23  ;;  %v2248_v50 = vadd.f32 %v2247_v25, %v2246_v48  ;;  %v2087_v25 = vsel %vm2047_vm11, %v4442_v7, 0.0 }
 0x2f6   : > { %v2080_v40 = vadd.f32 %v2079_v14, %v2078_v16 }
 0x2f7   : > { %v2202_v39 = vsel %vm1977_vm10, %v4704_v34, 0.0  ;;  %v2250_v33 = vadd.f32 %v2249_v35, %v2248_v50 }
 0x2f8   : > { %v2203_v20 = vadd.f32 %v2202_v39, %v2201_v51  ;;  %v2082_v27 = vadd.f32 %v2081_v4, %v2080_v40  ;;  %v2089_v39 = vsel %vm2047_vm11, %v4462_v6, 0.0 }
 0x2f9   : > { %v2252_v26 = vadd.f32 %v2251_v8, %v2250_v33  ;;  %v2091_v33 = vsel %vm2047_vm11, %v4482_v53, 0.0  ;;  %v2093_v8 = vsel %vm2047_vm11, %v4510_v59, 0.0 }
 0x2fa   : > { %v2084_v15 = vadd.f32 %v2083_v37, %v2082_v27  ;;  %v2263_v37 = vsel %vm2047_vm11, %v4585_v58, 0.0 }
 0x2fb   : > { %v2254_v0 = vadd.f32 %v2253_v36, %v2252_v26  ;;  %v2095_v36 = vsel %vm2047_vm11, %v4566_v22, 0.0 }
 0x2fc   : > { %v2086_v61 = vadd.f32 %v2085_v24, %v2084_v15  ;;  %v2265_v24 = vsel %vm2047_vm11, %v4591_v23, 0.0 }
 0x2fd   : > { %v2256_v18 = vadd.f32 %v2255_v2, %v2254_v0 }
 0x2fe   : > { %v1926_v52 = vpop.f32.mrb[24].mxu1  ;;  %v2088_v48 = vadd.f32 %v2087_v25, %v2086_v61  ;;  %v2099_v61 = vsel %vm2047_vm11, %v4652_v1, 0.0 }
 0x2ff   : > { %v4719_v57 = vadd.f32 %v4692_v49, %v1926_v52  ;;  %v1928_v51 = vpop.f32.mrb[25].mxu1  ;;  %v2258_v16 = vadd.f32 %v2257_v32, %v2256_v18  ;;  %v2101_v32 = vsel %vm2047_vm11, %v4695_v63, 0.0 }
 0x300   : > { %v2090_v50 = vadd.f32 %v2089_v39, %v2088_v48  ;;  %v2269_v48 = vsel %vm2047_vm11, %v4663_v29, 0.0  ;;  %v2271_v39 = vsel %vm2047_vm11, %v4704_v34, 0.0 }
 0x301   : > { %1973 = vst.msk [vmem:[%s4115_s30 + $0xe0] sm:$0xff] %vm299_vm0, %v4719_v57  ;;  %v2145_v13 = vmul.f32 %v4719_v57, %v4719_v57  ;;  %2375 = vrot.lane.b32.xlu0 %v4719_v57, %s2823_s23  ;;  %v2103_v29 = vsel %vm2047_vm11, %v4719_v57, 0.0 }
 0x302   : > { %v2092_v4 = vadd.f32 %v2091_v33, %v2090_v50 }
 0x303   : > { %v2204_v28 = vsel %vm1977_vm10, %v2145_v13, 0.0  ;;  %v2273_v33 = vsel %vm2047_vm11, %v2145_v13, 0.0 }
 0x304   : > { %v2205_v12 = vadd.f32 %v2204_v28, %v2203_v20  ;;  %v2259_v20 = vsel %vm2047_vm11, %v4563_v62, 0.0  ;;  %v2261_v62 = vsel %vm2047_vm11, %v4572_v45, 0.0  ;;  %v2094_v26 = vadd.f32 %v2093_v8, %v2092_v4 }
 0x305   : > { %v2260_v40 = vadd.f32 %v2259_v20, %v2258_v16  ;;  %v2097_v28 = vsel %vm2047_vm11, %v4614_v56, 0.0 }
 0x306   : > { %v2096_v45 = vadd.f32 %v2095_v36, %v2094_v26 }
 0x307   : > { %v2262_v27 = vadd.f32 %v2261_v62, %v2260_v40 }
 0x308   : > { %v2098_v25 = vadd.f32 %v2097_v28, %v2096_v45 }
 0x309   : > { %v2264_v15 = vadd.f32 %v2263_v37, %v2262_v27 }
 0x30a   : > { %v2100_v16 = vadd.f32 %v2099_v61, %v2098_v25  ;;  %v2824_v25 = vmov 0.0  }
 0x30b   : > { %v2266_v18 = vadd.f32 %v2265_v24, %v2264_v15  ;;  %2538 = vst.msk [vmem:[%s4817_s15] sm:$0xff] %vm1977_vm10, %v2824_v25 }
 0x30f   : > { %v1931_v14 = vpop.f32.mrb[26].mxu1 }
 0x310   : > { %v4746_v60 = vadd.f32 %v4692_v49, %v1931_v14  ;;  %v1933_v35 = vpop.f32.mrb[27].mxu1  ;;  %v2102_v14 = vadd.f32 %v2101_v32, %v2100_v16 }
 0x312   : > { %1974 = vst.msk [vmem:[%s4115_s30 + $0xe8] sm:$0xff] %vm299_vm0, %v4746_v60  ;;  %v2146_v21 = vmul.f32 %v4746_v60, %v4746_v60  ;;  %2377 = vrot.lane.b32.xlu1 %v4746_v60, %s2823_s23  ;;  %v2105_v35 = vsel %vm2047_vm11, %v4746_v60, 0.0  ;;  %v2104_v4 = vadd.f32 %v2103_v29, %v2102_v14 }
 0x314   : > { %v2206_v52 = vsel %vm1977_vm10, %v2146_v21, 0.0  ;;  %v2275_v27 = vsel %vm2047_vm11, %v2146_v21, 0.0  ;;  %v2106_v8 = vadd.f32 %v2105_v35, %v2104_v4  ;;  %v2320_v35 = vpop.permute.xlu0 %2319  ;;  %v5091_v4 = vld [vmem:[#allocation11_spill] sm:$0xff] }
 0x315   : > { %v2207_v51 = vadd.f32 %v2206_v52, %v2205_v12  ;;  %v2267_v12 = vsel %vm2047_vm11, %v4625_v54, 0.0 }
 0x316   : > { %v2268_v54 = vadd.f32 %v2267_v12, %v2266_v18 }
 0x318   : > { %v2270_v20 = vadd.f32 %v2269_v48, %v2268_v54 }
 0x31a   : > { %v1936_v0 = vpop.f32.mrb[28].mxu1  ;;  %v2272_v62 = vadd.f32 %v2271_v39, %v2270_v20 }
 0x31b   : > { %v4775_v58 = vadd.f32 %v4692_v49, %v1936_v0  ;;  %v1938_v2 = vpop.f32.mrb[29].mxu1 }
 0x31c   : > { %v2274_v26 = vadd.f32 %v2273_v33, %v2272_v62  ;;  %v1979_v33 = vsel %vm1977_vm10, %v4148_v43, 0.0  ;;  %v5092_v62 = vld [vmem:[#allocation8_spill] sm:$0xff] }
 0x31d   : > { %1975 = vst.msk [vmem:[%s4115_s30 + $0xf0] sm:$0xff] %vm299_vm0, %v4775_v58  ;;  %2379 = vrot.lane.b32.xlu0 %v4775_v58, %s2823_s23  ;;  %v2147_v23 = vmul.f32 %v4775_v58, %v4775_v58  ;;  %v2107_v34 = vsel %vm2047_vm11, %v4775_v58, 0.0 }
 0x31e   : > { %v2108_v36 = vadd.f32 %v2107_v34, %v2106_v8  ;;  %v2276_v28 = vadd.f32 %v2275_v27, %v2274_v26  ;;  %v1981_v34 = vsel %vm1977_vm10, %v5092_v62, 0.0  ;;  %v1983_v8 = vsel %vm1977_vm10, %v4214_v19, 0.0 }
 0x31f   : > { %v2208_v50 = vsel %vm1977_vm10, %v2147_v23, 0.0  ;;  %v2277_v15 = vsel %vm2047_vm11, %v2147_v23, 0.0 }
 0x320   : > { %v2209_v40 = vadd.f32 %v2208_v50, %v2207_v51  ;;  %v2278_v45 = vadd.f32 %v2277_v15, %v2276_v28  ;;  %v1985_v15 = vsel %vm1977_vm10, %v4245_v9, 0.0  ;;  %v2415_v28 = vmul.f32 %v2320_v35, %v5091_v4 }
 0x324   : > { %v1941_v52 = vpop.f32.mrb[30].mxu1 }
 0x325   : > { %v4800_v37 = vadd.f32 %v4692_v49, %v1941_v52  ;;  %v1943_v51 = vpop.f32.mrb[31].mxu1  ;;  %v2322_v52 = vpop.permute.xlu1 %2321 }
 0x326   : > { %v2324_v51 = vpop.permute.xlu0 %2323 }
 0x327   : > { %1976 = vst.msk [vmem:[%s4115_s30 + $0xf8] sm:$0xff] %vm299_vm0, %v4800_v37  ;;  %2381 = vrot.lane.b32.xlu1 %v4800_v37, %s2823_s23  ;;  %v2109_v13 = vsel %vm2047_vm11, %v4800_v37, 0.0  ;;  %v2148_v21 = vmul.f32 %v4800_v37, %v4800_v37  ;;  %vm2532_vm0 = vcmask 1044480  }
 0x328   : > { %v2110_v49 = vadd.f32 %v2109_v13, %v2108_v36  ;;  %v2416_v36 = vmul.f32 %v2322_v52, %v4148_v43  ;;  %v1991_v43 = vsel %vm1977_vm10, %v4309_v47, 0.0 }
 0x329   : > { %v2279_v0 = vsel %vm2047_vm11, %v2148_v21, 0.0  ;;  %v2210_v24 = vsel %vm1977_vm10, %v2148_v21, 0.0  ;;  %v5093_v21 = vld [vmem:[#allocation12_spill] sm:$0xff] }
 0x32a   : > { %v2111_v12 = vrot.slane %v2110_v49, 4  ;;  %v2280_v61 = vadd.f32 %v2279_v0, %v2278_v45  ;;  %v4822_v48 = vadd.f32 %v2210_v24, %v2209_v40  ;;  %v1978_v40 = vsel %vm1977_vm10, %v5091_v4, 0.0 }
 0x32b   : > { %v1980_v27 = vadd.f32 %v1979_v33, %v1978_v40  ;;  %v2417_v45 = vmul.f32 %v2324_v51, %v5092_v62  ;;  %v1989_v24 = vsel %vm1977_vm10, %v4285_v30, 0.0  ;;  %v1997_v40 = vsel %vm1977_vm10, %v4405_v42, 0.0 }
 0x32c   : > { %v2112_v2 = vadd.f32 %v2111_v12, %v2110_v49  ;;  %v2281_v18 = vrot.slane %v2280_v61, 4  ;;  %v1987_v49 = vsel %vm1977_vm10, %v5093_v21, 0.0  ;;  %v2448_v12 = vsel %vm1977_vm10, %v2416_v36, 0.0 }
 0x32d   : > { %v1982_v26 = vadd.f32 %v1981_v34, %v1980_v27  ;;  %v2450_v25 = vsel %vm1977_vm10, %v2417_v45, 0.0 }
 0x32e   : > { %v2113_v32 = vrot.slane %v2112_v2, 2  ;;  %v2282_v23 = vadd.f32 %v2281_v18, %v2280_v61  ;;  %v2447_v61 = vsel %vm1977_vm10, %v2415_v28, 0.0  ;;  %v2326_v18 = vpop.permute.xlu1 %2325 }
 0x32f   : > { %v1984_v13 = vadd.f32 %v1983_v8, %v1982_v26  ;;  %v1999_v26 = vsel %vm1977_vm10, %v4425_v5, 0.0 }
 0x330   : > { %v2114_v54 = vadd.f32 %v2113_v32, %v2112_v2  ;;  %v2283_v16 = vrot.slane %v2282_v23, 2 }
 0x331   : > { %v1986_v0 = vadd.f32 %v1985_v15, %v1984_v13  ;;  %v2001_v13 = vsel %vm1977_vm10, %v4445_v31, 0.0 }
 0x332   : > { %v2115_v39 = vrot.slane %v2114_v54, 1  ;;  %v2284_v29 = vadd.f32 %v2283_v16, %v2282_v23  ;;  %v2449_v23 = vadd.f32 %v2448_v12, %v2447_v61  ;;  %v1993_v16 = vsel %vm1977_vm10, %v4341_v3, 0.0 }
 0x333   : > { %v1988_v2 = vadd.f32 %v1987_v49, %v1986_v0  ;;  %v2003_v12 = vsel %vm1977_vm10, %v4465_v41, 0.0 }
 0x334   : > { %v2116_v50 = vadd.f32 %v2115_v39, %v2114_v54  ;;  %v2285_v20 = vrot.slane %v2284_v29, 1  ;;  %v2328_v54 = vpop.permute.xlu0 %2327  ;;  %v2418_v39 = vmul.f32 %v2326_v18, %v4214_v19 }
 0x335   : > { %v1990_v32 = vadd.f32 %v1989_v24, %v1988_v2  ;;  %v2419_v35 = vmul.f32 %v2328_v54, %v4245_v9 }
 0x336   : > { %2517 = vrot.lane.b32.xlu0 %v2116_v50, %s2823_s23  ;;  %v2286_v14 = vadd.f32 %v2285_v20, %v2284_v29  ;;  %v2451_v50 = vadd.f32 %v2450_v25, %v2449_v23  ;;  %v2330_v20 = vpop.permute.xlu1 %2329  ;;  %v2452_v62 = vsel %vm1977_vm10, %v2418_v39, 0.0 }
 0x337   : > { %v1992_v29 = vadd.f32 %v1991_v43, %v1990_v32  ;;  %v2420_v34 = vmul.f32 %v2330_v20, %v5093_v21  ;;  %v2454_v8 = vsel %vm1977_vm10, %v2419_v35, 0.0  ;;  %v2005_v43 = vsel %vm1977_vm10, %v4485_v44, 0.0 }
 0x338   : > { %2521 = vrot.lane.b32.xlu1 %v2286_v14, %s2823_s23  ;;  %v1995_v14 = vsel %vm1977_vm10, %v4375_v46, 0.0  ;;  %v2332_v4 = vpop.permute.xlu0 %2331  ;;  %v2453_v52 = vadd.f32 %v2452_v62, %v2451_v50 }
 0x339   : > { %v1994_v33 = vadd.f32 %v1993_v16, %v1992_v29  ;;  %v2421_v51 = vmul.f32 %v2332_v4, %v4285_v30  ;;  %v2456_v36 = vsel %vm1977_vm10, %v2420_v34, 0.0 }
 0x33a   : > { %v2334_v19 = vpop.permute.xlu1 %2333  ;;  %v2455_v21 = vadd.f32 %v2454_v8, %v2453_v52 }
 0x33b   : > { %v1996_v27 = vadd.f32 %v1995_v14, %v1994_v33  ;;  %v2422_v28 = vmul.f32 %v2334_v19, %v4309_v47  ;;  %v2458_v0 = vsel %vm1977_vm10, %v2421_v51, 0.0 }
 0x33c   : > { %v2336_v15 = vpop.permute.xlu0 %2335  ;;  %v2457_v30 = vadd.f32 %v2456_v36, %v2455_v21 }
 0x33d   : > { %v1998_v9 = vadd.f32 %v1997_v40, %v1996_v27  ;;  %v2423_v24 = vmul.f32 %v2336_v15, %v4341_v3  ;;  %v2460_v18 = vsel %vm1977_vm10, %v2422_v28, 0.0  ;;  %v2007_v3 = vsel %vm1977_vm10, %v4513_v17, 0.0 }
 0x33e   : > { %v2338_v45 = vpop.permute.xlu1 %2337  ;;  %v2459_v25 = vadd.f32 %v2458_v0, %v2457_v30  ;;  %v2009_v27 = vsel %vm1977_vm10, %v4337_v55, 0.0 }
 0x33f   : > { %v2000_v49 = vadd.f32 %v1999_v26, %v1998_v9  ;;  %v2424_v47 = vmul.f32 %v2338_v45, %v4375_v46  ;;  %v2462_v54 = vsel %vm1977_vm10, %v2423_v24, 0.0  ;;  %v2013_v45 = vsel %vm1977_vm10, %v4402_v38, 0.0 }
 0x340   : > { %v2340_v2 = vpop.permute.xlu0 %2339  ;;  %v2461_v39 = vadd.f32 %v2460_v18, %v2459_v25 }
 0x341   : > { %v2002_v61 = vadd.f32 %v2001_v13, %v2000_v49  ;;  %v2425_v16 = vmul.f32 %v2340_v2, %v4405_v42  ;;  %v2464_v20 = vsel %vm1977_vm10, %v2424_v47, 0.0 }
 0x342   : > { %v2342_v23 = vpop.permute.xlu1 %2341  ;;  %v2463_v14 = vadd.f32 %v2462_v54, %v2461_v39  ;;  %v2019_v39 = vsel %vm1977_vm10, %v4462_v6, 0.0 }
 0x343   : > { %v2004_v32 = vadd.f32 %v2003_v12, %v2002_v61  ;;  %v2426_v46 = vmul.f32 %v2342_v23, %v4425_v5  ;;  %v2466_v4 = vsel %vm1977_vm10, %v2425_v16, 0.0 }
 0x344   : > { %v2344_v50 = vpop.permute.xlu0 %2343  ;;  %v2465_v62 = vadd.f32 %v2464_v20, %v2463_v14  ;;  %v2021_v14 = vsel %vm1977_vm10, %v4482_v53, 0.0 }
 0x345   : > { %v2006_v29 = vadd.f32 %v2005_v43, %v2004_v32  ;;  %v2427_v40 = vmul.f32 %v2344_v50, %v4445_v31  ;;  %v2468_v42 = vsel %vm1977_vm10, %v2426_v46, 0.0  ;;  %v2011_v31 = vsel %vm1977_vm10, %v4371_v10, 0.0 }
 0x346   : > { %v2346_v33 = vpop.permute.xlu1 %2345  ;;  %v2467_v8 = vadd.f32 %v2466_v4, %v2465_v62  ;;  %v2017_v32 = vsel %vm1977_vm10, %v4442_v7, 0.0  ;;  %v2023_v62 = vsel %vm1977_vm10, %v4510_v59, 0.0 }
 0x347   : > { %v2008_v35 = vadd.f32 %v2007_v3, %v2006_v29  ;;  %v2428_v52 = vmul.f32 %v2346_v33, %v4465_v41  ;;  %v2470_v5 = vsel %vm1977_vm10, %v2427_v40, 0.0 }
 0x348   : > { %v2348_v34 = vpop.permute.xlu0 %2347  ;;  %v2469_v9 = vadd.f32 %v2468_v42, %v2467_v8  ;;  %v2027_v8 = vsel %vm1977_vm10, %v4614_v56, 0.0 }
 0x349   : > { %v2010_v19 = vadd.f32 %v2009_v27, %v2008_v35  ;;  %v2429_v51 = vmul.f32 %v2348_v34, %v4485_v44  ;;  %v2472_v15 = vsel %vm1977_vm10, %v2428_v52, 0.0 }
 0x34a   : > { %v2350_v26 = vpop.permute.xlu1 %2349  ;;  %v2471_v13 = vadd.f32 %v2470_v5, %v2469_v9 }
 0x34b   : > { %v2430_v36 = vmul.f32 %v2350_v26, %v4513_v17  ;;  %v2012_v28 = vadd.f32 %v2011_v31, %v2010_v19  ;;  %v2474_v21 = vsel %vm1977_vm10, %v2429_v51, 0.0  ;;  %v2015_v17 = vsel %vm1977_vm10, %v4422_v11, 0.0 }
 0x34c   : > { %v2473_v41 = vadd.f32 %v2472_v15, %v2471_v13  ;;  %v2352_v49 = vpop.permute.xlu0 %2351  ;;  %v2025_v19 = vsel %vm1977_vm10, %v4566_v22, 0.0  ;;  %v2029_v51 = vsel %vm1977_vm10, %v4652_v1, 0.0  ;;  %v2031_v15 = vsel %vm1977_vm10, %v4695_v63, 0.0 }
 0x34d   : > { %v2476_v0 = vsel %vm1977_vm10, %v2430_v36, 0.0  ;;  %v2014_v44 = vadd.f32 %v2013_v45, %v2012_v28  ;;  %v2431_v30 = vmul.f32 %v2352_v49, %v4337_v55 }
 0x34e   : > { %v2475_v24 = vadd.f32 %v2474_v21, %v2473_v41  ;;  %v2354_v12 = vpop.permute.xlu1 %2353  ;;  %v2033_v21 = vsel %vm1977_vm10, %v4719_v57, 0.0 }
 0x34f   : > { %v2432_v2 = vmul.f32 %v2354_v12, %v4371_v10  ;;  %v2016_v18 = vadd.f32 %v2015_v17, %v2014_v44  ;;  %v2478_v47 = vsel %vm1977_vm10, %v2431_v30, 0.0 }
 0x350   : > { %v2477_v61 = vadd.f32 %v2476_v0, %v2475_v24  ;;  %v2356_v43 = vpop.permute.xlu0 %2355 }
 0x351   : > { %v2480_v23 = vsel %vm1977_vm10, %v2432_v2, 0.0  ;;  %v2018_v54 = vadd.f32 %v2017_v32, %v2016_v18  ;;  %v2433_v55 = vmul.f32 %v2356_v43, %v4402_v38  ;;  %v2039_v43 = vsel %vm1977_vm10, %v4800_v37, 0.0 }
 0x352   : > { %v2479_v25 = vadd.f32 %v2478_v47, %v2477_v61  ;;  %v2358_v3 = vpop.permute.xlu1 %2357  ;;  %v2037_v61 = vsel %vm1977_vm10, %v4775_v58, 0.0 }
 0x353   : > { %v2434_v10 = vmul.f32 %v2358_v3, %v4422_v11  ;;  %v2020_v29 = vadd.f32 %v2019_v39, %v2018_v54  ;;  %v2482_v50 = vsel %vm1977_vm10, %v2433_v55, 0.0 }
 0x354   : > { %v2481_v16 = vadd.f32 %v2480_v23, %v2479_v25  ;;  %v2360_v20 = vpop.permute.xlu0 %2359 }
 0x355   : > { %v2484_v35 = vsel %vm1977_vm10, %v2434_v10, 0.0  ;;  %v2022_v33 = vadd.f32 %v2021_v14, %v2020_v29  ;;  %v2435_v38 = vmul.f32 %v2360_v20, %v4442_v7 }
 0x356   : > { %v2483_v46 = vadd.f32 %v2482_v50, %v2481_v16  ;;  %v2362_v4 = vpop.permute.xlu1 %2361 }
 0x357   : > { %v2436_v11 = vmul.f32 %v2362_v4, %v4462_v6  ;;  %v2024_v34 = vadd.f32 %v2023_v62, %v2022_v33  ;;  %v2486_v27 = vsel %vm1977_vm10, %v2435_v38, 0.0 }
 0x358   : > { %v2485_v40 = vadd.f32 %v2484_v35, %v2483_v46  ;;  %v2364_v42 = vpop.permute.xlu0 %2363 }
 0x359   : > { %v2488_v26 = vsel %vm1977_vm10, %v2436_v11, 0.0  ;;  %v2026_v7 = vadd.f32 %v2025_v19, %v2024_v34  ;;  %v2437_v6 = vmul.f32 %v2364_v42, %v4482_v53  ;;  %v2035_v53 = vsel %vm1977_vm10, %v4746_v60, 0.0 }
 0x35a   : > { %v2487_v52 = vadd.f32 %v2486_v27, %v2485_v40  ;;  %v2366_v5 = vpop.permute.xlu1 %2365 }
 0x35b   : > { %v2028_v9 = vadd.f32 %v2027_v8, %v2026_v7  ;;  %v2438_v36 = vmul.f32 %v2366_v5, %v4510_v59  ;;  %v2490_v41 = vsel %vm1977_vm10, %v2437_v6, 0.0 }
 0x35c   : > { %v2489_v31 = vadd.f32 %v2488_v26, %v2487_v52  ;;  %v2368_v13 = vpop.permute.xlu0 %2367 }
 0x35d   : > { %v2030_v28 = vadd.f32 %v2029_v51, %v2028_v9  ;;  %v2492_v44 = vsel %vm1977_vm10, %v2438_v36, 0.0  ;;  %v2439_v30 = vmul.f32 %v2368_v13, %v4566_v22 }
 0x35e   : > { %v2491_v45 = vadd.f32 %v2490_v41, %v2489_v31  ;;  %v2370_v0 = vpop.permute.xlu1 %2369 }
 0x35f   : > { %v2032_v49 = vadd.f32 %v2031_v15, %v2030_v28  ;;  %v2440_v59 = vmul.f32 %v2370_v0, %v4614_v56  ;;  %v2494_v23 = vsel %vm1977_vm10, %v2439_v30, 0.0 }
 0x360   : > { %v2372_v24 = vpop.permute.xlu0 %2371  ;;  %v2493_v17 = vadd.f32 %v2492_v44, %v2491_v45 }
 0x361   : > { %v2034_v12 = vadd.f32 %v2033_v21, %v2032_v49  ;;  %v2441_v47 = vmul.f32 %v2372_v24, %v4652_v1  ;;  %v2496_v54 = vsel %vm1977_vm10, %v2440_v59, 0.0  ;;  %v2539_v49 = vld [vmem:[%s4817_s15] sm:$0xff] }
 0x362   : > { %v2495_v56 = vadd.f32 %v2494_v23, %v2493_v17 }
 0x363   : > { %v2036_v18 = vadd.f32 %v2035_v53, %v2034_v12  ;;  %v2498_v16 = vsel %vm1977_vm10, %v2441_v47, 0.0 }
 0x364   : > { %v2497_v10 = vadd.f32 %v2496_v54, %v2495_v56 }
 0x365   : > { %v2038_v32 = vadd.f32 %v2037_v61, %v2036_v18 }
 0x366   : > { %v2499_v20 = vadd.f32 %v2498_v16, %v2497_v10 }
 0x367   : > { %v2374_v2 = vpop.permute.xlu1 %2373  ;;  %v2040_v55 = vadd.f32 %v2039_v43, %v2038_v32 }
 0x368   : > { %v2442_v22 = vmul.f32 %v2374_v2, %v4695_v63  ;;  %v2212_v63 = vrot.slane %v4822_v48, 4 }
 0x369   : > { %v2041_v46 = vrot.slane %v2040_v55, 4 }
 0x36a   : > { %v2500_v29 = vsel %vm1977_vm10, %v2442_v22, 0.0  ;;  %v2213_v62 = vadd.f32 %v2212_v63, %v4822_v48 }
 0x36b   : > { %v2501_v33 = vadd.f32 %v2500_v29, %v2499_v20  ;;  %v2042_v40 = vadd.f32 %v2041_v46, %v2040_v55 }
 0x36d   : > { %v2043_v42 = vrot.slane %v2042_v40, 2 }
 0x36f   : > { %v2044_v26 = vadd.f32 %v2043_v42, %v2042_v40 }
 0x371   : > { %v2045_v6 = vrot.slane %v2044_v26, 1 }
 0x373   : > { %v2376_v25 = vpop.permute.xlu0 %2375  ;;  %v2046_v15 = vadd.f32 %v2045_v6, %v2044_v26 }
 0x374   : > { %v2443_v39 = vmul.f32 %v2376_v25, %v4719_v57 }
 0x376   : > { %v2502_v14 = vsel %vm1977_vm10, %v2443_v39, 0.0 }
 0x377   : > { %v2503_v38 = vadd.f32 %v2502_v14, %v2501_v33 }
 0x384   : > { %v2378_v3 = vpop.permute.xlu1 %2377 }
 0x385   : > { %v2444_v50 = vmul.f32 %v2378_v3, %v4746_v60 }
 0x387   : > { %v2504_v4 = vsel %vm1977_vm10, %v2444_v50, 0.0 }
 0x388   : > { %v2505_v11 = vadd.f32 %v2504_v4, %v2503_v38 }
 0x38f   : > { %v2380_v1 = vpop.permute.xlu0 %2379 }
 0x390   : > { %v2445_v35 = vmul.f32 %v2380_v1, %v4775_v58  ;;  %v2214_v58 = vrot.slane %v2213_v62, 2 }
 0x392   : > { %v2506_v57 = vsel %vm1977_vm10, %v2445_v35, 0.0  ;;  %v2215_v7 = vadd.f32 %v2214_v58, %v2213_v62 }
 0x393   : > { %v2507_v27 = vadd.f32 %v2506_v57, %v2505_v11 }
 0x394   : > { %v2216_v9 = vrot.slane %v2215_v7, 1 }
 0x396   : > { %v2217_v36 = vadd.f32 %v2216_v9, %v2215_v7 }
 0x399   : > { %v2382_v34 = vpop.permute.xlu1 %2381 }
 0x39a   : > { %v2446_v60 = vmul.f32 %v2382_v34, %v4800_v37 }
 0x39c   : > { %v2508_v52 = vsel %vm1977_vm10, %v2446_v60, 0.0 }
 0x39d   : > { %v2509_v19 = vadd.f32 %v2508_v52, %v2507_v27 }
 0x39f   : > { %v2510_v8 = vrot.slane %v2509_v19, 4 }
 0x3a1   : > { %v2511_v5 = vadd.f32 %v2510_v8, %v2509_v19 }
 0x3a3   : > { %v2512_v51 = vrot.slane %v2511_v5, 2 }
 0x3a5   : > { %v2513_v31 = vadd.f32 %v2512_v51, %v2511_v5 }
 0x3a7   : > { %v2514_v48 = vrot.slane %v2513_v31, 1 }
 0x3a8   : > { %v2518_v37 = vpop.permute.xlu0 %2517 }
 0x3a9   : > { %v2525_v28 = vsel %vm2524_vm12, %v2046_v15, %v2518_v37  ;;  %v2515_v13 = vadd.f32 %v2514_v48, %v2513_v31 }
 0x3aa   : > { %v2522_v21 = vpop.permute.xlu1 %2521  ;;  %v2527_v41 = vsel %vm2526_vm13, %v2525_v28, %v2217_v36 }
 0x3ab   : > { %v2529_v45 = vsel %vm2528_vm14, %v2527_v41, %v2522_v21 }
 0x3ac   : > { %v2531_v0 = vsel %vm2530_vm15, %v2529_v45, %v2515_v13 }
 0x3ad   : > { %v2533_v44 = vsel %vm2532_vm0, %v2531_v0, 0.0 }
 0x3ae   : > { %v2540_v53 = vadd.f32 %v2539_v49, %v2533_v44 }
 0x3b0   : > { %2541 = vst.msk [vmem:[%s4817_s15] sm:$0xff] %vm1977_vm10, %v2540_v53 }
 0x3b1 PF: > { %s15_s17 = sadd.s32 1, %s2813_s17   ;;  %s5094_s15 = smov %s2809_s16 }
 0x3b2   : > { %p12_p5 = scmp.ge.s32.totalorder %s15_s17, 4   ;;  %s5095_s16 = smov %s5097_s18 }
 0x3b4   :  { %14 = sbr.rel (!%p12_p5) target bundleno = 2 (0x2), region = 78 }

</bundles_post_ra>
